<compile_context>
chip_gen: v5e
topology: v5e:2x2
jax: 0.10.0
libtpu: 0.0.40
codegen_flags: <defaults>
</compile_context>

<pallas_src>
import functools

import jax
import jax.numpy as jnp
from jax.experimental import pallas as pl
from jax.experimental.pallas import tpu as pltpu


def _gcn_kernel(te_ref, x_ref, wt2a_ref, bt2a_ref, aadj_ref, badj_ref,
                w1rep_ref, w2cat_ref, wg_ref, bg_ref, o_ref,
                *, hops, B, T, N, d, M):
    te = te_ref[...]                                    # (R, d), R = B*T*N
    x = x_ref[...]                                      # (R, d)

    # ---- block-diagonal adjacency, one MXU dot ---------------------------
    # s[r, c] = te[r] @ Wt2a[:, c mod N] + bt2a[c mod N]   (Wt2a pre-tiled)
    s = jnp.dot(te, wt2a_ref[...], preferred_element_type=jnp.float32)
    s = s + bt2a_ref[...]                               # (R, R)
    # aadj/badj are block-diagonal (zero off-block), so off-block entries of
    # A_bd come out as relu(0) = 0 — the mask costs nothing in-kernel.
    a_bd = jnp.maximum(jnp.sin(s) * aadj_ref[...] + badj_ref[...], 0.0)

    w2cat = w2cat_ref[...]                              # (d, M*d) rank factors

    # ---- hop loop, accumulating concat(H_0..H_hops) @ Wg block-by-block ---
    h = x                                               # H_0
    out = jnp.dot(x, wg_ref[0:d, :], preferred_element_type=jnp.float32)
    for k in range(hops):
        # neighbourhood aggregation: one (R,R)@(R,d) dot (all b, t at once).
        hm = jnp.dot(a_bd, h, preferred_element_type=jnp.float32)      # (R, d)
        # per-node matmul via fused rank-M factorization:
        #   H @ W[n] = sum_m w1[n, m] * (H @ W2_m)  ->  single wide dot.
        wide = jnp.dot(hm, w2cat, preferred_element_type=jnp.float32)  # (R, M*d)
        scaled = w1rep_ref[...] * wide                  # reload from VMEM (cheap)
        pn = scaled[:, 0:d]
        for m in range(1, M):
            pn = pn + scaled[:, m * d:(m + 1) * d]
        z = x + pn
        h = jax.nn.sigmoid(z) * jnp.tanh(z)             # GLU-like gate (EUP work)
        out = out + jnp.dot(h, wg_ref[(k + 1) * d:(k + 2) * d, :],
                            preferred_element_type=jnp.float32)

    out = out + bg_ref[...]                             # (R, d)

    # ---- lane-dense output: (B*N, T*d), one unmasked full-width store -----
    row_blocks = []
    for b in range(B):
        base = b * T * N
        row_blocks.append(jnp.concatenate(
            [out[base + t * N: base + (t + 1) * N, :] for t in range(T)],
            axis=1))
    o_ref[...] = jnp.concatenate(row_blocks, axis=0)


def gcn_forward(X, timeEmbedding, params, *, hops):
    B, d, N, T = X.shape
    M = params["w1"].shape[1]
    G = B * T                       # number of (batch, time) blocks
    R = G * N                       # folded row count

    # --- tiny layout / parameter prep (plain JAX glue, all KB-sized) ---
    # activations as (B*T*N, d), row index = (b*T + t)*N + n
    x = jnp.transpose(X, (0, 3, 2, 1)).reshape(R, d)
    te = jnp.transpose(timeEmbedding, (0, 2, 1, 3)).reshape(R, d)

    eye_g = jnp.eye(G, dtype=jnp.float32)
    aadj = jnp.kron(eye_g, params["alpha1"] @ params["alpha2"])     # (R, R) block-diag
    badj = jnp.kron(eye_g, params["beta1"] @ params["beta2"])       # (R, R) block-diag
    wt2a = jnp.tile(params["wt2a"], (1, G))                         # (d, R)
    bt2a = jnp.tile(params["bt2a"].reshape(1, N), (1, G))           # (1, R)
    # w1 pre-broadcast over the d output lanes of each rank factor, tiled over
    # the (b, t) blocks: w1rep[g*N + n, m*d + j] = w1[n, m]
    w1rep = jnp.tile(jnp.repeat(params["w1"], d, axis=1), (G, 1))   # (R, M*d)
    # rank-M factors concatenated along output columns: w2cat[i, m*d+j] = W2_m[i, j]
    w2cat = params["w2"].reshape(M, d, d).transpose(1, 0, 2).reshape(d, M * d)
    wg = params["wg"]                                               # ((hops+1)*d, d)
    bg = params["bg"].reshape(1, d)

    kernel = functools.partial(_gcn_kernel, hops=hops, B=B, T=T, N=N, d=d, M=M)
    out = pl.pallas_call(
        kernel,
        out_shape=jax.ShapeDtypeStruct((B * N, T * d), jnp.float32),
        grid_spec=pltpu.PrefetchScalarGridSpec(
            num_scalar_prefetch=0,
            grid=(1,),                                   # single step, no pipeline
            in_specs=[
                pl.BlockSpec((R, d), lambda i: (0, 0)),              # timeEmb (folded)
                pl.BlockSpec((R, d), lambda i: (0, 0)),              # X (folded)
                pl.BlockSpec((d, R), lambda i: (0, 0)),              # Wt2a (tiled)
                pl.BlockSpec((1, R), lambda i: (0, 0)),              # bt2a (tiled)
                pl.BlockSpec((R, R), lambda i: (0, 0)),              # alpha1@alpha2 block-diag
                pl.BlockSpec((R, R), lambda i: (0, 0)),              # beta1@beta2 block-diag
                pl.BlockSpec((R, M * d), lambda i: (0, 0)),          # w1 pre-broadcast
                pl.BlockSpec((d, M * d), lambda i: (0, 0)),          # w2 rank factors (fused)
                pl.BlockSpec(((hops + 1) * d, d), lambda i: (0, 0)), # gcnLinear W^T blocks
                pl.BlockSpec((1, d), lambda i: (0, 0)),              # gcnLinear bias
            ],
            out_specs=pl.BlockSpec((B * N, T * d), lambda i: (0, 0)),
        ),
        compiler_params=pltpu.CompilerParams(
            dimension_semantics=("arbitrary",)),
    )(te, x, wt2a, bt2a, aadj, badj, w1rep, w2cat, wg, bg)

    # dropout: identity at inference.
    # layout fix-up: (B*N, T*d) -> (B, N, T, d) -> (B, dmodel, N, T)
    return jnp.transpose(out.reshape(B, N, T, d), (0, 3, 1, 2))


def gcn_reference(X, timeEmbedding, params, *, hops):
    """Pure-JAX replica of the PyTorch forward (eval mode)."""
    B, d, N, T = X.shape
    te = jnp.transpose(timeEmbedding, (0, 2, 1, 3))
    A = jnp.sin(jnp.einsum('btnd,dk->btnk', te, params["wt2a"]) + params["bt2a"])
    A = A * (params["alpha1"] @ params["alpha2"])[None, None]
    A = A + (params["beta1"] @ params["beta2"])[None, None]
    A = jnp.maximum(A, 0.0)
    x = jnp.transpose(X, (0, 3, 2, 1))               # (B, T, N, d)
    W = (params["w1"] @ params["w2"]).reshape(N, d, d)
    H = [x]
    hb = x
    for _ in range(hops):
        hn = jnp.einsum('btnk,btkd->btnd', A, hb)
        hn = jnp.einsum('btnk,nkd->btnd', hn, W)
        z = x + hn
        hn = jax.nn.sigmoid(z) * jnp.tanh(z)
        H.append(hn)
        hb = hn
    Hcat = jnp.concatenate(H, axis=-1)
    out = Hcat @ params["wg"] + params["bg"]
    return jnp.transpose(out, (0, 3, 2, 1))


if __name__ == "__main__":
    B, Tin, N, dmodel, M, hops = 2, 8, 8, 16, 4, 2

    key = jax.random.PRNGKey(0)
    ks = jax.random.split(key, 12)
    params = {
        "wt2a":   jax.random.normal(ks[0], (dmodel, N), jnp.float32) * 0.1,
        "bt2a":   jax.random.normal(ks[1], (N,), jnp.float32) * 0.1,
        "alpha1": jax.random.normal(ks[2], (N, M), jnp.float32) * 0.1,
        "alpha2": jax.random.normal(ks[3], (M, N), jnp.float32) * 0.1,
        "beta1":  jax.random.normal(ks[4], (N, M), jnp.float32) * 0.1,
        "beta2":  jax.random.normal(ks[5], (M, N), jnp.float32) * 0.1,
        "w1":     jax.random.normal(ks[6], (N, M), jnp.float32) * 0.1,
        "w2":     jax.random.normal(ks[7], (M, dmodel * dmodel), jnp.float32) * 0.1,
        "wg":     jax.random.normal(ks[8], (dmodel * (hops + 1), dmodel), jnp.float32) * 0.1,
        "bg":     jax.random.normal(ks[9], (dmodel,), jnp.float32) * 0.1,
    }

    X = jax.random.normal(ks[10], (B, dmodel, N, Tin), jnp.float32)              # batch*dmodel*node*T
    timeEmbedding = jax.random.normal(ks[11], (B, N, Tin, dmodel), jnp.float32)  # batch*N*Tin*dmodel

    out = gcn_forward(X, timeEmbedding, params, hops=hops)
    out = jax.block_until_ready(out)

    ref = gcn_reference(X, timeEmbedding, params, hops=hops)
    assert out.shape == (B, dmodel, N, Tin), out.shape
    assert jnp.allclose(out, ref, rtol=2e-3, atol=2e-3), float(jnp.max(jnp.abs(out - ref)))

    print("KERNEL_OK")
</pallas_src>

<mosaic_0001>
module attributes {stable_mosaic.version = 11 : i64} {
  func.func @_gcn_kernel(%arg0: i32, %arg1: memref<128x16xf32, #tpu.memory_space<vmem>>, %arg2: memref<128x16xf32, #tpu.memory_space<vmem>>, %arg3: memref<16x128xf32, #tpu.memory_space<vmem>>, %arg4: memref<1x128xf32, #tpu.memory_space<vmem>>, %arg5: memref<128x128xf32, #tpu.memory_space<vmem>>, %arg6: memref<128x128xf32, #tpu.memory_space<vmem>>, %arg7: memref<128x64xf32, #tpu.memory_space<vmem>>, %arg8: memref<16x64xf32, #tpu.memory_space<vmem>>, %arg9: memref<48x16xf32, #tpu.memory_space<vmem>>, %arg10: memref<1x16xf32, #tpu.memory_space<vmem>>, %arg11: memref<16x128xf32, #tpu.memory_space<vmem>>) attributes {dimension_semantics = [#tpu.dimension_semantics<arbitrary>], iteration_bounds = array<i64: 1>, scalar_prefetch = 0 : i64, scratch_operands = 0 : i64, tpu.core_type = #tpu.core_type<tc>, window_params = [{pipeline_mode = #tpu.pipeline_mode<synchronous>, transform_indices = @transform_0, window_bounds = array<i64: 128, 16>}, {pipeline_mode = #tpu.pipeline_mode<synchronous>, transform_indices = @transform_1, window_bounds = array<i64: 128, 16>}, {pipeline_mode = #tpu.pipeline_mode<synchronous>, transform_indices = @transform_2, window_bounds = array<i64: 16, 128>}, {pipeline_mode = #tpu.pipeline_mode<synchronous>, transform_indices = @transform_3, window_bounds = array<i64: 1, 128>}, {pipeline_mode = #tpu.pipeline_mode<synchronous>, transform_indices = @transform_4, window_bounds = array<i64: 128, 128>}, {pipeline_mode = #tpu.pipeline_mode<synchronous>, transform_indices = @transform_5, window_bounds = array<i64: 128, 128>}, {pipeline_mode = #tpu.pipeline_mode<synchronous>, transform_indices = @transform_6, window_bounds = array<i64: 128, 64>}, {pipeline_mode = #tpu.pipeline_mode<synchronous>, transform_indices = @transform_7, window_bounds = array<i64: 16, 64>}, {pipeline_mode = #tpu.pipeline_mode<synchronous>, transform_indices = @transform_8, window_bounds = array<i64: 48, 16>}, {pipeline_mode = #tpu.pipeline_mode<synchronous>, transform_indices = @transform_9, window_bounds = array<i64: 1, 16>}, {pipeline_mode = #tpu.pipeline_mode<synchronous>, transform_indices = @transform_10, window_bounds = array<i64: 16, 128>}]} {
    %c0 = arith.constant 0 : index
    %c0_0 = arith.constant 0 : index
    %0 = vector.load %arg1[%c0, %c0_0] : memref<128x16xf32, #tpu.memory_space<vmem>>, vector<128x16xf32>
    %c0_1 = arith.constant 0 : index
    %c0_2 = arith.constant 0 : index
    %1 = vector.load %arg2[%c0_1, %c0_2] : memref<128x16xf32, #tpu.memory_space<vmem>>, vector<128x16xf32>
    %c0_3 = arith.constant 0 : index
    %c0_4 = arith.constant 0 : index
    %2 = vector.load %arg3[%c0_3, %c0_4] : memref<16x128xf32, #tpu.memory_space<vmem>>, vector<16x128xf32>
    %cst = arith.constant dense<0.000000e+00> : vector<128x128xf32>
    %3 = tpu.matmul %0, %2, %cst {dimension_numbers = #tpu.dot_dimension_numbers<[1], [0], [0], [1], [0, 0, 1, 1], [], []>} : vector<128x16xf32>, vector<16x128xf32>, vector<128x128xf32> -> vector<128x128xf32>
    %c0_5 = arith.constant 0 : index
    %c0_6 = arith.constant 0 : index
    %4 = vector.load %arg4[%c0_5, %c0_6] : memref<1x128xf32, #tpu.memory_space<vmem>>, vector<1x128xf32>
    %5 = vector.broadcast %4 : vector<1x128xf32> to vector<128x128xf32>
    %6 = arith.addf %3, %5 : vector<128x128xf32>
    %7 = math.sin %6 : vector<128x128xf32>
    %c0_7 = arith.constant 0 : index
    %c0_8 = arith.constant 0 : index
    %8 = vector.load %arg5[%c0_7, %c0_8] : memref<128x128xf32, #tpu.memory_space<vmem>>, vector<128x128xf32>
    %9 = arith.mulf %7, %8 : vector<128x128xf32>
    %c0_9 = arith.constant 0 : index
    %c0_10 = arith.constant 0 : index
    %10 = vector.load %arg6[%c0_9, %c0_10] : memref<128x128xf32, #tpu.memory_space<vmem>>, vector<128x128xf32>
    %11 = arith.addf %9, %10 : vector<128x128xf32>
    %cst_11 = arith.constant 0.000000e+00 : f32
    %12 = vector.broadcast %cst_11 : f32 to vector<128x128xf32>
    %13 = arith.maximumf %11, %12 : vector<128x128xf32>
    %c0_12 = arith.constant 0 : index
    %c0_13 = arith.constant 0 : index
    %14 = vector.load %arg8[%c0_12, %c0_13] : memref<16x64xf32, #tpu.memory_space<vmem>>, vector<16x64xf32>
    %c0_14 = arith.constant 0 : index
    %c0_15 = arith.constant 0 : index
    %15 = vector.load %arg9[%c0_14, %c0_15] : memref<48x16xf32, #tpu.memory_space<vmem>>, vector<16x16xf32>
    %cst_16 = arith.constant dense<0.000000e+00> : vector<128x16xf32>
    %16 = tpu.matmul %1, %15, %cst_16 {dimension_numbers = #tpu.dot_dimension_numbers<[1], [0], [0], [1], [0, 0, 1, 1], [], []>} : vector<128x16xf32>, vector<16x16xf32>, vector<128x16xf32> -> vector<128x16xf32>
    %cst_17 = arith.constant dense<0.000000e+00> : vector<128x16xf32>
    %17 = tpu.matmul %13, %1, %cst_17 {dimension_numbers = #tpu.dot_dimension_numbers<[1], [0], [0], [1], [0, 0, 1, 1], [], []>} : vector<128x128xf32>, vector<128x16xf32>, vector<128x16xf32> -> vector<128x16xf32>
    %cst_18 = arith.constant dense<0.000000e+00> : vector<128x64xf32>
    %18 = tpu.matmul %17, %14, %cst_18 {dimension_numbers = #tpu.dot_dimension_numbers<[1], [0], [0], [1], [0, 0, 1, 1], [], []>} : vector<128x16xf32>, vector<16x64xf32>, vector<128x64xf32> -> vector<128x64xf32>
    %c0_19 = arith.constant 0 : index
    %c0_20 = arith.constant 0 : index
    %19 = vector.load %arg7[%c0_19, %c0_20] : memref<128x64xf32, #tpu.memory_space<vmem>>, vector<128x64xf32>
    %20 = arith.mulf %19, %18 : vector<128x64xf32>
    %21 = vector.extract_strided_slice %20 {offsets = [0, 0], sizes = [128, 16], strides = [1, 1]} : vector<128x64xf32> to vector<128x16xf32>
    %22 = vector.extract_strided_slice %20 {offsets = [0, 16], sizes = [128, 16], strides = [1, 1]} : vector<128x64xf32> to vector<128x16xf32>
    %23 = arith.addf %21, %22 : vector<128x16xf32>
    %24 = vector.extract_strided_slice %20 {offsets = [0, 32], sizes = [128, 16], strides = [1, 1]} : vector<128x64xf32> to vector<128x16xf32>
    %25 = arith.addf %23, %24 : vector<128x16xf32>
    %26 = vector.extract_strided_slice %20 {offsets = [0, 48], sizes = [128, 16], strides = [1, 1]} : vector<128x64xf32> to vector<128x16xf32>
    %27 = arith.addf %25, %26 : vector<128x16xf32>
    %28 = arith.addf %1, %27 : vector<128x16xf32>
    %29 = arith.negf %28 : vector<128x16xf32>
    %30 = math.exp %29 : vector<128x16xf32>
    %cst_21 = arith.constant 1.000000e+00 : f32
    %31 = vector.broadcast %cst_21 : f32 to vector<128x16xf32>
    %32 = arith.addf %31, %30 : vector<128x16xf32>
    %33 = arith.divf %31, %32 : vector<128x16xf32>
    %34 = math.tanh %28 : vector<128x16xf32>
    %35 = arith.mulf %33, %34 : vector<128x16xf32>
    %c16 = arith.constant 16 : index
    %c0_22 = arith.constant 0 : index
    %36 = vector.load %arg9[%c16, %c0_22] : memref<48x16xf32, #tpu.memory_space<vmem>>, vector<16x16xf32>
    %cst_23 = arith.constant dense<0.000000e+00> : vector<128x16xf32>
    %37 = tpu.matmul %35, %36, %cst_23 {dimension_numbers = #tpu.dot_dimension_numbers<[1], [0], [0], [1], [0, 0, 1, 1], [], []>} : vector<128x16xf32>, vector<16x16xf32>, vector<128x16xf32> -> vector<128x16xf32>
    %38 = arith.addf %16, %37 : vector<128x16xf32>
    %cst_24 = arith.constant dense<0.000000e+00> : vector<128x16xf32>
    %39 = tpu.matmul %13, %35, %cst_24 {dimension_numbers = #tpu.dot_dimension_numbers<[1], [0], [0], [1], [0, 0, 1, 1], [], []>} : vector<128x128xf32>, vector<128x16xf32>, vector<128x16xf32> -> vector<128x16xf32>
    %cst_25 = arith.constant dense<0.000000e+00> : vector<128x64xf32>
    %40 = tpu.matmul %39, %14, %cst_25 {dimension_numbers = #tpu.dot_dimension_numbers<[1], [0], [0], [1], [0, 0, 1, 1], [], []>} : vector<128x16xf32>, vector<16x64xf32>, vector<128x64xf32> -> vector<128x64xf32>
    %c0_26 = arith.constant 0 : index
    %c0_27 = arith.constant 0 : index
    %41 = vector.load %arg7[%c0_26, %c0_27] : memref<128x64xf32, #tpu.memory_space<vmem>>, vector<128x64xf32>
    %42 = arith.mulf %41, %40 : vector<128x64xf32>
    %43 = vector.extract_strided_slice %42 {offsets = [0, 0], sizes = [128, 16], strides = [1, 1]} : vector<128x64xf32> to vector<128x16xf32>
    %44 = vector.extract_strided_slice %42 {offsets = [0, 16], sizes = [128, 16], strides = [1, 1]} : vector<128x64xf32> to vector<128x16xf32>
    %45 = arith.addf %43, %44 : vector<128x16xf32>
    %46 = vector.extract_strided_slice %42 {offsets = [0, 32], sizes = [128, 16], strides = [1, 1]} : vector<128x64xf32> to vector<128x16xf32>
    %47 = arith.addf %45, %46 : vector<128x16xf32>
    %48 = vector.extract_strided_slice %42 {offsets = [0, 48], sizes = [128, 16], strides = [1, 1]} : vector<128x64xf32> to vector<128x16xf32>
    %49 = arith.addf %47, %48 : vector<128x16xf32>
    %50 = arith.addf %1, %49 : vector<128x16xf32>
    %51 = arith.negf %50 : vector<128x16xf32>
    %52 = math.exp %51 : vector<128x16xf32>
    %cst_28 = arith.constant 1.000000e+00 : f32
    %53 = vector.broadcast %cst_28 : f32 to vector<128x16xf32>
    %54 = arith.addf %53, %52 : vector<128x16xf32>
    %55 = arith.divf %53, %54 : vector<128x16xf32>
    %56 = math.tanh %50 : vector<128x16xf32>
    %57 = arith.mulf %55, %56 : vector<128x16xf32>
    %c32 = arith.constant 32 : index
    %c0_29 = arith.constant 0 : index
    %58 = vector.load %arg9[%c32, %c0_29] : memref<48x16xf32, #tpu.memory_space<vmem>>, vector<16x16xf32>
    %cst_30 = arith.constant dense<0.000000e+00> : vector<128x16xf32>
    %59 = tpu.matmul %57, %58, %cst_30 {dimension_numbers = #tpu.dot_dimension_numbers<[1], [0], [0], [1], [0, 0, 1, 1], [], []>} : vector<128x16xf32>, vector<16x16xf32>, vector<128x16xf32> -> vector<128x16xf32>
    %60 = arith.addf %38, %59 : vector<128x16xf32>
    %c0_31 = arith.constant 0 : index
    %c0_32 = arith.constant 0 : index
    %61 = vector.load %arg10[%c0_31, %c0_32] : memref<1x16xf32, #tpu.memory_space<vmem>>, vector<1x16xf32>
    %62 = vector.broadcast %61 : vector<1x16xf32> to vector<128x16xf32>
    %63 = arith.addf %60, %62 : vector<128x16xf32>
    %64 = vector.extract_strided_slice %63 {offsets = [0, 0], sizes = [8, 16], strides = [1, 1]} : vector<128x16xf32> to vector<8x16xf32>
    %65 = vector.extract_strided_slice %63 {offsets = [8, 0], sizes = [8, 16], strides = [1, 1]} : vector<128x16xf32> to vector<8x16xf32>
    %66 = vector.extract_strided_slice %63 {offsets = [16, 0], sizes = [8, 16], strides = [1, 1]} : vector<128x16xf32> to vector<8x16xf32>
    %67 = vector.extract_strided_slice %63 {offsets = [24, 0], sizes = [8, 16], strides = [1, 1]} : vector<128x16xf32> to vector<8x16xf32>
    %68 = vector.extract_strided_slice %63 {offsets = [32, 0], sizes = [8, 16], strides = [1, 1]} : vector<128x16xf32> to vector<8x16xf32>
    %69 = vector.extract_strided_slice %63 {offsets = [40, 0], sizes = [8, 16], strides = [1, 1]} : vector<128x16xf32> to vector<8x16xf32>
    %70 = vector.extract_strided_slice %63 {offsets = [48, 0], sizes = [8, 16], strides = [1, 1]} : vector<128x16xf32> to vector<8x16xf32>
    %71 = vector.extract_strided_slice %63 {offsets = [56, 0], sizes = [8, 16], strides = [1, 1]} : vector<128x16xf32> to vector<8x16xf32>
    %72 = tpu.concatenate %64, %65, %66, %67, %68, %69, %70, %71 in 1 : vector<8x16xf32>, vector<8x16xf32>, vector<8x16xf32>, vector<8x16xf32>, vector<8x16xf32>, vector<8x16xf32>, vector<8x16xf32>, vector<8x16xf32> -> vector<8x128xf32>
    %73 = vector.extract_strided_slice %63 {offsets = [64, 0], sizes = [8, 16], strides = [1, 1]} : vector<128x16xf32> to vector<8x16xf32>
    %74 = vector.extract_strided_slice %63 {offsets = [72, 0], sizes = [8, 16], strides = [1, 1]} : vector<128x16xf32> to vector<8x16xf32>
    %75 = vector.extract_strided_slice %63 {offsets = [80, 0], sizes = [8, 16], strides = [1, 1]} : vector<128x16xf32> to vector<8x16xf32>
    %76 = vector.extract_strided_slice %63 {offsets = [88, 0], sizes = [8, 16], strides = [1, 1]} : vector<128x16xf32> to vector<8x16xf32>
    %77 = vector.extract_strided_slice %63 {offsets = [96, 0], sizes = [8, 16], strides = [1, 1]} : vector<128x16xf32> to vector<8x16xf32>
    %78 = vector.extract_strided_slice %63 {offsets = [104, 0], sizes = [8, 16], strides = [1, 1]} : vector<128x16xf32> to vector<8x16xf32>
    %79 = vector.extract_strided_slice %63 {offsets = [112, 0], sizes = [8, 16], strides = [1, 1]} : vector<128x16xf32> to vector<8x16xf32>
    %80 = vector.extract_strided_slice %63 {offsets = [120, 0], sizes = [8, 16], strides = [1, 1]} : vector<128x16xf32> to vector<8x16xf32>
    %81 = tpu.concatenate %73, %74, %75, %76, %77, %78, %79, %80 in 1 : vector<8x16xf32>, vector<8x16xf32>, vector<8x16xf32>, vector<8x16xf32>, vector<8x16xf32>, vector<8x16xf32>, vector<8x16xf32>, vector<8x16xf32> -> vector<8x128xf32>
    %82 = tpu.concatenate %72, %81 in 0 : vector<8x128xf32>, vector<8x128xf32> -> vector<16x128xf32>
    %c0_33 = arith.constant 0 : index
    %c0_34 = arith.constant 0 : index
    %83 = vector.load %arg11[%c0_33, %c0_34] : memref<16x128xf32, #tpu.memory_space<vmem>>, vector<16x128xf32>
    tpu.vector_store %arg11[%c0_33, %c0_34], %82 {strides = array<i32>} : memref<16x128xf32, #tpu.memory_space<vmem>>, vector<16x128xf32>,
    return
  }
  func.func @transform_0(%arg0: i32) -> (i32, i32) {
    %c0_i32 = arith.constant 0 : i32
    %c0_i32_0 = arith.constant 0 : i32
    %c0_i32_1 = arith.constant 0 : i32
    return %c0_i32, %c0_i32_0 : i32, i32
  }
  func.func @transform_1(%arg0: i32) -> (i32, i32) {
    %c0_i32 = arith.constant 0 : i32
    %c0_i32_0 = arith.constant 0 : i32
    %c0_i32_1 = arith.constant 0 : i32
    return %c0_i32, %c0_i32_0 : i32, i32
  }
  func.func @transform_2(%arg0: i32) -> (i32, i32) {
    %c0_i32 = arith.constant 0 : i32
    %c0_i32_0 = arith.constant 0 : i32
    %c0_i32_1 = arith.constant 0 : i32
    return %c0_i32, %c0_i32_0 : i32, i32
  }
  func.func @transform_3(%arg0: i32) -> (i32, i32) {
    %c0_i32 = arith.constant 0 : i32
    %c0_i32_0 = arith.constant 0 : i32
    %c0_i32_1 = arith.constant 0 : i32
    return %c0_i32, %c0_i32_0 : i32, i32
  }
  func.func @transform_4(%arg0: i32) -> (i32, i32) {
    %c0_i32 = arith.constant 0 : i32
    %c0_i32_0 = arith.constant 0 : i32
    %c0_i32_1 = arith.constant 0 : i32
    return %c0_i32, %c0_i32_0 : i32, i32
  }
  func.func @transform_5(%arg0: i32) -> (i32, i32) {
    %c0_i32 = arith.constant 0 : i32
    %c0_i32_0 = arith.constant 0 : i32
    %c0_i32_1 = arith.constant 0 : i32
    return %c0_i32, %c0_i32_0 : i32, i32
  }
  func.func @transform_6(%arg0: i32) -> (i32, i32) {
    %c0_i32 = arith.constant 0 : i32
    %c0_i32_0 = arith.constant 0 : i32
    %c0_i32_1 = arith.constant 0 : i32
    return %c0_i32, %c0_i32_0 : i32, i32
  }
  func.func @transform_7(%arg0: i32) -> (i32, i32) {
    %c0_i32 = arith.constant 0 : i32
    %c0_i32_0 = arith.constant 0 : i32
    %c0_i32_1 = arith.constant 0 : i32
    return %c0_i32, %c0_i32_0 : i32, i32
  }
  func.func @transform_8(%arg0: i32) -> (i32, i32) {
    %c0_i32 = arith.constant 0 : i32
    %c0_i32_0 = arith.constant 0 : i32
    %c0_i32_1 = arith.constant 0 : i32
    return %c0_i32, %c0_i32_0 : i32, i32
  }
  func.func @transform_9(%arg0: i32) -> (i32, i32) {
    %c0_i32 = arith.constant 0 : i32
    %c0_i32_0 = arith.constant 0 : i32
    %c0_i32_1 = arith.constant 0 : i32
    return %c0_i32, %c0_i32_0 : i32, i32
  }
  func.func @transform_10(%arg0: i32) -> (i32, i32) {
    %c0_i32 = arith.constant 0 : i32
    %c0_i32_0 = arith.constant 0 : i32
    %c0_i32_1 = arith.constant 0 : i32
    return %c0_i32, %c0_i32_0 : i32, i32
  }
}

</mosaic_0001>

<bundles_post_ra>
// kernel: tpu_custom_call.1
= control target key start
LH: loop header
LB: loop body
LE: loop exit
PB: predicated region body
PF: predicated region fallthrough
CT: control target
= control target key end

     0   :  { %vm9743_vm0 = vcmask 130048   ;;  %s9599_s0 = inlined_call_operand.vmem [shape: f32[128,16], index: 0, kind: input, shape index: {}]   ;;  %s9600_s1 = inlined_call_operand.vmem [shape: f32[128,16], index: 1, kind: input, shape index: {}]   ;;  %s9601_s2 = inlined_call_operand.vmem [shape: f32[16,128], index: 2, kind: input, shape index: {}]   ;;  %s9602_s3 = inlined_call_operand.vmem [shape: f32[1,128], index: 3, kind: input, shape index: {}]   ;;  %s9603_s4 = inlined_call_operand.vmem [shape: f32[128,128], index: 4, kind: input, shape index: {}]   ;;  %s9604_s5 = inlined_call_operand.vmem [shape: f32[128,128], index: 5, kind: input, shape index: {}]   ;;  %s9605_s6 = inlined_call_operand.vmem [shape: f32[128,64], index: 6, kind: input, shape index: {}]   ;;  %s9606_s7 = inlined_call_operand.vmem [shape: f32[16,64], index: 7, kind: input, shape index: {}]   ;;  %s9607_s8 = inlined_call_operand.vmem [shape: f32[48,16], index: 8, kind: input, shape index: {}]   ;;  %s9608_s9 = inlined_call_operand.vmem [shape: f32[1,16], index: 9, kind: input, shape index: {}]   ;;  %s9609_s10 = inlined_call_operand.hbm [shape: f32[16,128], index: 10, kind: output, shape index: {}]  }
   0x1   :  { %v69_v0 = vld [vmem:[%s9601_s2 + $0x8] sm:$0xff]  ;;  %v68_v1 = vld [vmem:[%s9601_s2] sm:$0xff]  ;;  %v51_v3 = vld [vmem:[%s9599_s0 + $0x78] sm:$0xff] }
   0x2   :  { %137 = vmatpush.msra.mxu0 %v69_v0  ;;  %v36_v2 = vld [vmem:[%s9599_s0] sm:$0xff]  ;;  %4927 = vmatpush.msra.mxu2 %v69_v0 }
   0x4   :  { %138 = vmatpush.msra.mxu0 %v68_v1  ;;  %4928 = vmatpush.msra.mxu2 %v68_v1 }
   0x5   :  { %15 = vsyncpa [#allocation3], 0  ;;  %4751 = vmatmul.msk.f32.vlgmr.msra.gmra.mxu0 %vm9743_vm0, %v36_v2  ;;  %4766 = vmatmul.msk.f32.vlgmr.msra.gmra.mxu2 %vm9743_vm0, %v51_v3  ;;  %v37_v4 = vld [vmem:[%s9599_s0 + $0x8] sm:$0xff]  ;;  %v38_v5 = vld [vmem:[%s9599_s0 + $0x10] sm:$0xff]  ;;  %v9632_v33 = vmov 683565275  }
   0x6   :  { %v39_v6 = vld [vmem:[%s9599_s0 + $0x18] sm:$0xff]  ;;  %v40_v7 = vld [vmem:[%s9599_s0 + $0x20] sm:$0xff]  ;;  %v41_v8 = vld [vmem:[%s9599_s0 + $0x28] sm:$0xff]  ;;  %v9620_v35 = vmov 2475754826   ;;  %s5238_s21 = smov 112  }
   0x7   :  { %v42_v9 = vld [vmem:[%s9599_s0 + $0x30] sm:$0xff]  ;;  %v43_v10 = vld [vmem:[%s9599_s0 + $0x38] sm:$0xff]  ;;  %v44_v11 = vld [vmem:[%s9599_s0 + $0x40] sm:$0xff]  ;;  %v9622_v39 = vmov 2131351028   ;;  %s5240_s25 = smov 80  }
   0x8   :  { %v45_v12 = vld [vmem:[%s9599_s0 + $0x48] sm:$0xff]  ;;  %v46_v13 = vld [vmem:[%s9599_s0 + $0x50] sm:$0xff]  ;;  %v47_v14 = vld [vmem:[%s9599_s0 + $0x58] sm:$0xff]  ;;  %v9614_v42 = vmov 2102212464   ;;  %s5244_s2 = smov 64  }
   0x9   :  { %v48_v15 = vld [vmem:[%s9599_s0 + $0x60] sm:$0xff]  ;;  %v49_v16 = vld [vmem:[%s9599_s0 + $0x68] sm:$0xff]  ;;  %v50_v17 = vld [vmem:[%s9599_s0 + $0x70] sm:$0xff]  ;;  %v9634_v45 = vmov 920167782   ;;  %s4739_s23 = sshll.u32 %s9609_s10, 4  ;;  %s4740_s23 = int_to_ptr.hbm [resolvable:$true] %s4739_s23 }
   0xa   :  { %v5376_v18 = vld [vmem:[%s9602_s3] ss:$0 sm:$0xff]  ;;  %v9618_v48 = vmov 1326507024   ;;  %s5246_s24 = smov 128   ;;  %s5247_s26 = smov 8  }
   0xd   :  { %4752 = vmatmul.msk.f32.gmra.mxu0 %vm9743_vm0, %v37_v4 }
  0x15   :  { %4753 = vmatmul.msk.f32.gmra.mxu0 %vm9743_vm0, %v38_v5 }
  0x1d   :  { %4754 = vmatmul.msk.f32.gmra.mxu0 %vm9743_vm0, %v39_v6 }
  0x25   :  { %4755 = vmatmul.msk.f32.gmra.mxu0 %vm9743_vm0, %v40_v7 }
  0x2d   :  { %4756 = vmatmul.msk.f32.gmra.mxu0 %vm9743_vm0, %v41_v8 }
  0x35   :  { %4757 = vmatmul.msk.f32.gmra.mxu0 %vm9743_vm0, %v42_v9 }
  0x3d   :  { %4758 = vmatmul.msk.f32.gmra.mxu0 %vm9743_vm0, %v43_v10 }
  0x45   :  { %4759 = vmatmul.msk.f32.gmra.mxu0 %vm9743_vm0, %v44_v11 }
  0x4d   :  { %4760 = vmatmul.msk.f32.gmra.mxu0 %vm9743_vm0, %v45_v12 }
  0x55   :  { %4761 = vmatmul.msk.f32.gmra.mxu0 %vm9743_vm0, %v46_v13 }
  0x5d   :  { %4762 = vmatmul.msk.f32.gmra.mxu0 %vm9743_vm0, %v47_v14 }
  0x65   :  { %4763 = vmatmul.msk.f32.gmra.mxu0 %vm9743_vm0, %v48_v15 }
  0x6d   :  { %4764 = vmatmul.msk.f32.gmra.mxu0 %vm9743_vm0, %v49_v16 }
  0x75   :  { %4765 = vmatmul.msk.f32.gmra.mxu0 %vm9743_vm0, %v50_v17 }
  0x82   :  { %v140_v19 = vpop.f32.mrf.mxu0 }
  0x83   :  { %v5379_v20 = vadd.f32 %v5376_v18, %v140_v19 }
  0x85   :  { %v191_v21 = vand.u32 2139095040, %v5379_v20  ;;  %v188_v23 = vand.u32 2147483647, %v5379_v20 }
  0x87   :  { %v192_v22 = vshrl.u32 %v191_v21, 23  ;;  %v195_v26 = vand.u32 8388607, %v188_v23 }
  0x89   :  { %v4767_v24 = vadd.s32 4294967169, %v192_v22  ;;  %v196_v30 = vor.u32 8388608, %v195_v26 }
  0x8a   :  { %v143_v29 = vpop.f32.mrf.mxu0 }
  0x8b   :  { %v198_v25 = vadd.s32 1, %v4767_v24  ;;  %v5390_v37 = vadd.f32 %v5376_v18, %v143_v29  ;;  %v5400_v53 = vshll.u32 %v196_v30, 8 }
  0x8d   :  { %vm199_vm1 = vcmp.gt.s32.totalorder %v198_v25, 0  ;;  %9786 = vst [vmem:[#allocation5_spill] sm:$0xff] %v5390_v37  ;;  %v346_v56 = vand.u32 2139095040, %v5390_v37  ;;  %v237_v63 = vand.u32 65535, %v5400_v53  ;;  %v238_v2 = vshrl.u32 %v5400_v53, 16 }
  0x8e   :  { %v200_v27 = vsel %vm199_vm1, %v198_v25, 0  ;;  %v9616_v25 = vmov 0  }
  0x8f   :  { %v202_v28 = vand.u32 31, %v200_v27  ;;  %v5385_v32 = vshrl.u32 %v200_v27, 5  ;;  %v347_v3 = vshrl.u32 %v346_v56, 23 }
  0x91   :  { %v203_v31 = vsub.s32 32, %v202_v28  ;;  %v205_v34 = vshll.u32 %v9632_v33, %v202_v28  ;;  %v208_v36 = vshll.u32 %v9620_v35, %v202_v28  ;;  %v211_v41 = vshll.u32 %v9622_v39, %v202_v28 }
  0x92   :  { %v214_v44 = vshll.u32 %v9614_v42, %v202_v28  ;;  %v217_v47 = vshll.u32 %v9634_v45, %v202_v28  ;;  %vm220_vm2 = vcmp.lt.s32.totalorder %v5385_v32, 1  ;;  %vm223_vm3 = vcmp.lt.s32.totalorder %v5385_v32, 4 }
  0x93   :  { %v206_v38 = vshrl.u32 %v9620_v35, %v203_v31  ;;  %v209_v40 = vshrl.u32 %v9622_v39, %v203_v31  ;;  %v212_v43 = vshrl.u32 %v9614_v42, %v203_v31  ;;  %v215_v46 = vshrl.u32 %v9634_v45, %v203_v31 }
  0x94   :  { %v218_v49 = vshrl.u32 %v9618_v48, %v203_v31  ;;  %vm222_vm4 = vcmp.lt.s32.totalorder %v5385_v32, 3  ;;  %vm221_vm5 = vcmp.lt.s32.totalorder %v5385_v32, 2  ;;  %v4770_v14 = vadd.s32 4294967169, %v347_v3 }
  0x95   :  { %v207_v50 = vor.u32 %v206_v38, %v205_v34  ;;  %v210_v51 = vor.u32 %v209_v40, %v208_v36  ;;  %v213_v52 = vor.u32 %v212_v43, %v211_v41  ;;  %v216_v54 = vor.u32 %v215_v46, %v214_v44 }
  0x96   :  { %v219_v55 = vor.u32 %v218_v49, %v217_v47  ;;  %v204_v15 = vshrl.u32 %v9632_v33, %v203_v31  ;;  %v353_v34 = vadd.s32 1, %v4770_v14 }
  0x97   :  { %v228_v57 = vsel %vm220_vm2, %v207_v50, %v210_v51  ;;  %v232_v58 = vsel %vm220_vm2, %v210_v51, %v213_v52  ;;  %v229_v59 = vsel %vm223_vm3, %v216_v54, 920167782  ;;  %v225_v31 = vsel %vm223_vm3, %v213_v52, 2102212464 }
  0x98   :  { %v233_v60 = vsel %vm223_vm3, %v219_v55, 1326507024  ;;  %v230_v61 = vsel %vm222_vm4, %v213_v52, %v229_v59  ;;  %v224_v44 = vsel %vm220_vm2, %v204_v15, %v207_v50  ;;  %v226_v49 = vsel %vm222_vm4, %v210_v51, %v225_v31  ;;  %v146_v50 = vpop.f32.mrf.mxu0 }
  0x99   :  { %v234_v62 = vsel %vm222_vm4, %v216_v54, %v233_v60  ;;  %v231_v0 = vsel %vm221_vm5, %v228_v57, %v230_v61  ;;  %vm354_vm10 = vcmp.gt.s32.totalorder %v353_v34, 0  ;;  %v227_v59 = vsel %vm221_vm5, %v224_v44, %v226_v49 }
  0x9a   :  { %v235_v1 = vsel %vm221_vm5, %v232_v58, %v234_v62  ;;  %v261_v6 = vand.u32 65535, %v231_v0  ;;  %v262_v7 = vshrl.u32 %v231_v0, 16  ;;  %v355_v61 = vsel %vm354_vm10, %v353_v34, 0 }
  0x9b   :  { %v239_v4 = vand.u32 65535, %v235_v1  ;;  %v240_v5 = vshrl.u32 %v235_v1, 16  ;;  %v281_v51 = vmul.u32 %v5400_v53, %v227_v59  ;;  %v5446_v0 = vadd.f32 %v5376_v18, %v146_v50 }
  0x9c   :  { %v264_v10 = vmul.u32 %v262_v7, %v237_v63  ;;  %v265_v11 = vmul.u32 %v261_v6, %v238_v2  ;;  %v263_v17 = vmul.u32 %v261_v6, %v237_v63  ;;  %v266_v24 = vmul.u32 %v262_v7, %v238_v2 }
  0x9d   :  { %v242_v8 = vmul.u32 %v240_v5, %v237_v63  ;;  %v243_v9 = vmul.u32 %v239_v4, %v238_v2  ;;  %v241_v12 = vmul.u32 %v239_v4, %v237_v63  ;;  %v244_v16 = vmul.u32 %v240_v5, %v238_v2  ;;  %9787 = vst [vmem:[#allocation6_spill] sm:$0xff] %v5446_v0 }
  0x9e   :  { %v267_v19 = vshll.u32 %v264_v10, 16  ;;  %v269_v27 = vshll.u32 %v265_v11, 16  ;;  %v268_v46 = vshrl.u32 %v264_v10, 16  ;;  %v270_v52 = vshrl.u32 %v265_v11, 16 }
  0x9f   :  { %v245_v13 = vshll.u32 %v242_v8, 16  ;;  %v247_v21 = vshll.u32 %v243_v9, 16  ;;  %v246_v40 = vshrl.u32 %v242_v8, 16  ;;  %v248_v54 = vshrl.u32 %v243_v9, 16 }
  0xa0   :  { %vm271_vm7 = vc.u32 %v263_v17, %v267_v19  ;;  %v273_v28 = vadd.s32 %v267_v19, %v263_v17  ;;  %v357_v63 = vand.u32 31, %v355_v61  ;;  %v501_v32 = vand.u32 2139095040, %v5446_v0 }
  0xa1   :  { %vm249_vm6 = vc.u32 %v241_v12, %v245_v13  ;;  %v251_v22 = vadd.s32 %v245_v13, %v241_v12  ;;  %v272_v30 = vsel %vm271_vm7, 1, %v9616_v25  ;;  %v9613_v53 = vand.u32 2147483647, %v5390_v37 }
  0xa2   :  { %v250_v26 = vsel %vm249_vm6, 1, %v9616_v25  ;;  %v274_v38 = vadd.s32 %v272_v30, %v266_v24  ;;  %vm275_vm9 = vc.u32 %v273_v28, %v269_v27  ;;  %v5438_v58 = vadd.s32 %v273_v28, %v269_v27  ;;  %v149_v27 = vpop.f32.mrf.mxu0 }
  0xa3   :  { %v252_v29 = vadd.s32 %v250_v26, %v244_v16  ;;  %vm253_vm8 = vc.u32 %v251_v22, %v247_v21  ;;  %v276_v43 = vsel %vm275_vm9, 1, %v9616_v25  ;;  %v358_v4 = vsub.s32 32, %v357_v63 }
  0xa4   :  { %v254_v36 = vsel %vm253_vm8, 1, %v9616_v25  ;;  %v278_v47 = vadd.s32 %v276_v43, %v274_v38  ;;  %v502_v6 = vshrl.u32 %v501_v32, 23  ;;  %v372_v12 = vshll.u32 %v9634_v45, %v357_v63 }
  0xa5   :  { %v256_v41 = vadd.s32 %v254_v36, %v252_v29  ;;  %v373_v8 = vshrl.u32 %v9618_v48, %v358_v4  ;;  %v370_v11 = vshrl.u32 %v9634_v45, %v358_v4  ;;  %v356_v13 = vshrl.u32 %v355_v61, 5 }
  0xa6   :  { %v279_v56 = vadd.s32 %v278_v47, %v268_v46  ;;  %v4773_v9 = vadd.s32 4294967169, %v502_v6  ;;  %v364_v14 = vshrl.u32 %v9622_v39, %v358_v4  ;;  %v367_v15 = vshrl.u32 %v9614_v42, %v358_v4 }
  0xa7   :  { %v257_v55 = vadd.s32 %v256_v41, %v246_v40  ;;  %v369_v16 = vshll.u32 %v9614_v42, %v357_v63  ;;  %v374_v19 = vor.u32 %v373_v8, %v372_v12  ;;  %v361_v22 = vshrl.u32 %v9620_v35, %v358_v4 }
  0xa8   :  { %v280_v60 = vadd.s32 %v279_v56, %v270_v52  ;;  %v508_v21 = vadd.s32 1, %v4773_v9  ;;  %v363_v24 = vshll.u32 %v9620_v35, %v357_v63  ;;  %v366_v26 = vshll.u32 %v9622_v39, %v357_v63 }
  0xa9   :  { %v5436_v57 = vadd.s32 %v257_v55, %v248_v54  ;;  %v350_v28 = vand.u32 8388607, %v9613_v53  ;;  %v360_v29 = vshll.u32 %v9632_v33, %v357_v63  ;;  %v371_v30 = vor.u32 %v370_v11, %v369_v16  ;;  %v185_v16 = vpop.f32.mrf.mxu2 }
  0xaa   :  { %v284_v62 = vadd.s32 1, %v280_v60  ;;  %v365_v31 = vor.u32 %v364_v14, %v363_v24  ;;  %v368_v36 = vor.u32 %v367_v15, %v366_v26  ;;  %vm378_vm13 = vcmp.lt.s32.totalorder %v356_v13, 4 }
  0xab   :  { %vm283_vm11 = vc.u32 %v5436_v57, %v5438_v58  ;;  %v388_v38 = vsel %vm378_vm13, %v374_v19, 1326507024  ;;  %vm509_vm14 = vcmp.gt.s32.totalorder %v508_v21, 0  ;;  %v5471_v40 = vadd.f32 %v5376_v18, %v149_v27 }
  0xac   :  { %v285_v1 = vsel %vm283_vm11, %v284_v62, %v280_v60  ;;  %v362_v41 = vor.u32 %v361_v22, %v360_v29  ;;  %vm375_vm15 = vcmp.lt.s32.totalorder %v356_v13, 1  ;;  %vm377_vm1 = vcmp.lt.s32.totalorder %v356_v13, 3 }
  0xad   :  { %v286_v2 = vadd.s32 %v285_v1, %v281_v51  ;;  %9788 = vst [vmem:[#allocation7_spill] sm:$0xff] %v5471_v40  ;;  %v384_v44 = vsel %vm378_vm13, %v371_v30, 920167782  ;;  %v351_v46 = vor.u32 8388608, %v350_v28  ;;  %v387_v47 = vsel %vm375_vm15, %v365_v31, %v368_v36 }
  0xae   :  { %v389_v49 = vsel %vm377_vm1, %v371_v30, %v388_v38  ;;  %v510_v54 = vsel %vm509_vm14, %v508_v21, 0  ;;  %v380_v55 = vsel %vm378_vm13, %v368_v36, 2102212464  ;;  %v656_v52 = vand.u32 2139095040, %v5471_v40 }
  0xaf   :  { %v287_v3 = vadd.s32 536870912, %v286_v2  ;;  %v359_v56 = vshrl.u32 %v9632_v33, %v358_v4  ;;  %vm376_vm2 = vcmp.lt.s32.totalorder %v356_v13, 2  ;;  %v383_v59 = vsel %vm375_vm15, %v362_v41, %v365_v31 }
  0xb0   :  { %v385_v60 = vsel %vm377_vm1, %v368_v36, %v384_v44  ;;  %v390_v50 = vsel %vm376_vm2, %v387_v47, %v389_v49  ;;  %v512_v62 = vand.u32 31, %v510_v54  ;;  %v381_v63 = vsel %vm377_vm1, %v365_v31, %v380_v55 }
  0xb1   :  { %v5449_v5 = vshrl.u32 %v287_v3, 30  ;;  %v379_v51 = vsel %vm375_vm15, %v359_v56, %v362_v41  ;;  %v5481_v1 = vshll.u32 %v351_v46, 8  ;;  %v657_v3 = vshrl.u32 %v656_v52, 23 }
  0xb2   :  { %v394_v32 = vand.u32 65535, %v390_v50  ;;  %v9612_v6 = vand.u32 2147483647, %v5446_v0  ;;  %v5484_v4 = vsel %vm376_vm2, %v379_v51, %v381_v63  ;;  %v513_v8 = vsub.s32 32, %v512_v62 }
  0xb3   :  { %v289_v7 = vshll.u32 %v5449_v5, 30  ;;  %9789 = vst [vmem:[#allocation8_spill] sm:$0xff] %v5481_v1  ;;  %v392_v9 = vand.u32 65535, %v5481_v1  ;;  %v282_v13 = vadd.s32 %v5438_v58, %v5436_v57  ;;  %v393_v14 = vshrl.u32 %v5481_v1, 16 }
  0xb4   :  { %9790 = vst [vmem:[#allocation9_spill] sm:$0xff] %v5484_v4  ;;  %v4776_v15 = vadd.s32 4294967169, %v657_v3  ;;  %v5498_v22 = vand.u32 8388607, %v9612_v6  ;;  %v525_v58 = vshrl.u32 %v9634_v45, %v513_v8  ;;  %v528_v29 = vshrl.u32 %v9618_v48, %v513_v8 }
  0xb5   :  { %v5453_v10 = vsub.s32 %v286_v2, %v289_v7  ;;  %v386_v2 = vsel %vm376_vm2, %v383_v59, %v385_v60  ;;  %v395_v7 = vshrl.u32 %v390_v50, 16  ;;  %v5492_v19 = vmul.u32 %v394_v32, %v392_v9 }
  0xb6   :  { %v416_v11 = vand.u32 65535, %v386_v2  ;;  %v417_v12 = vshrl.u32 %v386_v2, 16  ;;  %v5502_v26 = vmul.u32 %v394_v32, %v393_v14  ;;  %v5513_v30 = vadd.f32 %v5376_v18, %v185_v16 }
  0xb7   :  { %vm291_vm12 = vcmp.lt.s32.totalorder %v5453_v10, 0  ;;  %v292_v17 = vsub.s32 0, %v5453_v10  ;;  %v5500_v24 = vmul.u32 %v395_v7, %v392_v9  ;;  %v5504_v57 = vmul.u32 %v395_v7, %v393_v14 }
  0xb8   :  { %v5507_v27 = vmul.u32 %v416_v11, %v392_v9  ;;  %v5509_v28 = vmul.u32 %v417_v12, %v392_v9  ;;  %9792 = vst [vmem:[#allocation11_spill] sm:$0xff] %v5513_v30  ;;  %v5516_v31 = vshrl.u32 %v510_v54, 5  ;;  %v524_v36 = vshll.u32 %v9614_v42, %v512_v62 }
  0xb9   :  { %v293_v34 = vsel %vm291_vm12, %v292_v17, %v5453_v10  ;;  %9791 = vst [vmem:[#allocation10_spill] sm:$0xff] %v5500_v24  ;;  %v663_v38 = vadd.s32 1, %v4776_v15  ;;  %v516_v41 = vshrl.u32 %v9620_v35, %v513_v8  ;;  %v522_v44 = vshrl.u32 %v9614_v42, %v513_v8 }
  0xba   :  { %v294_v43 = vclz %v293_v34  ;;  %v527_v46 = vshll.u32 %v9634_v45, %v512_v62  ;;  %v400_v47 = vshll.u32 %v5500_v24, 16  ;;  %v5524_v49 = vmul.u32 %v416_v11, %v393_v14 }
  0xbb   :  { %v526_v55 = vor.u32 %v525_v58, %v524_v36  ;;  %v9611_v52 = vand.u32 2147483647, %v5471_v40  ;;  %v515_v54 = vshll.u32 %v9632_v33, %v512_v62  ;;  %v518_v56 = vshll.u32 %v9620_v35, %v512_v62 }
  0xbc   :  { %v4768_v61 = vadd.s32 4294967294, %v294_v43  ;;  %v519_v43 = vshrl.u32 %v9622_v39, %v513_v8  ;;  %v521_v59 = vshll.u32 %v9622_v39, %v512_v62  ;;  %v529_v60 = vor.u32 %v528_v29, %v527_v46 }
  0xbd   :  { %vm664_vm4 = vcmp.gt.s32.totalorder %v663_v38, 0  ;;  %v2516_v51 = vand.u32 2139095040, %v5513_v30  ;;  %v517_v63 = vor.u32 %v516_v41, %v515_v54  ;;  %vm533_vm5 = vcmp.lt.s32.totalorder %v5516_v31, 4 }
  0xbe   :  { %vm4769_vm3 = vcmp.lt.s32.totalorder %v4768_v61, 0  ;;  %v520_v2 = vor.u32 %v519_v43, %v518_v56  ;;  %v523_v3 = vor.u32 %v522_v44, %v521_v59  ;;  %vm190_vm6 = vcmp.lt.s32.totalorder %v5379_v20, 0 }
  0xbf   :  { %v5490_v17 = vsel %vm4769_vm3, 0, %v4768_v61  ;;  %v5535_v7 = vmul.u32 %v417_v12, %v393_v14  ;;  %v506_v62 = vor.u32 8388608, %v5498_v22  ;;  %v539_v9 = vsel %vm533_vm5, %v526_v55, 920167782 }
  0xc0   :  { %v302_v34 = vsub.s32 4294967266, %v5490_v17  ;;  %v298_v32 = vsub.s32 32, %v5490_v17  ;;  %vm5539_vm7 = vc.u32 %v5492_v19, %v400_v47  ;;  %v543_v15 = vsel %vm533_vm5, %v529_v60, 1326507024 }
  0xc1   :  { %9793 = vst [vmem:[#allocation12_spill] sm:$0xff] %v5535_v7  ;;  %v660_v16 = vand.u32 8388607, %v9611_v52  ;;  %v665_v58 = vsel %vm664_vm4, %v663_v38, 0  ;;  %vm530_vm8 = vcmp.lt.s32.totalorder %v5516_v31, 1  ;;  %vm532_vm9 = vcmp.lt.s32.totalorder %v5516_v31, 3 }
  0xc2   :  { %v303_v61 = vadd.s32 127, %v302_v34  ;;  %v2517_v12 = vshrl.u32 %v2516_v51, 23  ;;  %v514_v14 = vshrl.u32 %v9632_v33, %v513_v8  ;;  %v535_v22 = vsel %vm533_vm5, %v523_v3, 2102212464 }
  0xc3   :  { %v538_v34 = vsel %vm530_vm8, %v517_v63, %v520_v2  ;;  %v540_v36 = vsel %vm532_vm9, %v523_v3, %v539_v9  ;;  %v300_v41 = vshrl.u32 %v282_v13, %v298_v32  ;;  %v542_v43 = vsel %vm530_vm8, %v520_v2, %v523_v3  ;;  %v152_v32 = vpop.f32.mrf.mxu0 }
  0xc4   :  { %v304_v29 = vshll.u32 %v303_v61, 23  ;;  %v544_v44 = vsel %vm532_vm9, %v526_v55, %v543_v15  ;;  %v667_v46 = vand.u32 31, %v665_v58  ;;  %v299_v54 = vshll.u32 %v5453_v10, %v5490_v17 }
  0xc5   :  { %v312_v38 = vsub.s32 4, %v5449_v5  ;;  %vm531_vm10 = vcmp.lt.s32.totalorder %v5516_v31, 2  ;;  %v534_v56 = vsel %vm530_vm8, %v514_v14, %v517_v63  ;;  %v536_v60 = vsel %vm532_vm9, %v520_v2, %v535_v22 }
  0xc6   :  { %v305_v59 = vor.u32 4788187, %v304_v29  ;;  %v541_v8 = vsel %vm531_vm10, %v538_v34, %v540_v36  ;;  %v4812_v61 = vadd.s32 4294967169, %v2517_v12  ;;  %v405_v13 = vsel %vm5539_vm7, 1, %v9616_v25 }
  0xc7   :  { %v545_v55 = vsel %vm531_vm10, %v542_v43, %v544_v44  ;;  %v5559_v51 = vshll.u32 %v506_v62, 8  ;;  %v9610_v10 = vand.u32 2147483647, %v5513_v30  ;;  %v301_v17 = vor.u32 %v300_v41, %v299_v54 }
  0xc8   :  { %v5563_v63 = vadd.s32 %v400_v47, %v5492_v19  ;;  %v661_v2 = vor.u32 8388608, %v660_v16  ;;  %v5565_v3 = vsub.s32 32, %v667_v46  ;;  %v5570_v9 = vsel %vm190_vm6, %v312_v38, %v5449_v5 }
  0xc9   :  { %9796 = vst [vmem:[#allocation13_spill] sm:$0xff] %v5559_v51  ;;  %v5574_v11 = vsel %vm531_vm10, %v534_v56, %v536_v60  ;;  %v571_v62 = vand.u32 65535, %v541_v8  ;;  %v572_v15 = vshrl.u32 %v541_v8, 16  ;;  %v306_v29 = vand.u32 2147483647, %v305_v59 }
  0xca   :  { %9797 = vst [vmem:[#allocation14_spill] sm:$0xff] %v5563_v63  ;;  %v5577_v12 = vadd.s32 %v405_v13, %v5504_v57  ;;  %v550_v19 = vshrl.u32 %v545_v55, 16  ;;  %v2523_v47 = vadd.s32 1, %v4812_v61  ;;  %v547_v16 = vand.u32 65535, %v5559_v51 }
  0xcb   :  { %9798 = vst [vmem:[#allocation15_spill] sm:$0xff] %v5574_v11  ;;  %v548_v14 = vshrl.u32 %v5559_v51, 16  ;;  %v5583_v5 = vand.u32 8388607, %v9610_v10  ;;  %v5586_v31 = vadd.f32 %v5376_v18, %v152_v32  ;;  %v308_v22 = vcvt.s32.f32 %v301_v17 }
  0xcc   :  { %9799 = vst [vmem:[#allocation16_spill] sm:$0xff] %v5577_v12  ;;  %v683_v57 = vshrl.u32 %v9618_v48, %v5565_v3  ;;  %v5592_v36 = vshll.u32 %v661_v2, 8  ;;  %v549_v41 = vand.u32 65535, %v545_v55  ;;  %v5594_v43 = vmul.u32 %v571_v62, %v547_v16 }
  0xcd   :  { %9800 = vst [vmem:[#allocation17_spill] sm:$0xff] %v5586_v31  ;;  %v5596_v44 = vmul.u32 %v572_v15, %v547_v16  ;;  %v680_v54 = vshrl.u32 %v9634_v45, %v5565_v3  ;;  %v309_v38 = vmul.f32 %v308_v22, %v306_v29  ;;  %v5600_v56 = vmul.u32 %v550_v19, %v547_v16 }
  0xce   :  { %9801 = vst [vmem:[#allocation18_spill] sm:$0xff] %v5592_v36  ;;  %v682_v59 = vshll.u32 %v9634_v45, %v667_v46  ;;  %vm2524_vm11 = vcmp.gt.s32.totalorder %v2523_v47, 0  ;;  %v5603_v60 = vshrl.u32 %v665_v58, 5  ;;  %v674_v8 = vshrl.u32 %v9622_v39, %v5565_v3 }
  0xcf   :  { %9802 = vst [vmem:[#allocation19_spill] sm:$0xff] %v5594_v43  ;;  %v677_v61 = vshrl.u32 %v9614_v42, %v5565_v3  ;;  %v679_v13 = vshll.u32 %v9614_v42, %v667_v46  ;;  %vm5612_vm12 = vcmp.le.f32.partialorder %v188_v23, 0.7853982  ;;  %v5616_v17 = vmul.u32 %v571_v62, %v548_v14 }
  0xd0   :  { %9803 = vst [vmem:[#allocation20_spill] sm:$0xff] %v5596_v44  ;;  %v671_v58 = vshrl.u32 %v9620_v35, %v5565_v3  ;;  %v673_v2 = vshll.u32 %v9620_v35, %v667_v46  ;;  %v684_v32 = vor.u32 %v683_v57, %v682_v59  ;;  %v676_v29 = vshll.u32 %v9622_v39, %v667_v46 }
  0xd1   :  { %9804 = vst [vmem:[#allocation21_spill] sm:$0xff] %v5600_v56  ;;  %v681_v22 = vor.u32 %v680_v54, %v679_v13  ;;  %v2525_v10 = vsel %vm2524_vm11, %v2523_v47, 0  ;;  %v811_v52 = vand.u32 2139095040, %v5586_v31  ;;  %v310_v6 = vxor.u32 2147483648, %v309_v38 }
  0xd2   :  { %9807 = vst [vmem:[#allocation22_spill] sm:$0xff] %v5616_v17  ;;  %v551_v53 = vmul.u32 %v549_v41, %v547_v16  ;;  %v5623_v23 = vmul.u32 %v572_v15, %v548_v14  ;;  %v670_v34 = vshll.u32 %v9632_v33, %v667_v46  ;;  %v555_v62 = vshll.u32 %v5600_v56, 16 }
  0xd3   :  { %v675_v21 = vor.u32 %v674_v8, %v673_v2  ;;  %v678_v50 = vor.u32 %v677_v61, %v676_v29  ;;  %vm688_vm13 = vcmp.lt.s32.totalorder %v5603_v60, 4  ;;  %v5628_v42 = vmul.u32 %v549_v41, %v548_v14  ;;  %v155_v61 = vpop.f32.mrf.mxu0 }
  0xd4   :  { %9808 = vst [vmem:[#allocation23_spill] sm:$0xff] %v5623_v23  ;;  %v672_v57 = vor.u32 %v671_v58, %v670_v34  ;;  %v698_v47 = vsel %vm688_vm13, %v684_v32, 1326507024  ;;  %v2527_v54 = vand.u32 31, %v2525_v10  ;;  %v554_v59 = vmul.u32 %v550_v19, %v548_v14 }
  0xd5   :  { %9809 = vst [vmem:[#allocation24_spill] sm:$0xff] %v5628_v42  ;;  %v694_v15 = vsel %vm688_vm13, %v681_v22, 920167782  ;;  %v5635_v16 = vand.u32 65535, %v5592_v36  ;;  %v812_v46 = vshrl.u32 %v811_v52, 23  ;;  %v311_v8 = vsel %vm190_vm6, %v310_v6, %v309_v38 }
  0xd6   :  { %vm685_vm14 = vcmp.lt.s32.totalorder %v5603_v60, 1  ;;  %vm687_vm15 = vcmp.lt.s32.totalorder %v5603_v60, 3  ;;  %v5642_v34 = vshrl.u32 %v5592_v36, 16  ;;  %vm559_vm1 = vc.u32 %v551_v53, %v555_v62 }
  0xd7   :  { %v697_v19 = vsel %vm685_vm14, %v675_v21, %v678_v50  ;;  %v699_v14 = vsel %vm687_vm15, %v681_v22, %v698_v47  ;;  %v4779_v41 = vadd.s32 4294967169, %v812_v46  ;;  %v690_v52 = vsel %vm688_vm13, %v678_v50, 2102212464 }
  0xd8   :  { %v693_v6 = vsel %vm685_vm14, %v672_v57, %v675_v21  ;;  %v695_v38 = vsel %vm687_vm15, %v678_v50, %v694_v15  ;;  %v2528_v13 = vsub.s32 32, %v2527_v54  ;;  %v5657_v58 = vsel %vm5612_vm12, %v5379_v20, %v311_v8 }
  0xd9   :  { %v669_v2 = vshrl.u32 %v9632_v33, %v5565_v3  ;;  %vm686_vm2 = vcmp.lt.s32.totalorder %v5603_v60, 2  ;;  %v2521_v32 = vor.u32 8388608, %v5583_v5  ;;  %v560_v29 = vsel %vm559_vm1, 1, %v9616_v25 }
  0xda   :  { %v700_v22 = vsel %vm686_vm2, %v697_v19, %v699_v14  ;;  %v818_v47 = vadd.s32 1, %v4779_v41  ;;  %v5667_v50 = vadd.f32 %v5376_v18, %v155_v61  ;;  %v691_v3 = vsel %vm687_vm15, %v675_v21, %v690_v52 }
  0xdb   :  { %v689_v46 = vsel %vm685_vm14, %v669_v2, %v672_v57  ;;  %v696_v5 = vsel %vm686_vm2, %v693_v6, %v695_v38  ;;  %v5678_v8 = vmul.f32 %v5657_v58, %v5657_v58  ;;  %v5680_v19 = vadd.s32 %v555_v62, %v551_v53 }
  0xdc   :  { %9810 = vst [vmem:[#allocation25_spill] sm:$0xff] %v5667_v50  ;;  %v2542_v14 = vshll.u32 %v9634_v45, %v2527_v54  ;;  %v2543_v41 = vshrl.u32 %v9618_v48, %v2528_v13  ;;  %v5684_v61 = vadd.s32 %v560_v29, %v554_v59  ;;  %v705_v15 = vshrl.u32 %v700_v22, 16 }
  0xdd   :  { %9811 = vst [vmem:[#allocation26_spill] sm:$0xff] %v5680_v19  ;;  %v5686_v57 = vshrl.u32 %v2525_v10, 5  ;;  %vm819_vm3 = vcmp.gt.s32.totalorder %v818_v47, 0  ;;  %v5690_v21 = vsel %vm686_vm2, %v689_v46, %v691_v3  ;;  %v726_v52 = vand.u32 65535, %v696_v5 }
  0xde   :  { %9812 = vst [vmem:[#allocation27_spill] sm:$0xff] %v5684_v61  ;;  %v5692_v6 = vshll.u32 %v2521_v32, 8  ;;  %v966_v53 = vand.u32 2139095040, %v5667_v50  ;;  %v2533_v62 = vshll.u32 %v9620_v35, %v2527_v54  ;;  %v2534_v38 = vshrl.u32 %v9622_v39, %v2528_v13 }
  0xdf   :  { %9813 = vst [vmem:[#allocation28_spill] sm:$0xff] %v5690_v21  ;;  %v2536_v59 = vshll.u32 %v9622_v39, %v2527_v54  ;;  %v9815_v2 = vmov 2102212464   ;;  %v2540_v25 = vshrl.u32 %v9634_v45, %v2528_v13  ;;  %v2544_v60 = vor.u32 %v2543_v41, %v2542_v14 }
  0xe0   :  { %9814 = vst [vmem:[#allocation29_spill] sm:$0xff] %v5692_v6  ;;  %v2537_v29 = vshrl.u32 %v9815_v2, %v2528_v13  ;;  %v2539_v10 = vshll.u32 %v9815_v2, %v2527_v54  ;;  %v820_v46 = vsel %vm819_vm3, %v818_v47, 0  ;;  %v704_v3 = vand.u32 65535, %v700_v22 }
  0xe1   :  { %v5702_v32 = vmul.u32 %v705_v15, %v5635_v16  ;;  %v727_v48 = vshrl.u32 %v696_v5, 16  ;;  %vm2548_vm4 = vcmp.lt.s32.totalorder %v5686_v57, 4  ;;  %v2530_v39 = vshll.u32 %v9632_v33, %v2527_v54 }
  0xe2   :  { %v9817_v30 = vmov 2475754826   ;;  %v967_v0 = vshrl.u32 %v966_v53, 23  ;;  %v2535_v11 = vor.u32 %v2534_v38, %v2533_v62  ;;  %v2538_v51 = vor.u32 %v2537_v29, %v2536_v59 }
  0xe3   :  { %9816 = vst [vmem:[#allocation30_spill] sm:$0xff] %v5702_v32  ;;  %v2531_v40 = vshrl.u32 %v9817_v30, %v2528_v13  ;;  %v5710_v14 = vand.u32 65535, %v5692_v6  ;;  %v5712_v22 = vand.u32 31, %v820_v46  ;;  %v2541_v47 = vor.u32 %v2540_v25, %v2539_v10 }
  0xe4   :  { %vm2545_vm5 = vcmp.lt.s32.totalorder %v5686_v57, 1  ;;  %vm2547_vm6 = vcmp.lt.s32.totalorder %v5686_v57, 3  ;;  %v2558_v5 = vsel %vm2548_vm4, %v2544_v60, 1326507024  ;;  %v706_v54 = vmul.u32 %v704_v3, %v5635_v16 }
  0xe5   :  { %v5720_v41 = vmul.u32 %v704_v3, %v5642_v34  ;;  %v710_v53 = vshll.u32 %v5702_v32, 16  ;;  %v5724_v62 = vmul.u32 %v726_v52, %v5635_v16  ;;  %v2529_v38 = vshrl.u32 %v9632_v33, %v2528_v13 }
  0xe6   :  { %v2532_v25 = vor.u32 %v2531_v40, %v2530_v39  ;;  %vm2546_vm7 = vcmp.lt.s32.totalorder %v5686_v57, 2  ;;  %v4782_v59 = vadd.s32 4294967169, %v967_v0  ;;  %v2550_v29 = vsel %vm2548_vm4, %v2538_v51, 2102212464 }
  0xe7   :  { %9818 = vst [vmem:[#allocation31_spill] sm:$0xff] %v5720_v41  ;;  %v2557_v10 = vsel %vm2545_vm5, %v2535_v11, %v2538_v51  ;;  %v2559_v60 = vsel %vm2547_vm6, %v2541_v47, %v2558_v5  ;;  %v5735_v3 = vsub.s32 32, %v5712_v22  ;;  %v5738_v35 = vmul.u32 %v727_v48, %v5635_v16 }
  0xe8   :  { %9819 = vst [vmem:[#allocation32_spill] sm:$0xff] %v5724_v62  ;;  %v2554_v39 = vsel %vm2548_vm4, %v2541_v47, 920167782  ;;  %v973_v40 = vadd.s32 1, %v4782_v59  ;;  %v709_v13 = vmul.u32 %v705_v15, %v5642_v34  ;;  %vm714_vm8 = vc.u32 %v706_v54, %v710_v53 }
  0xe9   :  { %9820 = vst [vmem:[#allocation33_spill] sm:$0xff] %v5738_v35  ;;  %v5745_v33 = vmul.u32 %v726_v52, %v5642_v34  ;;  %v5748_v5 = vmul.u32 %v727_v48, %v5642_v34  ;;  %v2549_v45 = vsel %vm2545_vm5, %v2529_v38, %v2532_v25  ;;  %v2551_v16 = vsel %vm2547_vm6, %v2535_v11, %v2550_v29 }
  0xea   :  { %v2560_v47 = vsel %vm2546_vm7, %v2557_v10, %v2559_v60  ;;  %v2563_v59 = vshrl.u32 %v5692_v6, 16  ;;  %v2553_v52 = vsel %vm2545_vm5, %v2532_v25, %v2535_v11  ;;  %v2555_v48 = vsel %vm2547_vm6, %v2538_v51, %v2554_v39  ;;  %v158_v60 = vpop.f32.mrf.mxu0 }
  0xeb   :  { %9821 = vst [vmem:[#allocation34_spill] sm:$0xff] %v5745_v33  ;;  %v9823_v34 = vmov 1326507024   ;;  %v9824_v38 = vmov 0   ;;  %v5765_v36 = vadd.s32 %v710_v53, %v706_v54  ;;  %v9826_v29 = vand.u32 2147483647, %v5586_v31 }
  0xec   :  { %9822 = vst [vmem:[#allocation35_spill] sm:$0xff] %v5748_v5  ;;  %v838_v0 = vshrl.u32 %v9823_v34, %v5735_v3  ;;  %v715_v21 = vsel %vm714_vm8, 1, %v9824_v38  ;;  %vm974_vm9 = vcmp.gt.s32.totalorder %v973_v40, 0  ;;  %v5771_v15 = vsel %vm2546_vm7, %v2549_v45, %v2551_v16 }
  0xed   :  { %9825 = vst [vmem:[#allocation36_spill] sm:$0xff] %v5765_v36  ;;  %v815_v10 = vand.u32 8388607, %v9826_v29  ;;  %v2565_v11 = vshrl.u32 %v2560_v47, 16  ;;  %v9828_v25 = vmov 2131351028   ;;  %v2556_v54 = vsel %vm2546_vm7, %v2553_v52, %v2555_v48 }
  0xee   :  { %9827 = vst [vmem:[#allocation37_spill] sm:$0xff] %v5771_v15  ;;  %v829_v51 = vshrl.u32 %v9828_v25, %v5735_v3  ;;  %v9829_v39 = vmov 920167782   ;;  %v5779_v53 = vshrl.u32 %v820_v46, 5  ;;  %v832_v29 = vshrl.u32 %v9815_v2, %v5735_v3 }
  0xef   :  { %v837_v32 = vshll.u32 %v9829_v39, %v5712_v22  ;;  %v835_v31 = vshrl.u32 %v9829_v39, %v5735_v3  ;;  %v828_v45 = vshll.u32 %v9817_v30, %v5712_v22  ;;  %v975_v5 = vsel %vm974_vm9, %v973_v40, 0 }
  0xf0   :  { %v5788_v62 = vadd.f32 %v5376_v18, %v158_v60  ;;  %v2564_v33 = vand.u32 65535, %v2560_v47  ;;  %v816_v37 = vor.u32 8388608, %v815_v10  ;;  %v831_v57 = vshll.u32 %v9828_v25, %v5712_v22 }
  0xf1   :  { %v839_v16 = vor.u32 %v838_v0, %v837_v32  ;;  %v834_v46 = vshll.u32 %v9815_v2, %v5712_v22  ;;  %v5794_v52 = vadd.s32 %v715_v21, %v709_v13  ;;  %v5797_v48 = vmul.u32 %v2565_v11, %v5710_v14 }
  0xf2   :  { %9830 = vst [vmem:[#allocation38_spill] sm:$0xff] %v5788_v62  ;;  %v2586_v36 = vand.u32 65535, %v2556_v54  ;;  %v830_v41 = vor.u32 %v829_v51, %v828_v45  ;;  %v833_v32 = vor.u32 %v832_v29, %v831_v57  ;;  %vm843_vm10 = vcmp.lt.s32.totalorder %v5779_v53, 4 }
  0xf3   :  { %9831 = vst [vmem:[#allocation39_spill] sm:$0xff] %v5794_v52  ;;  %v836_v0 = vor.u32 %v835_v31, %v834_v46  ;;  %v5800_v40 = vand.u32 31, %v975_v5  ;;  %v2587_v47 = vshrl.u32 %v2556_v54, 16  ;;  %v853_v60 = vsel %vm843_vm10, %v839_v16, 1326507024 }
  0xf4   :  { %9832 = vst [vmem:[#allocation40_spill] sm:$0xff] %v5797_v48  ;;  %v1121_v21 = vand.u32 2139095040, %v5788_v62  ;;  %v2566_v13 = vmul.u32 %v2564_v33, %v5710_v14  ;;  %v5808_v52 = vmul.u32 %v2564_v33, %v2563_v59  ;;  %v5810_v51 = vshll.u32 %v816_v37, 8 }
  0xf5   :  { %v5813_v29 = vmul.u32 %v2565_v11, %v2563_v59  ;;  %v2570_v54 = vshll.u32 %v5797_v48, 16  ;;  %vm840_vm11 = vcmp.lt.s32.totalorder %v5779_v53, 1  ;;  %vm842_vm13 = vcmp.lt.s32.totalorder %v5779_v53, 3 }
  0xf6   :  { %9833 = vst [vmem:[#allocation41_spill] sm:$0xff] %v5808_v52  ;;  %v826_v45 = vshrl.u32 %v9817_v30, %v5735_v3  ;;  %v852_v16 = vsel %vm840_vm11, %v830_v41, %v833_v32  ;;  %v854_v33 = vsel %vm842_vm13, %v836_v0, %v853_v60  ;;  %v5825_v37 = vsub.s32 32, %v5800_v40 }
  0xf7   :  { %9834 = vst [vmem:[#allocation42_spill] sm:$0xff] %v5810_v51  ;;  %v5828_v11 = vmul.u32 %v2586_v36, %v5710_v14  ;;  %v5831_v57 = vmul.u32 %v2587_v47, %v5710_v14  ;;  %v5833_v46 = vmul.u32 %v2586_v36, %v2563_v59  ;;  %v1122_v10 = vshrl.u32 %v1121_v21, 23  ;;  %v161_v21 = vpop.f32.mrf.mxu0 }
  0xf8   :  { %v5836_v15 = vmul.u32 %v2587_v47, %v2563_v59  ;;  %v9839_v6 = vmov 683565275   ;;  %vm841_vm14 = vcmp.lt.s32.totalorder %v5779_v53, 2  ;;  %v5849_v36 = vshrl.u32 %v5810_v51, 16 }
  0xf9   :  { %9835 = vst [vmem:[#allocation43_spill] sm:$0xff] %v5828_v11  ;;  %v825_v48 = vshll.u32 %v9839_v6, %v5712_v22  ;;  %v5843_v60 = vsel %vm841_vm14, %v852_v16, %v854_v33  ;;  %v5846_v11 = vand.u32 65535, %v5810_v51  ;;  %v4785_v14 = vadd.s32 4294967169, %v1122_v10 }
  0xfa   :  { %9836 = vst [vmem:[#allocation44_spill] sm:$0xff] %v5831_v57  ;;  %vm5851_vm15 = vc.u32 %v2566_v13, %v2570_v54  ;;  %v9842_v22 = vand.u32 2147483647, %v5667_v50  ;;  %v993_v16 = vshrl.u32 %v9823_v34, %v5825_v37  ;;  %v5859_v33 = vadd.s32 %v2570_v54, %v2566_v13 }
  0xfb   :  { %9837 = vst [vmem:[#allocation45_spill] sm:$0xff] %v5833_v46  ;;  %v827_v47 = vor.u32 %v826_v45, %v825_v48  ;;  %v845_v10 = vsel %vm843_vm10, %v833_v32, 2102212464  ;;  %v849_v46 = vsel %vm843_vm10, %v836_v0, 920167782  ;;  %v984_v48 = vshrl.u32 %v9828_v25, %v5825_v37 }
  0xfc   :  { %9838 = vst [vmem:[#allocation46_spill] sm:$0xff] %v5836_v15  ;;  %v970_v31 = vand.u32 8388607, %v9842_v22  ;;  %v824_v15 = vshrl.u32 %v9839_v6, %v5735_v3  ;;  %v992_v45 = vshll.u32 %v9829_v39, %v5800_v40  ;;  %v5873_v13 = vadd.f32 %v5376_v18, %v161_v21 }
  0xfd   :  { %9843 = vst [vmem:[#allocation47_spill] sm:$0xff] %v5859_v33  ;;  %v5875_v54 = vshrl.u32 %v975_v5, 5  ;;  %v987_v3 = vshrl.u32 %v9815_v2, %v5825_v37  ;;  %v990_v22 = vshrl.u32 %v9829_v39, %v5825_v37  ;;  %v1128_v0 = vadd.s32 1, %v4785_v14 }
  0xfe   :  { %9844 = vst [vmem:[#allocation48_spill] sm:$0xff] %v5873_v13  ;;  %v844_v57 = vsel %vm840_vm11, %v824_v15, %v827_v47  ;;  %v971_v33 = vor.u32 8388608, %v970_v31  ;;  %v983_v52 = vshll.u32 %v9817_v30, %v5800_v40  ;;  %v994_v50 = vor.u32 %v993_v16, %v992_v45 }
  0xff   :  { %v846_v18 = vsel %vm842_vm13, %v830_v41, %v845_v10  ;;  %v848_v5 = vsel %vm840_vm11, %v827_v47, %v830_v41  ;;  %v986_v21 = vshll.u32 %v9828_v25, %v5800_v40  ;;  %v989_v14 = vshll.u32 %v9815_v2, %v5800_v40 }
 0x100   :  { %v850_v15 = vsel %vm842_vm13, %v833_v32, %v849_v46  ;;  %v9845_v31 = vshrl.u32 %v5843_v60, 16  ;;  %v985_v16 = vor.u32 %v984_v48, %v983_v52  ;;  %v1276_v10 = vand.u32 2139095040, %v5873_v13 }
 0x101   :  { %v988_v45 = vor.u32 %v987_v3, %v986_v21  ;;  %v991_v23 = vor.u32 %v990_v22, %v989_v14  ;;  %vm998_vm1 = vcmp.lt.s32.totalorder %v5875_v54, 4  ;;  %vm1129_vm2 = vcmp.gt.s32.totalorder %v1128_v0, 0 }
 0x102   :  { %v5898_v35 = vmul.u32 %v9845_v31, %v5846_v11  ;;  %v2575_v41 = vsel %vm5851_vm15, 1, %v9824_v38  ;;  %v5907_v32 = vsel %vm841_vm14, %v844_v57, %v846_v18  ;;  %v981_v46 = vshrl.u32 %v9817_v30, %v5825_v37 }
 0x103   :  { %9847 = vst [vmem:[#allocation50_spill] sm:$0xff] %v5907_v32  ;;  %v1008_v52 = vsel %vm998_vm1, %v994_v50, 1326507024  ;;  %v851_v47 = vsel %vm841_vm14, %v848_v5, %v850_v15  ;;  %v859_v48 = vand.u32 65535, %v5843_v60  ;;  %v980_v3 = vshll.u32 %v9839_v6, %v5800_v40 }
 0x104   :  { %9846 = vst [vmem:[#allocation49_spill] sm:$0xff] %v5898_v35  ;;  %v5918_v59 = vshll.u32 %v971_v33, 8  ;;  %vm995_vm3 = vcmp.lt.s32.totalorder %v5875_v54, 1  ;;  %vm997_vm4 = vcmp.lt.s32.totalorder %v5875_v54, 3  ;;  %v1130_v57 = vsel %vm1129_vm2, %v1128_v0, 0 }
 0x105   :  { %v1277_v22 = vshrl.u32 %v1276_v10, 23  ;;  %v865_v18 = vshll.u32 %v5898_v35, 16  ;;  %v1007_v50 = vsel %vm995_vm3, %v985_v16, %v988_v45  ;;  %v1009_v53 = vsel %vm997_vm4, %v991_v23, %v1008_v52 }
 0x106   :  { %9848 = vst [vmem:[#allocation51_spill] sm:$0xff] %v5918_v59  ;;  %v9660_v5 = vand.u32 2147483647, %v5788_v62  ;;  %v5929_v40 = vadd.s32 %v2575_v41, %v5813_v29  ;;  %v881_v33 = vand.u32 65535, %v851_v47  ;;  %v982_v14 = vor.u32 %v981_v46, %v980_v3 }
 0x107   :  { %v861_v0 = vmul.u32 %v859_v48, %v5846_v11  ;;  %vm996_vm5 = vcmp.lt.s32.totalorder %v5875_v54, 2  ;;  %v1004_v15 = vsel %vm998_vm1, %v991_v23, 920167782  ;;  %v5937_v31 = vand.u32 31, %v1130_v57 }
 0x108   :  { %9849 = vst [vmem:[#allocation52_spill] sm:$0xff] %v5929_v40  ;;  %v882_v10 = vshrl.u32 %v851_v47, 16  ;;  %v1000_v52 = vsel %vm998_vm1, %v988_v45, 2102212464  ;;  %v1010_v29 = vsel %vm996_vm5, %v1007_v50, %v1009_v53  ;;  %v4788_v41 = vadd.s32 4294967169, %v1277_v22 }
 0x109   :  { %vm869_vm6 = vc.u32 %v861_v0, %v865_v18  ;;  %v979_v46 = vshrl.u32 %v9839_v6, %v5825_v37  ;;  %v5946_v3 = vand.u32 65535, %v5918_v59  ;;  %v1125_v23 = vand.u32 8388607, %v9660_v5 }
 0x10a   :  { %v5951_v21 = vmul.u32 %v859_v48, %v5849_v36  ;;  %v1003_v47 = vsel %vm995_vm3, %v982_v14, %v985_v16  ;;  %v1005_v50 = vsel %vm997_vm4, %v988_v45, %v1004_v15  ;;  %v1283_v22 = vadd.s32 1, %v4788_v41 }
 0x10b   :  { %v999_v53 = vsel %vm995_vm3, %v979_v46, %v982_v14  ;;  %v1001_v37 = vsel %vm997_vm4, %v985_v16, %v1000_v52  ;;  %v1015_v40 = vshrl.u32 %v1010_v29, 16  ;;  %v5962_v62 = vsub.s32 32, %v5937_v31 }
 0x10c   :  { %9850 = vst [vmem:[#allocation53_spill] sm:$0xff] %v5951_v21  ;;  %v9851_v48 = vshrl.u32 %v5843_v60, 16  ;;  %v870_v32 = vsel %vm869_vm6, 1, %v9824_v38  ;;  %v5969_v51 = vmul.u32 %v881_v33, %v5846_v11  ;;  %v1013_v45 = vshrl.u32 %v5918_v59, 16  ;;  %v67_v60 = vld [vmem:[%s9600_s1 + $0x78] sm:$0xff] }
 0x10d   :  { %v5973_v14 = vmul.u32 %v882_v10, %v5846_v11  ;;  %v5976_v16 = vmul.u32 %v881_v33, %v5849_v36  ;;  %v1006_v15 = vsel %vm996_vm5, %v1003_v47, %v1005_v50  ;;  %v1126_v52 = vor.u32 8388608, %v1125_v23  ;;  %2752 = vmatpush.msrb.mxu0 %v67_v60  ;;  %4929 = vmatpush.msra.mxu1 %v67_v60 }
 0x10e   :  { %v864_v5 = vmul.u32 %v9851_v48, %v5849_v36  ;;  %9852 = vst [vmem:[#allocation54_spill] sm:$0xff] %v5969_v51  ;;  %v5985_v46 = vmul.u32 %v882_v10, %v5849_v36  ;;  %v5989_v11 = vsel %vm996_vm5, %v999_v53, %v1001_v37  ;;  %vm1284_vm7 = vcmp.gt.s32.totalorder %v1283_v22, 0  ;;  %v66_v36 = vld [vmem:[%s9600_s1 + $0x70] sm:$0xff] }
 0x10f   :  { %9853 = vst [vmem:[#allocation55_spill] sm:$0xff] %v5973_v14  ;;  %v5991_v33 = vadd.s32 %v865_v18, %v861_v0  ;;  %v5996_v23 = vmul.u32 %v1015_v40, %v5946_v3  ;;  %v1148_v50 = vshrl.u32 %v9823_v34, %v5962_v62  ;;  %v1014_v54 = vand.u32 65535, %v1010_v29  ;;  %2753 = vmatpush.msrb.mxu0 %v66_v36  ;;  %v65_v29 = vld [vmem:[%s9600_s1 + $0x68] sm:$0xff] }
 0x110   :  { %9854 = vst [vmem:[#allocation56_spill] sm:$0xff] %v5976_v16  ;;  %v5993_v47 = vadd.s32 %v870_v32, %v864_v5  ;;  %v1036_v10 = vand.u32 65535, %v1006_v15  ;;  %v1037_v53 = vshrl.u32 %v1006_v15, 16  ;;  %v1142_v37 = vshrl.u32 %v9815_v2, %v5962_v62  ;;  %4930 = vmatpush.msra.mxu1 %v66_v36 }
 0x111   :  { %9855 = vst [vmem:[#allocation57_spill] sm:$0xff] %v5985_v46  ;;  %v1147_v18 = vshll.u32 %v9829_v39, %v5937_v31  ;;  %v6009_v5 = vshll.u32 %v1126_v52, 8  ;;  %v1285_v0 = vsel %vm1284_vm7, %v1283_v22, 0  ;;  %v6015_v48 = vshrl.u32 %v1130_v57, 5  ;;  %2754 = vmatpush.msrb.mxu0 %v65_v29 }
 0x112   :  { %9856 = vst [vmem:[#allocation58_spill] sm:$0xff] %v5989_v11  ;;  %v1139_v15 = vshrl.u32 %v9828_v25, %v5962_v62  ;;  %v1141_v60 = vshll.u32 %v9828_v25, %v5937_v31  ;;  %v1145_v32 = vshrl.u32 %v9829_v39, %v5962_v62  ;;  %v1020_v52 = vshll.u32 %v5996_v23, 16  ;;  %4931 = vmatpush.msra.mxu1 %v65_v29 }
 0x113   :  { %9857 = vst [vmem:[#allocation59_spill] sm:$0xff] %v5991_v33  ;;  %v1136_v22 = vshrl.u32 %v9817_v30, %v5962_v62  ;;  %v1149_v41 = vor.u32 %v1148_v50, %v1147_v18  ;;  %v1138_v57 = vshll.u32 %v9817_v30, %v5937_v31  ;;  %v1144_v59 = vshll.u32 %v9815_v2, %v5937_v31  ;;  %v164_v50 = vpop.f32.mrf.mxu0 }
 0x114   :  { %9858 = vst [vmem:[#allocation60_spill] sm:$0xff] %v5993_v47  ;;  %v1143_v11 = vor.u32 %v1142_v37, %v1141_v60  ;;  %v1287_v46 = vand.u32 31, %v1285_v0  ;;  %v1016_v35 = vmul.u32 %v1014_v54, %v5946_v3  ;;  %v6032_v16 = vmul.u32 %v1014_v54, %v1013_v45 }
 0x115   :  { %9859 = vst [vmem:[#allocation61_spill] sm:$0xff] %v5996_v23  ;;  %v1019_v23 = vmul.u32 %v1015_v40, %v1013_v45  ;;  %v1135_v47 = vshll.u32 %v9839_v6, %v5937_v31  ;;  %v6037_v18 = vmul.u32 %v1036_v10, %v5946_v3  ;;  %v1140_v29 = vor.u32 %v1139_v15, %v1138_v57 }
 0x116   :  { %9860 = vst [vmem:[#allocation62_spill] sm:$0xff] %v6009_v5  ;;  %v1146_v36 = vor.u32 %v1145_v32, %v1144_v59  ;;  %vm1153_vm8 = vcmp.lt.s32.totalorder %v6015_v48, 4  ;;  %v6041_v37 = vmul.u32 %v1037_v53, %v5946_v3  ;;  %v6043_v60 = vmul.u32 %v1036_v10, %v1013_v45 }
 0x117   :  { %9861 = vst [vmem:[#allocation63_spill] sm:$0xff] %v6032_v16  ;;  %v1137_v51 = vor.u32 %v1136_v22, %v1135_v47  ;;  %v1163_v54 = vsel %vm1153_vm8, %v1149_v41, 1326507024  ;;  %vm1024_vm9 = vc.u32 %v1016_v35, %v1020_v52  ;;  %v1155_v40 = vsel %vm1153_vm8, %v1143_v11, 2102212464 }
 0x118   :  { %9862 = vst [vmem:[#allocation64_spill] sm:$0xff] %v6037_v18  ;;  %v9865_v14 = vand.u32 2147483647, %v5873_v13  ;;  %v6047_v33 = vsub.s32 32, %v1287_v46  ;;  %v6049_v21 = vmul.u32 %v1037_v53, %v1013_v45  ;;  %v1134_v59 = vshrl.u32 %v9839_v6, %v5962_v62 }
 0x119   :  { %9863 = vst [vmem:[#allocation65_spill] sm:$0xff] %v6041_v37  ;;  %vm1150_vm10 = vcmp.lt.s32.totalorder %v6015_v48, 1  ;;  %vm1152_vm11 = vcmp.lt.s32.totalorder %v6015_v48, 3  ;;  %v1159_v47 = vsel %vm1153_vm8, %v1146_v36, 920167782  ;;  %v1025_v32 = vsel %vm1024_vm9, 1, %v9824_v38 }
 0x11a   :  { %9864 = vst [vmem:[#allocation66_spill] sm:$0xff] %v6043_v60  ;;  %v1280_v31 = vand.u32 8388607, %v9865_v14  ;;  %v1162_v41 = vsel %vm1150_vm10, %v1140_v29, %v1143_v11  ;;  %v1164_v10 = vsel %vm1152_vm11, %v1146_v36, %v1163_v54  ;;  %v1154_v15 = vsel %vm1150_vm10, %v1134_v59, %v1137_v51 }
 0x11b   :  { %9866 = vst [vmem:[#allocation67_spill] sm:$0xff] %v6049_v21  ;;  %v1156_v14 = vsel %vm1152_vm11, %v1140_v29, %v1155_v40  ;;  %v6058_v22 = vand.u32 65535, %v6009_v5  ;;  %vm1151_vm13 = vcmp.lt.s32.totalorder %v6015_v48, 2  ;;  %v6062_v62 = vshrl.u32 %v6009_v5, 16 }
 0x11c   :  { %v1281_v45 = vor.u32 8388608, %v1280_v31  ;;  %v1303_v53 = vshrl.u32 %v9823_v34, %v6047_v33  ;;  %v6066_v57 = vadd.s32 %v1020_v52, %v1016_v35  ;;  %v1158_v3 = vsel %vm1150_vm10, %v1137_v51, %v1140_v29  ;;  %v6080_v31 = vld [vmem:[%s9602_s3] ss:$0 sm:$0xff]  ;;  %v167_v29 = vpop.f32.mrf.mxu0 }
 0x11d   :  { %v1160_v36 = vsel %vm1152_vm11, %v1143_v11, %v1159_v47  ;;  %v1165_v54 = vsel %vm1151_vm13, %v1162_v41, %v1164_v10  ;;  %v6070_v40 = vadd.s32 %v1025_v32, %v1019_v23  ;;  %v6074_v59 = vsel %vm1151_vm13, %v1154_v15, %v1156_v14 }
 0x11e   :  { %9867 = vst [vmem:[#allocation68_spill] sm:$0xff] %v6066_v57  ;;  %v1302_v13 = vshll.u32 %v9829_v39, %v1287_v46  ;;  %v6083_v35 = vadd.f32 %v6080_v31, %v164_v50  ;;  %v6085_v51 = vshrl.u32 %v1285_v0, 5  ;;  %v1294_v11 = vshrl.u32 %v9828_v25, %v6047_v33 }
 0x11f   :  { %9868 = vst [vmem:[#allocation69_spill] sm:$0xff] %v6070_v40  ;;  %v1297_v23 = vshrl.u32 %v9815_v2, %v6047_v33  ;;  %v1300_v52 = vshrl.u32 %v9829_v39, %v6047_v33  ;;  %v6095_v47 = vsel %vm1151_vm13, %v1158_v3, %v1160_v36  ;;  %v1170_v41 = vshrl.u32 %v1165_v54, 16 }
 0x120   :  { %9869 = vst [vmem:[#allocation70_spill] sm:$0xff] %v6074_v59  ;;  %v1304_v10 = vor.u32 %v1303_v53, %v1302_v13  ;;  %v6097_v50 = vshll.u32 %v1281_v45, 8  ;;  %v1291_v0 = vshrl.u32 %v9817_v30, %v6047_v33  ;;  %v1293_v32 = vshll.u32 %v9817_v30, %v1287_v46 }
 0x121   :  { %9870 = vst [vmem:[#allocation71_spill] sm:$0xff] %v6083_v35  ;;  %v1296_v15 = vshll.u32 %v9828_v25, %v1287_v46  ;;  %v1299_v14 = vshll.u32 %v9815_v2, %v1287_v46  ;;  %v1290_v48 = vshll.u32 %v9839_v6, %v1287_v46  ;;  %v1431_v3 = vand.u32 2139095040, %v6083_v35 }
 0x122   :  { %9871 = vst [vmem:[#allocation72_spill] sm:$0xff] %v6097_v50  ;;  %v6109_v13 = vadd.f32 %v6080_v31, %v167_v29  ;;  %v1295_v45 = vor.u32 %v1294_v11, %v1293_v32  ;;  %vm1308_vm14 = vcmp.lt.s32.totalorder %v6085_v51, 4  ;;  %v1169_v60 = vand.u32 65535, %v1165_v54 }
 0x123   :  { %v1298_v53 = vor.u32 %v1297_v23, %v1296_v15  ;;  %v1301_v36 = vor.u32 %v1300_v52, %v1299_v14  ;;  %v6113_v18 = vmul.u32 %v1170_v41, %v6058_v22  ;;  %v1318_v40 = vsel %vm1308_vm14, %v1304_v10, 1326507024 }
 0x124   :  { %v9678_v21 = vand.u32 2147483647, %v6083_v35  ;;  %v1191_v46 = vand.u32 65535, %v6095_v47  ;;  %v1192_v59 = vshrl.u32 %v6095_v47, 16  ;;  %v1292_v29 = vor.u32 %v1291_v0, %v1290_v48 }
 0x125   :  { %9872 = vst [vmem:[#allocation73_spill] sm:$0xff] %v6113_v18  ;;  %v6121_v11 = vand.u32 65535, %v6097_v50  ;;  %vm1305_vm15 = vcmp.lt.s32.totalorder %v6085_v51, 1  ;;  %vm1307_vm1 = vcmp.lt.s32.totalorder %v6085_v51, 3  ;;  %v1586_v23 = vand.u32 2139095040, %v6109_v13 }
 0x126   :  { %v1314_v52 = vsel %vm1308_vm14, %v1301_v36, 920167782  ;;  %v1317_v10 = vsel %vm1305_vm15, %v1295_v45, %v1298_v53  ;;  %v1319_v47 = vsel %vm1307_vm1, %v1301_v36, %v1318_v40  ;;  %v1432_v0 = vshrl.u32 %v1431_v3, 23  ;;  %v64_v3 = vld [vmem:[%s9600_s1 + $0x60] sm:$0xff] }
 0x127   :  { %v1171_v32 = vmul.u32 %v1169_v60, %v6058_v22  ;;  %v1175_v15 = vshll.u32 %v6113_v18, 16  ;;  %v6136_v14 = vshrl.u32 %v6097_v50, 16  ;;  %v1435_v48 = vand.u32 8388607, %v9678_v21  ;;  %2755 = vmatpush.msrb.mxu0 %v64_v3  ;;  %4932 = vmatpush.msra.mxu1 %v64_v3 }
 0x128   :  { %v1289_v54 = vshrl.u32 %v9839_v6, %v6047_v33  ;;  %vm1306_vm2 = vcmp.lt.s32.totalorder %v6085_v51, 2  ;;  %v1310_v5 = vsel %vm1308_vm14, %v1298_v53, 2102212464  ;;  %v1313_v40 = vsel %vm1305_vm15, %v1292_v29, %v1295_v45 }
 0x129   :  { %v1315_v36 = vsel %vm1307_vm1, %v1298_v53, %v1314_v52  ;;  %v1320_v21 = vsel %vm1306_vm2, %v1317_v10, %v1319_v47  ;;  %v1587_v35 = vshrl.u32 %v1586_v23, 23  ;;  %v9873_v33 = vand.u32 2147483647, %v6109_v13  ;;  %v63_v53 = vld [vmem:[%s9600_s1 + $0x58] sm:$0xff] }
 0x12a   :  { %v6157_v37 = vmul.u32 %v1169_v60, %v6062_v62  ;;  %v1174_v57 = vmul.u32 %v1170_v41, %v6062_v62  ;;  %v6161_v16 = vmul.u32 %v1191_v46, %v6058_v22  ;;  %v4791_v43 = vadd.s32 4294967169, %v1432_v0  ;;  %2756 = vmatpush.msrb.mxu0 %v63_v53  ;;  %4933 = vmatpush.msra.mxu1 %v63_v53 }
 0x12b   :  { %v1590_v18 = vand.u32 8388607, %v9873_v33  ;;  %vm6166_vm3 = vc.u32 %v1171_v32, %v1175_v15  ;;  %v1309_v52 = vsel %vm1305_vm15, %v1289_v54, %v1292_v29  ;;  %v1311_v60 = vsel %vm1307_vm1, %v1295_v45, %v1310_v5  ;;  %v62_v33 = vld [vmem:[%s9600_s1 + $0x50] sm:$0xff] }
 0x12c   :  { %9874 = vst [vmem:[#allocation74_spill] sm:$0xff] %v6157_v37  ;;  %v4794_v10 = vadd.s32 4294967169, %v1587_v35  ;;  %v1316_v41 = vsel %vm1306_vm2, %v1313_v40, %v1315_v36  ;;  %v1324_v47 = vand.u32 65535, %v1320_v21  ;;  %v1325_v0 = vshrl.u32 %v1320_v21, 16  ;;  %2757 = vmatpush.msrb.mxu0 %v62_v33  ;;  %4934 = vmatpush.msra.mxu1 %v62_v33 }
 0x12d   :  { %9875 = vst [vmem:[#allocation75_spill] sm:$0xff] %v6161_v16  ;;  %v1436_v3 = vor.u32 8388608, %v1435_v48  ;;  %v6180_v16 = vmul.u32 %v1192_v59, %v6058_v22  ;;  %v6183_v29 = vmul.u32 %v1191_v46, %v6062_v62  ;;  %v1591_v5 = vor.u32 8388608, %v1590_v18  ;;  %v170_v48 = vpop.f32.mrf.mxu0  ;;  %v61_v18 = vld [vmem:[%s9600_s1 + $0x48] sm:$0xff] }
 0x12e   :  { %v1593_v35 = vadd.s32 1, %v4794_v10  ;;  %v1180_v45 = vsel %vm6166_vm3, 1, %v9824_v38  ;;  %v6189_v21 = vmul.u32 %v1192_v59, %v6062_v62  ;;  %v6193_v54 = vsel %vm1306_vm2, %v1309_v52, %v1311_v60  ;;  %2758 = vmatpush.msrb.mxu0 %v61_v18  ;;  %4935 = vmatpush.msra.mxu1 %v61_v18 }
 0x12f   :  { %9878 = vst [vmem:[#allocation76_spill] sm:$0xff] %v6180_v16  ;;  %v1438_v22 = vadd.s32 1, %v4791_v43  ;;  %v1346_v40 = vand.u32 65535, %v1316_v41  ;;  %v1347_v36 = vshrl.u32 %v1316_v41, 16  ;;  %v6199_v53 = vadd.s32 %v1175_v15, %v1171_v32 }
 0x130   :  { %9879 = vst [vmem:[#allocation77_spill] sm:$0xff] %v6183_v29  ;;  %vm1594_vm4 = vcmp.gt.s32.totalorder %v1593_v35, 0  ;;  %v6202_v62 = vmul.u32 %v1325_v0, %v6121_v11  ;;  %v6205_v59 = vmul.u32 %v1324_v47, %v6136_v14  ;;  %v6207_v43 = vshll.u32 %v1436_v3, 8 }
 0x131   :  { %9880 = vst [vmem:[#allocation78_spill] sm:$0xff] %v6189_v21  ;;  %v6209_v51 = vadd.s32 %v1180_v45, %v1174_v57  ;;  %v6213_v52 = vshll.u32 %v1591_v5, 8  ;;  %v6216_v60 = vadd.f32 %v6080_v31, %v170_v48  ;;  %v6219_v32 = vmul.u32 %v1324_v47, %v6121_v11 }
 0x132   :  { %9881 = vst [vmem:[#allocation79_spill] sm:$0xff] %v6193_v54  ;;  %v6222_v15 = vmul.u32 %v1325_v0, %v6136_v14  ;;  %vm1439_vm5 = vcmp.gt.s32.totalorder %v1438_v22, 0  ;;  %v1595_v10 = vsel %vm1594_vm4, %v1593_v35, 0  ;;  %v6225_v41 = vmul.u32 %v1346_v40, %v6121_v11 }
 0x133   :  { %9882 = vst [vmem:[#allocation80_spill] sm:$0xff] %v6199_v53  ;;  %v6228_v57 = vmul.u32 %v1347_v36, %v6121_v11  ;;  %v6231_v3 = vmul.u32 %v1346_v40, %v6136_v14  ;;  %v1597_v33 = vand.u32 31, %v1595_v10  ;;  %v6236_v45 = vmul.u32 %v1347_v36, %v6136_v14 }
 0x134   :  { %9883 = vst [vmem:[#allocation81_spill] sm:$0xff] %v6202_v62  ;;  %v6239_v0 = vand.u32 65535, %v6207_v43  ;;  %v6241_v35 = vsel %vm1439_vm5, %v1438_v22, 0  ;;  %v1632_v11 = vand.u32 65535, %v6213_v52  ;;  %v6245_v40 = vshrl.u32 %v1595_v10, 5 }
 0x135   :  { %9884 = vst [vmem:[#allocation82_spill] sm:$0xff] %v6205_v59  ;;  %v1598_v48 = vsub.s32 32, %v1597_v33  ;;  %v1600_v23 = vshll.u32 %v9839_v6, %v1597_v33  ;;  %v1603_v46 = vshll.u32 %v9817_v30, %v1597_v33  ;;  %v1741_v47 = vand.u32 2139095040, %v6216_v60 }
 0x136   :  { %9885 = vst [vmem:[#allocation83_spill] sm:$0xff] %v6207_v43  ;;  %v1606_v22 = vshll.u32 %v9828_v25, %v1597_v33  ;;  %v1609_v54 = vshll.u32 %v9815_v2, %v1597_v33  ;;  %v1612_v10 = vshll.u32 %v9829_v39, %v1597_v33  ;;  %vm1615_vm6 = vcmp.lt.s32.totalorder %v6245_v40, 1 }
 0x137   :  { %9886 = vst [vmem:[#allocation84_spill] sm:$0xff] %v6209_v51  ;;  %v1601_v14 = vshrl.u32 %v9817_v30, %v1598_v48  ;;  %v1604_v36 = vshrl.u32 %v9828_v25, %v1598_v48  ;;  %v1607_v5 = vshrl.u32 %v9815_v2, %v1598_v48  ;;  %v1610_v18 = vshrl.u32 %v9829_v39, %v1598_v48 }
 0x138   :  { %9887 = vst [vmem:[#allocation85_spill] sm:$0xff] %v6216_v60  ;;  %v1613_v50 = vshrl.u32 %v9823_v34, %v1598_v48  ;;  %v1742_v29 = vshrl.u32 %v1741_v47, 23  ;;  %vm1618_vm7 = vcmp.lt.s32.totalorder %v6245_v40, 4  ;;  %v9892_v16 = vand.u32 2147483647, %v6216_v60 }
 0x139   :  { %9888 = vst [vmem:[#allocation86_spill] sm:$0xff] %v6225_v41  ;;  %v1605_v41 = vor.u32 %v1604_v36, %v1603_v46  ;;  %v1611_v59 = vor.u32 %v1610_v18, %v1609_v54  ;;  %vm1617_vm8 = vcmp.lt.s32.totalorder %v6245_v40, 3  ;;  %vm1616_vm9 = vcmp.lt.s32.totalorder %v6245_v40, 2 }
 0x13a   :  { %9889 = vst [vmem:[#allocation87_spill] sm:$0xff] %v6228_v57  ;;  %v1633_v57 = vshrl.u32 %v6213_v52, 16  ;;  %v1614_v21 = vor.u32 %v1613_v50, %v1612_v10  ;;  %v4797_v50 = vadd.s32 4294967169, %v1742_v29  ;;  %v9893_v37 = vshll.u32 %v6202_v62, 16 }
 0x13b   :  { %9890 = vst [vmem:[#allocation88_spill] sm:$0xff] %v6231_v3  ;;  %v1608_v3 = vor.u32 %v1607_v5, %v1606_v22  ;;  %v1624_v46 = vsel %vm1618_vm7, %v1611_v59, 920167782 }
 0x13c   :  { %9891 = vst [vmem:[#allocation89_spill] sm:$0xff] %v6236_v45  ;;  %v1602_v45 = vor.u32 %v1601_v14, %v1600_v23  ;;  %v6267_v23 = vand.u32 8388607, %v9892_v16  ;;  %v1628_v54 = vsel %vm1618_vm7, %v1614_v21, 1326507024  ;;  %v1599_v14 = vshrl.u32 %v9839_v6, %v1598_v48 }
 0x13d   :  { %v1627_v33 = vsel %vm1615_vm6, %v1605_v41, %v1608_v3  ;;  %v1620_v5 = vsel %vm1618_vm7, %v1608_v3, 2102212464  ;;  %v1625_v47 = vsel %vm1617_vm8, %v1608_v3, %v1624_v46  ;;  %v1629_v18 = vsel %vm1617_vm8, %v1611_v59, %v1628_v54 }
 0x13e   :  { %v1623_v51 = vsel %vm1615_vm6, %v1602_v45, %v1605_v41  ;;  %v1630_v36 = vsel %vm1616_vm9, %v1627_v33, %v1629_v18  ;;  %v1748_v22 = vadd.s32 1, %v4797_v50  ;;  %v6283_v3 = vadd.s32 %v9893_v37, %v6219_v32  ;;  %v60_v37 = vld [vmem:[%s9600_s1 + $0x40] sm:$0xff] }
 0x13f   :  { %v1626_v16 = vsel %vm1616_vm9, %v1623_v51, %v1625_v47  ;;  %v1634_v21 = vand.u32 65535, %v1630_v36  ;;  %v1635_v29 = vshrl.u32 %v1630_v36, 16  ;;  %v6286_v59 = vshrl.u32 %v6207_v43, 16  ;;  %2759 = vmatpush.msrb.mxu0 %v60_v37  ;;  %4936 = vmatpush.msra.mxu1 %v60_v37 }
 0x140   :  { %v1656_v10 = vand.u32 65535, %v1626_v16  ;;  %v1657_v53 = vshrl.u32 %v1626_v16, 16  ;;  %9894 = vst [vmem:[#allocation90_spill] sm:$0xff] %v6283_v3  ;;  %v6290_v48 = vsel %vm1615_vm6, %v1599_v14, %v1602_v45  ;;  %v6294_v51 = vsel %vm1617_vm8, %v1605_v41, %v1620_v5  ;;  %v59_v41 = vld [vmem:[%s9600_s1 + $0x38] sm:$0xff] }
 0x141   :  { %v1637_v33 = vmul.u32 %v1635_v29, %v1632_v11  ;;  %v1638_v46 = vmul.u32 %v1634_v21, %v1633_v57  ;;  %vm1749_vm10 = vcmp.gt.s32.totalorder %v1748_v22, 0  ;;  %v1636_v50 = vmul.u32 %v1634_v21, %v1632_v11  ;;  %2760 = vmatpush.msrb.mxu0 %v59_v41  ;;  %4937 = vmatpush.msra.mxu1 %v59_v41 }
 0x142   :  { %v1639_v47 = vmul.u32 %v1635_v29, %v1633_v57  ;;  %v1659_v18 = vmul.u32 %v1657_v53, %v1632_v11  ;;  %v1660_v16 = vmul.u32 %v1656_v10, %v1633_v57  ;;  %v1658_v36 = vmul.u32 %v1656_v10, %v1632_v11  ;;  %v58_v10 = vld [vmem:[%s9600_s1 + $0x30] sm:$0xff] }
 0x143   :  { %v1640_v45 = vshll.u32 %v1637_v33, 16  ;;  %v1641_v14 = vshrl.u32 %v1637_v33, 16  ;;  %v1661_v3 = vmul.u32 %v1657_v53, %v1633_v57  ;;  %v9895_v5 = vshll.u32 %v6202_v62, 16  ;;  %2761 = vmatpush.msrb.mxu0 %v58_v10  ;;  %4938 = vmatpush.msra.mxu1 %v58_v10 }
 0x144   :  { %v1642_v21 = vshll.u32 %v1638_v46, 16  ;;  %v1643_v29 = vshrl.u32 %v1638_v46, 16  ;;  %v1662_v61 = vshll.u32 %v1659_v18, 16  ;;  %v1663_v17 = vshrl.u32 %v1659_v18, 16 }
 0x145   :  { %vm6306_vm11 = vc.u32 %v6219_v32, %v9895_v5  ;;  %vm1644_vm13 = vc.u32 %v1636_v50, %v1640_v45  ;;  %v1646_v11 = vadd.s32 %v1640_v45, %v1636_v50  ;;  %v1664_v53 = vshll.u32 %v1660_v16, 16 }
 0x146   :  { %v1750_v57 = vsel %vm1749_vm10, %v1748_v22, 0  ;;  %v1645_v32 = vsel %vm1644_vm13, 1, %v9824_v38  ;;  %v1665_v33 = vshrl.u32 %v1660_v16, 16  ;;  %vm1666_vm14 = vc.u32 %v1658_v36, %v1662_v61  ;;  %v57_v22 = vld [vmem:[%s9600_s1 + $0x28] sm:$0xff] }
 0x147   :  { %v1668_v37 = vadd.s32 %v1662_v61, %v1658_v36  ;;  %v1647_v46 = vadd.s32 %v1645_v32, %v1639_v47  ;;  %vm1648_vm15 = vc.u32 %v1646_v11, %v1642_v21  ;;  %v1667_v18 = vsel %vm1666_vm14, 1, %v9824_v38  ;;  %2762 = vmatpush.msrb.mxu0 %v57_v22  ;;  %4939 = vmatpush.msra.mxu1 %v57_v22 }
 0x148   :  { %v1752_v5 = vand.u32 31, %v1750_v57  ;;  %v1649_v50 = vsel %vm1648_vm15, 1, %v9824_v38  ;;  %v1669_v45 = vadd.s32 %v1667_v18, %v1661_v3  ;;  %v6320_v41 = vshrl.u32 %v1750_v57, 5 }
 0x149   :  { %vm1670_vm1 = vc.u32 %v1668_v37, %v1664_v53  ;;  %v1651_v16 = vadd.s32 %v1649_v50, %v1647_v46  ;;  %v6323_v47 = vadd.s32 %v1668_v37, %v1664_v53  ;;  %v1442_v62 = vand.u32 31, %v6241_v35 }
 0x14a   :  { %v1671_v61 = vsel %vm1670_vm1, 1, %v9824_v38  ;;  %v6325_v36 = vsub.s32 32, %v1752_v5  ;;  %v1755_v11 = vshll.u32 %v9839_v6, %v1752_v5  ;;  %v1758_v10 = vshll.u32 %v9817_v30, %v1752_v5 }
 0x14b   :  { %v1673_v21 = vadd.s32 %v1671_v61, %v1669_v45  ;;  %v1761_v32 = vshll.u32 %v9828_v25, %v1752_v5  ;;  %v1652_v3 = vadd.s32 %v1651_v16, %v1641_v14  ;;  %v1764_v53 = vshll.u32 %v9815_v2, %v1752_v5 }
 0x14c   :  { %v1756_v57 = vshrl.u32 %v9817_v30, %v6325_v36  ;;  %v1759_v46 = vshrl.u32 %v9828_v25, %v6325_v36  ;;  %v1762_v18 = vshrl.u32 %v9815_v2, %v6325_v36  ;;  %v1765_v22 = vshrl.u32 %v9829_v39, %v6325_v36 }
 0x14d   :  { %v1674_v37 = vadd.s32 %v1673_v21, %v1663_v17  ;;  %v1767_v50 = vshll.u32 %v9829_v39, %v1752_v5  ;;  %v6340_v45 = vadd.s32 %v1652_v3, %v1643_v29  ;;  %v1768_v61 = vshrl.u32 %v9823_v34, %v6325_v36 }
 0x14e   :  { %v6342_v14 = vor.u32 %v1756_v57, %v1755_v11  ;;  %v6344_v16 = vor.u32 %v1759_v46, %v1758_v10  ;;  %v6349_v21 = vor.u32 %v1762_v18, %v1761_v32  ;;  %v1766_v44 = vor.u32 %v1765_v22, %v1764_v53 }
 0x14f   :  { %v1675_v17 = vadd.s32 %v1674_v37, %v1665_v33  ;;  %v1335_v4 = vsel %vm6306_vm11, 1, %v9824_v38  ;;  %vm1678_vm2 = vc.u32 %v6340_v45, %v6323_v47  ;;  %v1769_v29 = vor.u32 %v1768_v61, %v1767_v50 }
 0x150   :  { %v9898_v5 = vor.u32 8388608, %v6267_v23  ;;  %v1622_v33 = vsel %vm1616_vm9, %v6290_v48, %v6294_v51  ;;  %vm1770_vm3 = vcmp.lt.s32.totalorder %v6320_v41, 1  ;;  %vm1773_vm4 = vcmp.lt.s32.totalorder %v6320_v41, 4 }
 0x151   :  { %v1679_v10 = vadd.s32 1, %v1675_v17  ;;  %vm1772_vm5 = vcmp.lt.s32.totalorder %v6320_v41, 3  ;;  %v1778_v54 = vsel %vm1770_vm3, %v6342_v14, %v6344_v16  ;;  %v1779_v23 = vsel %vm1773_vm4, %v1766_v44, 920167782 }
 0x152   :  { %v6358_v11 = vshll.u32 %v9898_v5, 8  ;;  %v1782_v40 = vsel %vm1770_vm3, %v6344_v16, %v6349_v21  ;;  %vm1771_vm6 = vcmp.lt.s32.totalorder %v6320_v41, 2  ;;  %v1780_v51 = vsel %vm1772_vm5, %v6349_v21, %v1779_v23  ;;  %v173_v5 = vpop.f32.mrf.mxu0 }
 0x153   :  { %v1680_v48 = vsel %vm1678_vm2, %v1679_v10, %v1675_v17  ;;  %v1783_v32 = vsel %vm1773_vm4, %v1769_v29, 1326507024  ;;  %v1676_v3 = vmul.u32 %v6213_v52, %v1622_v33  ;;  %v1781_v57 = vsel %vm1771_vm6, %v1778_v54, %v1780_v51 }
 0x154   :  { %v1784_v46 = vsel %vm1772_vm5, %v1766_v44, %v1783_v32  ;;  %v1787_v53 = vand.u32 65535, %v6358_v11  ;;  %v1788_v18 = vshrl.u32 %v6358_v11, 16  ;;  %v1811_v22 = vand.u32 65535, %v1781_v57 }
 0x155   :  { %v1785_v37 = vsel %vm1771_vm6, %v1782_v40, %v1784_v46  ;;  %v1812_v50 = vshrl.u32 %v1781_v57, 16  ;;  %v6393_v61 = vshrl.u32 %v6241_v35, 5  ;;  %v6395_v17 = vadd.s32 %v1680_v48, %v1676_v3 }
 0x156   :  { %v1789_v52 = vand.u32 65535, %v1785_v37  ;;  %v1790_v29 = vshrl.u32 %v1785_v37, 16  ;;  %v6398_v33 = vadd.s32 %v1335_v4, %v6222_v15  ;;  %v1443_v44 = vsub.s32 32, %v1442_v62 }
 0x157   :  { %v1814_v10 = vmul.u32 %v1812_v50, %v1787_v53  ;;  %v6400_v54 = vmul.u32 %v1811_v22, %v1788_v18  ;;  %v1445_v23 = vshll.u32 %v9839_v6, %v1442_v62  ;;  %v6404_v40 = vshll.u32 %v9817_v30, %v1442_v62 }
 0x158   :  { %9899 = vst [vmem:[#allocation91_spill] sm:$0xff] %v6398_v33  ;;  %v1792_v51 = vmul.u32 %v1790_v29, %v1787_v53  ;;  %v6406_v35 = vmul.u32 %v1789_v52, %v1788_v18  ;;  %v1451_v48 = vshll.u32 %v9828_v25, %v1442_v62  ;;  %v1813_v32 = vmul.u32 %v1811_v22, %v1787_v53 }
 0x159   :  { %v1817_v3 = vshll.u32 %v1814_v10, 16  ;;  %v6410_v57 = vadd.f32 %v6080_v31, %v173_v5  ;;  %v1682_v4 = vadd.s32 536870912, %v6395_v17  ;;  %v1791_v15 = vmul.u32 %v1789_v52, %v1787_v53  ;;  %v56_v52 = vld [vmem:[%s9600_s1 + $0x20] sm:$0xff] }
 0x15a   :  { %v1795_v46 = vshll.u32 %v1792_v51, 16  ;;  %v1816_v37 = vmul.u32 %v1812_v50, %v1788_v18  ;;  %v1794_v33 = vmul.u32 %v1790_v29, %v1788_v18  ;;  %v9708_v1 = vshll.u32 %v6400_v54, 16  ;;  %2763 = vmatpush.msrb.mxu0 %v56_v52  ;;  %4940 = vmatpush.msra.mxu1 %v56_v52 }
 0x15b   :  { %9900 = vst [vmem:[#allocation92_spill] sm:$0xff] %v6410_v57  ;;  %vm1821_vm7 = vc.u32 %v1813_v32, %v1817_v3  ;;  %v6414_v19 = vadd.s32 %v1817_v3, %v1813_v32  ;;  %v1797_v42 = vshll.u32 %v6406_v35, 16  ;;  %v1454_v5 = vshll.u32 %v9815_v2, %v1442_v62 }
 0x15c   :  { %vm1799_vm8 = vc.u32 %v1791_v15, %v1795_v46  ;;  %v1801_v56 = vadd.s32 %v1795_v46, %v1791_v15  ;;  %v1822_v22 = vsel %vm1821_vm7, 1, %v9824_v38  ;;  %v1452_v53 = vshrl.u32 %v9815_v2, %v1443_v44 }
 0x15d   :  { %v1800_v24 = vsel %vm1799_vm8, 1, %v9824_v38  ;;  %v1824_v12 = vadd.s32 %v1822_v22, %v1816_v37  ;;  %vm1825_vm9 = vc.u32 %v6414_v19, %v9708_v1  ;;  %v6425_v18 = vshll.u32 %v9829_v39, %v1442_v62 }
 0x15e   :  { %v1802_v50 = vadd.s32 %v1800_v24, %v1794_v33  ;;  %vm1803_vm10 = vc.u32 %v1801_v56, %v1797_v42  ;;  %v6430_v29 = vshrl.u32 %v1682_v4, 30  ;;  %v1826_v3 = vsel %vm1825_vm9, 1, %v9824_v38  ;;  %v55_v42 = vld [vmem:[%s9600_s1 + $0x18] sm:$0xff] }
 0x15f   :  { %v1804_v32 = vsel %vm1803_vm10, 1, %v9824_v38  ;;  %v1896_v15 = vand.u32 2139095040, %v6410_v57  ;;  %v1796_v46 = vshrl.u32 %v1792_v51, 16  ;;  %v1818_v62 = vshrl.u32 %v1814_v10, 16  ;;  %2764 = vmatpush.msrb.mxu0 %v55_v42  ;;  %4941 = vmatpush.msra.mxu1 %v55_v42 }
 0x160   :  { %9901 = vst [vmem:[#allocation93_spill] sm:$0xff] %v6430_v29  ;;  %v1806_v37 = vadd.s32 %v1804_v32, %v1802_v50  ;;  %v1828_v22 = vadd.s32 %v1826_v3, %v1824_v12  ;;  %v1444_v24 = vshrl.u32 %v9839_v6, %v1443_v44  ;;  %v1446_v56 = vshrl.u32 %v9817_v30, %v1443_v44  ;;  %v54_v12 = vld [vmem:[%s9600_s1 + $0x10] sm:$0xff] }
 0x161   :  { %vm1460_vm11 = vcmp.lt.s32.totalorder %v6393_v61, 1  ;;  %v1897_v33 = vshrl.u32 %v1896_v15, 23  ;;  %v1449_v4 = vshrl.u32 %v9828_v25, %v1443_v44  ;;  %v1455_v51 = vshrl.u32 %v9829_v39, %v1443_v44  ;;  %2765 = vmatpush.msrb.mxu0 %v54_v12  ;;  %4942 = vmatpush.msra.mxu1 %v54_v12 }
 0x162   :  { %v1807_v50 = vadd.s32 %v1806_v37, %v1796_v46  ;;  %v1829_v10 = vadd.s32 %v1828_v22, %v1818_v62  ;;  %v1458_v52 = vshrl.u32 %v9823_v34, %v1443_v44  ;;  %v1775_v32 = vsel %vm1773_vm4, %v6349_v21, 2102212464  ;;  %v53_v44 = vld [vmem:[%s9600_s1 + $0x8] sm:$0xff] }
 0x163   :  { %v1820_v3 = vshrl.u32 %v6400_v54, 16  ;;  %v4800_v15 = vadd.s32 4294967169, %v1897_v33  ;;  %v1453_v42 = vor.u32 %v1452_v53, %v1451_v48  ;;  %v1684_v1 = vshll.u32 %v6430_v29, 30  ;;  %2766 = vmatpush.msrb.mxu0 %v53_v44  ;;  %4943 = vmatpush.msra.mxu1 %v53_v44 }
 0x164   :  { %v1754_v46 = vshrl.u32 %v9839_v6, %v6325_v36  ;;  %v1798_v37 = vshrl.u32 %v6406_v35, 16  ;;  %v1447_v62 = vor.u32 %v1446_v56, %v1445_v23  ;;  %v9711_v21 = vand.u32 2147483647, %v6410_v57 }
 0x165   :  { %v1830_v22 = vadd.s32 %v1829_v10, %v1820_v3  ;;  %v1903_v60 = vadd.s32 1, %v4800_v15  ;;  %v1450_v48 = vor.u32 %v1449_v4, %v6404_v40  ;;  %v1776_v36 = vsel %vm1772_vm5, %v6344_v16, %v1775_v32 }
 0x166   :  { %v1774_v53 = vsel %vm1770_vm3, %v1754_v46, %v6342_v14  ;;  %v6466_v35 = vadd.s32 %v1807_v50, %v1798_v37  ;;  %v1456_v33 = vor.u32 %v1455_v51, %v1454_v5  ;;  %v1459_v23 = vor.u32 %v1458_v52, %v6425_v18 }
 0x167   :  { %vm1463_vm13 = vcmp.lt.s32.totalorder %v6393_v61, 4  ;;  %vm1904_vm14 = vcmp.gt.s32.totalorder %v1903_v60, 0  ;;  %v6473_v40 = vsub.s32 %v6395_v17, %v1684_v1  ;;  %v9902_v14 = vshll.u32 %v6400_v54, 16  ;;  %v176_v17 = vpop.f32.mrf.mxu0 }
 0x168   :  { %v1465_v56 = vsel %vm1463_vm13, %v1453_v42, 2102212464  ;;  %v1905_v16 = vsel %vm1904_vm14, %v1903_v60, 0  ;;  %vm1461_vm15 = vcmp.lt.s32.totalorder %v6393_v61, 2  ;;  %v1777_v5 = vsel %vm1771_vm6, %v1774_v53, %v1776_v36 }
 0x169   :  { %v6478_v4 = vadd.s32 %v6414_v19, %v9902_v14  ;;  %v1834_v18 = vadd.s32 1, %v1830_v22  ;;  %v1900_v51 = vand.u32 8388607, %v9711_v21  ;;  %vm1462_vm1 = vcmp.lt.s32.totalorder %v6393_v61, 3 }
 0x16a   :  { %v1464_v1 = vsel %vm1460_vm11, %v1444_v24, %v1447_v62  ;;  %v1907_v19 = vand.u32 31, %v1905_v16  ;;  %v1466_v60 = vsel %vm1462_vm1, %v1450_v48, %v1465_v56  ;;  %v1468_v41 = vsel %vm1460_vm11, %v1447_v62, %v1450_v48 }
 0x16b   :  { %vm1833_vm2 = vc.u32 %v6466_v35, %v6478_v4  ;;  %v1469_v54 = vsel %vm1463_vm13, %v1456_v33, 920167782  ;;  %v1473_v50 = vsel %vm1463_vm13, %v1459_v23, 1326507024  ;;  %vm1686_vm3 = vcmp.lt.s32.totalorder %v6473_v40, 0 }
 0x16c   :  { %v1687_v24 = vsub.s32 0, %v6473_v40  ;;  %v1831_v10 = vmul.u32 %v6358_v11, %v1777_v5  ;;  %v6501_v12 = vsub.s32 32, %v1907_v19  ;;  %v1835_v52 = vsel %vm1833_vm2, %v1834_v18, %v1830_v22 }
 0x16d   :  { %v1901_v32 = vor.u32 8388608, %v1900_v51  ;;  %v1910_v3 = vshll.u32 %v9839_v6, %v1907_v19  ;;  %v6505_v15 = vadd.f32 %v6080_v31, %v176_v17  ;;  %v1913_v37 = vshll.u32 %v9817_v30, %v1907_v19 }
 0x16e   :  { %v1911_v46 = vshrl.u32 %v9817_v30, %v6501_v12  ;;  %v1914_v44 = vshrl.u32 %v9828_v25, %v6501_v12  ;;  %v1917_v11 = vshrl.u32 %v9815_v2, %v6501_v12  ;;  %v6514_v62 = vshrl.u32 %v1905_v16, 5 }
 0x16f   :  { %9903 = vst [vmem:[#allocation94_spill] sm:$0xff] %v6505_v15  ;;  %v1916_v22 = vshll.u32 %v9828_v25, %v1907_v19  ;;  %v1919_v53 = vshll.u32 %v9815_v2, %v1907_v19  ;;  %v1920_v36 = vshrl.u32 %v9829_v39, %v6501_v12  ;;  %v1922_v14 = vshll.u32 %v9829_v39, %v1907_v19 }
 0x170   :  { %v6520_v23 = vor.u32 %v1911_v46, %v1910_v3  ;;  %v6522_v56 = vor.u32 %v1914_v44, %v1913_v37  ;;  %v1923_v5 = vshrl.u32 %v9823_v34, %v6501_v12  ;;  %v6529_v16 = vsel %vm1461_vm15, %v1464_v1, %v1466_v60 }
 0x171   :  { %9904 = vst [vmem:[#allocation95_spill] sm:$0xff] %v6529_v16  ;;  %v1472_v18 = vsel %vm1460_vm11, %v1450_v48, %v1453_v42  ;;  %v6533_v51 = vor.u32 %v1917_v11, %v1916_v22  ;;  %v1921_v17 = vor.u32 %v1920_v36, %v1919_v53  ;;  %v1470_v3 = vsel %vm1462_vm1, %v1453_v42, %v1469_v54 }
 0x172   :  { %v1474_v46 = vsel %vm1462_vm1, %v1456_v33, %v1473_v50  ;;  %v6539_v19 = vadd.s32 %v1835_v52, %v1831_v10  ;;  %v1924_v37 = vor.u32 %v1923_v5, %v1922_v14  ;;  %v1688_v1 = vsel %vm1686_vm3, %v1687_v24, %v6473_v40 }
 0x173   :  { %vm1925_vm4 = vcmp.lt.s32.totalorder %v6514_v62, 1  ;;  %vm1928_vm5 = vcmp.lt.s32.totalorder %v6514_v62, 4  ;;  %v2051_v48 = vand.u32 2139095040, %v6505_v15  ;;  %vm1927_vm6 = vcmp.lt.s32.totalorder %v6514_v62, 3 }
 0x174   :  { %v1933_v42 = vsel %vm1925_vm4, %v6520_v23, %v6522_v56  ;;  %v1934_v33 = vsel %vm1928_vm5, %v1921_v17, 920167782  ;;  %v6554_v60 = vshll.u32 %v1901_v32, 8  ;;  %v1475_v54 = vsel %vm1461_vm15, %v1472_v18, %v1474_v46 }
 0x175   :  { %vm1926_vm7 = vcmp.lt.s32.totalorder %v6514_v62, 2  ;;  %v1935_v50 = vsel %vm1927_vm6, %v6533_v51, %v1934_v33  ;;  %v1937_v24 = vsel %vm1925_vm4, %v6522_v56, %v6533_v51  ;;  %v1689_v10 = vclz %v1688_v1 }
 0x176   :  { %v1837_v52 = vadd.s32 536870912, %v6539_v19  ;;  %v1936_v32 = vsel %vm1926_vm7, %v1933_v42, %v1935_v50  ;;  %v1938_v44 = vsel %vm1928_vm5, %v1924_v37, 1326507024  ;;  %v6573_v11 = vsel %vm1461_vm15, %v1468_v41, %v1470_v3 }
 0x177   :  { %v1939_v22 = vsel %vm1927_vm6, %v1921_v17, %v1938_v44  ;;  %v1967_v53 = vshrl.u32 %v1936_v32, 16  ;;  %v2052_v36 = vshrl.u32 %v2051_v48, 23  ;;  %v1479_v14 = vand.u32 65535, %v1475_v54 }
 0x178   :  { %v1480_v5 = vshrl.u32 %v1475_v54, 16  ;;  %v1940_v18 = vsel %vm1926_vm7, %v1937_v24, %v1939_v22  ;;  %v1942_v46 = vand.u32 65535, %v6554_v60  ;;  %v1943_v1 = vshrl.u32 %v6554_v60, 16 }
 0x179   :  { %v1944_v42 = vand.u32 65535, %v1940_v18  ;;  %v1945_v37 = vshrl.u32 %v1940_v18, 16  ;;  %v1966_v33 = vand.u32 65535, %v1936_v32  ;;  %v4795_v41 = vadd.s32 4294967294, %v1689_v10 }
 0x17a   :  { %v6583_v3 = vshrl.u32 %v1837_v52, 30  ;;  %v1969_v17 = vmul.u32 %v1967_v53, %v1942_v46  ;;  %v4803_v24 = vadd.s32 4294967169, %v2052_v36  ;;  %v6591_v44 = vmul.u32 %v1479_v14, %v6239_v0  ;;  %v52_v36 = vld [vmem:[%s9600_s1] sm:$0xff] }
 0x17b   :  { %v6586_v54 = vmul.u32 %v1945_v37, %v1942_v46  ;;  %v6588_v50 = vmul.u32 %v1944_v42, %v1943_v1  ;;  %v6594_v22 = vmul.u32 %v1480_v5, %v6239_v0  ;;  %v6597_v32 = vmul.u32 %v1479_v14, %v6286_v59  ;;  %2767 = vmatpush.msrb.mxu0 %v52_v36 }
 0x17c   :  { %9905 = vst [vmem:[#allocation96_spill] sm:$0xff] %v6583_v3  ;;  %v1946_v52 = vmul.u32 %v1944_v42, %v1942_v46  ;;  %v6601_v61 = vmul.u32 %v1966_v33, %v1943_v1  ;;  %vm4796_vm8 = vcmp.lt.s32.totalorder %v4795_v41, 0  ;;  %v1839_v48 = vshll.u32 %v6583_v3, 30  ;;  %4944 = vmatpush.msra.mxu1 %v52_v36 }
 0x17d   :  { %v1950_v18 = vshll.u32 %v6586_v54, 16  ;;  %v1968_v29 = vmul.u32 %v1966_v33, %v1942_v46  ;;  %v1972_v16 = vshll.u32 %v1969_v17, 16  ;;  %v1952_v14 = vshll.u32 %v6588_v50, 16 }
 0x17e   :  { %v2058_v10 = vadd.s32 1, %v4803_v24  ;;  %v1949_v43 = vmul.u32 %v1945_v37, %v1943_v1  ;;  %v1971_v21 = vmul.u32 %v1967_v53, %v1943_v1  ;;  %v9720_v7 = vshll.u32 %v6601_v61, 16 }
 0x17f   :  { %vm1954_vm9 = vc.u32 %v1946_v52, %v1950_v18  ;;  %v1956_v42 = vadd.s32 %v1950_v18, %v1946_v52  ;;  %vm1976_vm10 = vc.u32 %v1968_v29, %v1972_v16  ;;  %v6612_v3 = vadd.s32 %v1972_v16, %v1968_v29 }
 0x180   :  { %v1955_v57 = vsel %vm1954_vm9, 1, %v9824_v38  ;;  %v1977_v63 = vsel %vm1976_vm10, 1, %v9824_v38  ;;  %v6615_v46 = vmul.u32 %v1480_v5, %v6286_v59  ;;  %v9907_v33 = vand.u32 65535, %v6573_v11 }
 0x181   :  { %vm1958_vm11 = vc.u32 %v1956_v42, %v1952_v14  ;;  %v1979_v37 = vadd.s32 %v1977_v63, %v1971_v21  ;;  %v9909_v24 = vand.u32 2147483647, %v6505_v15  ;;  %v6625_v1 = vsel %vm4796_vm8, 0, %v4795_v41  ;;  %v179_v21 = vpop.f32.mrf.mxu0 }
 0x182   :  { %9906 = vst [vmem:[#allocation97_spill] sm:$0xff] %v6615_v46  ;;  %v6620_v52 = vmul.u32 %v9907_v33, %v6239_v0  ;;  %v1957_v18 = vadd.s32 %v1955_v57, %v1949_v43  ;;  %vm1980_vm13 = vc.u32 %v6612_v3, %v9720_v7  ;;  %vm2059_vm14 = vcmp.gt.s32.totalorder %v2058_v10, 0 }
 0x183   :  { %v2055_v53 = vand.u32 8388607, %v9909_v24  ;;  %v6631_v29 = vsub.s32 %v6539_v19, %v1839_v48  ;;  %v1959_v16 = vsel %vm1958_vm11, 1, %v9824_v38  ;;  %v1981_v5 = vsel %vm1980_vm13, 1, %v9824_v38 }
 0x184   :  { %9908 = vst [vmem:[#allocation98_spill] sm:$0xff] %v6620_v52  ;;  %v2060_v63 = vsel %vm2059_vm14, %v2058_v10, 0  ;;  %v9910_v36 = vshrl.u32 %v6573_v11, 16  ;;  %v6642_v43 = vadd.s32 %v6323_v47, %v6340_v45  ;;  %v1983_v57 = vadd.s32 %v1981_v5, %v1979_v37 }
 0x185   :  { %v2062_v14 = vand.u32 31, %v2060_v63  ;;  %v1693_v19 = vsub.s32 32, %v6625_v1  ;;  %v1697_v48 = vsub.s32 4294967266, %v6625_v1  ;;  %v1909_v42 = vshrl.u32 %v9839_v6, %v6501_v12 }
 0x186   :  { %v6638_v41 = vmul.u32 %v9910_v36, %v6239_v0  ;;  %v2056_v10 = vor.u32 8388608, %v2055_v53  ;;  %v1961_v33 = vadd.s32 %v1959_v16, %v1957_v18  ;;  %v1973_v24 = vshrl.u32 %v1969_v17, 16 }
 0x187   :  { %v6648_v7 = vsub.s32 32, %v2062_v14  ;;  %v6651_v0 = vadd.f32 %v6080_v31, %v179_v21  ;;  %vm1841_vm15 = vcmp.lt.s32.totalorder %v6631_v29, 0  ;;  %v1842_v47 = vsub.s32 0, %v6631_v29 }
 0x188   :  { %9911 = vst [vmem:[#allocation99_spill] sm:$0xff] %v6638_v41  ;;  %v1929_v45 = vsel %vm1925_vm4, %v1909_v42, %v6520_v23  ;;  %v1951_v37 = vshrl.u32 %v6586_v54, 16  ;;  %v1984_v5 = vadd.s32 %v1983_v57, %v1973_v24  ;;  %v6659_v12 = vshrl.u32 %v2060_v63, 5 }
 0x189   :  { %9912 = vst [vmem:[#allocation100_spill] sm:$0xff] %v6651_v0  ;;  %v2065_v17 = vshll.u32 %v9839_v6, %v2062_v14  ;;  %v2068_v53 = vshll.u32 %v9817_v30, %v2062_v14  ;;  %v2066_v31 = vshrl.u32 %v9817_v30, %v6648_v7  ;;  %v2069_v18 = vshrl.u32 %v9828_v25, %v6648_v7 }
 0x18a   :  { %v2071_v16 = vshll.u32 %v9828_v25, %v2062_v14  ;;  %v2072_v23 = vshrl.u32 %v9815_v2, %v6648_v7  ;;  %v1930_v54 = vsel %vm1928_vm5, %v6533_v51, 2102212464  ;;  %v1962_v63 = vadd.s32 %v1961_v33, %v1951_v37 }
 0x18b   :  { %v2074_v21 = vshll.u32 %v9815_v2, %v2062_v14  ;;  %v2075_v36 = vshrl.u32 %v9829_v39, %v6648_v7  ;;  %v1975_v57 = vshrl.u32 %v6601_v61, 16  ;;  %v6677_v42 = vor.u32 %v2066_v31, %v2065_v17 }
 0x18c   :  { %v6679_v24 = vor.u32 %v2069_v18, %v2068_v53  ;;  %v6681_v15 = vor.u32 %v2072_v23, %v2071_v16  ;;  %v1953_v52 = vshrl.u32 %v6588_v50, 16  ;;  %v2077_v46 = vshll.u32 %v9829_v39, %v2062_v14 }
 0x18d   :  { %v2076_v41 = vor.u32 %v2075_v36, %v2074_v21  ;;  %v2078_v51 = vshrl.u32 %v9823_v34, %v6648_v7  ;;  %v1931_v33 = vsel %vm1927_vm6, %v6522_v56, %v1930_v54  ;;  %v1985_v37 = vadd.s32 %v1984_v5, %v1975_v57 }
 0x18e   :  { %vm2080_vm1 = vcmp.lt.s32.totalorder %v6659_v12, 1  ;;  %v6691_v17 = vshll.u32 %v2056_v10, 8  ;;  %v6693_v53 = vadd.s32 %v1962_v63, %v1953_v52  ;;  %vm2083_vm2 = vcmp.lt.s32.totalorder %v6659_v12, 4 }
 0x18f   :  { %v2079_v31 = vor.u32 %v2078_v51, %v2077_v46  ;;  %v2088_v50 = vsel %vm2080_vm1, %v6677_v42, %v6679_v24  ;;  %v6703_v14 = vsel %vm1841_vm15, %v1842_v47, %v6631_v29  ;;  %vm2082_vm3 = vcmp.lt.s32.totalorder %v6659_v12, 3 }
 0x190   :  { %v2089_v56 = vsel %vm2083_vm2, %v2076_v41, 920167782  ;;  %v2092_v46 = vsel %vm2080_vm1, %v6679_v24, %v6681_v15  ;;  %v9913_v52 = vshll.u32 %v6601_v61, 16  ;;  %vm2081_vm4 = vcmp.lt.s32.totalorder %v6659_v12, 2 }
 0x191   :  { %v2090_v47 = vsel %vm2082_vm3, %v6681_v15, %v2089_v56  ;;  %v2093_v5 = vsel %vm2083_vm2, %v2079_v31, 1326507024  ;;  %v1989_v18 = vadd.s32 1, %v1985_v37  ;;  %v2097_v61 = vand.u32 65535, %v6691_v17 }
 0x192   :  { %v6715_v10 = vadd.s32 %v6612_v3, %v9913_v52  ;;  %v2091_v16 = vsel %vm2081_vm4, %v2088_v50, %v2090_v47  ;;  %v2094_v23 = vsel %vm2082_vm3, %v2076_v41, %v2093_v5  ;;  %v1932_v21 = vsel %vm1926_vm7, %v1929_v45, %v1931_v33 }
 0x193   :  { %v2095_v3 = vsel %vm2081_vm4, %v2092_v46, %v2094_v23  ;;  %v2121_v54 = vand.u32 65535, %v2091_v16  ;;  %v2122_v63 = vshrl.u32 %v2091_v16, 16  ;;  %v2098_v36 = vshrl.u32 %v6691_v17, 16 }
 0x194   :  { %9914 = vst [vmem:[#allocation101_spill] sm:$0xff] %v6715_v10  ;;  %vm1988_vm5 = vc.u32 %v6693_v53, %v6715_v10  ;;  %v2099_v57 = vand.u32 65535, %v2095_v3  ;;  %v2100_v51 = vshrl.u32 %v2095_v3, 16  ;;  %v9915_v41 = vand.u32 65535, %v6573_v11 }
 0x195   :  { %v6741_v50 = vshrl.u32 %v6642_v43, %v1693_v19  ;;  %v6743_v56 = vadd.s32 127, %v1697_v48  ;;  %v2124_v46 = vmul.u32 %v2122_v63, %v2097_v61  ;;  %v1844_v52 = vclz %v6703_v14 }
 0x196   :  { %v6738_v31 = vmul.u32 %v9915_v41, %v6286_v59  ;;  %v1990_v47 = vsel %vm1988_vm5, %v1989_v18, %v1985_v37  ;;  %v2102_v62 = vmul.u32 %v2100_v51, %v2097_v61  ;;  %v2103_v45 = vmul.u32 %v2099_v57, %v2098_v36 }
 0x197   :  { %v1986_v33 = vmul.u32 %v6554_v60, %v1932_v21  ;;  %v2123_v5 = vmul.u32 %v2121_v54, %v2097_v61  ;;  %v2125_v16 = vmul.u32 %v2121_v54, %v2098_v36  ;;  %v2127_v23 = vshll.u32 %v2124_v46, 16 }
 0x198   :  { %9916 = vst [vmem:[#allocation102_spill] sm:$0xff] %v6738_v31  ;;  %v2101_v3 = vmul.u32 %v2099_v57, %v2097_v61  ;;  %v2105_v10 = vshll.u32 %v2102_v62, 16  ;;  %v2206_v43 = vand.u32 2139095040, %v6651_v0  ;;  %v2104_v48 = vmul.u32 %v2100_v51, %v2098_v36 }
 0x199   :  { %v6749_v19 = vadd.s32 %v1990_v47, %v1986_v33  ;;  %v2126_v31 = vmul.u32 %v2122_v63, %v2098_v36  ;;  %vm2131_vm6 = vc.u32 %v2123_v5, %v2127_v23  ;;  %v2107_v14 = vshll.u32 %v2103_v45, 16 }
 0x19a   :  { %vm2109_vm7 = vc.u32 %v2101_v3, %v2105_v10  ;;  %v2111_v37 = vadd.s32 %v2105_v10, %v2101_v3  ;;  %v2132_v18 = vsel %vm2131_vm6, 1, %v9824_v38  ;;  %v2129_v54 = vshll.u32 %v2125_v16, 16 }
 0x19b   :  { %v2110_v60 = vsel %vm2109_vm7, 1, %v9824_v38  ;;  %v2133_v21 = vadd.s32 %v2127_v23, %v2123_v5  ;;  %v2134_v61 = vadd.s32 %v2132_v18, %v2126_v31  ;;  %v2064_v57 = vshrl.u32 %v9839_v6, %v6648_v7 }
 0x19c   :  { %v2112_v41 = vadd.s32 %v2110_v60, %v2104_v48  ;;  %vm2113_vm8 = vc.u32 %v2111_v37, %v2107_v14  ;;  %v2207_v47 = vshrl.u32 %v2206_v43, 23  ;;  %v1992_v51 = vadd.s32 536870912, %v6749_v19 }
 0x19d   :  { %v2085_v63 = vsel %vm2083_vm2, %v6681_v15, 2102212464  ;;  %v2114_v10 = vsel %vm2113_vm8, 1, %v9824_v38  ;;  %vm2135_vm9 = vc.u32 %v2133_v21, %v2129_v54  ;;  %v2106_v36 = vshrl.u32 %v2102_v62, 16 }
 0x19e   :  { %v2116_v33 = vadd.s32 %v2114_v10, %v2112_v41  ;;  %v2136_v5 = vsel %vm2135_vm9, 1, %v9824_v38  ;;  %v4806_v31 = vadd.s32 4294967169, %v2207_v47  ;;  %v1699_v23 = vshll.u32 %v6743_v56, 23 }
 0x19f   :  { %v2084_v7 = vsel %vm2080_vm1, %v2064_v57, %v6677_v42  ;;  %v2128_v3 = vshrl.u32 %v2124_v46, 16  ;;  %v2138_v43 = vadd.s32 %v2136_v5, %v2134_v61  ;;  %v2086_v15 = vsel %vm2082_vm3, %v6679_v24, %v2085_v63 }
 0x1a0   :  { %v2108_v48 = vshrl.u32 %v2103_v45, 16  ;;  %v2117_v14 = vadd.s32 %v2116_v33, %v2106_v36  ;;  %v2213_v37 = vadd.s32 1, %v4806_v31  ;;  %v4798_v62 = vadd.s32 4294967294, %v1844_v52 }
 0x1a1   :  { %v6768_v41 = vshrl.u32 %v1992_v51, 30  ;;  %v2130_v18 = vshrl.u32 %v2125_v16, 16  ;;  %v2139_v60 = vadd.s32 %v2138_v43, %v2128_v3  ;;  %v6772_v56 = vadd.s32 %v2133_v21, %v2129_v54 }
 0x1a2   :  { %v6770_v47 = vadd.s32 %v2117_v14, %v2108_v48  ;;  %v9918_v42 = vand.u32 2147483647, %v6651_v0  ;;  %vm2214_vm10 = vcmp.gt.s32.totalorder %v2213_v37, 0  ;;  %v1694_v61 = vshll.u32 %v6473_v40, %v6625_v1 }
 0x1a3   :  { %9917 = vst [vmem:[#allocation103_spill] sm:$0xff] %v6768_v41  ;;  %v2087_v24 = vsel %vm2081_vm4, %v2084_v7, %v2086_v15  ;;  %v2140_v45 = vadd.s32 %v2139_v60, %v2130_v18  ;;  %v2215_v52 = vsel %vm2214_vm10, %v2213_v37, 0  ;;  %v9919_v16 = vshrl.u32 %v6573_v11, 16 }
 0x1a4   :  { %v2210_v46 = vand.u32 8388607, %v9918_v42  ;;  %vm2143_vm11 = vc.u32 %v6770_v47, %v6772_v56  ;;  %v2217_v54 = vand.u32 31, %v2215_v52  ;;  %v1696_v21 = vor.u32 %v6741_v50, %v1694_v61 }
 0x1a5   :  { %v6784_v51 = vmul.u32 %v9919_v16, %v6286_v59  ;;  %v1700_v63 = vor.u32 4788187, %v1699_v23  ;;  %vm4799_vm13 = vcmp.lt.s32.totalorder %v4798_v62, 0  ;;  %v2144_v40 = vadd.s32 1, %v2140_v45 }
 0x1a6   :  { %v1994_v1 = vshll.u32 %v6768_v41, 30  ;;  %v2141_v12 = vmul.u32 %v6691_v17, %v2087_v24  ;;  %v2211_v10 = vor.u32 8388608, %v2210_v46  ;;  %v2218_v36 = vsub.s32 32, %v2217_v54 }
 0x1a7   :  { %9920 = vst [vmem:[#allocation104_spill] sm:$0xff] %v6784_v51  ;;  %v2145_v33 = vsel %vm2143_vm11, %v2144_v40, %v2140_v45  ;;  %v6791_v5 = vshrl.u32 %v2215_v52, 5  ;;  %v2220_v59 = vshll.u32 %v9839_v6, %v2217_v54  ;;  %v2223_v11 = vshll.u32 %v9817_v30, %v2217_v54 }
 0x1a8   :  { %v2146_v31 = vadd.s32 %v2145_v33, %v2141_v12  ;;  %v2221_v7 = vshrl.u32 %v9817_v30, %v2218_v36  ;;  %v2224_v50 = vshrl.u32 %v9828_v25, %v2218_v36  ;;  %v2226_v23 = vshll.u32 %v9828_v25, %v2217_v54 }
 0x1a9   :  { %v2227_v3 = vshrl.u32 %v9815_v2, %v2218_v36  ;;  %v2229_v17 = vshll.u32 %v9815_v2, %v2217_v54  ;;  %v2230_v43 = vshrl.u32 %v9829_v39, %v2218_v36  ;;  %v2232_v15 = vshll.u32 %v9829_v39, %v2217_v54 }
 0x1aa   :  { %v2147_v48 = vadd.s32 536870912, %v2146_v31  ;;  %v6802_v14 = vor.u32 %v2221_v7, %v2220_v59  ;;  %v6804_v37 = vor.u32 %v2224_v50, %v2223_v11  ;;  %v2233_v18 = vshrl.u32 %v9823_v34, %v2218_v36 }
 0x1ab   :  { %v6809_v60 = vadd.s32 %v6478_v4, %v6466_v35  ;;  %v2228_v42 = vor.u32 %v2227_v3, %v2226_v23  ;;  %v2231_v46 = vor.u32 %v2230_v43, %v2229_v17  ;;  %v1703_v24 = vcvt.s32.f32 %v1696_v21 }
 0x1ac   :  { %v6815_v45 = vsub.s32 %v6749_v19, %v1994_v1  ;;  %v2234_v52 = vor.u32 %v2233_v18, %v2232_v15  ;;  %vm2235_vm14 = vcmp.lt.s32.totalorder %v6791_v5, 1  ;;  %v6819_v16 = vsel %vm4799_vm13, 0, %v4798_v62 }
 0x1ad   :  { %vm2238_vm15 = vcmp.lt.s32.totalorder %v6791_v5, 4  ;;  %v2243_v35 = vsel %vm2235_vm14, %v6802_v14, %v6804_v37  ;;  %v6826_v4 = vshll.u32 %v2211_v10, 8  ;;  %v1701_v54 = vand.u32 2147483647, %v1700_v63 }
 0x1ae   :  { %v6828_v21 = vshrl.u32 %v2147_v48, 30  ;;  %vm2237_vm1 = vcmp.lt.s32.totalorder %v6791_v5, 3  ;;  %v2244_v19 = vsel %vm2238_vm15, %v2231_v46, 920167782  ;;  %vm2236_vm2 = vcmp.lt.s32.totalorder %v6791_v5, 2 }
 0x1af   :  { %v2245_v62 = vsel %vm2237_vm1, %v2228_v42, %v2244_v19  ;;  %v2247_v40 = vsel %vm2235_vm14, %v6804_v37, %v2228_v42  ;;  %v2248_v1 = vsel %vm2238_vm15, %v2234_v52, 1326507024  ;;  %v1852_v63 = vsub.s32 4294967266, %v6819_v16 }
 0x1b0   :  { %9921 = vst [vmem:[#allocation105_spill] sm:$0xff] %v6828_v21  ;;  %v1997_v12 = vsub.s32 0, %v6815_v45  ;;  %v2246_v10 = vsel %vm2236_vm2, %v2243_v35, %v2245_v62  ;;  %v317_v33 = vmul.f32 -0.001358992, %v5678_v8  ;;  %v2249_v59 = vsel %vm2237_vm1, %v2231_v46, %v2248_v1 }
 0x1b1   :  { %v2252_v11 = vand.u32 65535, %v6826_v4  ;;  %v2276_v7 = vand.u32 65535, %v2246_v10  ;;  %v2277_v50 = vshrl.u32 %v2246_v10, 16  ;;  %v6849_v23 = vmul.f32 %v1703_v24, %v1701_v54 }
 0x1b2   :  { %vm1996_vm3 = vcmp.lt.s32.totalorder %v6815_v45, 0  ;;  %v2250_v3 = vsel %vm2236_vm2, %v2247_v40, %v2249_v59  ;;  %v2253_v17 = vshrl.u32 %v6826_v4, 16  ;;  %v2149_v43 = vshll.u32 %v6828_v21, 30 }
 0x1b3   :  { %v2254_v15 = vand.u32 65535, %v2250_v3  ;;  %v2255_v48 = vshrl.u32 %v2250_v3, 16  ;;  %v2279_v18 = vmul.u32 %v2277_v50, %v2252_v11  ;;  %v1848_v46 = vsub.s32 32, %v6819_v16 }
 0x1b4   :  { %v1853_v52 = vadd.s32 127, %v1852_v63  ;;  %v2280_v35 = vmul.u32 %v2276_v7, %v2253_v17  ;;  %v318_v19 = vadd.f32 0.041655596, %v317_v33  ;;  %v1998_v24 = vsel %vm1996_vm3, %v1997_v12, %v6815_v45 }
 0x1b5   :  { %v2219_v54 = vshrl.u32 %v9839_v6, %v2218_v36  ;;  %v2257_v62 = vmul.u32 %v2255_v48, %v2252_v11  ;;  %v324_v1 = vmul.f32 -0.00019511016, %v5678_v8  ;;  %v2240_v40 = vsel %vm2238_vm15, %v2228_v42, 2102212464 }
 0x1b6   :  { %v2258_v10 = vmul.u32 %v2254_v15, %v2253_v17  ;;  %v2278_v59 = vmul.u32 %v2276_v7, %v2252_v11  ;;  %v2282_v61 = vshll.u32 %v2279_v18, 16  ;;  %v6862_v3 = vsub.s32 %v2146_v31, %v2149_v43 }
 0x1b7   :  { %v2256_v57 = vmul.u32 %v2254_v15, %v2252_v11  ;;  %v2260_v21 = vshll.u32 %v2257_v62, 16  ;;  %v2281_v63 = vmul.u32 %v2277_v50, %v2253_v17  ;;  %v2284_v41 = vshll.u32 %v2280_v35, 16 }
 0x1b8   :  { %vm2286_vm4 = vc.u32 %v2278_v59, %v2282_v61  ;;  %v2288_v33 = vadd.s32 %v2282_v61, %v2278_v59  ;;  %v319_v12 = vmul.f32 %v318_v19, %v5678_v8  ;;  %v2259_v36 = vmul.u32 %v2255_v48, %v2253_v17  ;;  %v182_v61 = vpop.f32.mrf.mxu0 }
 0x1b9   :  { %vm2264_vm5 = vc.u32 %v2256_v57, %v2260_v21  ;;  %v2266_v0 = vadd.s32 %v2260_v21, %v2256_v57  ;;  %v2287_v51 = vsel %vm2286_vm4, 1, %v9824_v38  ;;  %v2262_v34 = vshll.u32 %v2258_v10, 16 }
 0x1ba   :  { %v2265_v42 = vsel %vm2264_vm5, 1, %v9824_v38  ;;  %v2289_v7 = vadd.s32 %v2287_v51, %v2281_v63  ;;  %vm2290_vm6 = vc.u32 %v2288_v33, %v2284_v41  ;;  %v1850_v31 = vshrl.u32 %v6809_v60, %v1848_v46 }
 0x1bb   :  { %v1854_v11 = vshll.u32 %v1853_v52, 23  ;;  %v1999_v43 = vclz %v1998_v24  ;;  %v2267_v50 = vadd.s32 %v2265_v42, %v2259_v36  ;;  %v9922_v15 = vshll.u32 %v6594_v22, 16 }
 0x1bc   :  { %v2239_v57 = vsel %vm2235_vm14, %v2219_v54, %v6802_v14  ;;  %vm2268_vm8 = vc.u32 %v2266_v0, %v2262_v34  ;;  %v2291_v51 = vsel %vm2290_vm6, 1, %v9824_v38  ;;  %v320_v21 = vadd.f32 -0.4999988, %v319_v12 }
 0x1bd   :  { %vm6871_vm7 = vc.u32 %v6591_v44, %v9922_v15  ;;  %v2241_v60 = vsel %vm2237_vm1, %v6804_v37, %v2240_v40  ;;  %v2269_v17 = vsel %vm2268_vm8, 1, %v9824_v38  ;;  %v2283_v48 = vshrl.u32 %v2279_v18, 16 }
 0x1be   :  { %v2293_v46 = vadd.s32 %v2291_v51, %v2289_v7  ;;  %v2152_v52 = vsub.s32 0, %v6862_v3  ;;  %v2261_v19 = vshrl.u32 %v2257_v62, 16  ;;  %v2271_v24 = vadd.s32 %v2269_v17, %v2267_v50 }
 0x1bf   :  { %v325_v59 = vadd.f32 0.008332121, %v324_v1  ;;  %v4801_v63 = vadd.s32 4294967294, %v1999_v43  ;;  %vm2151_vm9 = vcmp.lt.s32.totalorder %v6862_v3, 0  ;;  %v2285_v34 = vshrl.u32 %v2280_v35, 16 }
 0x1c0   :  { %v2294_v0 = vadd.s32 %v2293_v46, %v2283_v48  ;;  %v2263_v14 = vshrl.u32 %v2258_v10, 16  ;;  %v2272_v54 = vadd.s32 %v2271_v24, %v2261_v19  ;;  %v321_v12 = vmul.f32 %v320_v21, %v5678_v8 }
 0x1c1   :  { %v326_v37 = vmul.f32 %v325_v59, %v5678_v8  ;;  %v1849_v18 = vshll.u32 %v6631_v29, %v6819_v16  ;;  %v1855_v40 = vor.u32 4788187, %v1854_v11  ;;  %v2242_v62 = vsel %vm2236_vm2, %v2239_v57, %v2241_v60 }
 0x1c2   :  { %v2295_v36 = vadd.s32 %v2294_v0, %v2285_v34  ;;  %v2153_v1 = vsel %vm2151_vm9, %v2152_v52, %v6862_v3  ;;  %v6892_v42 = vadd.s32 %v2272_v54, %v2263_v14  ;;  %v6894_v35 = vadd.s32 %v2288_v33, %v2284_v41 }
 0x1c3   :  { %v327_v10 = vadd.f32 -0.16666654, %v326_v37  ;;  %v1851_v7 = vor.u32 %v1850_v31, %v1849_v18  ;;  %vm4802_vm10 = vcmp.lt.s32.totalorder %v4801_v63, 0  ;;  %v9925_v50 = vsel %vm5612_vm12, 0, %v5570_v9  ;;  %v9931_v37 = vld [vmem:[#allocation14_spill] sm:$0xff] }
 0x1c4   :  { %v2299_v43 = vadd.s32 1, %v2295_v36  ;;  %v332_v29 = vadd.s32 3, %v9925_v50  ;;  %v2296_v16 = vmul.u32 %v6826_v4, %v2242_v62  ;;  %vm2298_vm11 = vc.u32 %v6892_v42, %v6894_v35  ;;  %v2668_v62 = vld [vmem:[%s9603_s4] sm:$0xff] }
 0x1c5   :  { %v322_v5 = vadd.f32 1.0, %v321_v12  ;;  %v328_v11 = vmul.f32 %v327_v10, %v5678_v8  ;;  %v1856_v15 = vand.u32 2147483647, %v1855_v40  ;;  %v2154_v41 = vclz %v2153_v1  ;;  %v9932_v10 = vld [vmem:[#allocation12_spill] sm:$0xff] }
 0x1c6   :  { %v2300_v33 = vsel %vm2298_vm11, %v2299_v43, %v2295_v36  ;;  %v422_v31 = vshll.u32 %v5509_v28, 16  ;;  %v6906_v51 = vsel %vm4802_vm10, 0, %v4801_v63  ;;  %v1490_v4 = vsel %vm6871_vm7, 1, %v9824_v38  ;;  %v9933_v43 = vld [vmem:[#allocation85_spill] sm:$0xff] }
 0x1c7   :  { %v6908_v55 = vadd.s32 %v2300_v33, %v2296_v16  ;;  %v329_v9 = vadd.f32 1.0, %v328_v11  ;;  %vm1585_vm12 = vcmp.lt.s32.totalorder %v6109_v13, 0  ;;  %v1858_v21 = vcvt.s32.f32 %v1851_v7  ;;  %v2700_v16 = vld [vmem:[%s9604_s5] sm:$0xff]  ;;  %v9936_v33 = vld [vmem:[#allocation97_spill] sm:$0xff] }
 0x1c8   :  { %vm331_vm13 = vweird.f32 %v5379_v20  ;;  %v333_v8 = vand.u32 3, %v332_v29  ;;  %v1705_v60 = vxor.u32 2147483648, %v6849_v23  ;;  %v339_v48 = vxor.u32 2147483648, %v322_v5 }
 0x1c9   :  { %v330_v17 = vmul.f32 %v329_v9, %v5657_v58  ;;  %vm426_vm14 = vc.u32 %v5507_v27, %v422_v31  ;;  %v6918_v46 = vmul.f32 %v1858_v21, %v1856_v15  ;;  %v2007_v52 = vsub.s32 4294967266, %v6906_v51 }
 0x1ca   :  { %v4804_v19 = vadd.s32 4294967294, %v2154_v41  ;;  %v6922_v24 = vadd.s32 %v422_v31, %v5507_v27  ;;  %v2302_v59 = vadd.s32 536870912, %v6908_v55  ;;  %v424_v34 = vshll.u32 %v5524_v49, 16  ;;  %v5157_v27 = vld [vmem:[%s9602_s3] ss:$0 sm:$0xff]  ;;  %s5239_s3 = smov 96  }
 0x1cb   :  { %v336_v63 = vxor.u32 2147483648, %v330_v17  ;;  %v427_v0 = vsel %vm426_vm14, 1, %v9824_v38  ;;  %v9926_v58 = vand.u32 2147483647, %v6109_v13  ;;  %v9927_v14 = vmov 0 }
 0x1cc   :  { %vm335_vm1 = vcmp.eq.s32.totalorder %v333_v8, 0  ;;  %vm338_vm2 = vcmp.eq.s32.totalorder %v333_v8, 2  ;;  %v6936_v54 = vadd.f32 %v5157_v27, %v182_v61  ;;  %v9930_v12 = vshll.u32 %v5502_v26, 16 }
 0x1cd   :  { %vm6929_vm15 = vcmp.le.f32.partialorder %v9926_v58, 0.7853982  ;;  %vm334_vm4 = vcmp.lt.s32.totalorder %v333_v8, 2  ;;  %v337_v18 = vsel %vm335_vm1, %v322_v5, %v336_v63  ;;  %v340_v40 = vsel %vm338_vm2, %v339_v48, %v330_v17  ;;  %v9939_v58 = vld [vmem:[#allocation101_spill] sm:$0xff] }
 0x1ce   :  { %v9928_v14 = vsel %vm6929_vm15, 4294967295, %v9927_v14  ;;  %vm408_vm3 = vc.u32 %v9931_v37, %v9930_v12  ;;  %vm430_vm5 = vc.u32 %v6922_v24, %v424_v34  ;;  %vm4805_vm6 = vcmp.lt.s32.totalorder %v4804_v19, 0 }
 0x1cf   :  { %9929 = vst [vmem:[#allocation106_spill] sm:$0xff] %v9928_v14  ;;  %v341_v36 = vsel %vm334_vm4, %v337_v18, %v340_v40  ;;  %v2361_v1 = vand.u32 2139095040, %v6936_v54  ;;  %v429_v7 = vadd.s32 %v427_v0, %v9932_v10  ;;  %vm1740_vm7 = vcmp.lt.s32.totalorder %v9933_v43, 0 }
 0x1d0   :  { %v6950_v50 = vshrl.u32 %v2302_v59, 30  ;;  %v342_v29 = vsel %vm331_vm13, nan, %v341_v36  ;;  %v409_v5 = vsel %vm408_vm3, 1, %v9824_v38  ;;  %v431_v11 = vsel %vm430_vm5, 1, %v9824_v38 }
 0x1d1   :  { %v9935_v15 = vshll.u32 %v6594_v22, 16  ;;  %v6965_v31 = vadd.s32 %v1490_v4, %v9936_v33  ;;  %v2684_v9 = vmul.f32 %v2668_v62, %v342_v29  ;;  %v2362_v21 = vshrl.u32 %v2361_v1, 23 }
 0x1d2   :  { %9934 = vst [vmem:[#allocation14_spill] sm:$0xff] %v6950_v50  ;;  %v1706_v20 = vsel %vm1585_vm12, %v1705_v60, %v6849_v23  ;;  %v2003_v8 = vsub.s32 32, %v6906_v51  ;;  %v2008_v17 = vadd.s32 127, %v2007_v52  ;;  %v6972_v48 = vsel %vm4805_vm6, 0, %v4804_v19  ;;  %v9940_v19 = vld [vmem:[#allocation10_spill] sm:$0xff] }
 0x1d3   :  { %v6962_v41 = vadd.s32 %v9935_v15, %v6591_v44  ;;  %v6974_v61 = vadd.f32 %v2700_v16, %v2684_v9  ;;  %v4809_v59 = vadd.s32 4294967169, %v2362_v21  ;;  %v9938_v44 = vld [vmem:[#allocation16_spill] sm:$0xff]  ;;  %v433_v0 = vadd.s32 %v431_v11, %v429_v7 }
 0x1d4   :  { %v411_v63 = vadd.s32 %v409_v5, %v9938_v44  ;;  %v1860_v4 = vxor.u32 2147483648, %v6918_v46  ;;  %v1987_v27 = vadd.s32 %v9939_v58, %v6693_v53  ;;  %v2304_v12 = vshll.u32 %v6950_v50, 30 }
 0x1d5   :  { %9937 = vst [vmem:[#allocation12_spill] sm:$0xff] %v6974_v61  ;;  %v9735_v23 = vand.u32 2147483647, %v6936_v54  ;;  %v9734_v60 = vmax.f32 %v6974_v61, 0.0  ;;  %v2368_v52 = vadd.s32 1, %v4809_v59  ;;  %v401_v37 = vshrl.u32 %v9940_v19, 16 }
 0x1d6   :  { %v423_v18 = vshrl.u32 %v5509_v28, 16  ;;  %v6988_v40 = vsel %vm6929_vm15, %v6109_v13, %v1706_v20  ;;  %v2005_v62 = vshrl.u32 %v1987_v27, %v2003_v8  ;;  %v2009_v36 = vshll.u32 %v2008_v17, 23 }
 0x1d7   :  { %v2158_v53 = vsub.s32 32, %v6972_v48  ;;  %v2004_v1 = vshll.u32 %v6815_v45, %v6906_v51  ;;  %2768 = vmatmul.f32.vlgmr.msrb.gmra.mxu0 %v9734_v60  ;;  %vm2369_vm8 = vcmp.gt.s32.totalorder %v2368_v52, 0  ;;  %v412_v10 = vadd.s32 %v411_v63, %v401_v37 }
 0x1d8   :  { %v434_v7 = vadd.s32 %v433_v0, %v423_v18  ;;  %v2142_v28 = vadd.s32 %v6772_v56, %v6770_v47  ;;  %v6998_v29 = vsub.s32 %v6908_v55, %v2304_v12  ;;  %v2365_v16 = vand.u32 8388607, %v9735_v23  ;;  %v9952_v23 = vld [vmem:[#allocation19_spill] sm:$0xff] }
 0x1d9   :  { %v2370_v5 = vsel %vm2369_vm8, %v2368_v52, 0  ;;  %v7005_v45 = vsel %vm1740_vm7, %v1860_v4, %v6918_v46  ;;  %v403_v11 = vshrl.u32 %v5502_v26, 16  ;;  %v425_v15 = vshrl.u32 %v5524_v49, 16 }
 0x1da   :  { %v2372_v51 = vand.u32 31, %v2370_v5  ;;  %v7009_v33 = vor.u32 %v2005_v62, %v2004_v1  ;;  %v7011_v47 = vor.u32 4788187, %v2009_v36  ;;  %v7013_v56 = vshrl.u32 %v2142_v28, %v2158_v53  ;;  %v9942_v53 = vld [vmem:[#allocation21_spill] sm:$0xff] }
 0x1db   :  { %v2162_v55 = vsub.s32 4294967266, %v6972_v48  ;;  %v7018_v21 = vadd.s32 %v412_v10, %v403_v11  ;;  %v7023_v46 = vadd.s32 %v6922_v24, %v424_v34  ;;  %v435_v26 = vadd.s32 %v434_v7, %v425_v15  ;;  %v9945_v15 = vld [vmem:[#allocation26_spill] sm:$0xff] }
 0x1dc   :  { %v7016_v9 = vsub.s32 32, %v2372_v51  ;;  %vm2306_vm9 = vcmp.lt.s32.totalorder %v6998_v29, 0  ;;  %v2307_v20 = vsub.s32 0, %v6998_v29  ;;  %v2366_v8 = vor.u32 8388608, %v2365_v16 }
 0x1dd   :  { %v7027_v17 = vshrl.u32 %v2370_v5, 5  ;;  %v2375_v59 = vshll.u32 %v9839_v6, %v2372_v51  ;;  %v2378_v63 = vshll.u32 %v9817_v30, %v2372_v51  ;;  %v2381_v49 = vshll.u32 %v9828_v25, %v2372_v51 }
 0x1de   :  { %v2376_v44 = vshrl.u32 %v9817_v30, %v7016_v9  ;;  %v2379_v24 = vshrl.u32 %v9828_v25, %v7016_v9  ;;  %v2382_v34 = vshrl.u32 %v9815_v2, %v7016_v9  ;;  %v2384_v0 = vshll.u32 %v9815_v2, %v2372_v51 }
 0x1df   :  { %v2385_v4 = vshrl.u32 %v9829_v39, %v7016_v9  ;;  %v2387_v27 = vshll.u32 %v9829_v39, %v2372_v51  ;;  %v9941_v12 = vmov 1326507024   ;;  %v439_v52 = vadd.s32 1, %v435_v26  ;;  %v9943_v51 = vld [vmem:[#allocation24_spill] sm:$0xff] }
 0x1e0   :  { %v7041_v58 = vor.u32 %v2376_v44, %v2375_v59  ;;  %v2388_v30 = vshrl.u32 %v9941_v12, %v7016_v9  ;;  %v7046_v19 = vor.u32 %v2379_v24, %v2378_v63  ;;  %v2383_v37 = vor.u32 %v2382_v34, %v2381_v49  ;;  %v9946_v49 = vld [vmem:[#allocation8_spill] sm:$0xff]  ;;  %v9947_v24 = vld [vmem:[#allocation9_spill] sm:$0xff] }
 0x1e1   :  { %v2386_v25 = vor.u32 %v2385_v4, %v2384_v0  ;;  %vm438_vm10 = vc.u32 %v7018_v21, %v7023_v46  ;;  %v7050_v18 = vadd.s32 127, %v2162_v55  ;;  %vm2390_vm11 = vcmp.lt.s32.totalorder %v7027_v17, 1 }
 0x1e2   :  { %v2389_v2 = vor.u32 %v2388_v30, %v2387_v27  ;;  %v7053_v62 = vshll.u32 %v2366_v8, 8  ;;  %v7058_v39 = vsel %vm2306_vm9, %v2307_v20, %v6998_v29  ;;  %vm2393_vm13 = vcmp.lt.s32.totalorder %v7027_v17, 4  ;;  %v9949_v30 = vld [vmem:[#allocation20_spill] sm:$0xff] }
 0x1e3   :  { %v2398_v36 = vsel %vm2390_vm11, %v7041_v58, %v7046_v19  ;;  %vm2392_vm14 = vcmp.lt.s32.totalorder %v7027_v17, 3  ;;  %v2399_v10 = vsel %vm2393_vm13, %v2386_v25, 920167782  ;;  %v2402_v7 = vsel %vm2390_vm11, %v7046_v19, %v2383_v37 }
 0x1e4   :  { %v440_v28 = vsel %vm438_vm10, %v439_v52, %v435_v26  ;;  %vm2391_vm1 = vcmp.lt.s32.totalorder %v7027_v17, 2  ;;  %v2400_v16 = vsel %vm2392_vm14, %v2383_v37, %v2399_v10  ;;  %v2403_v5 = vsel %vm2393_vm13, %v2389_v2, 1326507024 }
 0x1e5   :  { %v9944_v11 = vshll.u32 %v9943_v51, 16  ;;  %v2401_v55 = vsel %vm2391_vm1, %v2398_v36, %v2400_v16  ;;  %v2404_v20 = vsel %vm2392_vm14, %v2386_v25, %v2403_v5  ;;  %v2407_v26 = vand.u32 65535, %v7053_v62 }
 0x1e6   :  { %v2408_v8 = vshrl.u32 %v7053_v62, 16  ;;  %v2405_v59 = vsel %vm2391_vm1, %v2402_v7, %v2404_v20  ;;  %v2431_v44 = vand.u32 65535, %v2401_v55  ;;  %v2432_v63 = vshrl.u32 %v2401_v55, 16 }
 0x1e7   :  { %vm563_vm2 = vc.u32 %v9945_v15, %v9944_v11  ;;  %v9948_v34 = vmul.u32 %v9946_v49, %v9947_v24  ;;  %v2409_v4 = vand.u32 65535, %v2405_v59  ;;  %v2410_v27 = vshrl.u32 %v2405_v59, 16  ;;  %v9950_v11 = vld [vmem:[#allocation22_spill] sm:$0xff]  ;;  %v9951_v59 = vld [vmem:[#allocation27_spill] sm:$0xff] }
 0x1e8   :  { %v564_v12 = vsel %vm563_vm2, 1, %v9824_v38  ;;  %v577_v52 = vshll.u32 %v9949_v30, 16  ;;  %v2309_v25 = vclz %v7058_v39  ;;  %v2434_v2 = vmul.u32 %v2432_v63, %v2407_v26 }
 0x1e9   :  { %v441_v0 = vadd.s32 %v440_v28, %v9948_v34  ;;  %v2435_v36 = vmul.u32 %v2431_v44, %v2408_v8  ;;  %v558_v10 = vshrl.u32 %v9943_v51, 16  ;;  %v2412_v16 = vmul.u32 %v2410_v27, %v2407_v26 }
 0x1ea   :  { %v2413_v7 = vmul.u32 %v2409_v4, %v2408_v8  ;;  %v578_v5 = vshrl.u32 %v9949_v30, 16  ;;  %v2433_v55 = vmul.u32 %v2431_v44, %v2407_v26  ;;  %v2437_v28 = vshll.u32 %v2434_v2, 16 }
 0x1eb   :  { %v442_v20 = vadd.s32 536870912, %v441_v0  ;;  %v566_v49 = vadd.s32 %v564_v12, %v9951_v59  ;;  %v2411_v24 = vmul.u32 %v2409_v4, %v2407_v26  ;;  %v2415_v34 = vshll.u32 %v2412_v16, 16 }
 0x1ec   :  { %v2436_v60 = vmul.u32 %v2432_v63, %v2408_v8  ;;  %vm7099_vm3 = vc.u32 %v9952_v23, %v577_v52  ;;  %v2414_v51 = vmul.u32 %v2410_v27, %v2408_v8  ;;  %v2417_v57 = vshll.u32 %v2413_v7, 16 }
 0x1ed   :  { %v2439_v1 = vshll.u32 %v2435_v36, 16  ;;  %vm2441_vm4 = vc.u32 %v2433_v55, %v2437_v28  ;;  %vm2419_vm5 = vc.u32 %v2411_v24, %v2415_v34  ;;  %v2421_v30 = vadd.s32 %v2415_v34, %v2411_v24 }
 0x1ee   :  { %v2442_v44 = vsel %vm2441_vm4, 1, %v9824_v38  ;;  %v2443_v15 = vadd.s32 %v2437_v28, %v2433_v55  ;;  %v2374_v12 = vshrl.u32 %v9839_v6, %v7016_v9  ;;  %v2420_v26 = vsel %vm2419_vm5, 1, %v9824_v38 }
 0x1ef   :  { %v2444_v63 = vadd.s32 %v2442_v44, %v2436_v60  ;;  %v7107_v4 = vshrl.u32 %v442_v20, 30  ;;  %v2395_v59 = vsel %vm2393_vm13, %v2383_v37, 2102212464  ;;  %v2422_v8 = vadd.s32 %v2420_v26, %v2414_v51 }
 0x1f0   :  { %vm2423_vm6 = vc.u32 %v2421_v30, %v2417_v57  ;;  %vm2445_vm8 = vc.u32 %v2443_v15, %v2439_v1  ;;  %v2438_v24 = vshrl.u32 %v2434_v2, 16  ;;  %v2416_v28 = vshrl.u32 %v2412_v16, 16  ;;  %v9955_v57 = vld [vmem:[#allocation23_spill] sm:$0xff] }
 0x1f1   :  { %v2424_v27 = vsel %vm2423_vm6, 1, %v9824_v38  ;;  %v2446_v34 = vsel %vm2445_vm8, 1, %v9824_v38  ;;  %v444_v55 = vshll.u32 %v7107_v4, 30  ;;  %v582_v60 = vsel %vm7099_vm3, 1, %v9824_v38 }
 0x1f2   :  { %v2426_v6 = vadd.s32 %v2424_v27, %v2422_v8  ;;  %v2448_v9 = vadd.s32 %v2446_v34, %v2444_v63  ;;  %v2418_v20 = vshrl.u32 %v2413_v7, 16  ;;  %v583_v37 = vadd.s32 %v577_v52, %v9952_v23 }
 0x1f3   :  { %v445_v44 = vsub.s32 %v441_v0, %v444_v55  ;;  %v584_v51 = vadd.s32 %v582_v60, %v9955_v57  ;;  %v2440_v26 = vshrl.u32 %v2435_v36, 16  ;;  %v9956_v61 = vshrl.u32 %v9942_v53, 16  ;;  %v9959_v55 = vld [vmem:[#allocation33_spill] sm:$0xff] }
 0x1f4   :  { %v2427_v30 = vadd.s32 %v2426_v6, %v2416_v28  ;;  %v2449_v2 = vadd.s32 %v2448_v9, %v2438_v24  ;;  %v4807_v14 = vadd.s32 4294967294, %v2309_v25  ;;  %v9957_v63 = vshll.u32 %v9950_v11, 16 }
 0x1f5   :  { %v567_v50 = vadd.s32 %v566_v49, %v9956_v61  ;;  %vm446_vm9 = vcmp.lt.s32.totalorder %v445_v44, 0  ;;  %v447_v16 = vsub.s32 0, %v445_v44  ;;  %v2394_v0 = vsel %vm2390_vm11, %v2374_v12, %v7041_v58 }
 0x1f6   :  { %vm585_vm10 = vc.u32 %v583_v37, %v9957_v63  ;;  %v7126_v7 = vadd.s32 %v2427_v30, %v2418_v20  ;;  %v2450_v23 = vadd.s32 %v2449_v2, %v2440_v26  ;;  %v2396_v53 = vsel %vm2392_vm14, %v7046_v19, %v2395_v59  ;;  %v9964_v2 = vld [vmem:[#allocation13_spill] sm:$0xff] }
 0x1f7   :  { %v586_v52 = vsel %vm585_vm10, 1, %v9824_v38  ;;  %v7132_v61 = vadd.s32 %v2443_v15, %v2439_v1  ;;  %v448_v25 = vsel %vm446_vm9, %v447_v16, %v445_v44  ;;  %v2159_v49 = vshll.u32 %v6862_v3, %v6972_v48  ;;  %v9965_v16 = vld [vmem:[#allocation15_spill] sm:$0xff] }
 0x1f8   :  { %v588_v36 = vadd.s32 %v586_v52, %v584_v51  ;;  %v2454_v39 = vadd.s32 1, %v2450_v23  ;;  %v449_v8 = vclz %v448_v25  ;;  %v7136_v27 = vadd.s32 %v567_v50, %v558_v10  ;;  %v9968_v52 = vld [vmem:[#allocation32_spill] sm:$0xff] }
 0x1f9   :  { %vm4808_vm11 = vcmp.lt.s32.totalorder %v4807_v14, 0  ;;  %vm2453_vm13 = vc.u32 %v7126_v7, %v7132_v61  ;;  %v580_v58 = vshrl.u32 %v9950_v11, 16  ;;  %v2013_v19 = vcvt.s32.f32 %v7009_v33 }
 0x1fa   :  { %v589_v12 = vadd.s32 %v588_v36, %v578_v5  ;;  %v2397_v1 = vsel %vm2391_vm1, %v2394_v0, %v2396_v53  ;;  %v4771_v15 = vadd.s32 4294967294, %v449_v8  ;;  %v9958_v59 = vmov %v9957_v63  ;;  %v9967_v0 = vld [vmem:[#allocation34_spill] sm:$0xff] }
 0x1fb   :  { %v7146_v3 = vadd.s32 %v583_v37, %v9958_v59  ;;  %v2011_v50 = vand.u32 2147483647, %v7011_v47  ;;  %v7150_v48 = vor.u32 %v7013_v56, %v2159_v49  ;;  %v2164_v10 = vshll.u32 %v7050_v18, 23  ;;  %v9960_v18 = vld [vmem:[#allocation31_spill] sm:$0xff] }
 0x1fc   :  { %v590_v24 = vadd.s32 %v589_v12, %v580_v58  ;;  %v7153_v34 = vsel %vm4808_vm11, 0, %v4807_v14  ;;  %v2455_v5 = vsel %vm2453_vm13, %v2454_v39, %v2450_v23  ;;  %vm4772_vm14 = vcmp.lt.s32.totalorder %v4771_v15, 0  ;;  %v9962_v14 = vld [vmem:[#allocation36_spill] sm:$0xff] }
 0x1fd   :  { %vm593_vm1 = vc.u32 %v7136_v27, %v7146_v3  ;;  %v2451_v33 = vmul.u32 %v7053_v62, %v2397_v1  ;;  %v452_v17 = vsel %vm4772_vm14, 0, %v4771_v15  ;;  %v732_v28 = vshll.u32 %v9959_v55, 16  ;;  %v9963_v62 = vld [vmem:[#allocation5_spill] sm:$0xff]  ;;  %v9969_v15 = vld [vmem:[#allocation39_spill] sm:$0xff] }
 0x1fe   :  { %v594_v11 = vadd.s32 1, %v590_v24  ;;  %v437_v47 = vadd.s32 %v7023_v46, %v7018_v21  ;;  %v453_v56 = vsub.s32 32, %v452_v17  ;;  %v457_v6 = vsub.s32 4294967266, %v452_v17 }
 0x1ff   :  { %v9961_v9 = vshll.u32 %v9960_v18, 16  ;;  %v2165_v60 = vor.u32 4788187, %v2164_v10  ;;  %v2317_v20 = vsub.s32 4294967266, %v7153_v34  ;;  %v7165_v37 = vadd.s32 %v2455_v5, %v2451_v33  ;;  %v9970_v10 = vld [vmem:[#allocation35_spill] sm:$0xff] }
 0x200   :  { %v595_v57 = vsel %vm593_vm1, %v594_v11, %v590_v24  ;;  %vm345_vm3 = vcmp.lt.s32.totalorder %v9963_v62, 0  ;;  %v454_v51 = vshll.u32 %v445_v44, %v452_v17  ;;  %v455_v30 = vshrl.u32 %v437_v47, %v453_v56 }
 0x201   :  { %vm718_vm2 = vc.u32 %v9962_v14, %v9961_v9  ;;  %v458_v26 = vadd.s32 127, %v457_v6  ;;  %v9966_v21 = vmul.u32 %v9964_v2, %v9965_v16  ;;  %v734_v23 = vshll.u32 %v9967_v0, 16 }
 0x202   :  { %v719_v63 = vsel %vm718_vm2, 1, %v9824_v38  ;;  %vm736_vm4 = vc.u32 %v9968_v52, %v732_v28  ;;  %v738_v53 = vadd.s32 %v732_v28, %v9968_v52  ;;  %v2297_v25 = vadd.s32 %v6894_v35, %v6892_v42  ;;  %v9971_v35 = vld [vmem:[#allocation30_spill] sm:$0xff] }
 0x203   :  { %v596_v46 = vadd.s32 %v595_v57, %v9966_v21  ;;  %v456_v36 = vor.u32 %v455_v30, %v454_v51  ;;  %v459_v49 = vshll.u32 %v458_v26, 23  ;;  %v2313_v39 = vsub.s32 32, %v7153_v34 }
 0x204   :  { %v2318_v8 = vadd.s32 127, %v2317_v20  ;;  %v737_v58 = vsel %vm736_vm4, 1, %v9824_v38  ;;  %vm740_vm5 = vc.u32 %v738_v53, %v734_v23  ;;  %v721_v59 = vadd.s32 %v719_v63, %v9969_v15 }
 0x205   :  { %v597_v44 = vadd.s32 536870912, %v596_v46  ;;  %v460_v12 = vor.u32 4788187, %v459_v49  ;;  %v739_v24 = vadd.s32 %v737_v58, %v9970_v10  ;;  %v2457_v5 = vadd.s32 536870912, %v7165_v37  ;;  %v9978_v10 = vld [vmem:[#allocation6_spill] sm:$0xff] }
 0x206   :  { %v467_v42 = vsub.s32 4, %v7107_v4  ;;  %v711_v33 = vshrl.u32 %v9971_v35, 16  ;;  %v741_v17 = vsel %vm740_vm5, 1, %v9824_v38  ;;  %v9972_v11 = vand.u32 2147483647, %v9933_v43 }
 0x207   :  { %v7179_v1 = vshrl.u32 %v597_v44, 30  ;;  %v461_v47 = vand.u32 2147483647, %v460_v12  ;;  %v463_v56 = vcvt.s32.f32 %v456_v36  ;;  %v743_v9 = vadd.s32 %v741_v17, %v739_v24 }
 0x208   :  { %vm7189_vm6 = vcmp.le.f32.partialorder %v9972_v11, 0.7853982  ;;  %v7194_v14 = vmul.f32 %v2013_v19, %v2011_v50  ;;  %v2166_v20 = vand.u32 2147483647, %v2165_v60  ;;  %v2168_v57 = vcvt.s32.f32 %v7150_v48 }
 0x209   :  { %v599_v6 = vshll.u32 %v7179_v1, 30  ;;  %v733_v51 = vshrl.u32 %v9959_v55, 16  ;;  %v2315_v30 = vshrl.u32 %v2297_v25, %v2313_v39  ;;  %v464_v26 = vmul.f32 %v463_v56, %v461_v47 }
 0x20a   :  { %v722_v16 = vadd.s32 %v721_v59, %v711_v33  ;;  %v2319_v21 = vshll.u32 %v2318_v8, 23  ;;  %v468_v63 = vsel %vm345_vm3, %v467_v42, %v7107_v4  ;;  %v713_v52 = vshrl.u32 %v9960_v18, 16 }
 0x20b   :  { %v7198_v2 = vsub.s32 %v596_v46, %v599_v6  ;;  %v744_v36 = vadd.s32 %v743_v9, %v733_v51  ;;  %v7204_v19 = vshrl.u32 %v2457_v5, 30  ;;  %v465_v50 = vxor.u32 2147483648, %v464_v26 }
 0x20c   :  { %v7208_v55 = vmul.f32 %v2168_v57, %v2166_v20  ;;  %v2314_v60 = vshll.u32 %v6998_v29, %v7153_v34  ;;  %v9975_v46 = vand.u32 2147483647, %v9963_v62  ;;  %v735_v4 = vshrl.u32 %v9967_v0, 16 }
 0x20d   :  { %vm601_vm8 = vcmp.lt.s32.totalorder %v7198_v2, 0  ;;  %v602_v48 = vsub.s32 0, %v7198_v2  ;;  %v466_v18 = vsel %vm345_vm3, %v465_v50, %v464_v26  ;;  %v7224_v39 = vadd.s32 %v722_v16, %v713_v52  ;;  %v9982_v16 = vld [vmem:[#allocation53_spill] sm:$0xff]  ;;  %v9985_v50 = vld [vmem:[#allocation55_spill] sm:$0xff] }
 0x20e   :  { %vm7214_vm9 = vcmp.le.f32.partialorder %v9975_v46, 0.7853982  ;;  %v7226_v8 = vor.u32 %v2315_v30, %v2314_v60  ;;  %v745_v58 = vadd.s32 %v744_v36, %v735_v4  ;;  %v7233_v0 = vor.u32 4788187, %v2319_v21  ;;  %v9986_v4 = vld [vmem:[#allocation18_spill] sm:$0xff] }
 0x20f   :  { %v470_v49 = vsel %vm7214_vm9, 0, %v468_v63  ;;  %v603_v44 = vsel %vm601_vm8, %v602_v48, %v7198_v2  ;;  %v7231_v29 = vsel %vm7214_vm9, %v9963_v62, %v466_v18  ;;  %v2459_v12 = vshll.u32 %v7204_v19, 30  ;;  %v9984_v63 = vld [vmem:[#allocation59_spill] sm:$0xff]  ;;  %v9987_v18 = vld [vmem:[#allocation28_spill] sm:$0xff] }
 0x210   :  { %v604_v34 = vclz %v603_v44  ;;  %v471_v15 = vmul.f32 %v7231_v29, %v7231_v29  ;;  %v7238_v59 = vadd.s32 %v738_v53, %v734_v23  ;;  %vm500_vm10 = vcmp.lt.s32.totalorder %v9978_v10, 0 }
 0x211   :  { %v7243_v24 = vmul.f32 %v6988_v40, %v6988_v40  ;;  %v7249_v5 = vsel %vm7189_vm6, %v9933_v43, %v7005_v45  ;;  %v487_v42 = vadd.s32 3, %v470_v49  ;;  %v2015_v33 = vxor.u32 2147483648, %v7194_v14 }
 0x212   :  { %v4774_v35 = vadd.s32 4294967294, %v604_v34  ;;  %v472_v17 = vmul.f32 -0.001358992, %v471_v15  ;;  %v479_v11 = vmul.f32 -0.00019511016, %v471_v15  ;;  %vm748_vm11 = vc.u32 %v7224_v39, %v7238_v59 }
 0x213   :  { %v2170_v23 = vxor.u32 2147483648, %v7208_v55  ;;  %v2323_v53 = vcvt.s32.f32 %v7226_v8  ;;  %v749_v47 = vadd.s32 1, %v745_v58  ;;  %v2321_v56 = vand.u32 2147483647, %v7233_v0 }
 0x214   :  { %vm4775_vm13 = vcmp.lt.s32.totalorder %v4774_v35, 0  ;;  %v7258_v45 = vsub.s32 %v7165_v37, %v2459_v12  ;;  %v473_v6 = vadd.f32 0.041655596, %v472_v17  ;;  %v480_v9 = vadd.f32 0.008332121, %v479_v11 }
 0x215   :  { %v7260_v20 = vand.u32 3, %v487_v42  ;;  %v9979_v57 = vand.u32 2147483647, %v9978_v10  ;;  %v607_v30 = vsel %vm4775_vm13, 0, %v4774_v35  ;;  %v750_v26 = vsel %vm748_vm11, %v749_v47, %v745_v58 }
 0x216   :  { %v9983_v21 = vshll.u32 %v9982_v16, 16  ;;  %v474_v52 = vmul.f32 %v473_v6, %v471_v15  ;;  %v481_v36 = vmul.f32 %v480_v9, %v471_v15  ;;  %v622_v37 = vsub.s32 4, %v7179_v1  ;;  %v9989_v6 = vld [vmem:[#allocation54_spill] sm:$0xff] }
 0x217   :  { %vm7264_vm14 = vcmp.le.f32.partialorder %v9979_v57, 0.7853982  ;;  %v887_v48 = vshll.u32 %v9985_v50, 16  ;;  %v592_v60 = vadd.s32 %v7146_v3, %v7136_v27  ;;  %v608_v46 = vsub.s32 32, %v607_v30 }
 0x218   :  { %vm873_vm1 = vc.u32 %v9984_v63, %v9983_v21  ;;  %v612_v25 = vsub.s32 4294967266, %v607_v30  ;;  %v9988_v49 = vmul.u32 %v9986_v4, %v9987_v18  ;;  %vm2461_vm2 = vcmp.lt.s32.totalorder %v7258_v45, 0  ;;  %v9990_v63 = vld [vmem:[#allocation60_spill] sm:$0xff] }
 0x219   :  { %v475_v34 = vadd.f32 -0.4999988, %v474_v52  ;;  %v482_v58 = vadd.f32 -0.16666654, %v481_v36  ;;  %v874_v12 = vsel %vm873_vm1, 1, %v9824_v38  ;;  %vm490_vm3 = vcmp.eq.s32.totalorder %v7260_v20, 0 }
 0x21a   :  { %v751_v44 = vadd.s32 %v750_v26, %v9988_v49  ;;  %vm493_vm4 = vcmp.eq.s32.totalorder %v7260_v20, 2  ;;  %v609_v42 = vshll.u32 %v7198_v2, %v607_v30  ;;  %v610_v35 = vshrl.u32 %v592_v60, %v608_v46 }
 0x21b   :  { %v613_v27 = vadd.s32 127, %v612_v25  ;;  %v476_v17 = vmul.f32 %v475_v34, %v471_v15  ;;  %v483_v11 = vmul.f32 %v482_v58, %v471_v15  ;;  %vm489_vm5 = vcmp.lt.s32.totalorder %v7260_v20, 2 }
 0x21c   :  { %v752_v3 = vadd.s32 536870912, %v751_v44  ;;  %v623_v47 = vsel %vm500_vm10, %v622_v37, %v7179_v1  ;;  %vm891_vm8 = vc.u32 %v9989_v6, %v887_v48  ;;  %vm486_vm9 = vweird.f32 %v9963_v62  ;;  %v9991_v1 = vld [vmem:[#allocation56_spill] sm:$0xff] }
 0x21d   :  { %v611_v9 = vor.u32 %v610_v35, %v609_v42  ;;  %v614_v57 = vshll.u32 %v613_v27, 23  ;;  %v893_v2 = vadd.s32 %v887_v48, %v9989_v6  ;;  %v2462_v30 = vsub.s32 0, %v7258_v45  ;;  %v9992_v48 = vld [vmem:[#allocation49_spill] sm:$0xff] }
 0x21e   :  { %v7289_v26 = vshrl.u32 %v752_v3, 30  ;;  %v477_v21 = vadd.f32 1.0, %v476_v17  ;;  %v484_v15 = vadd.f32 1.0, %v483_v11  ;;  %v876_v52 = vadd.s32 %v874_v12, %v9990_v63  ;;  %v9993_v3 = vld [vmem:[#allocation57_spill] sm:$0xff] }
 0x21f   :  { %v615_v36 = vor.u32 4788187, %v614_v57  ;;  %v889_v37 = vshll.u32 %v9991_v1, 16  ;;  %v892_v46 = vsel %vm891_vm8, 1, %v9824_v38  ;;  %v625_v18 = vsel %vm7264_vm14, 0, %v623_v47 }
 0x220   :  { %v754_v60 = vshll.u32 %v7289_v26, 30  ;;  %v485_v25 = vmul.f32 %v484_v15, %v7231_v29  ;;  %v494_v4 = vxor.u32 2147483648, %v477_v21  ;;  %v866_v49 = vshrl.u32 %v9992_v48, 16 }
 0x221   :  { %v616_v34 = vand.u32 2147483647, %v615_v36  ;;  %v618_v58 = vcvt.s32.f32 %v611_v9  ;;  %vm895_vm11 = vc.u32 %v893_v2, %v889_v37  ;;  %v2463_v12 = vsel %vm2461_vm2, %v2462_v30, %v7258_v45  ;;  %v2669_v9 = vld [vmem:[%s9603_s4 + $0x8] sm:$0xff] }
 0x222   :  { %v7301_v42 = vsub.s32 %v751_v44, %v754_v60  ;;  %v491_v35 = vxor.u32 2147483648, %v485_v25  ;;  %v877_v27 = vadd.s32 %v876_v52, %v866_v49  ;;  %v894_v17 = vadd.s32 %v892_v46, %v9993_v3  ;;  %v2701_v36 = vld [vmem:[%s9604_s5 + $0x8] sm:$0xff] }
 0x223   :  { %v619_v29 = vmul.f32 %v618_v58, %v616_v34  ;;  %v868_v47 = vshrl.u32 %v9982_v16, 16  ;;  %v495_v6 = vsel %vm493_vm4, %v494_v4, %v485_v25  ;;  %v642_v57 = vadd.s32 3, %v625_v18  ;;  %v9994_v18 = vld [vmem:[#allocation7_spill] sm:$0xff] }
 0x224   :  { %vm756_vm13 = vcmp.lt.s32.totalorder %v7301_v42, 0  ;;  %v757_v11 = vsub.s32 0, %v7301_v42  ;;  %v492_v44 = vsel %vm490_vm3, %v477_v21, %v491_v35  ;;  %v896_v30 = vsel %vm895_vm11, 1, %v9824_v38 }
 0x225   :  { %v496_v15 = vsel %vm489_vm5, %v492_v44, %v495_v6  ;;  %v620_v63 = vxor.u32 2147483648, %v619_v29  ;;  %v888_v16 = vshrl.u32 %v9985_v50, 16  ;;  %v7327_v46 = vadd.s32 %v877_v27, %v868_v47  ;;  %v9996_v47 = vld [vmem:[#allocation63_spill] sm:$0xff]  ;;  %v9998_v6 = vld [vmem:[#allocation68_spill] sm:$0xff] }
 0x226   :  { %v758_v52 = vsel %vm756_vm13, %v757_v11, %v7301_v42  ;;  %v497_v21 = vsel %vm486_vm9, nan, %v496_v15  ;;  %v898_v25 = vadd.s32 %v896_v30, %v894_v17  ;;  %v7333_v20 = vmul.f32 %v2323_v53, %v2321_v56  ;;  %v9999_v15 = vld [vmem:[#allocation65_spill] sm:$0xff] }
 0x227   :  { %v759_v60 = vclz %v758_v52  ;;  %v2685_v4 = vmul.f32 %v2669_v9, %v497_v21  ;;  %v621_v50 = vsel %vm500_vm10, %v620_v63, %v619_v29  ;;  %v890_v62 = vshrl.u32 %v9991_v1, 16  ;;  %v10000_v21 = vld [vmem:[#allocation42_spill] sm:$0xff] }
 0x228   :  { %vm655_vm1 = vcmp.lt.s32.totalorder %v9994_v18, 0  ;;  %v624_v48 = vsel %vm7264_vm14, %v9978_v10, %v621_v50  ;;  %v7342_v34 = vadd.s32 %v893_v2, %v889_v37  ;;  %v899_v0 = vadd.s32 %v898_v25, %v888_v16 }
 0x229   :  { %v4777_v49 = vadd.s32 4294967294, %v759_v60  ;;  %v2464_v58 = vclz %v2463_v12  ;;  %v7344_v8 = vadd.f32 %v2701_v36, %v2685_v4  ;;  %v626_v53 = vmul.f32 %v624_v48, %v624_v48  ;;  %v10001_v36 = vld [vmem:[#allocation50_spill] sm:$0xff] }
 0x22a   :  { %v747_v56 = vadd.s32 %v7238_v59, %v7224_v39  ;;  %v7348_v35 = vand.u32 3, %v642_v57  ;;  %v900_v1 = vadd.s32 %v899_v0, %v890_v62  ;;  %vm903_vm2 = vc.u32 %v7327_v46, %v7342_v34 }
 0x22b   :  { %9995 = vst [vmem:[#allocation85_spill] sm:$0xff] %v7344_v8  ;;  %vm4778_vm10 = vcmp.lt.s32.totalorder %v4777_v49, 0  ;;  %v9742_v51 = vmax.f32 %v7344_v8, 0.0  ;;  %v627_v27 = vmul.f32 -0.001358992, %v626_v53  ;;  %v777_v17 = vsub.s32 4, %v7289_v26 }
 0x22c   :  { %v634_v2 = vmul.f32 -0.00019511016, %v626_v53  ;;  %v762_v37 = vsel %vm4778_vm10, 0, %v4777_v49  ;;  %v904_v29 = vadd.s32 1, %v900_v1  ;;  %v9997_v44 = vshll.u32 %v9996_v47, 16 }
 0x22d   :  { %v763_v3 = vsub.s32 32, %v762_v37  ;;  %v767_v12 = vsub.s32 4294967266, %v762_v37  ;;  %2771 = vmatmul.f32.gmra.mxu0 %v9742_v51  ;;  %v628_v39 = vadd.f32 0.041655596, %v627_v27  ;;  %v764_v11 = vshll.u32 %v7301_v42, %v762_v37  ;;  %v10046_v51 = vld [vmem:[#allocation89_spill] sm:$0xff] }
 0x22e   :  { %v635_v59 = vadd.f32 0.008332121, %v634_v2  ;;  %vm1028_vm14 = vc.u32 %v9998_v6, %v9997_v44  ;;  %v905_v30 = vsel %vm903_vm2, %v904_v29, %v900_v1  ;;  %v1042_v63 = vshll.u32 %v9999_v15, 16  ;;  %v10009_v6 = vld [vmem:[#allocation66_spill] sm:$0xff] }
 0x22f   :  { %v765_v9 = vshrl.u32 %v747_v56, %v763_v3  ;;  %v768_v57 = vadd.s32 127, %v767_v12  ;;  %v629_v52 = vmul.f32 %v628_v39, %v626_v53  ;;  %v10002_v60 = vmul.u32 %v10000_v21, %v10001_v36  ;;  %v10006_v3 = vld [vmem:[#allocation61_spill] sm:$0xff]  ;;  %v10008_v39 = vld [vmem:[#allocation64_spill] sm:$0xff] }
 0x230   :  { %v636_v16 = vmul.f32 %v635_v59, %v626_v53  ;;  %v1029_v42 = vsel %vm1028_vm14, 1, %v9824_v38  ;;  %v7368_v4 = vadd.s32 4294967294, %v2464_v58  ;;  %v10003_v50 = vand.u32 2147483647, %v9994_v18  ;;  %v10007_v58 = vld [vmem:[#allocation69_spill] sm:$0xff] }
 0x231   :  { %v906_v25 = vadd.s32 %v905_v30, %v10002_v60  ;;  %v766_v49 = vor.u32 %v765_v9, %v764_v11  ;;  %v769_v0 = vshll.u32 %v768_v57, 23  ;;  %v630_v56 = vadd.f32 -0.4999988, %v629_v52 }
 0x232   :  { %vm7372_vm3 = vcmp.le.f32.partialorder %v10003_v50, 0.7853982  ;;  %v637_v1 = vadd.f32 -0.16666654, %v636_v16  ;;  %v778_v27 = vsel %vm655_vm1, %v777_v17, %v7289_v26  ;;  %v1021_v12 = vshrl.u32 %v10006_v3, 16 }
 0x233   :  { %v907_v2 = vadd.s32 536870912, %v906_v25  ;;  %v770_v37 = vor.u32 4788187, %v769_v0  ;;  %v1031_v29 = vadd.s32 %v1029_v42, %v10007_v58  ;;  %vm1046_vm4 = vc.u32 %v10008_v39, %v1042_v63  ;;  %v10010_v42 = vld [vmem:[#allocation67_spill] sm:$0xff] }
 0x234   :  { %v631_v59 = vmul.f32 %v630_v56, %v626_v53  ;;  %v638_v44 = vmul.f32 %v637_v1, %v626_v53  ;;  %vm644_vm5 = vcmp.lt.s32.totalorder %v7348_v35, 2  ;;  %v1044_v9 = vshll.u32 %v10009_v6, 16 }
 0x235   :  { %v7383_v11 = vshrl.u32 %v907_v2, 30  ;;  %v771_v57 = vand.u32 2147483647, %v770_v37  ;;  %v773_v30 = vcvt.s32.f32 %v766_v49  ;;  %v1047_v26 = vsel %vm1046_vm4, 1, %v9824_v38 }
 0x236   :  { %v1048_v17 = vadd.s32 %v1042_v63, %v10008_v39  ;;  %v632_v52 = vadd.f32 1.0, %v631_v59  ;;  %v639_v16 = vadd.f32 1.0, %v638_v44  ;;  %v780_v21 = vsel %vm7372_vm3, 0, %v778_v27 }
 0x237   :  { %v909_v36 = vshll.u32 %v7383_v11, 30  ;;  %v774_v53 = vmul.f32 %v773_v30, %v771_v57  ;;  %v1032_v60 = vadd.s32 %v1031_v29, %v1021_v12  ;;  %v1049_v50 = vadd.s32 %v1047_v26, %v10010_v42 }
 0x238   :  { %vm1050_vm8 = vc.u32 %v1048_v17, %v1044_v9  ;;  %v640_v0 = vmul.f32 %v639_v16, %v624_v48  ;;  %vm645_vm9 = vcmp.eq.s32.totalorder %v7348_v35, 0  ;;  %v649_v49 = vxor.u32 2147483648, %v632_v52 }
 0x239   :  { %v7393_v56 = vsub.s32 %v906_v25, %v909_v36  ;;  %vm648_vm11 = vcmp.eq.s32.totalorder %v7348_v35, 2  ;;  %v775_v63 = vxor.u32 2147483648, %v774_v53  ;;  %v1023_v1 = vshrl.u32 %v9996_v47, 16  ;;  %v2670_v47 = vld [vmem:[%s9603_s4 + $0x10] sm:$0xff] }
 0x23a   :  { %v1051_v27 = vsel %vm1050_vm8, 1, %v9824_v38  ;;  %v646_v2 = vxor.u32 2147483648, %v640_v0  ;;  %v797_v37 = vadd.s32 3, %v780_v21  ;;  %v1043_v25 = vshrl.u32 %v9999_v15, 16  ;;  %v10011_v36 = vld [vmem:[#allocation17_spill] sm:$0xff] }
 0x23b   :  { %vm911_vm13 = vcmp.lt.s32.totalorder %v7393_v56, 0  ;;  %v912_v3 = vsub.s32 0, %v7393_v56  ;;  %v776_v48 = vsel %vm655_vm1, %v775_v63, %v774_v53  ;;  %v7402_v12 = vadd.s32 %v1032_v60, %v1023_v1  ;;  %v10013_v1 = vld [vmem:[#allocation74_spill] sm:$0xff] }
 0x23c   :  { %v1053_v58 = vadd.s32 %v1051_v27, %v1049_v50  ;;  %v647_v29 = vsel %vm645_vm9, %v632_v52, %v646_v2  ;;  %v650_v39 = vsel %vm648_vm11, %v649_v49, %v640_v0  ;;  %v7411_v59 = vsel %vm7372_vm3, %v9994_v18, %v776_v48  ;;  %v2702_v52 = vld [vmem:[%s9604_s5 + $0x10] sm:$0xff]  ;;  %v10015_v2 = vld [vmem:[#allocation80_spill] sm:$0xff] }
 0x23d   :  { %v913_v44 = vsel %vm911_vm13, %v912_v3, %v7393_v56  ;;  %vm641_vm1 = vweird.f32 %v9978_v10  ;;  %v651_v57 = vsel %vm644_vm5, %v647_v29, %v650_v39  ;;  %v781_v15 = vmul.f32 %v7411_v59, %v7411_v59 }
 0x23e   :  { %v914_v30 = vclz %v913_v44  ;;  %v652_v26 = vsel %vm641_vm1, nan, %v651_v57  ;;  %v1045_v62 = vshrl.u32 %v10009_v6, 16  ;;  %v7423_v16 = vadd.s32 %v1048_v17, %v1044_v9  ;;  %v10018_v44 = vld [vmem:[#allocation76_spill] sm:$0xff] }
 0x23f   :  { %v1054_v21 = vadd.s32 %v1053_v58, %v1043_v25  ;;  %vm810_vm10 = vcmp.lt.s32.totalorder %v10011_v36, 0  ;;  %v2686_v10 = vmul.f32 %v2670_v47, %v652_v26  ;;  %v782_v53 = vmul.f32 -0.001358992, %v781_v15 }
 0x240   :  { %v789_v35 = vmul.f32 -0.00019511016, %v781_v15  ;;  %v4780_v60 = vadd.s32 4294967294, %v914_v30  ;;  %vm4811_vm2 = vcmp.lt.s32.totalorder %v7368_v4, 0  ;;  %v7427_v42 = vand.u32 3, %v797_v37 }
 0x241   :  { %v1055_v50 = vadd.s32 %v1054_v21, %v1045_v62  ;;  %vm1058_vm14 = vc.u32 %v7402_v12, %v7423_v16  ;;  %v7431_v0 = vadd.f32 %v2702_v52, %v2686_v10  ;;  %v783_v6 = vadd.f32 0.041655596, %v782_v53  ;;  %v10022_v62 = vld [vmem:[#allocation51_spill] sm:$0xff]  ;;  %v10023_v21 = vld [vmem:[#allocation58_spill] sm:$0xff] }
 0x242   :  { %v790_v9 = vadd.f32 0.008332121, %v789_v35  ;;  %vm4781_vm3 = vcmp.lt.s32.totalorder %v4780_v60, 0  ;;  %v902_v17 = vadd.s32 %v7342_v34, %v7327_v46  ;;  %v10014_v27 = vshll.u32 %v10013_v1, 16 }
 0x243   :  { %10012 = vst [vmem:[#allocation97_spill] sm:$0xff] %v7431_v0  ;;  %v917_v49 = vsel %vm4781_vm3, 0, %v4780_v60  ;;  %v1059_v63 = vadd.s32 1, %v1055_v50  ;;  %v9741_v3 = vmax.f32 %v7431_v0, 0.0  ;;  %v784_v48 = vmul.f32 %v783_v6, %v781_v15 }
 0x244   :  { %vm7438_vm4 = vc.u32 %v10015_v2, %v10014_v27  ;;  %v791_v25 = vmul.f32 %v790_v9, %v781_v15  ;;  %v918_v58 = vsub.s32 32, %v917_v49  ;;  %v922_v29 = vsub.s32 4294967266, %v917_v49 }
 0x245   :  { %v932_v39 = vsub.s32 4, %v7383_v11  ;;  %v1060_v47 = vsel %vm1058_vm14, %v1059_v63, %v1055_v50  ;;  %v1197_v46 = vshll.u32 %v10018_v44, 16  ;;  %2774 = vmatmul.f32.vlgmr.msra.gmra.mxu1 %v9741_v3  ;;  %v785_v34 = vadd.f32 -0.4999988, %v784_v48 }
 0x246   :  { %v792_v57 = vadd.f32 -0.16666654, %v791_v25  ;;  %v10019_v30 = vand.u32 2147483647, %v10011_v36  ;;  %v920_v52 = vshrl.u32 %v902_v17, %v918_v58  ;;  %v10024_v10 = vmul.u32 %v10022_v62, %v10023_v21 }
 0x247   :  { %v7459_v35 = vsel %vm4811_vm2, 0, %v7368_v4  ;;  %v919_v60 = vshll.u32 %v7393_v56, %v917_v49  ;;  %v923_v50 = vadd.s32 127, %v922_v29  ;;  %v1184_v6 = vsel %vm7438_vm4, 1, %v9824_v38  ;;  %v10025_v56 = vld [vmem:[#allocation75_spill] sm:$0xff]  ;;  %v10027_v29 = vld [vmem:[#allocation77_spill] sm:$0xff] }
 0x248   :  { %vm7449_vm5 = vcmp.le.f32.partialorder %v10019_v30, 0.7853982  ;;  %v1061_v53 = vadd.s32 %v1060_v47, %v10024_v10  ;;  %v786_v9 = vmul.f32 %v785_v34, %v781_v15  ;;  %v793_v63 = vmul.f32 %v792_v57, %v781_v15  ;;  %v10026_v15 = vld [vmem:[#allocation84_spill] sm:$0xff] }
 0x249   :  { %vm799_vm8 = vcmp.lt.s32.totalorder %v7427_v42, 2  ;;  %vm800_vm9 = vcmp.eq.s32.totalorder %v7427_v42, 0  ;;  %vm796_vm11 = vweird.f32 %v9994_v18  ;;  %v921_v27 = vor.u32 %v920_v52, %v919_v60  ;;  %v10029_v60 = vld [vmem:[#allocation78_spill] sm:$0xff] }
 0x24a   :  { %v1062_v17 = vadd.s32 536870912, %v1061_v53  ;;  %v924_v2 = vshll.u32 %v923_v50, 23  ;;  %v933_v4 = vsel %vm810_vm10, %v932_v39, %v7383_v11  ;;  %vm1201_vm13 = vc.u32 %v10025_v56, %v1197_v46  ;;  %v10028_v39 = vld [vmem:[#allocation73_spill] sm:$0xff] }
 0x24b   :  { %v787_v49 = vadd.f32 1.0, %v786_v9  ;;  %v794_v37 = vadd.f32 1.0, %v793_v63  ;;  %v1186_v25 = vadd.s32 %v1184_v6, %v10026_v15  ;;  %v1199_v47 = vshll.u32 %v10027_v29, 16 }
 0x24c   :  { %v7472_v48 = vshrl.u32 %v1062_v17, 30  ;;  %v925_v58 = vor.u32 4788187, %v924_v2  ;;  %v1202_v34 = vsel %vm1201_vm13, 1, %v9824_v38  ;;  %v1203_v57 = vadd.s32 %v1197_v46, %v10025_v56 }
 0x24d   :  { %v795_v30 = vmul.f32 %v794_v37, %v7411_v59  ;;  %v804_v52 = vxor.u32 2147483648, %v787_v49  ;;  %v1176_v62 = vshrl.u32 %v10028_v39, 16  ;;  %v928_v10 = vcvt.s32.f32 %v921_v27  ;;  %v2671_v37 = vld [vmem:[%s9603_s4 + $0x18] sm:$0xff] }
 0x24e   :  { %v1064_v11 = vshll.u32 %v7472_v48, 30  ;;  %v926_v21 = vand.u32 2147483647, %v925_v58  ;;  %v1204_v50 = vadd.s32 %v1202_v34, %v10029_v60  ;;  %vm1205_vm1 = vc.u32 %v1203_v57, %v1199_v47 }
 0x24f   :  { %v801_v6 = vxor.u32 2147483648, %v795_v30  ;;  %vm803_vm2 = vcmp.eq.s32.totalorder %v7427_v42, 2  ;;  %v1187_v63 = vadd.s32 %v1186_v25, %v1176_v62  ;;  %v935_v59 = vsel %vm7449_vm5, 0, %v933_v4 }
 0x250   :  { %v7483_v9 = vsub.s32 %v1061_v53, %v1064_v11  ;;  %v929_v17 = vmul.f32 %v928_v10, %v926_v21  ;;  %v1178_v46 = vshrl.u32 %v10013_v1, 16  ;;  %v1206_v2 = vsel %vm1205_vm1, 1, %v9824_v38 }
 0x251   :  { %v802_v27 = vsel %vm800_vm9, %v787_v49, %v801_v6  ;;  %v805_v56 = vsel %vm803_vm2, %v804_v52, %v795_v30  ;;  %v1198_v1 = vshrl.u32 %v10018_v44, 16  ;;  %v1208_v25 = vadd.s32 %v1206_v2, %v1204_v50  ;;  %v2703_v49 = vld [vmem:[%s9604_s5 + $0x18] sm:$0xff] }
 0x252   :  { %vm1066_vm14 = vcmp.lt.s32.totalorder %v7483_v9, 0  ;;  %v1067_v53 = vsub.s32 0, %v7483_v9  ;;  %v806_v15 = vsel %vm799_vm8, %v802_v27, %v805_v56  ;;  %v930_v4 = vxor.u32 2147483648, %v929_v17  ;;  %v10031_v2 = vld [vmem:[#allocation82_spill] sm:$0xff] }
 0x253   :  { %v807_v58 = vsel %vm796_vm11, nan, %v806_v15  ;;  %v7505_v30 = vadd.s32 %v1187_v63, %v1178_v46  ;;  %v1200_v52 = vshrl.u32 %v10027_v29, 16  ;;  %v1209_v44 = vadd.s32 %v1208_v25, %v1198_v1  ;;  %v10033_v56 = vld [vmem:[#allocation90_spill] sm:$0xff]  ;;  %v10035_v25 = vld [vmem:[#allocation25_spill] sm:$0xff] }
 0x254   :  { %v1068_v34 = vsel %vm1066_vm14, %v1067_v53, %v7483_v9  ;;  %v2687_v11 = vmul.f32 %v2671_v37, %v807_v58  ;;  %v931_v42 = vsel %vm810_vm10, %v930_v4, %v929_v17  ;;  %v7512_v18 = vadd.s32 %v7132_v61, %v7126_v7  ;;  %v10034_v37 = vld [vmem:[#allocation87_spill] sm:$0xff] }
 0x255   :  { %v1069_v39 = vclz %v1068_v34  ;;  %v2468_v62 = vsub.s32 32, %v7459_v35  ;;  %v7518_v21 = vsel %vm7449_vm5, %v10011_v36, %v931_v42  ;;  %v7520_v10 = vadd.s32 %v1203_v57, %v1199_v47 }
 0x256   :  { %v7522_v29 = vadd.f32 %v2703_v49, %v2687_v11  ;;  %v936_v60 = vmul.f32 %v7518_v21, %v7518_v21  ;;  %v1210_v6 = vadd.s32 %v1209_v44, %v1200_v52  ;;  %v2469_v7 = vshll.u32 %v7258_v45, %v7459_v35  ;;  %v10036_v44 = vld [vmem:[#allocation62_spill] sm:$0xff] }
 0x257   :  { %v4783_v50 = vadd.s32 4294967294, %v1069_v39  ;;  %v2472_v61 = vsub.s32 4294967266, %v7459_v35  ;;  %v952_v63 = vadd.s32 3, %v935_v59  ;;  %vm1213_vm10 = vc.u32 %v7505_v30, %v7520_v10 }
 0x258   :  { %10030 = vst [vmem:[#allocation16_spill] sm:$0xff] %v7522_v29  ;;  %v9740_v26 = vmax.f32 %v7522_v29, 0.0  ;;  %v937_v47 = vmul.f32 -0.001358992, %v936_v60  ;;  %v944_v57 = vmul.f32 -0.00019511016, %v936_v60  ;;  %v1057_v4 = vadd.s32 %v7423_v16, %v7402_v12 }
 0x259   :  { %vm4784_vm3 = vcmp.lt.s32.totalorder %v4783_v50, 0  ;;  %v1214_v46 = vadd.s32 1, %v1210_v6  ;;  %v10032_v27 = vshll.u32 %v10031_v2, 16  ;;  %v1352_v53 = vshll.u32 %v10034_v37, 16 }
 0x25a   :  { %v1072_v17 = vsel %vm4784_vm3, 0, %v4783_v50  ;;  %2777 = vmatmul.f32.gmra.mxu1 %v9740_v26  ;;  %v938_v59 = vadd.f32 0.041655596, %v937_v47  ;;  %v945_v15 = vadd.f32 0.008332121, %v944_v57  ;;  %vm965_vm5 = vcmp.lt.s32.totalorder %v10035_v25, 0 }
 0x25b   :  { %vm1338_vm4 = vc.u32 %v10033_v56, %v10032_v27  ;;  %v1073_v1 = vsub.s32 32, %v1072_v17  ;;  %v953_v58 = vand.u32 3, %v952_v63  ;;  %v1077_v49 = vsub.s32 4294967266, %v1072_v17  ;;  %v10037_v50 = vld [vmem:[#allocation70_spill] sm:$0xff]  ;;  %v10039_v27 = vld [vmem:[#allocation88_spill] sm:$0xff] }
 0x25c   :  { %v1215_v34 = vsel %vm1213_vm10, %v1214_v46, %v1210_v6  ;;  %v1339_v52 = vsel %vm1338_vm4, 1, %v9824_v38  ;;  %v939_v11 = vmul.f32 %v938_v59, %v936_v60  ;;  %v946_v42 = vmul.f32 %v945_v15, %v936_v60  ;;  %v10040_v63 = vld [vmem:[#allocation86_spill] sm:$0xff]  ;;  %v10044_v15 = vld [vmem:[#allocation91_spill] sm:$0xff] }
 0x25d   :  { %v1075_v39 = vshrl.u32 %v1057_v4, %v1073_v1  ;;  %v10038_v47 = vmul.u32 %v10036_v44, %v10037_v50  ;;  %v1074_v12 = vshll.u32 %v7483_v9, %v1072_v17  ;;  %v1078_v16 = vadd.s32 127, %v1077_v49 }
 0x25e   :  { %v1354_v56 = vshll.u32 %v10039_v27, 16  ;;  %vm1356_vm8 = vc.u32 %v10040_v63, %v1352_v53  ;;  %v940_v26 = vadd.f32 -0.4999988, %v939_v11  ;;  %v947_v3 = vadd.f32 -0.16666654, %v946_v42 }
 0x25f   :  { %v1216_v57 = vadd.s32 %v1215_v34, %v10038_v47  ;;  %v10041_v6 = vand.u32 2147483647, %v10035_v25  ;;  %v1341_v4 = vadd.s32 %v1339_v52, %v10044_v15  ;;  %v1076_v1 = vor.u32 %v1075_v39, %v1074_v12  ;;  %v10045_v47 = vld [vmem:[#allocation81_spill] sm:$0xff] }
 0x260   :  { %v1079_v34 = vshll.u32 %v1078_v16, 23  ;;  %v1357_v9 = vsel %vm1356_vm8, 1, %v9824_v38  ;;  %v1358_v17 = vadd.s32 %v1352_v53, %v10040_v63  ;;  %v941_v49 = vmul.f32 %v940_v26, %v936_v60 }
 0x261   :  { %vm7553_vm9 = vcmp.le.f32.partialorder %v10041_v6, 0.7853982  ;;  %v1217_v59 = vadd.s32 536870912, %v1216_v57  ;;  %v948_v44 = vmul.f32 %v947_v3, %v936_v60  ;;  %vm954_vm11 = vcmp.lt.s32.totalorder %v953_v58, 2 }
 0x262   :  { %v1087_v11 = vsub.s32 4, %v7472_v48  ;;  %vm951_vm13 = vweird.f32 %v10011_v36  ;;  %v1080_v50 = vor.u32 4788187, %v1079_v34  ;;  %v1331_v6 = vshrl.u32 %v10045_v47, 16 }
 0x263   :  { %v7561_v42 = vshrl.u32 %v1217_v59, 30  ;;  %v1359_v52 = vadd.s32 %v1357_v9, %v10046_v51  ;;  %vm1360_vm1 = vc.u32 %v1358_v17, %v1354_v56  ;;  %v942_v39 = vadd.f32 1.0, %v941_v49 }
 0x264   :  { %v949_v12 = vadd.f32 1.0, %v948_v44  ;;  %vm955_vm2 = vcmp.eq.s32.totalorder %v953_v58, 0  ;;  %v1081_v26 = vand.u32 2147483647, %v1080_v50  ;;  %v1083_v3 = vcvt.s32.f32 %v1076_v1 }
 0x265   :  { %v1219_v53 = vshll.u32 %v7561_v42, 30  ;;  %v1342_v60 = vadd.s32 %v1341_v4, %v1331_v6  ;;  %v1361_v16 = vsel %vm1360_vm1, 1, %v9824_v38  ;;  %v959_v59 = vxor.u32 2147483648, %v942_v39 }
 0x266   :  { %v950_v63 = vmul.f32 %v949_v12, %v7518_v21  ;;  %v1088_v15 = vsel %vm965_vm5, %v1087_v11, %v7472_v48  ;;  %v1084_v51 = vmul.f32 %v1083_v3, %v1081_v26  ;;  %v1333_v9 = vshrl.u32 %v10031_v2, 16  ;;  %v2672_v2 = vld [vmem:[%s9603_s4 + $0x20] sm:$0xff] }
 0x267   :  { %v7572_v34 = vsub.s32 %v1216_v57, %v1219_v53  ;;  %v1353_v49 = vshrl.u32 %v10034_v37, 16  ;;  %v1363_v44 = vadd.s32 %v1361_v16, %v1359_v52  ;;  %vm958_vm14 = vcmp.eq.s32.totalorder %v953_v58, 2 }
 0x268   :  { %v956_v50 = vxor.u32 2147483648, %v950_v63  ;;  %v1085_v21 = vxor.u32 2147483648, %v1084_v51  ;;  %v1090_v1 = vsel %vm7553_vm9, 0, %v1088_v15  ;;  %v7580_v47 = vadd.s32 %v1342_v60, %v1333_v9  ;;  %v2704_v60 = vld [vmem:[%s9604_s5 + $0x20] sm:$0xff] }
 0x269   :  { %vm1221_vm10 = vcmp.lt.s32.totalorder %v7572_v34, 0  ;;  %v1222_v4 = vsub.s32 0, %v7572_v34  ;;  %v1364_v48 = vadd.s32 %v1363_v44, %v1353_v49  ;;  %v960_v11 = vsel %vm958_vm14, %v959_v59, %v950_v63 }
 0x26a   :  { %v957_v57 = vsel %vm955_vm2, %v942_v39, %v956_v50  ;;  %v1355_v6 = vshrl.u32 %v10039_v27, 16  ;;  %v1086_v12 = vsel %vm965_vm5, %v1085_v21, %v1084_v51  ;;  %v7591_v26 = vadd.s32 %v1358_v17, %v1354_v56 }
 0x26b   :  { %v1223_v37 = vsel %vm1221_vm10, %v1222_v4, %v7572_v34  ;;  %v961_v52 = vsel %vm954_vm11, %v957_v57, %v960_v11  ;;  %v2473_v39 = vadd.s32 127, %v2472_v61  ;;  %v1089_v58 = vsel %vm7553_vm9, %v10035_v25, %v1086_v12  ;;  %v10050_v57 = vld [vmem:[#allocation79_spill] sm:$0xff] }
 0x26c   :  { %v1224_v53 = vclz %v1223_v37  ;;  %v962_v3 = vsel %vm951_vm13, nan, %v961_v52  ;;  %v1365_v27 = vadd.s32 %v1364_v48, %v1355_v6  ;;  %v1091_v63 = vmul.f32 %v1089_v58, %v1089_v58  ;;  %v10049_v48 = vld [vmem:[#allocation72_spill] sm:$0xff]  ;;  %v10052_v37 = vld [vmem:[#allocation99_spill] sm:$0xff] }
 0x26d   :  { %v2688_v16 = vmul.f32 %v2672_v2, %v962_v3  ;;  %vm1368_vm3 = vc.u32 %v7580_v47, %v7591_v26  ;;  %v2470_v36 = vshrl.u32 %v7512_v18, %v2468_v62  ;;  %v1107_v61 = vadd.s32 3, %v1090_v1 }
 0x26e   :  { %v4786_v59 = vadd.s32 4294967294, %v1224_v53  ;;  %v1369_v56 = vadd.s32 1, %v1365_v27  ;;  %v10047_v17 = vshll.u32 %v6597_v32, 16  ;;  %v1092_v46 = vmul.f32 -0.001358992, %v1091_v63 }
 0x26f   :  { %v7611_v15 = vadd.f32 %v2704_v60, %v2688_v16  ;;  %v1099_v51 = vmul.f32 -0.00019511016, %v1091_v63  ;;  %v2474_v9 = vshll.u32 %v2473_v39, 23  ;;  %v1212_v49 = vadd.s32 %v7520_v10, %v7505_v30 }
 0x270   :  { %vm1493_vm4 = vc.u32 %v6962_v41, %v10047_v17  ;;  %vm4787_vm5 = vcmp.lt.s32.totalorder %v4786_v59, 0  ;;  %v1370_v50 = vsel %vm1368_vm3, %v1369_v56, %v1365_v27  ;;  %v1093_v18 = vadd.f32 0.041655596, %v1092_v46 }
 0x271   :  { %10048 = vst [vmem:[#allocation101_spill] sm:$0xff] %v7611_v15  ;;  %v1227_v44 = vsel %vm4787_vm5, 0, %v4786_v59  ;;  %v9750_v4 = vmax.f32 %v7611_v15, 0.0  ;;  %v1100_v62 = vadd.f32 0.008332121, %v1099_v51  ;;  %v10051_v41 = vmul.u32 %v10049_v48, %v10050_v57 }
 0x272   :  { %v1228_v21 = vsub.s32 32, %v1227_v44  ;;  %v1232_v1 = vsub.s32 4294967266, %v1227_v44  ;;  %v1494_v2 = vsel %vm1493_vm4, 1, %v9824_v38  ;;  %v1507_v6 = vshll.u32 %v10052_v37, 16 }
 0x273   :  { %v1371_v11 = vadd.s32 %v1370_v50, %v10051_v41  ;;  %2780 = vmatmul.f32.gmra.mxu1 %v9750_v4  ;;  %v1094_v30 = vmul.f32 %v1093_v18, %v1091_v63  ;;  %v1101_v10 = vmul.f32 %v1100_v62, %v1091_v63  ;;  %v1108_v52 = vand.u32 3, %v1107_v61  ;;  %v10053_v61 = vld [vmem:[#allocation98_spill] sm:$0xff] }
 0x274   :  { %v1230_v12 = vshrl.u32 %v1212_v49, %v1228_v21  ;;  %v7626_v53 = vor.u32 %v2470_v36, %v2469_v7  ;;  %v1229_v39 = vshll.u32 %v7572_v34, %v1227_v44  ;;  %v1233_v3 = vadd.s32 127, %v1232_v1  ;;  %v10054_v49 = vld [vmem:[#allocation38_spill] sm:$0xff]  ;;  %v10056_v1 = vld [vmem:[#allocation104_spill] sm:$0xff] }
 0x275   :  { %v1372_v60 = vadd.s32 536870912, %v1371_v11  ;;  %v7629_v27 = vor.u32 4788187, %v2474_v9  ;;  %v1095_v16 = vadd.f32 -0.4999988, %v1094_v30  ;;  %v1496_v56 = vadd.s32 %v1494_v2, %v6965_v31  ;;  %v10055_v9 = vld [vmem:[#allocation102_spill] sm:$0xff] }
 0x276   :  { %v1102_v59 = vadd.f32 -0.16666654, %v1101_v10  ;;  %v1231_v17 = vor.u32 %v1230_v12, %v1229_v39  ;;  %v1234_v46 = vshll.u32 %v1233_v3, 23  ;;  %vm1511_vm8 = vc.u32 %v10053_v61, %v1507_v6 }
 0x277   :  { %v7632_v51 = vshrl.u32 %v1372_v60, 30  ;;  %vm1120_vm9 = vcmp.lt.s32.totalorder %v10054_v49, 0  ;;  %v1096_v45 = vmul.f32 %v1095_v16, %v1091_v63  ;;  %vm1109_vm11 = vcmp.lt.s32.totalorder %v1108_v52, 2 }
 0x278   :  { %v1103_v35 = vmul.f32 %v1102_v59, %v1091_v63  ;;  %v1486_v7 = vshrl.u32 %v6594_v22, 16  ;;  %v1512_v34 = vsel %vm1511_vm8, 1, %v9824_v38  ;;  %vm1106_vm13 = vweird.f32 %v10035_v25 }
 0x279   :  { %v1235_v36 = vor.u32 4788187, %v1234_v46  ;;  %v1374_v31 = vshll.u32 %v7632_v51, 30  ;;  %v1509_v44 = vshll.u32 %v10055_v9, 16  ;;  %v1513_v50 = vadd.s32 %v1507_v6, %v10053_v61  ;;  %v2673_v46 = vld [vmem:[%s9603_s4 + $0x28] sm:$0xff] }
 0x27a   :  { %v1097_v18 = vadd.f32 1.0, %v1096_v45  ;;  %v1104_v62 = vadd.f32 1.0, %v1103_v35  ;;  %v1497_v21 = vadd.s32 %v1496_v56, %v1486_v7  ;;  %v1514_v48 = vadd.s32 %v1512_v34, %v10056_v1  ;;  %v10061_v1 = vld [vmem:[#allocation94_spill] sm:$0xff] }
 0x27b   :  { %v1236_v63 = vand.u32 2147483647, %v1235_v36  ;;  %v1238_v57 = vcvt.s32.f32 %v1231_v17  ;;  %v7643_v41 = vsub.s32 %v1371_v11, %v1374_v31  ;;  %vm1515_vm1 = vc.u32 %v1513_v50, %v1509_v44  ;;  %v2705_v31 = vld [vmem:[%s9604_s5 + $0x28] sm:$0xff] }
 0x27c   :  { %v1105_v22 = vmul.f32 %v1104_v62, %v1089_v58  ;;  %vm1110_vm2 = vcmp.eq.s32.totalorder %v1108_v52, 0  ;;  %v1114_v2 = vxor.u32 2147483648, %v1097_v18  ;;  %v1516_v30 = vsel %vm1515_vm1, 1, %v9824_v38 }
 0x27d   :  { %v1239_v10 = vmul.f32 %v1238_v57, %v1236_v63  ;;  %vm1376_vm14 = vcmp.lt.s32.totalorder %v7643_v41, 0  ;;  %v1377_v6 = vsub.s32 0, %v7643_v41  ;;  %v1488_v12 = vshrl.u32 %v6597_v32, 16 }
 0x27e   :  { %v1111_v39 = vxor.u32 2147483648, %v1105_v22  ;;  %vm1113_vm10 = vcmp.eq.s32.totalorder %v1108_v52, 2  ;;  %v1508_v3 = vshrl.u32 %v10052_v37, 16  ;;  %v1518_v60 = vadd.s32 %v1516_v30, %v1514_v48 }
 0x27f   :  { %v1240_v11 = vxor.u32 2147483648, %v1239_v10  ;;  %v1242_v16 = vsub.s32 4, %v7561_v42  ;;  %v1378_v58 = vsel %vm1376_vm14, %v1377_v6, %v7643_v41  ;;  %v7652_v59 = vadd.s32 %v1497_v21, %v1488_v12  ;;  %v10060_v21 = vld [vmem:[#allocation92_spill] sm:$0xff] }
 0x280   :  { %v1112_v56 = vsel %vm1110_vm2, %v1097_v18, %v1111_v39  ;;  %v1115_v17 = vsel %vm1113_vm10, %v1114_v2, %v1105_v22  ;;  %v1379_v61 = vclz %v1378_v58  ;;  %v1519_v32 = vadd.s32 %v1518_v60, %v1508_v3 }
 0x281   :  { %v1116_v45 = vsel %vm1109_vm11, %v1112_v56, %v1115_v17  ;;  %v10057_v37 = vand.u32 2147483647, %v10054_v49  ;;  %v1241_v7 = vsel %vm1120_vm9, %v1240_v11, %v1239_v10  ;;  %v1510_v34 = vshrl.u32 %v10055_v9, 16 }
 0x282   :  { %v1117_v36 = vsel %vm1106_vm13, nan, %v1116_v45  ;;  %v4789_v18 = vadd.s32 4294967294, %v1379_v61  ;;  %v7677_v62 = vadd.s32 %v1513_v50, %v1509_v44  ;;  %vm9749_vm4 = vcmp.lt.s32.totalorder %v10060_v21, 0  ;;  %v10062_v44 = vld [vmem:[#allocation48_spill] sm:$0xff]  ;;  %v2679_v45 = vld [vmem:[%s9603_s4 + $0x58] sm:$0xff] }
 0x283   :  { %vm7660_vm3 = vcmp.le.f32.partialorder %v10057_v37, 0.7853982  ;;  %vm9748_vm5 = vcmp.lt.s32.totalorder %v10061_v1, 0  ;;  %v2478_v9 = vcvt.s32.f32 %v7626_v53  ;;  %v2689_v25 = vmul.f32 %v2673_v46, %v1117_v36  ;;  %v10070_v61 = vld [vmem:[#allocation100_spill] sm:$0xff] }
 0x284   :  { %v7675_v52 = vsel %vm7660_vm3, %v10054_v49, %v1241_v7  ;;  %v1520_v63 = vadd.s32 %v1519_v32, %v1510_v34  ;;  %v2476_v57 = vand.u32 2147483647, %v7629_v27  ;;  %v1243_v22 = vsel %vm1120_vm9, %v1242_v16, %v7561_v42  ;;  %v10074_v7 = vld [vmem:[#allocation83_spill] sm:$0xff] }
 0x285   :  { %v1246_v48 = vmul.f32 %v7675_v52, %v7675_v52  ;;  %vm4790_vm8 = vcmp.lt.s32.totalorder %v4789_v18, 0  ;;  %vm1523_vm11 = vc.u32 %v7652_v59, %v7677_v62  ;;  %vm1275_vm13 = vcmp.lt.s32.totalorder %v10062_v44, 0  ;;  %v10075_v34 = vld [vmem:[#allocation95_spill] sm:$0xff] }
 0x286   :  { %v7691_v50 = vadd.f32 %v2705_v31, %v2689_v25  ;;  %v1382_v30 = vsel %vm4790_vm8, 0, %v4789_v18  ;;  %v1367_v10 = vadd.s32 %v7591_v26, %v7580_v47  ;;  %v1524_v12 = vadd.s32 1, %v1520_v63 }
 0x287   :  { %v1247_v53 = vmul.f32 -0.001358992, %v1246_v48  ;;  %v1254_v2 = vmul.f32 -0.00019511016, %v1246_v48  ;;  %v1383_v6 = vsub.s32 32, %v1382_v30  ;;  %v1387_v27 = vsub.s32 4294967266, %v1382_v30 }
 0x288   :  { %10063 = vst [vmem:[#allocation10_spill] sm:$0xff] %v7691_v50  ;;  %v10064_v39 = vand.u32 2147483647, %v10060_v21  ;;  %v9746_v3 = vmax.f32 %v7691_v50, 0.0  ;;  %v1245_v60 = vsel %vm7660_vm3, 0, %v1243_v22  ;;  %v1384_v58 = vshll.u32 %v7643_v41, %v1382_v30 }
 0x289   :  { %v1248_v11 = vadd.f32 0.041655596, %v1247_v53  ;;  %v1255_v16 = vadd.f32 0.008332121, %v1254_v2  ;;  %v1385_v56 = vshrl.u32 %v1367_v10, %v1383_v6  ;;  %v1388_v47 = vadd.s32 127, %v1387_v27 }
 0x28a   :  { %vm7697_vm9 = vcmp.le.f32.partialorder %v10064_v39, 0.7853982  ;;  %v1525_v26 = vsel %vm1523_vm11, %v1524_v12, %v1520_v63  ;;  %v10067_v17 = vand.u32 2147483647, %v10061_v1  ;;  %v10071_v32 = vand.u32 2147483647, %v10070_v61  ;;  %2783 = vmatmul.f32.gmra.mxu1 %v9746_v3 }
 0x28b   :  { %v2325_v41 = vxor.u32 2147483648, %v7333_v20  ;;  %v1249_v37 = vmul.f32 %v1248_v11, %v1246_v48  ;;  %v1256_v35 = vmul.f32 %v1255_v16, %v1246_v48  ;;  %v10076_v36 = vmul.u32 %v10074_v7, %v10075_v34  ;;  %v10094_v3 = vld [vmem:[#allocation43_spill] sm:$0xff] }
 0x28c   :  { %vm7710_vm1 = vcmp.le.f32.partialorder %v10067_v17, 0.7853982  ;;  %vm7716_vm2 = vcmp.le.f32.partialorder %v10071_v32, 0.7853982  ;;  %v2479_v18 = vmul.f32 %v2478_v9, %v2476_v57  ;;  %v1386_v25 = vor.u32 %v1385_v56, %v1384_v58 }
 0x28d   :  { %v1526_v31 = vadd.s32 %v1525_v26, %v10076_v36  ;;  %v1389_v63 = vshll.u32 %v1388_v47, 23  ;;  %v1397_v22 = vsub.s32 4, %v7632_v51  ;;  %v1250_v53 = vadd.f32 -0.4999988, %v1249_v37 }
 0x28e   :  { %v1257_v2 = vadd.f32 -0.16666654, %v1256_v35  ;;  %v1262_v30 = vadd.s32 3, %v1245_v60  ;;  %v2016_v6 = vsel %vm9749_vm4, %v2015_v33, %v7194_v14  ;;  %v2171_v9 = vsel %vm9748_vm5, %v2170_v23, %v7208_v55 }
 0x28f   :  { %v1527_v10 = vadd.s32 536870912, %v1526_v31  ;;  %vm9744_vm14 = vcmp.lt.s32.totalorder %v10070_v61, 0  ;;  %v1390_v57 = vor.u32 4788187, %v1389_v63  ;;  %v1251_v12 = vmul.f32 %v1250_v53, %v1246_v48  ;;  %v2674_v53 = vld [vmem:[%s9603_s4 + $0x30] sm:$0xff] }
 0x290   :  { %v2326_v27 = vsel %vm9744_vm14, %v2325_v41, %v7333_v20  ;;  %v1258_v39 = vmul.f32 %v1257_v2, %v1246_v48  ;;  %v2480_v11 = vxor.u32 2147483648, %v2479_v18  ;;  %v1393_v14 = vcvt.s32.f32 %v1386_v25 }
 0x291   :  { %v7741_v60 = vshrl.u32 %v1527_v10, 30  ;;  %v1391_v16 = vand.u32 2147483647, %v1390_v57  ;;  %v1398_v33 = vsel %vm1275_vm13, %v1397_v22, %v7632_v51  ;;  %v1252_v58 = vadd.f32 1.0, %v1251_v12 }
 0x292   :  { %v1259_v55 = vadd.f32 1.0, %v1258_v39  ;;  %v1263_v23 = vand.u32 3, %v1262_v30  ;;  %v7750_v20 = vsel %vm7697_vm9, %v10060_v21, %v2016_v6  ;;  %vm9745_vm10 = vcmp.lt.s32.totalorder %v6936_v54, 0  ;;  %v2706_v39 = vld [vmem:[%s9604_s5 + $0x30] sm:$0xff] }
 0x293   :  { %v1529_v56 = vshll.u32 %v7741_v60, 30  ;;  %v10077_v48 = vand.u32 2147483647, %v10062_v44  ;;  %v1394_v26 = vmul.f32 %v1393_v14, %v1391_v16  ;;  %v1269_v17 = vxor.u32 2147483648, %v1252_v58 }
 0x294   :  { %v1260_v51 = vmul.f32 %v1259_v55, %v7675_v52  ;;  %v7767_v37 = vsel %vm7710_vm1, %v10061_v1, %v2171_v9  ;;  %v7772_v35 = vsel %vm7716_vm2, %v10070_v61, %v2326_v27  ;;  %v2481_v7 = vsel %vm9745_vm10, %v2480_v11, %v2479_v18  ;;  %v10083_v11 = vld [vmem:[#allocation71_spill] sm:$0xff] }
 0x295   :  { %vm7755_vm3 = vcmp.le.f32.partialorder %v10077_v48, 0.7853982  ;;  %v7762_v41 = vsub.s32 %v1526_v31, %v1529_v56  ;;  %v1395_v52 = vxor.u32 2147483648, %v1394_v26  ;;  %vm1264_vm8 = vcmp.lt.s32.totalorder %v1263_v23, 2 }
 0x296   :  { %v1400_v32 = vsel %vm7755_vm3, 0, %v1398_v33  ;;  %v1266_v34 = vxor.u32 2147483648, %v1260_v51  ;;  %vm1265_vm0 = vcmp.eq.s32.totalorder %v1263_v23, 0  ;;  %vm1268_vm14 = vcmp.eq.s32.totalorder %v1263_v23, 2 }
 0x297   :  { %vm1531_vm11 = vcmp.lt.s32.totalorder %v7762_v41, 0  ;;  %v1532_v36 = vsub.s32 0, %v7762_v41  ;;  %v1396_v31 = vsel %vm1275_vm13, %v1395_v52, %v1394_v26  ;;  %v1417_v25 = vadd.s32 3, %v1400_v32  ;;  %v10085_v52 = vld [vmem:[#allocation41_spill] sm:$0xff] }
 0x298   :  { %v1267_v63 = vsel %vm1265_vm0, %v1252_v58, %v1266_v34  ;;  %v1270_v22 = vsel %vm1268_vm14, %v1269_v17, %v1260_v51  ;;  %v7786_v18 = vsel %vm7755_vm3, %v10062_v44, %v1396_v31  ;;  %vm1261_vm10 = vweird.f32 %v10054_v49  ;;  %v10088_v31 = vld [vmem:[#allocation44_spill] sm:$0xff] }
 0x299   :  { %v1533_v2 = vsel %vm1531_vm11, %v1532_v36, %v7762_v41  ;;  %v1271_v30 = vsel %vm1264_vm8, %v1267_v63, %v1270_v22  ;;  %v1401_v10 = vmul.f32 %v7786_v18, %v7786_v18  ;;  %v7794_v9 = vmul.f32 %v7249_v5, %v7249_v5  ;;  %v10087_v36 = vld [vmem:[#allocation47_spill] sm:$0xff] }
 0x29a   :  { %v1534_v6 = vclz %v1533_v2  ;;  %v7798_v57 = vmul.f32 %v7750_v20, %v7750_v20  ;;  %v10080_v27 = vand.u32 2147483647, %v6936_v54  ;;  %v1272_v49 = vsel %vm1261_vm10, nan, %v1271_v30 }
 0x29b   :  { %vm1430_vm13 = vcmp.lt.s32.totalorder %v10083_v11, 0  ;;  %v2690_v16 = vmul.f32 %v2674_v53, %v1272_v49  ;;  %v1402_v14 = vmul.f32 -0.001358992, %v1401_v10  ;;  %v1409_v33 = vmul.f32 -0.00019511016, %v1401_v10 }
 0x29c   :  { %vm7802_vm0 = vcmp.le.f32.partialorder %v10080_v27, 0.7853982  ;;  %v4792_v58 = vadd.s32 4294967294, %v1534_v6  ;;  %v7812_v55 = vmul.f32 %v7767_v37, %v7767_v37  ;;  %v7816_v23 = vmul.f32 %v7772_v35, %v7772_v35 }
 0x29d   :  { %v7821_v56 = vsel %vm7802_vm0, %v6936_v54, %v2481_v7  ;;  %v7823_v48 = vand.u32 3, %v1417_v25  ;;  %v7825_v47 = vadd.f32 %v2706_v39, %v2690_v16  ;;  %v1403_v26 = vadd.f32 0.041655596, %v1402_v14 }
 0x29e   :  { %v1410_v51 = vadd.f32 0.008332121, %v1409_v33  ;;  %vm4793_vm14 = vcmp.lt.s32.totalorder %v4792_v58, 0  ;;  %v1522_v17 = vadd.s32 %v7677_v62, %v7652_v59  ;;  %v10086_v34 = vshll.u32 %v10085_v52, 16 }
 0x29f   :  { %10084 = vst [vmem:[#allocation21_spill] sm:$0xff] %v7825_v47  ;;  %v1537_v32 = vsel %vm4793_vm14, 0, %v4792_v58  ;;  %v2592_v63 = vshll.u32 %v10088_v31, 16  ;;  %v9747_v7 = vmax.f32 %v7825_v47, 0.0  ;;  %v1404_v22 = vmul.f32 %v1403_v26, %v1401_v10  ;;  %v10092_v58 = vld [vmem:[#allocation93_spill] sm:$0xff] }
 0x2a0   :  { %vm2578_vm10 = vc.u32 %v10087_v36, %v10086_v34  ;;  %v1411_v25 = vmul.f32 %v1410_v51, %v1401_v10  ;;  %v1538_v53 = vsub.s32 32, %v1537_v32  ;;  %v7836_v2 = vmul.f32 %v7821_v56, %v7821_v56  ;;  %v10093_v51 = vld [vmem:[#allocation45_spill] sm:$0xff] }
 0x2a1   :  { %v10089_v30 = vand.u32 2147483647, %v10083_v11  ;;  %v1542_v62 = vsub.s32 4294967266, %v1537_v32  ;;  %v1552_v6 = vsub.s32 4, %v7741_v60  ;;  %2786 = vmatmul.f32.gmra.mxu1 %v9747_v7  ;;  %v1405_v27 = vadd.f32 -0.4999988, %v1404_v22 }
 0x2a2   :  { %v1412_v49 = vadd.f32 -0.16666654, %v1411_v25  ;;  %v1540_v39 = vshrl.u32 %v1522_v17, %v1538_v53  ;;  %v2579_v16 = vsel %vm2578_vm10, 1, %v9824_v38  ;;  %v1539_v14 = vshll.u32 %v7762_v41, %v1537_v32 }
 0x2a3   :  { %vm7840_vm3 = vcmp.le.f32.partialorder %v10089_v30, 0.7853982  ;;  %v1543_v33 = vadd.s32 127, %v1542_v62  ;;  %v1707_v26 = vsub.s32 4, %v10092_v58  ;;  %v2594_v34 = vshll.u32 %v10093_v51, 16 }
 0x2a4   :  { %v1406_v36 = vmul.f32 %v1405_v27, %v1401_v10  ;;  %v1413_v30 = vmul.f32 %v1412_v49, %v1401_v10  ;;  %vm1419_vm8 = vcmp.lt.s32.totalorder %v7823_v48, 2  ;;  %vm2596_vm11 = vc.u32 %v10094_v3, %v2592_v63  ;;  %v10095_v10 = vld [vmem:[#allocation40_spill] sm:$0xff] }
 0x2a5   :  { %v7854_v7 = vadd.s32 %v2592_v63, %v10094_v3  ;;  %vm1416_vm14 = vweird.f32 %v10062_v44  ;;  %vm1420_vm10 = vcmp.eq.s32.totalorder %v7823_v48, 0  ;;  %v1541_v17 = vor.u32 %v1540_v39, %v1539_v14  ;;  %v10096_v63 = vld [vmem:[#allocation52_spill] sm:$0xff] }
 0x2a6   :  { %v1544_v41 = vshll.u32 %v1543_v33, 23  ;;  %v1553_v32 = vsel %vm1430_vm13, %v1552_v6, %v7741_v60  ;;  %v1407_v22 = vadd.f32 1.0, %v1406_v36  ;;  %v1414_v25 = vadd.f32 1.0, %v1413_v30  ;;  %v10097_v36 = vld [vmem:[#allocation96_spill] sm:$0xff] }
 0x2a7   :  { %vm1423_vm5 = vcmp.eq.s32.totalorder %v7823_v48, 2  ;;  %v2571_v53 = vshrl.u32 %v10095_v10, 16  ;;  %v1708_v3 = vsel %vm1585_vm12, %v1707_v26, %v10092_v58  ;;  %v2581_v27 = vadd.s32 %v2579_v16, %v10096_v63 }
 0x2a8   :  { %v1545_v62 = vor.u32 4788187, %v1544_v41  ;;  %v2597_v49 = vsel %vm2596_vm11, 1, %v9824_v38  ;;  %v1415_v39 = vmul.f32 %v1414_v25, %v7786_v18  ;;  %v1424_v14 = vxor.u32 2147483648, %v1407_v22  ;;  %v10099_v25 = vld [vmem:[#allocation46_spill] sm:$0xff] }
 0x2a9   :  { %v1555_v60 = vsel %vm7840_vm3, 0, %v1553_v32  ;;  %vm2600_vm4 = vc.u32 %v7854_v7, %v2594_v34  ;;  %v1548_v33 = vcvt.s32.f32 %v1541_v17  ;;  %v1862_v30 = vsub.s32 4, %v10097_v36 }
 0x2aa   :  { %v1546_v6 = vand.u32 2147483647, %v1545_v62  ;;  %v2573_v58 = vshrl.u32 %v10085_v52, 16  ;;  %v1421_v26 = vxor.u32 2147483648, %v1415_v39  ;;  %v1710_v41 = vsel %vm6929_vm15, 0, %v1708_v3  ;;  %v2675_v52 = vld [vmem:[%s9603_s4 + $0x38] sm:$0xff] }
 0x2ab   :  { %v2593_v18 = vshrl.u32 %v10088_v31, 16  ;;  %v2599_v10 = vadd.s32 %v2597_v49, %v10099_v25  ;;  %v1572_v32 = vadd.s32 3, %v1555_v60  ;;  %v2582_v4 = vadd.s32 %v2581_v27, %v2571_v53  ;;  %v10101_v25 = vld [vmem:[#allocation103_spill] sm:$0xff] }
 0x2ac   :  { %v1549_v63 = vmul.f32 %v1548_v33, %v1546_v6  ;;  %v2601_v47 = vsel %vm2600_vm4, 1, %v9824_v38  ;;  %v1422_v17 = vsel %vm1420_vm10, %v1407_v22, %v1421_v26  ;;  %v1425_v62 = vsel %vm1423_vm5, %v1424_v14, %v1415_v39  ;;  %v2707_v39 = vld [vmem:[%s9604_s5 + $0x38] sm:$0xff] }
 0x2ad   :  { %v1712_v3 = vmul.f32 -0.001358992, %v7243_v24  ;;  %v1719_v31 = vmul.f32 -0.00019511016, %v7243_v24  ;;  %v1426_v49 = vsel %vm1419_vm8, %v1422_v17, %v1425_v62  ;;  %v1727_v27 = vadd.s32 3, %v1710_v41 }
 0x2ae   :  { %v1550_v53 = vxor.u32 2147483648, %v1549_v63  ;;  %v1863_v38 = vsel %vm1740_vm7, %v1862_v30, %v10097_v36  ;;  %v1427_v22 = vsel %vm1416_vm14, nan, %v1426_v49  ;;  %v2603_v6 = vadd.s32 %v2601_v47, %v2599_v10 }
 0x2af   :  { %v1713_v14 = vadd.f32 0.041655596, %v1712_v3  ;;  %v1720_v60 = vadd.f32 0.008332121, %v1719_v31  ;;  %v2691_v33 = vmul.f32 %v2675_v52, %v1427_v22  ;;  %v7902_v26 = vadd.s32 %v2582_v4, %v2573_v58 }
 0x2b0   :  { %v1551_v48 = vsel %vm1430_vm13, %v1550_v53, %v1549_v63  ;;  %v2595_v16 = vshrl.u32 %v10093_v51, 16  ;;  %v1865_v47 = vsel %vm7189_vm6, 0, %v1863_v38  ;;  %v7918_v58 = vand.u32 3, %v1727_v27 }
 0x2b1   :  { %v7908_v44 = vsel %vm7840_vm3, %v10083_v11, %v1551_v48  ;;  %v1714_v36 = vmul.f32 %v1713_v14, %v7243_v24  ;;  %v1721_v30 = vmul.f32 %v1720_v60, %v7243_v24  ;;  %v7914_v41 = vadd.f32 %v2707_v39, %v2691_v33 }
 0x2b2   :  { %v1556_v4 = vmul.f32 %v7908_v44, %v7908_v44  ;;  %v2017_v10 = vsub.s32 4, %v10101_v25  ;;  %v7921_v63 = vand.u32 3, %v1572_v32  ;;  %v2604_v62 = vadd.s32 %v2603_v6, %v2593_v18 }
 0x2b3   :  { %10100 = vst [vmem:[#allocation24_spill] sm:$0xff] %v7914_v41  ;;  %v1715_v59 = vadd.f32 -0.4999988, %v1714_v36  ;;  %v1722_v17 = vadd.f32 -0.16666654, %v1721_v30  ;;  %v9760_v52 = vmax.f32 %v7914_v41, 0.0  ;;  %v7939_v36 = vadd.s32 %v7854_v7, %v2594_v34 }
 0x2b4   :  { %v1557_v3 = vmul.f32 -0.001358992, %v1556_v4  ;;  %v1564_v31 = vmul.f32 -0.00019511016, %v1556_v4  ;;  %v1882_v28 = vadd.s32 3, %v1865_v47  ;;  %vm1730_vm12 = vcmp.eq.s32.totalorder %v7918_v58, 0 }
 0x2b5   :  { %v1716_v49 = vmul.f32 %v1715_v59, %v7243_v24  ;;  %v1723_v53 = vmul.f32 %v1722_v17, %v7243_v24  ;;  %v1867_v38 = vmul.f32 -0.001358992, %v7794_v9  ;;  %v1874_v27 = vmul.f32 -0.00019511016, %v7794_v9  ;;  %2789 = vmatmul.f32.gmra.mxu1 %v9760_v52 }
 0x2b6   :  { %v1558_v32 = vadd.f32 0.041655596, %v1557_v3  ;;  %v1565_v22 = vadd.f32 0.008332121, %v1564_v31  ;;  %vm10102_vm15 = vcmp.lt.s32.totalorder %v10060_v21, 0  ;;  %vm1733_vm7 = vcmp.eq.s32.totalorder %v7918_v58, 2 }
 0x2b7   :  { %v2018_v18 = vsel %vm10102_vm15, %v2017_v10, %v10101_v25  ;;  %v1724_v39 = vadd.f32 1.0, %v1723_v53  ;;  %v1868_v14 = vadd.f32 0.041655596, %v1867_v38  ;;  %v1875_v24 = vadd.f32 0.008332121, %v1874_v27 }
 0x2b8   :  { %v2605_v60 = vadd.s32 %v2604_v62, %v2595_v16  ;;  %v1559_v6 = vmul.f32 %v1558_v32, %v1556_v4  ;;  %v1566_v33 = vmul.f32 %v1565_v22, %v1556_v4  ;;  %v1717_v48 = vadd.f32 1.0, %v1716_v49  ;;  %v10103_v62 = vld [vmem:[#allocation105_spill] sm:$0xff] }
 0x2b9   :  { %vm1729_vm6 = vcmp.lt.s32.totalorder %v7918_v58, 2  ;;  %v1725_v30 = vmul.f32 %v1724_v39, %v6988_v40  ;;  %v1869_v47 = vmul.f32 %v1868_v14, %v7794_v9  ;;  %v1876_v25 = vmul.f32 %v1875_v24, %v7794_v9 }
 0x2ba   :  { %v7944_v10 = vand.u32 3, %v1882_v28  ;;  %v1560_v59 = vadd.f32 -0.4999988, %v1559_v6  ;;  %v1567_v16 = vadd.f32 -0.16666654, %v1566_v33  ;;  %v2020_v17 = vsel %vm7697_vm9, 0, %v2018_v18 }
 0x2bb   :  { %v2172_v3 = vsub.s32 4, %v10103_v62  ;;  %vm1575_vm4 = vcmp.eq.s32.totalorder %v7921_v63, 0  ;;  %vm1578_vm5 = vcmp.eq.s32.totalorder %v7921_v63, 2  ;;  %vm1726_vm13 = vweird.f32 %v6109_v13  ;;  %v2708_v13 = vld [vmem:[%s9604_s5 + $0x40] sm:$0xff] }
 0x2bc   :  { %v1731_v40 = vxor.u32 2147483648, %v1725_v30  ;;  %v1870_v7 = vadd.f32 -0.4999988, %v1869_v47  ;;  %v1877_v51 = vadd.f32 -0.16666654, %v1876_v25  ;;  %v2609_v34 = vadd.s32 1, %v2605_v60 }
 0x2bd   :  { %v1561_v31 = vmul.f32 %v1560_v59, %v1556_v4  ;;  %v1568_v28 = vmul.f32 %v1567_v16, %v1556_v4  ;;  %vm1574_vm3 = vcmp.lt.s32.totalorder %v7921_v63, 2  ;;  %v1734_v49 = vxor.u32 2147483648, %v1717_v48 }
 0x2be   :  { %vm2608_vm9 = vc.u32 %v7902_v26, %v7939_v36  ;;  %vm1571_vm8 = vweird.f32 %v10083_v11  ;;  %v1871_v42 = vmul.f32 %v1870_v7, %v7794_v9  ;;  %v1878_v53 = vmul.f32 %v1877_v51, %v7794_v9  ;;  %v2709_v11 = vld [vmem:[%s9604_s5 + $0x48] sm:$0xff] }
 0x2bf   :  { %v2022_v38 = vmul.f32 -0.001358992, %v7798_v57  ;;  %v2037_v27 = vadd.s32 3, %v2020_v17  ;;  %v1562_v32 = vadd.f32 1.0, %v1561_v31  ;;  %v1569_v22 = vadd.f32 1.0, %v1568_v28  ;;  %v2676_v28 = vld [vmem:[%s9603_s4 + $0x40] sm:$0xff] }
 0x2c0   :  { %v1732_v4 = vsel %vm1730_vm12, %v1717_v48, %v1731_v40  ;;  %vm1885_vm11 = vcmp.eq.s32.totalorder %v7944_v10, 0  ;;  %v2029_v18 = vmul.f32 -0.00019511016, %v7798_v57  ;;  %v1879_v39 = vadd.f32 1.0, %v1878_v53 }
 0x2c1   :  { %v2023_v14 = vadd.f32 0.041655596, %v2022_v38  ;;  %vm10104_vm14 = vcmp.lt.s32.totalorder %v10061_v1, 0  ;;  %v2610_v6 = vsel %vm2608_vm9, %v2609_v34, %v2605_v60  ;;  %v1570_v9 = vmul.f32 %v1569_v22, %v7908_v44  ;;  %v10105_v60 = vld [vmem:[#allocation29_spill] sm:$0xff] }
 0x2c2   :  { %v2173_v24 = vsel %vm10104_vm14, %v2172_v3, %v10103_v62  ;;  %v1579_v33 = vxor.u32 2147483648, %v1562_v32  ;;  %v1735_v47 = vsel %vm1733_vm7, %v1734_v49, %v1725_v30  ;;  %v2030_v25 = vadd.f32 0.008332121, %v2029_v18  ;;  %v10106_v62 = vld [vmem:[#allocation37_spill] sm:$0xff] }
 0x2c3   :  { %v1736_v48 = vsel %vm1729_vm6, %v1732_v4, %v1735_v47  ;;  %v1872_v59 = vadd.f32 1.0, %v1871_v42  ;;  %v1880_v16 = vmul.f32 %v1879_v39, %v7249_v5  ;;  %vm1884_vm10 = vcmp.lt.s32.totalorder %v7944_v10, 2  ;;  %v2677_v42 = vld [vmem:[%s9603_s4 + $0x48] sm:$0xff] }
 0x2c4   :  { %v2024_v17 = vmul.f32 %v2023_v14, %v7798_v57  ;;  %v1576_v40 = vxor.u32 2147483648, %v1570_v9  ;;  %vm1888_vm12 = vcmp.eq.s32.totalorder %v7944_v10, 2  ;;  %v2031_v44 = vmul.f32 %v2030_v25, %v7798_v57 }
 0x2c5   :  { %v10107_v3 = vmul.u32 %v10105_v60, %v10106_v62  ;;  %v1886_v7 = vxor.u32 2147483648, %v1880_v16  ;;  %v7981_v51 = vand.u32 3, %v2037_v27  ;;  %v2175_v5 = vsel %vm7710_vm1, 0, %v2173_v24  ;;  %v10109_v60 = vld [vmem:[#allocation14_spill] sm:$0xff] }
 0x2c6   :  { %v2025_v58 = vadd.f32 -0.4999988, %v2024_v17  ;;  %v1577_v34 = vsel %vm1575_vm4, %v1562_v32, %v1576_v40  ;;  %v1580_v31 = vsel %vm1578_vm5, %v1579_v33, %v1570_v9  ;;  %v1737_v49 = vsel %vm1726_vm13, nan, %v1736_v48 }
 0x2c7   :  { %v7979_v30 = vadd.s32 %v2610_v6, %v10107_v3  ;;  %vm1881_vm15 = vweird.f32 %v9933_v43  ;;  %v2032_v46 = vadd.f32 -0.16666654, %v2031_v44  ;;  %v1581_v53 = vsel %vm1574_vm3, %v1577_v34, %v1580_v31  ;;  %v2678_v31 = vld [vmem:[%s9603_s4 + $0x50] sm:$0xff] }
 0x2c8   :  { %v1889_v38 = vxor.u32 2147483648, %v1872_v59  ;;  %v2026_v27 = vmul.f32 %v2025_v58, %v7798_v57  ;;  %v2177_v32 = vmul.f32 -0.001358992, %v7812_v55  ;;  %v1582_v22 = vsel %vm1571_vm8, nan, %v1581_v53 }
 0x2c9   :  { %v2033_v4 = vmul.f32 %v2032_v46, %v7798_v57  ;;  %v2184_v18 = vmul.f32 -0.00019511016, %v7812_v55  ;;  %v2612_v39 = vadd.s32 536870912, %v7979_v30  ;;  %v2692_v63 = vmul.f32 %v2676_v28, %v1582_v22 }
 0x2ca   :  { %v2693_v14 = vmul.f32 %v2677_v42, %v1737_v49  ;;  %v1887_v24 = vsel %vm1885_vm11, %v1872_v59, %v1886_v7  ;;  %v2178_v6 = vadd.f32 0.041655596, %v2177_v32  ;;  %v2027_v9 = vadd.f32 1.0, %v2026_v27 }
 0x2cb   :  { %v2034_v33 = vadd.f32 1.0, %v2033_v4  ;;  %vm2039_vm1 = vcmp.lt.s32.totalorder %v7981_v51, 2  ;;  %vm2040_vm7 = vcmp.eq.s32.totalorder %v7981_v51, 0  ;;  %v2185_v57 = vadd.f32 0.008332121, %v2184_v18 }
 0x2cc   :  { %v8017_v47 = vadd.f32 %v2708_v13, %v2692_v63  ;;  %v1890_v25 = vsel %vm1888_vm12, %v1889_v38, %v1880_v16  ;;  %v2179_v48 = vmul.f32 %v2178_v6, %v7812_v55  ;;  %v2192_v59 = vadd.s32 3, %v2175_v5 }
 0x2cd   :  { %v1891_v17 = vsel %vm1884_vm10, %v1887_v24, %v1890_v25  ;;  %v2035_v40 = vmul.f32 %v2034_v33, %v7750_v20  ;;  %v2186_v44 = vmul.f32 %v2185_v57, %v7812_v55  ;;  %v2327_v62 = vsub.s32 4, %v10109_v60 }
 0x2ce   :  { %10108 = vst [vmem:[#allocation26_spill] sm:$0xff] %v8017_v47  ;;  %v9759_v3 = vmax.f32 %v8017_v47, 0.0  ;;  %v8028_v7 = vadd.f32 %v2709_v11, %v2693_v14  ;;  %vm2036_vm6 = vweird.f32 %v10060_v21  ;;  %v2180_v58 = vadd.f32 -0.4999988, %v2179_v48 }
 0x2cf   :  { %v8031_v16 = vshrl.u32 %v2612_v39, 30  ;;  %v2041_v34 = vxor.u32 2147483648, %v2035_v40  ;;  %vm2043_vm4 = vcmp.eq.s32.totalorder %v7981_v51, 2  ;;  %v2044_v10 = vxor.u32 2147483648, %v2027_v9 }
 0x2d0   :  { %10110 = vst [vmem:[#allocation8_spill] sm:$0xff] %v8028_v7  ;;  %v2187_v5 = vadd.f32 -0.16666654, %v2186_v44  ;;  %2792 = vmatmul.f32.gmra.mxu1 %v9759_v3  ;;  %v1892_v20 = vsel %vm1881_vm15, nan, %v1891_v17  ;;  %v2181_v28 = vmul.f32 %v2180_v58, %v7812_v55  ;;  %v2332_v49 = vmul.f32 -0.001358992, %v7816_v23 }
 0x2d1   :  { %v2339_v42 = vmul.f32 -0.00019511016, %v7816_v23  ;;  %v2042_v46 = vsel %vm2040_vm7, %v2027_v9, %v2041_v34  ;;  %v2193_v38 = vand.u32 3, %v2192_v59  ;;  %v2614_v27 = vshll.u32 %v8031_v16, 30  ;;  %v8420_v3 = vld [vmem:[%s9600_s1 + $0x40] sm:$0xff] }
 0x2d2   :  { %v2188_v53 = vmul.f32 %v2187_v5, %v7812_v55  ;;  %v9758_v43 = vmax.f32 %v8028_v7, 0.0  ;;  %vm10111_vm5 = vcmp.lt.s32.totalorder %v10070_v61, 0  ;;  %v2333_v22 = vadd.f32 0.041655596, %v2332_v49  ;;  %v2710_v55 = vld [vmem:[%s9604_s5 + $0x50] sm:$0xff]  ;;  %10142 = vst [vmem:[#allocation5_spill] sm:$0xff] %v8420_v3 }
 0x2d3   :  { %v2328_v32 = vsel %vm10111_vm5, %v2327_v62, %v10109_v60  ;;  %v2340_v13 = vadd.f32 0.008332121, %v2339_v42  ;;  %v2694_v4 = vmul.f32 %v2678_v31, %v1892_v20  ;;  %v2045_v18 = vsel %vm2043_vm4, %v2044_v10, %v2035_v40 }
 0x2d4   :  { %v2189_v39 = vadd.f32 1.0, %v2188_v53  ;;  %v8055_v63 = vsub.s32 %v7979_v30, %v2614_v27  ;;  %v2046_v14 = vsel %vm2039_vm1, %v2042_v46, %v2045_v18  ;;  %v2182_v24 = vadd.f32 1.0, %v2181_v28 }
 0x2d5   :  { %v2334_v6 = vmul.f32 %v2333_v22, %v7816_v23  ;;  %v2341_v11 = vmul.f32 %v2340_v13, %v7816_v23  ;;  %vm2194_vm13 = vcmp.lt.s32.totalorder %v2193_v38, 2  ;;  %v2330_v33 = vsel %vm7716_vm2, 0, %v2328_v32  ;;  %v2711_v32 = vld [vmem:[%s9604_s5 + $0x58] sm:$0xff] }
 0x2d6   :  { %v2190_v9 = vmul.f32 %v2189_v39, %v7767_v37  ;;  %v2617_v30 = vsub.s32 0, %v8055_v63  ;;  %v2482_v48 = vsub.s32 4, %v7204_v19  ;;  %vm2616_vm3 = vcmp.lt.s32.totalorder %v8055_v63, 0 }
 0x2d7   :  { %v2335_v57 = vadd.f32 -0.4999988, %v2334_v6  ;;  %v2342_v25 = vadd.f32 -0.16666654, %v2341_v11  ;;  %v8070_v51 = vadd.f32 %v2710_v55, %v2694_v4  ;;  %v2047_v59 = vsel %vm2036_vm6, nan, %v2046_v14 }
 0x2d8   :  { %vm2195_vm9 = vcmp.eq.s32.totalorder %v2193_v38, 0  ;;  %v2196_v17 = vxor.u32 2147483648, %v2190_v9  ;;  %2795 = vmatmul.f32.gmra.mxu1 %v9758_v43  ;;  %v2199_v37 = vxor.u32 2147483648, %v2182_v24  ;;  %v2487_v60 = vmul.f32 -0.001358992, %v7836_v2 }
 0x2d9   :  { %10112 = vst [vmem:[#allocation9_spill] sm:$0xff] %v8070_v51  ;;  %v2336_v40 = vmul.f32 %v2335_v57, %v7816_v23  ;;  %v2343_v44 = vmul.f32 %v2342_v25, %v7816_v23  ;;  %vm2198_vm2 = vcmp.eq.s32.totalorder %v2193_v38, 2  ;;  %v2347_v62 = vadd.s32 3, %v2330_v33 }
 0x2da   :  { %v2494_v21 = vmul.f32 -0.00019511016, %v7836_v2  ;;  %v2618_v58 = vsel %vm2616_vm3, %v2617_v30, %v8055_v63  ;;  %v2197_v34 = vsel %vm2195_vm9, %v2182_v24, %v2196_v17  ;;  %vm10113_vm8 = vcmp.lt.s32.totalorder %v6936_v54, 0 }
 0x2db   :  { %v2344_v10 = vadd.f32 1.0, %v2343_v44  ;;  %v2483_v5 = vsel %vm10113_vm8, %v2482_v48, %v7204_v19  ;;  %v2488_v20 = vadd.f32 0.041655596, %v2487_v60  ;;  %v9757_v31 = vmax.f32 %v8070_v51, 0.0 }
 0x2dc   :  { %v2695_v28 = vmul.f32 %v2679_v45, %v2047_v59  ;;  %v2495_v49 = vadd.f32 0.008332121, %v2494_v21  ;;  %v2619_v23 = vclz %v2618_v58  ;;  %v2200_v42 = vsel %vm2198_vm2, %v2199_v37, %v2190_v9  ;;  %v2712_v37 = vld [vmem:[%s9604_s5 + $0x60] sm:$0xff] }
 0x2dd   :  { %v2337_v46 = vadd.f32 1.0, %v2336_v40  ;;  %v2345_v53 = vmul.f32 %v2344_v10, %v7772_v35  ;;  %v2489_v27 = vmul.f32 %v2488_v20, %v7836_v2  ;;  %v2201_v22 = vsel %vm2194_vm13, %v2197_v34, %v2200_v42 }
 0x2de   :  { %v2496_v19 = vmul.f32 %v2495_v49, %v7836_v2  ;;  %v4813_v13 = vadd.s32 4294967294, %v2619_v23  ;;  %vm2191_vm11 = vweird.f32 %v10061_v1  ;;  %v2348_v4 = vand.u32 3, %v2347_v62  ;;  %v2680_v1 = vld [vmem:[%s9603_s4 + $0x60] sm:$0xff] }
 0x2df   :  { %v2490_v18 = vadd.f32 -0.4999988, %v2489_v27  ;;  %v2607_v39 = vadd.s32 %v7939_v36, %v7902_v26  ;;  %v2351_v55 = vxor.u32 2147483648, %v2345_v53  ;;  %v2485_v35 = vsel %vm7802_vm0, 0, %v2483_v5 }
 0x2e0   :  { %v2497_v14 = vadd.f32 -0.16666654, %v2496_v19  ;;  %vm4814_vm14 = vcmp.lt.s32.totalorder %v4813_v13, 0  ;;  %2798 = vmatmul.f32.gmra.mxu1 %v9757_v31  ;;  %v8102_v38 = vadd.f32 %v2711_v32, %v2695_v28  ;;  %v2202_v24 = vsel %vm2191_vm11, nan, %v2201_v22  ;;  %v2681_v28 = vld [vmem:[%s9603_s4 + $0x68] sm:$0xff]  ;;  %v10116_v32 = vld [vmem:[#allocation11_spill] sm:$0xff] }
 0x2e1   :  { %v2354_v6 = vxor.u32 2147483648, %v2337_v46  ;;  %v2622_v11 = vsel %vm4814_vm14, 0, %v4813_v13  ;;  %v2491_v26 = vmul.f32 %v2490_v18, %v7836_v2  ;;  %vm2350_vm0 = vcmp.eq.s32.totalorder %v2348_v4, 0  ;;  %v2749_v19 = vld [vmem:[%s9606_s7 + $0x8] sm:$0xff]  ;;  %v2769_v13 = vpop.f32.mrf.mxu0 }
 0x2e2   :  { %10114 = vst [vmem:[#allocation20_spill] sm:$0xff] %v8102_v38  ;;  %v2498_v36 = vmul.f32 %v2497_v14, %v7836_v2  ;;  %v2623_v12 = vsub.s32 32, %v2622_v11  ;;  %v2624_v9 = vshll.u32 %v8055_v63, %v2622_v11  ;;  %v2502_v33 = vadd.s32 3, %v2485_v35  ;;  %2879 = vmatpush.msrb.mxu2 %v2749_v19 }
 0x2e3   :  { %v2627_v30 = vsub.s32 4294967266, %v2622_v11  ;;  %vm2349_vm10 = vcmp.lt.s32.totalorder %v2348_v4, 2  ;;  %v2352_v57 = vsel %vm2350_vm0, %v2337_v46, %v2351_v55  ;;  %v9756_v59 = vmax.f32 %v8102_v38, 0.0 }
 0x2e4   :  { %v2499_v25 = vadd.f32 1.0, %v2498_v36  ;;  %v2625_v48 = vshrl.u32 %v2607_v39, %v2623_v12  ;;  %v2696_v17 = vmul.f32 %v2680_v1, %v2202_v24  ;;  %vm2353_vm12 = vcmp.eq.s32.totalorder %v2348_v4, 2  ;;  %v2748_v4 = vld [vmem:[%s9606_s7] sm:$0xff]  ;;  %v2682_v1 = vld [vmem:[%s9603_s4 + $0x70] sm:$0xff] }
 0x2e5   :  { %v2628_v45 = vadd.s32 127, %v2627_v30  ;;  %v2355_v2 = vsel %vm2353_vm12, %v2354_v6, %v2345_v53  ;;  %v2492_v40 = vadd.f32 1.0, %v2491_v26  ;;  %v2503_v62 = vand.u32 3, %v2502_v33  ;;  %2880 = vmatpush.msrb.mxu2 %v2748_v4  ;;  %v2714_v30 = vld [vmem:[%s9604_s5 + $0x70] sm:$0xff] }
 0x2e6   :  { %v2500_v63 = vmul.f32 %v2499_v25, %v7821_v56  ;;  %v2626_v44 = vor.u32 %v2625_v48, %v2624_v9  ;;  %v2356_v60 = vsel %vm2349_vm10, %v2352_v57, %v2355_v2  ;;  %v8117_v34 = vadd.f32 %v2712_v37, %v2696_v17 }
 0x2e7   :  { %v2629_v21 = vshll.u32 %v2628_v45, 23  ;;  %vm2346_vm15 = vweird.f32 %v10070_v61  ;;  %v2509_v56 = vxor.u32 2147483648, %v2492_v40  ;;  %vm2505_vm1 = vcmp.eq.s32.totalorder %v2503_v62, 0  ;;  %v2713_v61 = vld [vmem:[%s9604_s5 + $0x68] sm:$0xff] }
 0x2e8   :  { %v2506_v58 = vxor.u32 2147483648, %v2500_v63  ;;  %2801 = vmatmul.f32.gmra.mxu1 %v9756_v59  ;;  %10115 = vst [vmem:[#allocation22_spill] sm:$0xff] %v8117_v34  ;;  %v2633_v5 = vcvt.s32.f32 %v2626_v44  ;;  %v2357_v20 = vsel %vm2346_vm15, nan, %v2356_v60  ;;  %vm2508_vm7 = vcmp.eq.s32.totalorder %v2503_v62, 2 }
 0x2e9   :  { %v2630_v10 = vor.u32 4788187, %v2629_v21  ;;  %v9755_v42 = vmax.f32 %v8117_v34, 0.0  ;;  %v2697_v46 = vmul.f32 %v2681_v28, %v2357_v20  ;;  %v2637_v27 = vsub.s32 4, %v8031_v16  ;;  %v2772_v48 = vpop.f32.mrf.mxu0 }
 0x2ea   :  { %v2507_v23 = vsel %vm2505_vm1, %v2492_v40, %v2506_v58  ;;  %vm2515_vm6 = vcmp.lt.s32.totalorder %v10116_v32, 0  ;;  %vm2504_vm4 = vcmp.lt.s32.totalorder %v2503_v62, 2  ;;  %v2510_v22 = vsel %vm2508_vm7, %v2509_v56, %v2500_v63  ;;  %v2775_v40 = vpop.f32.mrf.mxu1 }
 0x2eb   :  { %v2631_v49 = vand.u32 2147483647, %v2630_v10  ;;  %v2511_v18 = vsel %vm2504_vm4, %v2507_v23, %v2510_v22  ;;  %v10117_v39 = vand.u32 2147483647, %v10116_v32  ;;  %v8143_v14 = vadd.f32 %v2713_v61, %v2697_v46  ;;  %v2715_v22 = vld [vmem:[%s9604_s5 + $0x78] sm:$0xff]  ;;  %s5242_s5 = smov 32  }
 0x2ec   :  { %vm2501_vm13 = vweird.f32 %v6936_v54  ;;  %v2638_v6 = vsel %vm2515_vm6, %v2637_v27, %v8031_v16  ;;  %vm10121_vm3 = vcmask 130048   ;;  %vm2656_vm0 = vweird.f32 %v10116_v32 }
 0x2ed   :  { %v2634_v53 = vmul.f32 %v2633_v5, %v2631_v49  ;;  %vm8137_vm5 = vcmp.le.f32.partialorder %v10117_v39, 0.7853982  ;;  %10120 = vst [vmem:[#allocation27_spill] sm:$0xff] %v8143_v14  ;;  %v2512_v11 = vsel %vm2501_vm13, nan, %v2511_v18  ;;  %4815 = vmatmul.msk.f32.vlgmr.msrb.gmra.mxu2 %vm10121_vm3, %v2769_v13  ;;  %v9754_v54 = vmax.f32 %v8143_v14, 0.0  ;;  %vm10123_vm9 = vmmov %vm10121_vm3 }
 0x2ee   :  { %v2640_v12 = vsel %vm8137_vm5, 0, %v2638_v6  ;;  %v2698_v9 = vmul.f32 %v2682_v1, %v2512_v11  ;;  %vm10124_vm11 = vmmov %vm10121_vm3 }
 0x2ef   :  { %v2635_v35 = vxor.u32 2147483648, %v2634_v53  ;;  %v2657_v17 = vadd.s32 3, %v2640_v12  ;;  %vm10126_vm10 = vmmov %vm10121_vm3 }
 0x2f0   :  { %2804 = vmatmul.f32.gmra.mxu1 %v9755_v42  ;;  %v8162_v45 = vadd.f32 %v2714_v30, %v2698_v9  ;;  %vm10127_vm12 = vmmov %vm10121_vm3  ;;  %v2933_v30 = vld [vmem:[%s9605_s6 + $0x18] sm:$0xff] }
 0x2f1   :  { %v2636_v24 = vsel %vm2515_vm6, %v2635_v35, %v2634_v53  ;;  %v2658_v60 = vand.u32 3, %v2657_v17  ;;  %v2683_v53 = vld [vmem:[%s9603_s4 + $0x78] sm:$0xff]  ;;  %vm10128_vm15 = vmmov %vm10121_vm3  ;;  %s5241_s4 = smov 16  }
 0x2f2   :  { %v2639_v26 = vsel %vm8137_vm5, %v10116_v32, %v2636_v24  ;;  %10122 = vst [vmem:[#allocation19_spill] sm:$0xff] %v8162_v45  ;;  %v9753_v62 = vmax.f32 %v8162_v45, 0.0  ;;  %v2778_v23 = vpop.f32.mrf.mxu1  ;;  %vm10129_vm1 = vmmov %vm10121_vm3 }
 0x2f3   :  { %v2641_v36 = vmul.f32 %v2639_v26, %v2639_v26  ;;  %vm2663_vm2 = vcmp.eq.s32.totalorder %v2658_v60, 2  ;;  %vm2660_vm8 = vcmp.eq.s32.totalorder %v2658_v60, 0  ;;  %vm2659_vm14 = vcmp.lt.s32.totalorder %v2658_v60, 2  ;;  %vm10130_vm7 = vmmov %vm10129_vm1 }
 0x2f4   :  { %vm10131_vm6 = vmmov %vm10129_vm1 }
 0x2f5   :  { %v2642_v16 = vmul.f32 -0.001358992, %v2641_v36  ;;  %v2649_v33 = vmul.f32 -0.00019511016, %v2641_v36  ;;  %4816 = vmatmul.msk.f32.gmra.mxu2 %vm10123_vm9, %v2772_v48  ;;  %vm10132_vm4 = vmmov %vm10129_vm1  ;;  %v2934_v48 = vld [vmem:[%s9605_s6 + $0x20] sm:$0xff] }
 0x2f6   :  { %vm10133_vm5 = vmmov %vm10129_vm1 }
 0x2f7   :  { %v2643_v57 = vadd.f32 0.041655596, %v2642_v16  ;;  %v2650_v25 = vadd.f32 0.008332121, %v2649_v33  ;;  %vm10134_vm13 = vmmov %vm10129_vm1 }
 0x2f8   :  { %2807 = vmatmul.f32.gmra.mxu1 %v9754_v54  ;;  %vm10135_vm3 = vmmov %vm10129_vm1 }
 0x2f9   :  { %v2644_v37 = vmul.f32 %v2643_v57, %v2641_v36  ;;  %v2651_v2 = vmul.f32 %v2650_v25, %v2641_v36  ;;  %vm10136_vm9 = vmmov %vm10129_vm1 }
 0x2fa   :  { %v2781_v18 = vpop.f32.mrf.mxu1 }
 0x2fb   :  { %v2645_v63 = vadd.f32 -0.4999988, %v2644_v37  ;;  %v2652_v44 = vadd.f32 -0.16666654, %v2651_v2  ;;  %v2935_v2 = vld [vmem:[%s9605_s6 + $0x28] sm:$0xff] }
 0x2fd   :  { %v2646_v21 = vmul.f32 %v2645_v63, %v2641_v36  ;;  %v2653_v58 = vmul.f32 %v2652_v44, %v2641_v36  ;;  %4817 = vmatmul.msk.f32.gmra.mxu2 %vm10124_vm11, %v2775_v40  ;;  %v2936_v44 = vld [vmem:[%s9605_s6 + $0x30] sm:$0xff] }
 0x2ff   :  { %v2647_v10 = vadd.f32 1.0, %v2646_v21  ;;  %v2654_v5 = vadd.f32 1.0, %v2653_v58  ;;  %v2937_v58 = vld [vmem:[%s9605_s6 + $0x38] sm:$0xff] }
 0x300   :  { %2810 = vmatmul.f32.gmra.mxu1 %v9753_v62 }
 0x301   :  { %v2655_v20 = vmul.f32 %v2654_v5, %v2639_v26  ;;  %v2664_v28 = vxor.u32 2147483648, %v2647_v10 }
 0x303   :  { %v2661_v56 = vxor.u32 2147483648, %v2655_v20  ;;  %v2665_v49 = vsel %vm2663_vm2, %v2664_v28, %v2655_v20  ;;  %vm10137_vm2 = vmmov %vm10129_vm1  ;;  %v2938_v20 = vld [vmem:[%s9605_s6 + $0x40] sm:$0xff] }
 0x305   :  { %v2662_v46 = vsel %vm2660_vm8, %v2647_v10, %v2661_v56  ;;  %4818 = vmatmul.msk.f32.gmra.mxu2 %vm10126_vm10, %v2778_v23  ;;  %vm10138_vm8 = vmmov %vm10129_vm1 }
 0x306   :  { %v2666_v27 = vsel %vm2659_vm14, %v2662_v46, %v2665_v49  ;;  %v2939_v49 = vld [vmem:[%s9605_s6 + $0x48] sm:$0xff] }
 0x307   :  { %v2667_v61 = vsel %vm2656_vm0, nan, %v2666_v27  ;;  %v2784_v32 = vpop.f32.mrf.mxu1 }
 0x308   :  { %v2699_v19 = vmul.f32 %v2683_v53, %v2667_v61  ;;  %v2940_v53 = vld [vmem:[%s9605_s6 + $0x50] sm:$0xff] }
 0x30a   :  { %v8176_v13 = vadd.f32 %v2715_v22, %v2699_v19  ;;  %v2941_v22 = vld [vmem:[%s9605_s6 + $0x58] sm:$0xff] }
 0x30c   :  { %10125 = vst [vmem:[#allocation23_spill] sm:$0xff] %v8176_v13  ;;  %v9752_v4 = vmax.f32 %v8176_v13, 0.0 }
 0x30d   :  { %4819 = vmatmul.msk.f32.gmra.mxu2 %vm10127_vm12, %v2781_v18 }
 0x30e   :  { %2813 = vmatmul.f32.gmra.mxu1 %v9752_v4 }
 0x315   :  { %4820 = vmatmul.msk.f32.gmra.mxu2 %vm10128_vm15, %v2784_v32  ;;  %v2942_v32 = vld [vmem:[%s9605_s6 + $0x60] sm:$0xff] }
 0x31e   :  { %v2787_v39 = vpop.f32.mrf.mxu1 }
 0x31f   :  { %4821 = vmatmul.msk.f32.gmra.mxu2 %vm10129_vm1, %v2787_v39 }
 0x332   :  { %v2790_v55 = vpop.f32.mrf.mxu1 }
 0x333   :  { %4822 = vmatmul.msk.f32.gmra.mxu2 %vm10130_vm7, %v2790_v55 }
 0x34d   :  { %v2793_v35 = vpop.f32.mrf.mxu1 }
 0x34e   :  { %4823 = vmatmul.msk.f32.gmra.mxu2 %vm10131_vm6, %v2793_v35  ;;  %v2943_v35 = vld [vmem:[%s9605_s6 + $0x68] sm:$0xff] }
 0x355   :  { %v2796_v24 = vpop.f32.mrf.mxu1 }
 0x356   :  { %4824 = vmatmul.msk.f32.gmra.mxu2 %vm10132_vm4, %v2796_v24 }
 0x35d   :  { %v2799_v6 = vpop.f32.mrf.mxu1 }
 0x35e   :  { %4825 = vmatmul.msk.f32.gmra.mxu2 %vm10133_vm5, %v2799_v6 }
 0x365   :  { %v2802_v11 = vpop.f32.mrf.mxu1 }
 0x366   :  { %4826 = vmatmul.msk.f32.gmra.mxu2 %vm10134_vm13, %v2802_v11  ;;  %v2944_v11 = vld [vmem:[%s9605_s6 + $0x70] sm:$0xff] }
 0x36d   :  { %v2805_v1 = vpop.f32.mrf.mxu1 }
 0x36e   :  { %4827 = vmatmul.msk.f32.gmra.mxu2 %vm10135_vm3, %v2805_v1 }
 0x370   :  { %v8191_v26 = vpop.f32.mrf.mxu2 }
 0x375   :  { %v2808_v36 = vpop.f32.mrf.mxu1 }
 0x376   :  { %4828 = vmatmul.msk.f32.gmra.mxu2 %vm10136_vm9, %v2808_v36 }
 0x378   :  { %v8194_v12 = vpop.f32.mrf.mxu2 }
 0x37d   :  { %v2811_v9 = vpop.f32.mrf.mxu1 }
 0x37e   :  { %4829 = vmatmul.msk.f32.gmra.mxu2 %vm10137_vm2, %v2811_v9 }
 0x380   :  { %v8197_v16 = vpop.f32.mrf.mxu2 }
 0x388   :  { %v2891_v57 = vpop.f32.mrf.mxu2 }
 0x389   :  { %v8203_v25 = vmul.f32 %v2933_v30, %v2891_v57  ;;  %v2945_v57 = vld [vmem:[%s9605_s6 + $0x78] sm:$0xff] }
 0x38b   :  { %v2814_v33 = vpop.f32.mrf.mxu1  ;;  %2984 = vrot.lane.b32.xlu0 %v8203_v25, %s5238_s21 }
 0x38c   :  { %4830 = vmatmul.msk.f32.gmra.mxu2 %vm10138_vm8, %v2814_v33 }
 0x390   :  { %v2894_v17 = vpop.f32.mrf.mxu2 }
 0x391   :  { %v8210_v37 = vmul.f32 %v2934_v48, %v2894_v17 }
 0x393   :  { %3050 = vrot.lane.b32.xlu1 %v8210_v37, %s5239_s3  ;;  %2986 = vrot.lane.b32.xlu0 %v8210_v37, %s5238_s21 }
 0x398   :  { %v2897_v40 = vpop.f32.mrf.mxu2 }
 0x399   :  { %v8219_v63 = vmul.f32 %v2935_v2, %v2897_v40 }
 0x39b   :  { %3116 = vrot.lane.b32.xlu2 %v8219_v63, %s5240_s25  ;;  %3052 = vrot.lane.b32.xlu1 %v8219_v63, %s5239_s3 }
 0x39c   :  { %2988 = vrot.lane.b32.xlu0 %v8219_v63, %s5238_s21 }
 0x3a2   :  { %v2900_v60 = vpop.f32.mrf.mxu2 }
 0x3a3   :  { %v8230_v21 = vmul.f32 %v2936_v44, %v2900_v60  ;;  %v2932_v60 = vld [vmem:[%s9605_s6 + $0x10] sm:$0xff] }
 0x3a5   :  { %3118 = vrot.lane.b32.xlu2 %v8230_v21, %s5240_s25  ;;  %3054 = vrot.lane.b32.xlu1 %v8230_v21, %s5239_s3 }
 0x3a6   :  { %2990 = vrot.lane.b32.xlu0 %v8230_v21, %s5238_s21 }
 0x3b6   :  { %v2903_v10 = vpop.f32.mrf.mxu2 }
 0x3b7   :  { %v8241_v5 = vmul.f32 %v2937_v58, %v2903_v10 }
 0x3b9   :  { %3120 = vrot.lane.b32.xlu2 %v8241_v5, %s5240_s25  ;;  %3056 = vrot.lane.b32.xlu1 %v8241_v5, %s5239_s3 }
 0x3ba   :  { %2992 = vrot.lane.b32.xlu0 %v8241_v5, %s5238_s21 }
 0x3d1   :  { %v2906_v28 = vpop.f32.mrf.mxu2 }
 0x3d2   :  { %v8252_v56 = vmul.f32 %v2938_v20, %v2906_v28  ;;  %v8348_v20 = vmul.f32 %v2932_v60, %v8197_v16 }
 0x3d4   :  { %3122 = vrot.lane.b32.xlu2 %v8252_v56, %s5240_s25  ;;  %3058 = vrot.lane.b32.xlu1 %v8252_v56, %s5239_s3 }
 0x3d5   :  { %2994 = vrot.lane.b32.xlu0 %v8252_v56, %s5238_s21 }
 0x3d9   :  { %v2909_v23 = vpop.f32.mrf.mxu2 }
 0x3da   :  { %v8263_v46 = vmul.f32 %v2939_v49, %v2909_v23  ;;  %v2931_v49 = vld [vmem:[%s9605_s6 + $0x8] sm:$0xff] }
 0x3db   :  { %v8361_v16 = vmul.f32 %v2931_v49, %v8194_v12 }
 0x3dc   :  { %3124 = vrot.lane.b32.xlu2 %v8263_v46, %s5240_s25  ;;  %3060 = vrot.lane.b32.xlu1 %v8263_v46, %s5239_s3 }
 0x3dd   :  { %2996 = vrot.lane.b32.xlu0 %v8263_v46, %s5238_s21 }
 0x3e1   :  { %v2912_v27 = vpop.f32.mrf.mxu2 }
 0x3e2   :  { %v8274_v61 = vmul.f32 %v2940_v53, %v2912_v27 }
 0x3e4   :  { %3126 = vrot.lane.b32.xlu2 %v8274_v61, %s5240_s25  ;;  %3062 = vrot.lane.b32.xlu1 %v8274_v61, %s5239_s3 }
 0x3e5   :  { %2998 = vrot.lane.b32.xlu0 %v8274_v61, %s5238_s21 }
 0x3e9   :  { %v2915_v19 = vpop.f32.mrf.mxu2 }
 0x3ea   :  { %v8285_v18 = vmul.f32 %v2941_v22, %v2915_v19 }
 0x3ec   :  { %3128 = vrot.lane.b32.xlu2 %v8285_v18, %s5240_s25  ;;  %3064 = vrot.lane.b32.xlu1 %v8285_v18, %s5239_s3 }
 0x3ed   :  { %3000 = vrot.lane.b32.xlu0 %v8285_v18, %s5238_s21 }
 0x3f1   :  { %v2918_v39 = vpop.f32.mrf.mxu2 }
 0x3f2   :  { %v8296_v55 = vmul.f32 %v2942_v32, %v2918_v39  ;;  %v2930_v32 = vld [vmem:[%s9605_s6] sm:$0xff] }
 0x3f3   :  { %v8373_v12 = vmul.f32 %v2930_v32, %v8191_v26 }
 0x3f4   :  { %3130 = vrot.lane.b32.xlu2 %v8296_v55, %s5240_s25  ;;  %3066 = vrot.lane.b32.xlu1 %v8296_v55, %s5239_s3 }
 0x3f5   :  { %3002 = vrot.lane.b32.xlu0 %v8296_v55, %s5238_s21  ;;  %v3117_v2 = vpop.permute.xlu2 %3116 }
 0x3f9   :  { %v2921_v24 = vpop.f32.mrf.mxu2 }
 0x3fa   :  { %v8307_v6 = vmul.f32 %v2943_v35, %v2921_v24 }
 0x3fc   :  { %3132 = vrot.lane.b32.xlu2 %v8307_v6, %s5240_s25  ;;  %3004 = vrot.lane.b32.xlu1 %v8307_v6, %s5238_s21 }
 0x3fd   :  { %v8316_v36 = vpop.permute.xlu0 %2984 }
 0x401   :  { %v2924_v1 = vpop.f32.mrf.mxu2 }
 0x402   :  { %v8318_v9 = vmul.f32 %v2944_v11, %v2924_v1 }
 0x404   :  { %3068 = vrot.lane.b32.xlu1 %v8307_v6, %s5239_s3  ;;  %3070 = vrot.lane.b32.xlu2 %v8318_v9, %s5239_s3 }
 0x405   :  { %3006 = vrot.lane.b32.xlu0 %v8318_v9, %s5238_s21  ;;  %v8326_v33 = vpop.permute.xlu0 %2986  ;;  %v8328_v30 = vpop.permute.xlu1 %3050 }
 0x40c   :  { %3134 = vrot.lane.b32.xlu2 %v8318_v9, %s5240_s25 }
 0x40d   :  { %v3053_v58 = vpop.permute.xlu1 %3052 }
 0x40e   :  { %v2989_v40 = vpop.permute.xlu0 %2988 }
 0x40f   :  { %v2927_v48 = vpop.f32.mrf.mxu2  ;;  %v3031_v44 = vadd.f32 %v2989_v40, %v8219_v63  ;;  %v3119_v63 = vpop.permute.xlu2 %3118 }
 0x410   :  { %v8335_v17 = vmul.f32 %v2945_v57, %v2927_v48 }
 0x411   :  { %v3095_v10 = vadd.f32 %v3053_v58, %v3031_v44 }
 0x412   :  { %3072 = vrot.lane.b32.xlu1 %v8335_v17, %s5239_s3  ;;  %3008 = vrot.lane.b32.xlu0 %v8335_v17, %s5238_s21 }
 0x413   :  { %v3159_v28 = vadd.f32 %v3117_v2, %v3095_v10 }
 0x414   :  { %3136 = vrot.lane.b32.xlu2 %v8335_v17, %s5240_s25 }
 0x417   :  { %v3055_v27 = vpop.permute.xlu1 %3054 }
 0x418   :  { %v2991_v23 = vpop.permute.xlu0 %2990 }
 0x419   :  { %v3032_v53 = vadd.f32 %v2991_v23, %v8230_v21  ;;  %v3121_v21 = vpop.permute.xlu2 %3120 }
 0x41a   :  { %3048 = vrot.lane.b32.xlu1 %v8203_v25, %s5239_s3  ;;  %2982 = vrot.lane.b32.xlu0 %v8348_v20, %s5238_s21 }
 0x41b   :  { %v3096_v22 = vadd.f32 %v3055_v27, %v3032_v53 }
 0x41c   :  { %3114 = vrot.lane.b32.xlu2 %v8210_v37, %s5240_s25 }
 0x41d   :  { %v3160_v19 = vadd.f32 %v3119_v63, %v3096_v22 }
 0x422   :  { %3046 = vrot.lane.b32.xlu1 %v8348_v20, %s5239_s3  ;;  %2980 = vrot.lane.b32.xlu0 %v8361_v16, %s5238_s21 }
 0x424   :  { %3112 = vrot.lane.b32.xlu2 %v8203_v25, %s5240_s25 }
 0x42a   :  { %3044 = vrot.lane.b32.xlu1 %v8361_v16, %s5239_s3  ;;  %2978 = vrot.lane.b32.xlu0 %v8373_v12, %s5238_s21 }
 0x42b   :  { %v3057_v24 = vpop.permute.xlu1 %3056 }
 0x42c   :  { %3110 = vrot.lane.b32.xlu2 %v8348_v20, %s5240_s25  ;;  %v2993_v35 = vpop.permute.xlu0 %2992 }
 0x42d   :  { %v3033_v26 = vadd.f32 %v2993_v35, %v8241_v5  ;;  %v8396_v35 = vld [vmem:[%s9600_s1 + $0x28] sm:$0xff] }
 0x42e   :  { %v3123_v39 = vpop.permute.xlu2 %3122  ;;  %10139 = vst [vmem:[#allocation33_spill] sm:$0xff] %v8396_v35 }
 0x42f   :  { %v3097_v11 = vadd.f32 %v3057_v24, %v3033_v26 }
 0x431   :  { %v3161_v1 = vadd.f32 %v3121_v21, %v3097_v11 }
 0x432   :  { %3108 = vrot.lane.b32.xlu1 %v8361_v16, %s5240_s25  ;;  %3042 = vrot.lane.b32.xlu0 %v8373_v12, %s5239_s3 }
 0x434   :  { %3106 = vrot.lane.b32.xlu2 %v8373_v12, %s5240_s25 }
 0x436   :  { %v3125_v57 = vpop.permute.xlu2 %3124 }
 0x43e   :  { %v3127_v48 = vpop.permute.xlu2 %3126 }
 0x446   :  { %v3059_v2 = vpop.permute.xlu1 %3058  ;;  %v3129_v40 = vpop.permute.xlu2 %3128 }
 0x447   :  { %v2995_v44 = vpop.permute.xlu0 %2994 }
 0x448   :  { %v3034_v60 = vadd.f32 %v2995_v44, %v8252_v56  ;;  %v3175_v56 = vadd.f32 %v8396_v35, %v3159_v28 }
 0x44a   :  { %v3098_v58 = vadd.f32 %v3059_v2, %v3034_v60  ;;  %v4836_v24 = vmul.f32 -1.442695, %v3175_v56 }
 0x44c   :  { %v3162_v10 = vadd.f32 %v3123_v39, %v3098_v58  ;;  %v8402_v39 = vld [vmem:[%s9600_s1 + $0x30] sm:$0xff]  ;;  %v8411_v58 = vld [vmem:[%s9600_s1 + $0x38] sm:$0xff]  ;;  %4964 = vpow2.f32 %v4836_v24 }
 0x44d   :  { %10140 = vst [vmem:[#allocation31_spill] sm:$0xff] %v8402_v39  ;;  %v3176_v26 = vadd.f32 %v8402_v39, %v3160_v19  ;;  %v3177_v28 = vadd.f32 %v8411_v58, %v3161_v1 }
 0x44e   :  { %v3061_v63 = vpop.permute.xlu1 %3060  ;;  %v3131_v49 = vpop.permute.xlu2 %3130  ;;  %10141 = vst [vmem:[#allocation36_spill] sm:$0xff] %v8411_v58 }
 0x44f   :  { %v2997_v23 = vpop.permute.xlu0 %2996  ;;  %v4837_v60 = vmul.f32 -1.442695, %v3176_v26 }
 0x450   :  { %v3035_v11 = vadd.f32 %v2997_v23, %v8263_v46  ;;  %v4838_v23 = vmul.f32 -1.442695, %v3177_v28 }
 0x451   :  { %4966 = vpow2.f32 %v4837_v60 }
 0x452   :  { %v3099_v54 = vadd.f32 %v3061_v63, %v3035_v11  ;;  %v4965_v43 = vpop.eup %4964  ;;  %4968 = vpow2.f32 %v4838_v23 }
 0x453   :  { %4970 = vtanh.f32 %v3175_v56 }
 0x454   :  { %v3163_v59 = vadd.f32 %v3125_v57, %v3099_v54  ;;  %v8430_v54 = vld [vmem:[%s9600_s1 + $0x48] sm:$0xff] }
 0x455   :  { %10143 = vst [vmem:[#allocation13_spill] sm:$0xff] %v8430_v54 }
 0x456   :  { %v3063_v53 = vpop.permute.xlu1 %3062  ;;  %v8389_v5 = vpop.permute.xlu2 %3132 }
 0x457   :  { %v2999_v27 = vpop.permute.xlu0 %2998 }
 0x458   :  { %v3036_v4 = vadd.f32 %v2999_v27, %v8274_v61  ;;  %v3178_v61 = vadd.f32 %v8420_v3, %v3162_v10  ;;  %v3030_v10 = vadd.f32 %v8326_v33, %v8210_v37 }
 0x45a   :  { %v3100_v42 = vadd.f32 %v3063_v53, %v3036_v4  ;;  %v3179_v4 = vadd.f32 %v8430_v54, %v3163_v59  ;;  %v4839_v53 = vmul.f32 -1.442695, %v3178_v61  ;;  %v8449_v59 = vld [vmem:[%s9600_s1 + $0x58] sm:$0xff] }
 0x45b   :  { %10145 = vst [vmem:[#allocation34_spill] sm:$0xff] %v8449_v59 }
 0x45e   :  { %v3065_v22 = vpop.permute.xlu1 %3064  ;;  %v8391_v32 = vpop.permute.xlu2 %3070 }
 0x45f   :  { %v3001_v21 = vpop.permute.xlu0 %3000 }
 0x460   :  { %v3037_v19 = vadd.f32 %v3001_v21, %v8285_v18  ;;  %v3164_v18 = vadd.f32 %v3127_v48, %v3100_v42  ;;  %v8438_v42 = vld [vmem:[%s9600_s1 + $0x50] sm:$0xff] }
 0x461   :  { %10144 = vst [vmem:[#allocation15_spill] sm:$0xff] %v8438_v42 }
 0x462   :  { %v3101_v31 = vadd.f32 %v3065_v22, %v3037_v19  ;;  %v3094_v19 = vadd.f32 %v8328_v30, %v3030_v10 }
 0x464   :  { %v3165_v57 = vadd.f32 %v3129_v40, %v3101_v31  ;;  %v4840_v31 = vmul.f32 -1.442695, %v3179_v4  ;;  %v8458_v40 = vld [vmem:[%s9600_s1 + $0x60] sm:$0xff] }
 0x465   :  { %10146 = vst [vmem:[#allocation32_spill] sm:$0xff] %v8458_v40 }
 0x466   :  { %v3067_v2 = vpop.permute.xlu1 %3066  ;;  %v8406_v44 = vpop.permute.xlu2 %3134  ;;  %v8452_v37 = vadd.f32 %v8449_v59, %v3165_v57 }
 0x467   :  { %v3003_v62 = vpop.permute.xlu0 %3002 }
 0x468   :  { %v3038_v46 = vadd.f32 %v3003_v62, %v8296_v55  ;;  %v4967_v62 = vpop.eup %4966  ;;  %v8425_v55 = vadd.f32 1.0, %v4965_v43  ;;  %v8441_v43 = vadd.f32 %v8438_v42, %v3164_v18  ;;  %v4842_v23 = vmul.f32 -1.442695, %v8452_v37 }
 0x469   :  { %v8443_v48 = vadd.f32 1.0, %v4967_v62  ;;  %v4969_v21 = vpop.eup %4968 }
 0x46a   :  { %v3102_v1 = vadd.f32 %v3067_v2, %v3038_v46  ;;  %4972 = vrcp.f32 %v8425_v55  ;;  %v4841_v11 = vmul.f32 -1.442695, %v8441_v43  ;;  %v8471_v18 = vpop.eup %4970 }
 0x46b   :  { %4974 = vpow2.f32 %v4839_v53 }
 0x46c   :  { %v3166_v22 = vadd.f32 %v3131_v49, %v3102_v1  ;;  %4976 = vtanh.f32 %v3176_v26 }
 0x46d   :  { %4978 = vrcp.f32 %v8443_v48 }
 0x46e   :  { %v3005_v27 = vpop.permute.xlu1 %3004  ;;  %v8423_v63 = vpop.permute.xlu2 %3136  ;;  %v8461_v49 = vadd.f32 %v8458_v40, %v3166_v22  ;;  %4980 = vpow2.f32 %v4840_v31  ;;  %v8493_v22 = vld [vmem:[%s9600_s1 + $0x20] sm:$0xff]  ;;  %v8501_v31 = vld [vmem:[%s9600_s1 + $0x70] sm:$0xff] }
 0x46f   :  { %v3039_v33 = vadd.f32 %v3005_v27, %v8307_v6  ;;  %v8466_v6 = vadd.f32 1.0, %v4969_v21  ;;  %4982 = vtanh.f32 %v3177_v28  ;;  %10148 = vst [vmem:[#allocation35_spill] sm:$0xff] %v8501_v31 }
 0x470   :  { %v4843_v26 = vmul.f32 -1.442695, %v8461_v49  ;;  %v8475_v30 = vpop.eup %4972  ;;  %4984 = vpow2.f32 %v4841_v11 }
 0x471   :  { %4986 = vrcp.f32 %v8466_v6  ;;  %v3326_v14 = vmul.f32 %v8475_v30, %v8425_v55 }
 0x472   :  { %4988 = vpow2.f32 %v4842_v23 }
 0x473   :  { %4990 = vpow2.f32 %v4843_v26 }
 0x474   :  { %4992 = vtanh.f32 %v3178_v61 }
 0x476   :  { %v3069_v56 = vpop.permute.xlu1 %3068  ;;  %v3115_v24 = vpop.permute.xlu2 %3114 }
 0x477   :  { %v3103_v2 = vadd.f32 %v3069_v56, %v3039_v33  ;;  %v3007_v60 = vpop.permute.xlu0 %3006  ;;  %v3158_v27 = vadd.f32 %v3115_v24, %v3094_v19 }
 0x478   :  { %v3040_v46 = vadd.f32 %v3007_v60, %v8318_v9  ;;  %v8480_v9 = vld [vmem:[%s9600_s1 + $0x68] sm:$0xff] }
 0x479   :  { %v3167_v1 = vadd.f32 %v8389_v5, %v3103_v2  ;;  %10147 = vst [vmem:[#allocation39_spill] sm:$0xff] %v8480_v9  ;;  %v4975_v5 = vpop.eup %4974  ;;  %v3174_v10 = vadd.f32 %v8493_v22, %v3158_v27 }
 0x47a   :  { %v3104_v62 = vadd.f32 %v8391_v32, %v3040_v46  ;;  %v8487_v53 = vpop.eup %4976  ;;  %v8506_v56 = vadd.f32 1.0, %v4975_v5 }
 0x47b   :  { %v8483_v57 = vadd.f32 %v8480_v9, %v3167_v1  ;;  %v8496_v21 = vpop.eup %4978  ;;  %v4835_v60 = vmul.f32 -1.442695, %v3174_v10 }
 0x47c   :  { %v3168_v28 = vadd.f32 %v8406_v44, %v3104_v62  ;;  %v4981_v33 = vpop.eup %4980 }
 0x47d   :  { %v4844_v32 = vmul.f32 -1.442695, %v8483_v57  ;;  %v8508_v24 = vpop.eup %4982  ;;  %v8513_v46 = vadd.f32 1.0, %v4981_v33 }
 0x47e   :  { %v8504_v44 = vadd.f32 %v8501_v31, %v3168_v28  ;;  %v4985_v2 = vpop.eup %4984  ;;  %v3327_v31 = vsub.f32 1.0, %v3326_v14 }
 0x47f   :  { %4994 = vpow2.f32 %v4844_v32  ;;  %v8511_v19 = vpop.eup %4986  ;;  %v8516_v61 = vadd.f32 1.0, %v4985_v2 }
 0x480   :  { %v4845_v11 = vmul.f32 -1.442695, %v8504_v44  ;;  %4996 = vtanh.f32 %v3179_v4  ;;  %v4989_v23 = vpop.eup %4988 }
 0x481   :  { %v4991_v26 = vpop.eup %4990  ;;  %v8523_v28 = vadd.f32 1.0, %v4989_v23 }
 0x482   :  { %4998 = vpow2.f32 %v4845_v11  ;;  %v8520_v5 = vpop.eup %4992  ;;  %v8528_v11 = vadd.f32 1.0, %v4991_v26 }
 0x483   :  { %5000 = vrcp.f32 %v8506_v56  ;;  %vm3420_vm9 = vweird.f32 %v8523_v28 }
 0x484   :  { %v3073_v1 = vpop.permute.xlu1 %3072  ;;  %v3009_v27 = vpop.permute.xlu0 %3008  ;;  %5002 = vtanh.f32 %v8441_v43  ;;  %vm3435_vm13 = vweird.f32 %v8528_v11 }
 0x485   :  { %v3041_v62 = vadd.f32 %v3009_v27, %v8335_v17  ;;  %5004 = vpow2.f32 %v4835_v60  ;;  %v4995_v4 = vpop.eup %4994  ;;  %v3113_v27 = vpop.permute.xlu2 %3112 }
 0x486   :  { %5006 = vrcp.f32 %v8513_v46  ;;  %v8525_v33 = vpop.eup %4996  ;;  %v8535_v60 = vadd.f32 1.0, %v4995_v4 }
 0x487   :  { %v3105_v32 = vadd.f32 %v3073_v1, %v3041_v62  ;;  %5008 = vtanh.f32 %v8452_v37  ;;  %v3029_v37 = vadd.f32 %v8316_v36, %v8203_v25 }
 0x488   :  { %v4999_v2 = vpop.eup %4998  ;;  %5010 = vrcp.f32 %v8516_v61  ;;  %vm3450_vm1 = vweird.f32 %v8535_v60 }
 0x489   :  { %v3169_v17 = vadd.f32 %v8423_v63, %v3105_v32  ;;  %v8532_v43 = vpop.eup %5000  ;;  %5012 = vtanh.f32 %v8461_v49  ;;  %v8537_v23 = vadd.f32 1.0, %v4999_v2  ;;  %v8547_v63 = vld [vmem:[%s9600_s1 + $0x78] sm:$0xff] }
 0x48a   :  { %v8539_v1 = vpop.eup %5002  ;;  %5014 = vrcp.f32 %v8523_v28  ;;  %10149 = vst [vmem:[#allocation30_spill] sm:$0xff] %v8547_v63 }
 0x48b   :  { %v3185_v26 = vadd.f32 %v8547_v63, %v3169_v17  ;;  %v5005_v49 = vpop.eup %5004  ;;  %5016 = vrcp.f32 %v8528_v11  ;;  %v3469_v14 = vand.u32 2147483647, %v8537_v23  ;;  %vm3465_vm11 = vweird.f32 %v8537_v23 }
 0x48c   :  { %v3049_v62 = vpop.permute.xlu1 %3048  ;;  %v2983_v4 = vpop.permute.xlu0 %2982  ;;  %5018 = vrcp.f32 %v8537_v23  ;;  %v8559_v13 = vadd.f32 1.0, %v5005_v49 }
 0x48d   :  { %v8551_v32 = vpop.eup %5006  ;;  %v4846_v25 = vmul.f32 -1.442695, %v3185_v26  ;;  %v3093_v36 = vadd.f32 %v3049_v62, %v3029_v37  ;;  %5020 = vrcp.f32 %v8535_v60  ;;  %v8571_v37 = vld [vmem:[%s9600_s1 + $0x18] sm:$0xff]  ;;  %v3111_v47 = vpop.permute.xlu2 %3110  ;;  %vm8623_vm0 = vcmp.eq.f32.partialorder %v3469_v14, 8.507059e+37 }
 0x48e   :  { %v8554_v2 = vpop.eup %5008 }
 0x48f   :  { %v8557_v52 = vpop.eup %5010  ;;  %5022 = vpow2.f32 %v4846_v25  ;;  %v3157_v17 = vadd.f32 %v3113_v27, %v3093_v36 }
 0x490   :  { %v8561_v45 = vpop.eup %5012  ;;  %5024 = vtanh.f32 %v3174_v10  ;;  %v3336_v10 = vand.u32 2147483648, %v8425_v55 }
 0x491   :  { %v8565_v34 = vpop.eup %5014  ;;  %5026 = vtanh.f32 %v8483_v57  ;;  %v3173_v49 = vadd.f32 %v8571_v37, %v3157_v17  ;;  %v3028_v57 = vadd.f32 %v2983_v4, %v8348_v20  ;;  %v3351_v17 = vand.u32 2147483648, %v8443_v48 }
 0x492   :  { %v8574_v62 = vpop.eup %5016  ;;  %5028 = vtanh.f32 %v8504_v44 }
 0x493   :  { %v8578_v27 = vpop.eup %5018  ;;  %5030 = vrcp.f32 %v8559_v13  ;;  %v4834_v25 = vmul.f32 -1.442695, %v3173_v49  ;;  %vm3436_vm3 = vweird.f32 %v8574_v62 }
 0x494   :  { %v8582_v36 = vpop.eup %5020  ;;  %5032 = vtanh.f32 %v3185_v26  ;;  %v3047_v63 = vpop.permute.xlu1 %3046  ;;  %v3461_v20 = vmul.f32 %v8578_v27, %v8537_v23  ;;  %v8592_v26 = vor.u32 1.1754944e-38, %v3336_v10  ;;  %v8605_v10 = vmul.f32 %v8475_v30, %v3327_v31  ;;  %vm8688_vm8 = vmor %vm3435_vm13, %vm3436_vm3 }
 0x495   :  { %v2981_v38 = vpop.permute.xlu0 %2980  ;;  %v5023_v51 = vpop.eup %5022  ;;  %5034 = vpow2.f32 %v4834_v25  ;;  %v3092_v44 = vadd.f32 %v3047_v63, %v3028_v57  ;;  %v3471_v63 = vand.u32 2147483648, %v8537_v23  ;;  %v3446_v25 = vmul.f32 %v8582_v36, %v8535_v60 }
 0x496   :  { %v8586_v7 = vpop.eup %5024  ;;  %v8588_v40 = vadd.f32 1.0, %v5023_v51  ;;  %5036 = vtanh.f32 %v3173_v49  ;;  %v8602_v49 = vor.u32 1.1754944e-38, %v3351_v17  ;;  %v3027_v41 = vadd.f32 %v2981_v38, %v8361_v16 }
 0x497   :  { %v8594_v4 = vpop.eup %5026  ;;  %v3156_v59 = vadd.f32 %v3111_v47, %v3092_v44  ;;  %v8612_v47 = vld [vmem:[%s9600_s1 + $0x10] sm:$0xff]  ;;  %v3462_v54 = vsub.f32 1.0, %v3461_v20  ;;  %vm3466_vm14 = vweird.f32 %v8578_v27  ;;  %v3447_v31 = vsub.f32 1.0, %v3446_v25 }
 0x498   :  { %v5029_v57 = vpop.eup %5028  ;;  %5038 = vrcp.f32 %v8588_v40  ;;  %v3486_v42 = vand.u32 2147483648, %v8588_v40  ;;  %v3484_v17 = vand.u32 2147483647, %v8588_v40  ;;  %v3472_v38 = vor.u32 1.1754944e-38, %v3471_v63  ;;  %vm3467_vm15 = vmor %vm3465_vm11, %vm3466_vm14 }
 0x499   :  { %v8607_v9 = vpop.eup %5030  ;;  %v3172_v44 = vadd.f32 %v8612_v47, %v3156_v59  ;;  %v3463_v15 = vmul.f32 %v8578_v27, %v3462_v54  ;;  %vm3480_vm10 = vweird.f32 %v8588_v40  ;;  %v3448_v39 = vmul.f32 %v8582_v36, %v3447_v31 }
 0x49a   :  { %v8617_v51 = vpop.eup %5032  ;;  %vm3451_vm12 = vweird.f32 %v8582_v36  ;;  %v3454_v25 = vand.u32 2147483647, %v8535_v60  ;;  %v3487_v54 = vor.u32 1.1754944e-38, %v3486_v42  ;;  %v3456_v63 = vand.u32 2147483648, %v8535_v60 }
 0x49b   :  { %v5035_v50 = vpop.eup %5034  ;;  %v4833_v3 = vmul.f32 -1.442695, %v3172_v44  ;;  %v3464_v14 = vadd.f32 %v8578_v27, %v3463_v15  ;;  %v3449_v31 = vadd.f32 %v8582_v36, %v3448_v39  ;;  %vm8645_vm7 = vcmp.eq.f32.partialorder %v3484_v17, 8.507059e+37  ;;  %vm8652_vm6 = vmor %vm3450_vm1, %vm3451_vm12 }
 0x49c   :  { %v8627_v16 = vpop.eup %5036  ;;  %v8629_v20 = vadd.f32 1.0, %v5035_v50  ;;  %v3045_v58 = vpop.permute.xlu1 %3044  ;;  %v3431_v39 = vmul.f32 %v8574_v62, %v8528_v11  ;;  %vm3455_vm4 = vcmp.eq.f32.partialorder %v3454_v25, 8.507059e+37  ;;  %v3457_v60 = vor.u32 1.1754944e-38, %v3456_v63 }
 0x49d   :  { %v2979_v29 = vpop.permute.xlu0 %2978  ;;  %5040 = vpow2.f32 %v4833_v3  ;;  %v3091_v50 = vadd.f32 %v3045_v58, %v3027_v41  ;;  %v3468_v42 = vsel %vm3467_vm15, %v8578_v27, %v3464_v14  ;;  %vm3421_vm11 = vweird.f32 %v8565_v34 }
 0x49e   :  { %v5039_v0 = vpop.eup %5038  ;;  %5042 = vtanh.f32 %v3172_v44  ;;  %v3026_v35 = vadd.f32 %v2979_v29, %v8373_v12  ;;  %v3473_v29 = vsel %vm8623_vm0, %v3472_v38, %v3468_v42  ;;  %v3453_v12 = vsel %vm8652_vm6, %v8582_v36, %v3449_v31  ;;  %vm3422_vm0 = vmor %vm3420_vm9, %vm3421_vm11 }
 0x49f   :  { %v3476_v3 = vmul.f32 %v5039_v0, %v8588_v40  ;;  %5044 = vrcp.f32 %v8629_v20  ;;  %vm3481_vm5 = vweird.f32 %v5039_v0  ;;  %v3432_v23 = vsub.f32 1.0, %v3431_v39 }
 0x4a0   :  { %v8664_v27 = vmul.f32 %v5029_v57, %v3473_v29  ;;  %v3416_v44 = vmul.f32 %v8565_v34, %v8523_v28  ;;  %v3458_v38 = vsel %vm3455_vm4, %v3457_v60, %v3453_v12  ;;  %v3439_v36 = vand.u32 2147483647, %v8528_v11  ;;  %vm3482_vm2 = vmor %vm3480_vm10, %vm3481_vm5  ;;  %v3107_v60 = vpop.permute.xlu2 %3106 }
 0x4a1   :  { %v3477_v58 = vsub.f32 1.0, %v3476_v3  ;;  %v3433_v14 = vmul.f32 %v8574_v62, %v3432_v23  ;;  %v3441_v3 = vand.u32 2147483648, %v8528_v11  ;;  %v3424_v40 = vand.u32 2147483647, %v8523_v28 }
 0x4a2   :  { %v3417_v42 = vsub.f32 1.0, %v3416_v44  ;;  %v8699_v44 = vld [vmem:[%s9600_s1 + $0x8] sm:$0xff]  ;;  %vm3440_vm14 = vcmp.eq.f32.partialorder %v3439_v36, 8.507059e+37  ;;  %vm3405_vm12 = vweird.f32 %v8516_v61  ;;  %vm3406_vm15 = vweird.f32 %v8557_v52 }
 0x4a3   :  { %v5041_v17 = vpop.eup %5040  ;;  %v3478_v59 = vmul.f32 %v5039_v0, %v3477_v58  ;;  %v3434_v12 = vadd.f32 %v8574_v62, %v3433_v14  ;;  %vm3425_vm10 = vcmp.eq.f32.partialorder %v3424_v40, 8.507059e+37  ;;  %vm3331_vm1 = vweird.f32 %v8475_v30  ;;  %vm8773_vm13 = vmor %vm3405_vm12, %vm3406_vm15 }
 0x4a4   :  { %v8672_v25 = vpop.eup %5042  ;;  %v8674_v63 = vadd.f32 1.0, %v5041_v17  ;;  %v3109_v57 = vpop.permute.xlu1 %3108  ;;  %vm3390_vm6 = vweird.f32 %v8513_v46  ;;  %vm3391_vm4 = vweird.f32 %v8551_v32  ;;  %vm3330_vm5 = vweird.f32 %v8425_v55 }
 0x4a5   :  { %v3043_v31 = vpop.permute.xlu0 %3042  ;;  %v3155_v41 = vadd.f32 %v3109_v57, %v3091_v50  ;;  %v3479_v29 = vadd.f32 %v5039_v0, %v3478_v59  ;;  %v8682_v58 = vpop.eup %5044  ;;  %v3426_v50 = vand.u32 2147483648, %v8523_v28  ;;  %v3438_v14 = vsel %vm8688_vm8, %v8574_v62, %v3434_v12  ;;  %vm3392_vm11 = vmor %vm3390_vm6, %vm3391_vm4 }
 0x4a6   :  { %v3090_v39 = vadd.f32 %v3043_v31, %v3026_v35  ;;  %v3418_v35 = vmul.f32 %v8565_v34, %v3417_v42  ;;  %v3442_v31 = vor.u32 1.1754944e-38, %v3441_v3  ;;  %5046 = vrcp.f32 %v8674_v63  ;;  %vm3332_vm4 = vmor %vm3330_vm5, %vm3331_vm1 }
 0x4a7   :  { %v3171_v17 = vadd.f32 %v8699_v44, %v3155_v41  ;;  %v3483_v59 = vsel %vm3482_vm2, %v5039_v0, %v3479_v29  ;;  %v8712_v41 = vld [vmem:[%s9600_s1] sm:$0xff]  ;;  %v3427_v36 = vor.u32 1.1754944e-38, %v3426_v50  ;;  %v3401_v3 = vmul.f32 %v8557_v52, %v8516_v61 }
 0x4a8   :  { %v3154_v11 = vadd.f32 %v3107_v60, %v3090_v39  ;;  %v3488_v57 = vsel %vm8645_vm7, %v3487_v54, %v3483_v59  ;;  %v3419_v42 = vadd.f32 %v8565_v34, %v3418_v35  ;;  %v3443_v54 = vsel %vm3440_vm14, %v3442_v31, %v3438_v14  ;;  %v3522_v59 = vld [vmem:[%s9607_s8 + $0x10] sm:$0xff] }
 0x4a9   :  { %v4832_v8 = vmul.f32 -1.442695, %v3171_v17  ;;  %v8718_v62 = vmul.f32 %v8617_v51, %v3488_v57  ;;  %v8730_v51 = vmul.f32 %v8594_v4, %v3458_v38  ;;  %v3402_v28 = vsub.f32 1.0, %v3401_v3 }
 0x4aa   :  { %v8715_v0 = vadd.f32 %v8712_v41, %v3154_v11  ;;  %v3423_v15 = vsel %vm3422_vm0, %v8565_v34, %v3419_v42  ;;  %v3409_v12 = vand.u32 2147483647, %v8516_v61  ;;  %v3523_v34 = vld [vmem:[%s9607_s8 + $0x18] sm:$0xff]  ;;  %v3411_v60 = vand.u32 2147483648, %v8516_v61 }
 0x4ab   :  { %5048 = vpow2.f32 %v4832_v8  ;;  %3750 = vmatpush.msra.mxu2 %v8718_v62  ;;  %v3428_v29 = vsel %vm3425_vm10, %v3427_v36, %v3423_v15  ;;  %v8738_v8 = vmul.f32 %v8561_v45, %v3443_v54  ;;  %v3386_v4 = vmul.f32 %v8551_v32, %v8513_v46  ;;  %3586 = vmatpush.msra.mxu3 %v3523_v34 }
 0x4ac   :  { %v4831_v39 = vmul.f32 -1.442695, %v8715_v0  ;;  %5050 = vtanh.f32 %v3171_v17  ;;  %v8744_v38 = vmul.f32 %v8554_v2, %v3428_v29  ;;  %v3403_v23 = vmul.f32 %v8557_v52, %v3402_v28  ;;  %v8750_v35 = vpop.eup %5046 }
 0x4ad   :  { %3751 = vmatpush.msra.mxu2 %v8664_v27  ;;  %vm8753_vm7 = vcmp.eq.f32.partialorder %v3409_v12, 8.507059e+37  ;;  %v3387_v40 = vsub.f32 1.0, %v3386_v4  ;;  %v3394_v2 = vand.u32 2147483647, %v8513_v46  ;;  %v3396_v17 = vand.u32 2147483648, %v8513_v46  ;;  %3587 = vmatpush.msra.mxu3 %v3522_v59 }
 0x4ae   :  { %5052 = vpow2.f32 %v4831_v39  ;;  %v3404_v50 = vadd.f32 %v8557_v52, %v3403_v23  ;;  %v3371_v11 = vmul.f32 %v8532_v43, %v8506_v56  ;;  %v3412_v31 = vor.u32 1.1754944e-38, %v3411_v60  ;;  %v5174_v39 = vld [vmem:[%s9606_s7 + $0x8] sm:$0xff] }
 0x4af   :  { %3752 = vmatpush.msra.mxu2 %v8730_v51  ;;  %v3388_v42 = vmul.f32 %v8551_v32, %v3387_v40  ;;  %vm3375_vm3 = vweird.f32 %v8506_v56  ;;  %v3379_v54 = vand.u32 2147483647, %v8506_v56  ;;  %vm3376_vm9 = vweird.f32 %v8532_v43  ;;  %3877 = vmatpush.msrb.mxu3 %v5174_v39 }
 0x4b0   :  { %v3408_v36 = vsel %vm8773_vm13, %v8557_v52, %v3404_v50  ;;  %v3372_v3 = vsub.f32 1.0, %v3371_v11  ;;  %v3381_v61 = vand.u32 2147483648, %v8506_v56  ;;  %vm8794_vm2 = vcmp.eq.f32.partialorder %v3394_v2, 8.507059e+37  ;;  %v2751_v50 = vld [vmem:[%s9607_s8 + $0x8] sm:$0xff]  ;;  %v2750_v11 = vld [vmem:[%s9607_s8] sm:$0xff]  ;;  %vm3377_vm12 = vmor %vm3375_vm3, %vm3376_vm9 }
 0x4b1   :  { %v5049_v14 = vpop.eup %5048  ;;  %3753 = vmatpush.msra.mxu2 %v8738_v8  ;;  %v3413_v28 = vsel %vm8753_vm7, %v3412_v31, %v3408_v36  ;;  %v3389_v12 = vadd.f32 %v8551_v32, %v3388_v42  ;;  %v3356_v34 = vmul.f32 %v8511_v19, %v8466_v6  ;;  %v10164_v60 = vand.u32 2147483647, %v8425_v55  ;;  %3699 = vmatpush.msra.mxu0 %v2751_v50 }
 0x4b2   :  { %v8780_v15 = vpop.eup %5050  ;;  %v8806_v23 = vadd.f32 1.0, %v5049_v14  ;;  %v8809_v45 = vmul.f32 %v8539_v1, %v3413_v28  ;;  %v3397_v40 = vor.u32 1.1754944e-38, %v3396_v17  ;;  %v3373_v2 = vmul.f32 %v8532_v43, %v3372_v3  ;;  %v5175_v1 = vld [vmem:[%s9606_s7] sm:$0xff] }
 0x4b3   :  { %3754 = vmatpush.msra.mxu2 %v8744_v38  ;;  %vm8802_vm8 = vcmp.eq.f32.partialorder %v10164_v60, 8.507059e+37  ;;  %3878 = vmatpush.msrb.mxu3 %v5175_v1  ;;  %v3393_v46 = vsel %vm3392_vm11, %v8551_v32, %v3389_v12  ;;  %vm8828_vm14 = vcmp.eq.f32.partialorder %v3379_v54, 8.507059e+37  ;;  %v3357_v14 = vsub.f32 1.0, %v3356_v34 }
 0x4b4   :  { %v5053_v29 = vpop.eup %5052  ;;  %v3398_v57 = vsel %vm8794_vm2, %v3397_v40, %v3393_v46  ;;  %v3374_v31 = vadd.f32 %v8532_v43, %v3373_v2  ;;  %v3382_v42 = vor.u32 1.1754944e-38, %v3381_v61  ;;  %vm3361_vm0 = vweird.f32 %v8511_v19  ;;  %3700 = vmatpush.msra.mxu0 %v2750_v11 }
 0x4b5   :  { %v8825_v59 = vadd.f32 1.0, %v5053_v29  ;;  %3755 = vmatpush.msra.mxu2 %v8809_v45  ;;  %vm3345_vm10 = vweird.f32 %v8443_v48  ;;  %v8839_v32 = vmul.f32 %v8525_v33, %v3398_v57  ;;  %v3358_v54 = vmul.f32 %v8511_v19, %v3357_v14 }
 0x4b6   :  { %v3364_v36 = vand.u32 2147483647, %v8466_v6  ;;  %v3366_v3 = vand.u32 2147483648, %v8466_v6  ;;  %5054 = vrcp.f32 %v8806_v23  ;;  %v3378_v61 = vsel %vm3377_vm12, %v8532_v43, %v3374_v31 }
 0x4b7   :  { %v3341_v33 = vmul.f32 %v8496_v21, %v8443_v48  ;;  %v10169_v39 = vand.u32 2147483647, %v8443_v48  ;;  %v3329_v56 = vadd.f32 %v8475_v30, %v8605_v10  ;;  %vm10172_vm7 = vcmask 130048   ;;  %3756 = vmatpush.msra.mxu2 %v8839_v32 }
 0x4b8   :  { %4863 = vmatmul.msk.f32.vlgmr.msra.gmra.mxu0 %vm10172_vm7, %v8712_v41  ;;  %v3383_v43 = vsel %vm8828_vm14, %v3382_v42, %v3378_v61  ;;  %v3359_v28 = vadd.f32 %v8511_v19, %v3358_v54  ;;  %vm3360_vm6 = vweird.f32 %v8466_v6  ;;  %v3367_v12 = vor.u32 1.1754944e-38, %v3366_v3  ;;  %vm10173_vm14 = vmmov %vm10172_vm7 }
 0x4b9   :  { %vm8854_vm15 = vcmp.eq.f32.partialorder %v10169_v39, 8.507059e+37  ;;  %v8872_v10 = vmul.f32 %v8520_v5, %v3383_v43  ;;  %vm3362_vm13 = vmor %vm3360_vm6, %vm3361_vm0  ;;  %v3342_v52 = vsub.f32 1.0, %v3341_v33  ;;  %v3333_v34 = vsel %vm3332_vm4, %v8475_v30, %v3329_v56 }
 0x4ba   :  { %v3311_v60 = vmul.f32 %v8607_v9, %v8559_v13  ;;  %5056 = vrcp.f32 %v8825_v59  ;;  %v3363_v6 = vsel %vm3362_vm13, %v8511_v19, %v3359_v28  ;;  %vm3365_vm3 = vcmp.eq.f32.partialorder %v3364_v36, 8.507059e+37 }
 0x4bb   :  { %vm3346_vm9 = vweird.f32 %v8496_v21  ;;  %3757 = vmatpush.msra.mxu2 %v8872_v10  ;;  %v3368_v55 = vsel %vm3365_vm3, %v3367_v12, %v3363_v6  ;;  %v3343_v5 = vmul.f32 %v8496_v21, %v3342_v52  ;;  %v3338_v40 = vsel %vm8802_vm8, %v8592_v26, %v3333_v34 }
 0x4bc   :  { %v3312_v30 = vsub.f32 1.0, %v3311_v60  ;;  %v8888_v2 = vmul.f32 %v8508_v24, %v3368_v55  ;;  %vm3315_vm1 = vweird.f32 %v8559_v13  ;;  %v3321_v19 = vand.u32 2147483648, %v8559_v13  ;;  %v8894_v11 = vpop.eup %5054  ;;  %vm3347_vm2 = vmor %vm3345_vm10, %vm3346_vm9 }
 0x4bd   :  { %v3296_v50 = vmul.f32 %v8682_v58, %v8629_v20  ;;  %v3344_v1 = vadd.f32 %v8496_v21, %v3343_v5  ;;  %vm3316_vm5 = vweird.f32 %v8607_v9  ;;  %v3319_v26 = vand.u32 2147483647, %v8559_v13  ;;  %vm10174_vm9 = vmmov %vm10173_vm14 }
 0x4be   :  { %v3313_v46 = vmul.f32 %v8607_v9, %v3312_v30  ;;  %3758 = vmatpush.msra.mxu2 %v8888_v2  ;;  %v8906_v24 = vmul.f32 %v8471_v18, %v3338_v40  ;;  %vm3300_vm8 = vweird.f32 %v8629_v20  ;;  %vm3301_vm11 = vweird.f32 %v8682_v58  ;;  %vm3317_vm0 = vmor %vm3315_vm1, %vm3316_vm5 }
 0x4bf   :  { %v3297_v4 = vsub.f32 1.0, %v3296_v50  ;;  %v3348_v17 = vsel %vm3347_vm2, %v8496_v21, %v3344_v1  ;;  %v3306_v57 = vand.u32 2147483648, %v8629_v20  ;;  %v3281_v31 = vmul.f32 %v8750_v35, %v8674_v63  ;;  %vm3302_vm12 = vmor %vm3300_vm8, %vm3301_vm11 }
 0x4c0   :  { %v3314_v14 = vadd.f32 %v8607_v9, %v3313_v46  ;;  %4864 = vmatmul.msk.f32.gmra.mxu0 %vm10173_vm14, %v8699_v44  ;;  %v8917_v48 = vpop.eup %5056  ;;  %v3353_v18 = vsel %vm8854_vm15, %v8602_v49, %v3348_v17  ;;  %v3322_v21 = vor.u32 1.1754944e-38, %v3321_v19  ;;  %v3304_v54 = vand.u32 2147483647, %v8629_v20 }
 0x4c1   :  { %v3298_v42 = vmul.f32 %v8682_v58, %v3297_v4  ;;  %v8929_v36 = vmul.f32 %v8487_v53, %v3353_v18  ;;  %vm3320_vm10 = vcmp.eq.f32.partialorder %v3319_v26, 8.507059e+37  ;;  %v3282_v61 = vsub.f32 1.0, %v3281_v31  ;;  %v10183_v31 = vld [vmem:[#allocation33_spill] sm:$0xff]  ;;  %v10188_v18 = vld [vmem:[#allocation31_spill] sm:$0xff] }
 0x4c2   :  { %v3318_v3 = vsel %vm3317_vm0, %v8607_v9, %v3314_v14  ;;  %v3307_v39 = vor.u32 1.1754944e-38, %v3306_v57  ;;  %v3289_v29 = vand.u32 2147483647, %v8674_v63  ;;  %vm3286_vm15 = vweird.f32 %v8750_v35  ;;  %v10177_v14 = vld [vmem:[#allocation12_spill] sm:$0xff] }
 0x4c3   :  { %v3323_v33 = vsel %vm3320_vm10, %v3322_v21, %v3318_v3  ;;  %v3299_v49 = vadd.f32 %v8682_v58, %v3298_v42  ;;  %3759 = vmatpush.msra.mxu2 %v8929_v36  ;;  %v3283_v13 = vmul.f32 %v8750_v35, %v3282_v61  ;;  %v3291_v9 = vand.u32 2147483648, %v8674_v63  ;;  %vm10175_vm10 = vmmov %vm10174_vm9  ;;  %v10191_v21 = vld [vmem:[#allocation16_spill] sm:$0xff]  ;;  %v10198_v61 = vld [vmem:[#allocation5_spill] sm:$0xff] }
 0x4c4   :  { %v3266_v53 = vmul.f32 %v8894_v11, %v8806_v23  ;;  %v3510_v56 = vmul.f32 %v8586_v7, %v3323_v33  ;;  %vm3305_vm7 = vcmp.eq.f32.partialorder %v3304_v54, 8.507059e+37  ;;  %vm3285_vm6 = vweird.f32 %v8674_v63  ;;  %v10193_v42 = vld [vmem:[#allocation36_spill] sm:$0xff]  ;;  %v10196_v54 = vld [vmem:[#allocation101_spill] sm:$0xff]  ;;  %v10201_v33 = vld [vmem:[#allocation10_spill] sm:$0xff] }
 0x4c5   :  { %v3303_v43 = vsel %vm3302_vm12, %v8682_v58, %v3299_v49  ;;  %3760 = vmatpush.msra.mxu2 %v8906_v24  ;;  %v3284_v28 = vadd.f32 %v8750_v35, %v3283_v13  ;;  %vm3290_vm4 = vcmp.eq.f32.partialorder %v3289_v29, 8.507059e+37  ;;  %vm3287_vm13 = vmor %vm3285_vm6, %vm3286_vm15  ;;  %v3292_v52 = vor.u32 1.1754944e-38, %v3291_v9  ;;  %v10206_v29 = vld [vmem:[#allocation21_spill] sm:$0xff]  ;;  %v10208_v9 = vld [vmem:[#allocation15_spill] sm:$0xff] }
 0x4c6   :  { %v3308_v20 = vsel %vm3305_vm7, %v3307_v39, %v3303_v43  ;;  %v3267_v12 = vsub.f32 1.0, %v3266_v53  ;;  %vm3271_vm3 = vweird.f32 %v8894_v11  ;;  %v3276_v34 = vand.u32 2147483648, %v8806_v23  ;;  %vm10176_vm12 = vmmov %vm10174_vm9  ;;  %v10203_v39 = vld [vmem:[#allocation13_spill] sm:$0xff]  ;;  %v10211_v53 = vld [vmem:[#allocation24_spill] sm:$0xff] }
 0x4c7   :  { %v3251_v7 = vmul.f32 %v8917_v48, %v8825_v59  ;;  %3761 = vmatpush.msra.mxu2 %v3510_v56  ;;  %v3509_v58 = vmul.f32 %v8627_v16, %v3308_v20  ;;  %v3288_v63 = vsel %vm3287_vm13, %v8750_v35, %v3284_v28  ;;  %v3274_v6 = vand.u32 2147483647, %v8806_v23  ;;  %vm10179_vm15 = vmmov %vm10174_vm9  ;;  %v10216_v43 = vld [vmem:[#allocation26_spill] sm:$0xff]  ;;  %v10218_v20 = vld [vmem:[#allocation32_spill] sm:$0xff] }
 0x4c8   :  { %v3268_v60 = vmul.f32 %v8894_v11, %v3267_v12  ;;  %4865 = vmatmul.msk.f32.gmra.mxu0 %vm10174_vm9, %v8612_v47  ;;  %5058 = vtanh.f32 %v8715_v0  ;;  %v3293_v55 = vsel %vm3290_vm4, %v3292_v52, %v3288_v63  ;;  %vm3270_vm1 = vweird.f32 %v8806_v23  ;;  %vm10180_vm7 = vmmov %vm10174_vm9  ;;  %v10221_v28 = vld [vmem:[#allocation8_spill] sm:$0xff]  ;;  %v10223_v12 = vld [vmem:[#allocation39_spill] sm:$0xff] }
 0x4c9   :  { %v3252_v5 = vsub.f32 1.0, %v3251_v7  ;;  %3762 = vmatpush.msra.mxu2 %v3509_v58  ;;  %v3508_v40 = vmul.f32 %v8672_v25, %v3293_v55  ;;  %v3261_v16 = vand.u32 2147483648, %v8825_v59  ;;  %vm3272_vm5 = vmor %vm3270_vm1, %vm3271_vm3  ;;  %v3277_v35 = vor.u32 1.1754944e-38, %v3276_v34  ;;  %v10226_v52 = vld [vmem:[#allocation9_spill] sm:$0xff]  ;;  %v10228_v34 = vld [vmem:[#allocation35_spill] sm:$0xff] }
 0x4ca   :  { %v3269_v30 = vadd.f32 %v8894_v11, %v3268_v60  ;;  %vm3256_vm2 = vweird.f32 %v8917_v48  ;;  %v3259_v0 = vand.u32 2147483647, %v8825_v59  ;;  %vm3275_vm8 = vcmp.eq.f32.partialorder %v3274_v6, 8.507059e+37  ;;  %vm10184_vm6 = vmmov %vm10180_vm7  ;;  %v10231_v7 = vld [vmem:[#allocation20_spill] sm:$0xff]  ;;  %v10236_v63 = vld [vmem:[#allocation22_spill] sm:$0xff] }
 0x4cb   :  { %v3253_v19 = vmul.f32 %v8917_v48, %v3252_v5  ;;  %3763 = vmatpush.msra.mxu2 %v3508_v40  ;;  %vm3255_vm11 = vweird.f32 %v8825_v59  ;;  %v3262_v46 = vor.u32 1.1754944e-38, %v3261_v16  ;;  %v10178_v57 = vmax.f32 %v10177_v14, 0.0  ;;  %vm10185_vm4 = vmmov %vm10184_vm6  ;;  %v10239_v60 = vld [vmem:[#allocation27_spill] sm:$0xff] }
 0x4cc   :  { %v3273_v50 = vsel %vm3272_vm5, %v8894_v11, %v3269_v30  ;;  %vm3257_vm14 = vmor %vm3255_vm11, %vm3256_vm2  ;;  %vm3260_vm0 = vcmp.eq.f32.partialorder %v3259_v0, 8.507059e+37  ;;  %v10197_v3 = vmax.f32 %v10196_v54, 0.0  ;;  %v10202_v49 = vmax.f32 %v10201_v33, 0.0 }
 0x4cd   :  { %v3278_v25 = vsel %vm3275_vm8, %v3277_v35, %v3273_v50  ;;  %v3254_v1 = vadd.f32 %v8917_v48, %v3253_v19  ;;  %vm10189_vm13 = vmmov %vm10185_vm4  ;;  %v10207_v13 = vmax.f32 %v10206_v29, 0.0  ;;  %v10240_v6 = vmax.f32 %v10239_v60, 0.0  ;;  %v5180_v60 = vld [vmem:[%s9605_s6 + $0x20] sm:$0xff] }
 0x4ce   :  { %v3507_v23 = vmul.f32 %v8780_v15, %v3278_v25  ;;  %v5059_v26 = vpop.eup %5058  ;;  %v10181_v15 = vld [vmem:[#allocation85_spill] sm:$0xff]  ;;  %vm10190_vm3 = vmmov %vm10185_vm4 }
 0x4cf   :  { %v3258_v4 = vsel %vm3257_vm14, %v8917_v48, %v3254_v1  ;;  %v10182_v59 = vmax.f32 %v10181_v15, 0.0  ;;  %vm10194_vm9 = vmmov %vm10190_vm3 }
 0x4d0   :  { %3764 = vmatpush.msra.mxu2 %v3507_v23  ;;  %v3263_v17 = vsel %vm3260_vm0, %v3262_v46, %v3258_v4  ;;  %4866 = vmatmul.msk.f32.gmra.mxu0 %vm10175_vm10, %v8571_v37  ;;  %v10186_v37 = vld [vmem:[#allocation97_spill] sm:$0xff]  ;;  %vm10195_vm1 = vmmov %vm10190_vm3 }
 0x4d1   :  { %v3506_v11 = vmul.f32 %v5059_v26, %v3263_v17  ;;  %v10187_v48 = vmax.f32 %v10186_v37, 0.0  ;;  %vm10199_vm5 = vmmov %vm10195_vm1 }
 0x4d2   :  { %vm10200_vm2 = vmmov %vm10195_vm1 }
 0x4d3   :  { %4847 = vmatmul.msk.f32.vlgmr.msra.gmra.mxu3 %vm10176_vm12, %v3506_v11  ;;  %3765 = vmatpush.msra.mxu2 %v3506_v11  ;;  %vm10204_vm8 = vmmov %vm10195_vm1 }
 0x4d4   :  { %3766 = vmatmul.f32.vlgmr.msra.gmra.mxu2 %v10178_v57  ;;  %vm10205_vm11 = vmmov %vm10195_vm1 }
 0x4d5   :  { %vm10209_vm14 = vmmov %vm10195_vm1 }
 0x4d6   :  { %vm10210_vm0 = vmmov %vm10195_vm1 }
 0x4d7   :  { %vm10214_vm10 = vmmov %vm10210_vm0 }
 0x4d8   :  { %4867 = vmatmul.msk.f32.gmra.mxu0 %vm10179_vm15, %v8493_v22  ;;  %v10192_v22 = vmax.f32 %v10191_v21, 0.0  ;;  %vm10215_vm12 = vmmov %vm10210_vm0 }
 0x4d9   :  { %vm10219_vm15 = vmmov %vm10210_vm0 }
 0x4db   :  { %4848 = vmatmul.msk.f32.gmra.mxu3 %vm10180_vm7, %v3507_v23  ;;  %vm10220_vm7 = vmmov %vm10210_vm0 }
 0x4dc   :  { %3769 = vmatmul.f32.gmra.mxu2 %v10182_v59 }
 0x4e0   :  { %4868 = vmatmul.msk.f32.gmra.mxu0 %vm10184_vm6, %v10183_v31  ;;  %vm10224_vm6 = vmmov %vm10210_vm0 }
 0x4e3   :  { %4849 = vmatmul.msk.f32.gmra.mxu3 %vm10185_vm4, %v3508_v40  ;;  %vm10225_vm4 = vmmov %vm10210_vm0 }
 0x4e4   :  { %3772 = vmatmul.f32.gmra.mxu2 %v10187_v48 }
 0x4e8   :  { %4869 = vmatmul.msk.f32.gmra.mxu0 %vm10189_vm13, %v10188_v18  ;;  %vm10229_vm13 = vmmov %vm10210_vm0 }
 0x4eb   :  { %4850 = vmatmul.msk.f32.gmra.mxu3 %vm10190_vm3, %v3509_v58  ;;  %vm10230_vm3 = vmmov %vm10210_vm0  ;;  %v10233_v58 = vld [vmem:[#allocation30_spill] sm:$0xff] }
 0x4ec   :  { %3775 = vmatmul.f32.gmra.mxu2 %v10192_v22 }
 0x4f0   :  { %4870 = vmatmul.msk.f32.gmra.mxu0 %vm10194_vm9, %v10193_v42  ;;  %vm10234_vm9 = vmmov %vm10210_vm0 }
 0x4f3   :  { %4851 = vmatmul.msk.f32.gmra.mxu3 %vm10195_vm1, %v3510_v56  ;;  %v10213_v56 = vld [vmem:[#allocation34_spill] sm:$0xff]  ;;  %vm10235_vm1 = vmmov %vm10210_vm0 }
 0x4f4   :  { %3778 = vmatmul.f32.gmra.mxu2 %v10197_v3 }
 0x4f8   :  { %4871 = vmatmul.msk.f32.gmra.mxu0 %vm10199_vm5, %v10198_v61  ;;  %vm10238_vm5 = vmmov %vm10210_vm0 }
 0x4fb   :  { %4852 = vmatmul.msk.f32.gmra.mxu3 %vm10200_vm2, %v8906_v24  ;;  %v10212_v24 = vmax.f32 %v10211_v53, 0.0  ;;  %vm10241_vm2 = vmmov %vm10210_vm0 }
 0x4fc   :  { %3781 = vmatmul.f32.gmra.mxu2 %v10202_v49 }
 0x500   :  { %4872 = vmatmul.msk.f32.gmra.mxu0 %vm10204_vm8, %v10203_v39  ;;  %vm10244_vm8 = vmmov %vm10210_vm0 }
 0x503   :  { %4853 = vmatmul.msk.f32.gmra.mxu3 %vm10205_vm11, %v8929_v36  ;;  %v10217_v36 = vmax.f32 %v10216_v43, 0.0  ;;  %vm10247_vm11 = vmmov %vm10210_vm0 }
 0x504   :  { %3784 = vmatmul.f32.gmra.mxu2 %v10207_v13 }
 0x508   :  { %4873 = vmatmul.msk.f32.gmra.mxu0 %vm10209_vm14, %v10208_v9  ;;  %vm10248_vm14 = vmmov %vm10210_vm0 }
 0x50b   :  { %4854 = vmatmul.msk.f32.gmra.mxu3 %vm10210_vm0, %v8888_v2  ;;  %v10222_v2 = vmax.f32 %v10221_v28, 0.0 }
 0x50c   :  { %3787 = vmatmul.f32.gmra.mxu2 %v10212_v24 }
 0x510   :  { %4874 = vmatmul.msk.f32.gmra.mxu0 %vm10214_vm10, %v10213_v56  ;;  %vm10249_vm10 = vmmov %vm10210_vm0 }
 0x513   :  { %4855 = vmatmul.msk.f32.gmra.mxu3 %vm10215_vm12, %v8872_v10  ;;  %v10227_v10 = vmax.f32 %v10226_v52, 0.0  ;;  %vm10250_vm12 = vmmov %vm10210_vm0 }
 0x514   :  { %3790 = vmatmul.f32.gmra.mxu2 %v10217_v36 }
 0x518   :  { %4875 = vmatmul.msk.f32.gmra.mxu0 %vm10219_vm15, %v10218_v20  ;;  %vm10251_vm15 = vmmov %vm10210_vm0  ;;  %v5176_v20 = vld [vmem:[%s9605_s6] sm:$0xff] }
 0x51b   :  { %4856 = vmatmul.msk.f32.gmra.mxu3 %vm10220_vm7, %v8839_v32  ;;  %v10232_v32 = vmax.f32 %v10231_v7, 0.0  ;;  %vm10252_vm7 = vmmov %vm10210_vm0 }
 0x51c   :  { %3793 = vmatmul.f32.gmra.mxu2 %v10222_v2 }
 0x520   :  { %4876 = vmatmul.msk.f32.gmra.mxu0 %vm10224_vm6, %v10223_v12  ;;  %vm10253_vm6 = vmmov %vm10210_vm0  ;;  %v5177_v12 = vld [vmem:[%s9605_s6 + $0x8] sm:$0xff] }
 0x523   :  { %4857 = vmatmul.msk.f32.gmra.mxu3 %vm10225_vm4, %v8809_v45  ;;  %v10237_v45 = vmax.f32 %v10236_v63, 0.0  ;;  %vm10254_vm4 = vmmov %vm10210_vm0 }
 0x524   :  { %3796 = vmatmul.f32.gmra.mxu2 %v10227_v10 }
 0x528   :  { %4877 = vmatmul.msk.f32.gmra.mxu0 %vm10229_vm13, %v10228_v34  ;;  %vm10255_vm13 = vmmov %vm10210_vm0  ;;  %v5178_v34 = vld [vmem:[%s9605_s6 + $0x10] sm:$0xff] }
 0x52b   :  { %4858 = vmatmul.msk.f32.gmra.mxu3 %vm10230_vm3, %v8744_v38  ;;  %v10242_v38 = vld [vmem:[#allocation19_spill] sm:$0xff]  ;;  %vm10256_vm3 = vmmov %vm10210_vm0 }
 0x52c   :  { %3799 = vmatmul.f32.gmra.mxu2 %v10232_v32  ;;  %v10243_v55 = vmax.f32 %v10242_v38, 0.0 }
 0x530   :  { %4878 = vmatmul.msk.f32.gmra.mxu0 %vm10234_vm9, %v10233_v58  ;;  %vm10257_vm9 = vmmov %vm10210_vm0  ;;  %v5179_v58 = vld [vmem:[%s9605_s6 + $0x18] sm:$0xff] }
 0x533   :  { %4859 = vmatmul.msk.f32.gmra.mxu3 %vm10235_vm1, %v8738_v8  ;;  %v10245_v8 = vld [vmem:[#allocation23_spill] sm:$0xff]  ;;  %vm10258_vm1 = vmmov %vm10210_vm0 }
 0x534   :  { %3802 = vmatmul.f32.gmra.mxu2 %v10237_v45  ;;  %v10246_v40 = vmax.f32 %v10245_v8, 0.0 }
 0x535   :  { %v9055_v5 = vpop.f32.mrf.mxu0 }
 0x53b   :  { %4860 = vmatmul.msk.f32.gmra.mxu3 %vm10238_vm5, %v8730_v51  ;;  %vm10259_vm5 = vmmov %vm10210_vm0 }
 0x53c   :  { %3805 = vmatmul.f32.gmra.mxu2 %v10240_v6 }
 0x53d   :  { %v9061_v30 = vpop.f32.mrf.mxu0 }
 0x543   :  { %4861 = vmatmul.msk.f32.gmra.mxu3 %vm10241_vm2, %v8664_v27  ;;  %vm10260_vm2 = vmmov %vm10210_vm0 }
 0x544   :  { %3808 = vmatmul.f32.gmra.mxu2 %v10243_v55  ;;  %v5181_v55 = vld [vmem:[%s9605_s6 + $0x28] sm:$0xff] }
 0x545   :  { %v9066_v35 = vpop.f32.mrf.mxu0 }
 0x54b   :  { %4862 = vmatmul.msk.f32.gmra.mxu3 %vm10244_vm8, %v8718_v62  ;;  %vm10261_vm8 = vmmov %vm10210_vm0 }
 0x54c   :  { %3811 = vmatmul.f32.gmra.mxu2 %v10246_v40 }
 0x54d   :  { %v9071_v0 = vpop.f32.mrf.mxu0 }
 0x555   :  { %v9076_v25 = vpop.f32.mrf.mxu0 }
 0x556   :  { %v9063_v51 = vpop.f32.mrf.mxu3 }
 0x557   :  { %v3767_v16 = vpop.f32.mrf.mxu2 }
 0x558   :  { %4879 = vmatmul.msk.f32.vlgmr.msrb.gmra.mxu3 %vm10247_vm11, %v3767_v16  ;;  %v5182_v16 = vld [vmem:[%s9605_s6 + $0x30] sm:$0xff] }
 0x55d   :  { %v9083_v26 = vpop.f32.mrf.mxu0 }
 0x55e   :  { %v9068_v27 = vpop.f32.mrf.mxu3 }
 0x55f   :  { %v3770_v19 = vpop.f32.mrf.mxu2 }
 0x560   :  { %4880 = vmatmul.msk.f32.gmra.mxu3 %vm10248_vm14, %v3770_v19 }
 0x565   :  { %v9089_v14 = vpop.f32.mrf.mxu0 }
 0x566   :  { %v9073_v62 = vpop.f32.mrf.mxu3 }
 0x567   :  { %v3773_v50 = vpop.f32.mrf.mxu2 }
 0x568   :  { %4881 = vmatmul.msk.f32.gmra.mxu3 %vm10210_vm0, %v3773_v50 }
 0x56d   :  { %v9094_v59 = vpop.f32.mrf.mxu0 }
 0x56e   :  { %v9078_v1 = vpop.f32.mrf.mxu3 }
 0x56f   :  { %v3776_v23 = vpop.f32.mrf.mxu2 }
 0x570   :  { %4882 = vmatmul.msk.f32.gmra.mxu3 %vm10249_vm10, %v3776_v23  ;;  %v5183_v23 = vld [vmem:[%s9605_s6 + $0x38] sm:$0xff] }
 0x575   :  { %v3726_v48 = vpop.f32.mrf.mxu0 }
 0x576   :  { %v9081_v46 = vpop.f32.mrf.mxu3 }
 0x577   :  { %v3779_v4 = vpop.f32.mrf.mxu2 }
 0x578   :  { %4883 = vmatmul.msk.f32.gmra.mxu3 %vm10250_vm12, %v3779_v4  ;;  %vm10262_vm12 = vmmov %vm10258_vm1 }
 0x57e   :  { %v9086_v17 = vpop.f32.mrf.mxu3 }
 0x57f   :  { %v3782_v11 = vpop.f32.mrf.mxu2 }
 0x580   :  { %4884 = vmatmul.msk.f32.gmra.mxu3 %vm10251_vm15, %v3782_v11 }
 0x586   :  { %v9091_v57 = vpop.f32.mrf.mxu3 }
 0x587   :  { %v3785_v15 = vpop.f32.mrf.mxu2 }
 0x588   :  { %4885 = vmatmul.msk.f32.gmra.mxu3 %vm10252_vm7, %v3785_v15  ;;  %v5184_v15 = vld [vmem:[%s9605_s6 + $0x40] sm:$0xff] }
 0x58e   :  { %v9096_v31 = vpop.f32.mrf.mxu3 }
 0x58f   :  { %v3788_v37 = vpop.f32.mrf.mxu2 }
 0x590   :  { %4886 = vmatmul.msk.f32.gmra.mxu3 %vm10253_vm6, %v3788_v37 }
 0x596   :  { %v3613_v18 = vpop.f32.mrf.mxu3 }
 0x597   :  { %v9099_v21 = vadd.f32 %v3726_v48, %v3613_v18  ;;  %v3791_v22 = vpop.f32.mrf.mxu2  ;;  %v5185_v18 = vld [vmem:[%s9605_s6 + $0x48] sm:$0xff] }
 0x598   :  { %4887 = vmatmul.msk.f32.gmra.mxu3 %vm10254_vm4, %v3791_v22 }
 0x59e   :  { %v9102_v42 = vpop.f32.mrf.mxu3 }
 0x59f   :  { %v3794_v54 = vpop.f32.mrf.mxu2 }
 0x5a0   :  { %4888 = vmatmul.msk.f32.gmra.mxu3 %vm10255_vm13, %v3794_v54  ;;  %vm10263_vm13 = vmmov %vm10258_vm1 }
 0x5a6   :  { %v9105_v3 = vpop.f32.mrf.mxu3 }
 0x5a7   :  { %v3797_v61 = vpop.f32.mrf.mxu2 }
 0x5a8   :  { %4889 = vmatmul.msk.f32.gmra.mxu3 %vm10256_vm3, %v3797_v61  ;;  %v5186_v61 = vld [vmem:[%s9605_s6 + $0x50] sm:$0xff] }
 0x5ae   :  { %v9108_v33 = vpop.f32.mrf.mxu3 }
 0x5af   :  { %v3800_v49 = vpop.f32.mrf.mxu2 }
 0x5b0   :  { %4890 = vmatmul.msk.f32.gmra.mxu3 %vm10257_vm9, %v3800_v49 }
 0x5b6   :  { %v9111_v39 = vpop.f32.mrf.mxu3 }
 0x5b7   :  { %v3803_v29 = vpop.f32.mrf.mxu2 }
 0x5b8   :  { %4891 = vmatmul.msk.f32.gmra.mxu3 %vm10258_vm1, %v3803_v29 }
 0x5be   :  { %v9114_v13 = vpop.f32.mrf.mxu3 }
 0x5bf   :  { %v3806_v9 = vpop.f32.mrf.mxu2 }
 0x5c0   :  { %4892 = vmatmul.msk.f32.gmra.mxu3 %vm10259_vm5, %v3806_v9  ;;  %v5187_v9 = vld [vmem:[%s9605_s6 + $0x58] sm:$0xff] }
 0x5c6   :  { %v9118_v24 = vpop.f32.mrf.mxu3 }
 0x5c7   :  { %v3809_v53 = vpop.f32.mrf.mxu2 }
 0x5c8   :  { %4893 = vmatmul.msk.f32.gmra.mxu3 %vm10260_vm2, %v3809_v53 }
 0x5ce   :  { %v9121_v43 = vpop.f32.mrf.mxu3 }
 0x5cf   :  { %v3812_v56 = vpop.f32.mrf.mxu2 }
 0x5d0   :  { %4894 = vmatmul.msk.f32.gmra.mxu3 %vm10261_vm8, %v3812_v56 }
 0x5db   :  { %v3880_v36 = vpop.f32.mrf.mxu3 }
 0x5dc   :  { %v9126_v28 = vmul.f32 %v5176_v20, %v3880_v36  ;;  %v5188_v20 = vld [vmem:[%s9605_s6 + $0x60] sm:$0xff] }
 0x5de   :  { %4088 = vrot.lane.b32.xlu2 %v9126_v28, %s5240_s25  ;;  %4024 = vrot.lane.b32.xlu1 %v9126_v28, %s5239_s3 }
 0x5df   :  { %3960 = vrot.lane.b32.xlu0 %v9126_v28, %s5238_s21 }
 0x5e3   :  { %v3883_v2 = vpop.f32.mrf.mxu3 }
 0x5e4   :  { %v9137_v52 = vmul.f32 %v5177_v12, %v3883_v2 }
 0x5e6   :  { %4090 = vrot.lane.b32.xlu2 %v9137_v52, %s5240_s25  ;;  %4026 = vrot.lane.b32.xlu1 %v9137_v52, %s5239_s3 }
 0x5e7   :  { %3962 = vrot.lane.b32.xlu0 %v9137_v52, %s5238_s21 }
 0x5eb   :  { %v3886_v10 = vpop.f32.mrf.mxu3 }
 0x5ec   :  { %v9148_v7 = vmul.f32 %v5178_v34, %v3886_v10  ;;  %v5189_v34 = vld [vmem:[%s9605_s6 + $0x68] sm:$0xff] }
 0x5ee   :  { %4092 = vrot.lane.b32.xlu2 %v9148_v7, %s5240_s25  ;;  %4028 = vrot.lane.b32.xlu1 %v9148_v7, %s5239_s3 }
 0x5ef   :  { %3964 = vrot.lane.b32.xlu0 %v9148_v7, %s5238_s21 }
 0x5f3   :  { %v3889_v32 = vpop.f32.mrf.mxu3 }
 0x5f4   :  { %v9159_v63 = vmul.f32 %v5179_v58, %v3889_v32 }
 0x5f6   :  { %4094 = vrot.lane.b32.xlu2 %v9159_v63, %s5240_s25  ;;  %4030 = vrot.lane.b32.xlu1 %v9159_v63, %s5239_s3 }
 0x5f7   :  { %3966 = vrot.lane.b32.xlu0 %v9159_v63, %s5238_s21 }
 0x5fb   :  { %v3892_v45 = vpop.f32.mrf.mxu3 }
 0x5fc   :  { %v9170_v6 = vmul.f32 %v5180_v60, %v3892_v45  ;;  %v5190_v60 = vld [vmem:[%s9605_s6 + $0x70] sm:$0xff] }
 0x5fe   :  { %4096 = vrot.lane.b32.xlu2 %v9170_v6, %s5240_s25  ;;  %4032 = vrot.lane.b32.xlu1 %v9170_v6, %s5239_s3 }
 0x5ff   :  { %3968 = vrot.lane.b32.xlu0 %v9170_v6, %s5238_s21 }
 0x603   :  { %v3895_v38 = vpop.f32.mrf.mxu3 }
 0x604   :  { %v9181_v8 = vmul.f32 %v5181_v55, %v3895_v38 }
 0x606   :  { %4098 = vrot.lane.b32.xlu2 %v9181_v8, %s5240_s25  ;;  %4034 = vrot.lane.b32.xlu1 %v9181_v8, %s5239_s3 }
 0x607   :  { %3970 = vrot.lane.b32.xlu0 %v9181_v8, %s5238_s21 }
 0x60b   :  { %v3898_v40 = vpop.f32.mrf.mxu3 }
 0x60c   :  { %v9192_v19 = vmul.f32 %v5182_v16, %v3898_v40 }
 0x60e   :  { %4100 = vrot.lane.b32.xlu2 %v9192_v19, %s5240_s25  ;;  %4036 = vrot.lane.b32.xlu1 %v9192_v19, %s5239_s3 }
 0x60f   :  { %3972 = vrot.lane.b32.xlu0 %v9192_v19, %s5238_s21 }
 0x613   :  { %v3901_v50 = vpop.f32.mrf.mxu3 }
 0x614   :  { %v9203_v4 = vmul.f32 %v5183_v23, %v3901_v50 }
 0x616   :  { %4102 = vrot.lane.b32.xlu2 %v9203_v4, %s5240_s25  ;;  %4038 = vrot.lane.b32.xlu1 %v9203_v4, %s5239_s3 }
 0x617   :  { %3974 = vrot.lane.b32.xlu0 %v9203_v4, %s5238_s21 }
 0x61b   :  { %v3904_v11 = vpop.f32.mrf.mxu3 }
 0x61c   :  { %v9214_v37 = vmul.f32 %v5184_v15, %v3904_v11  ;;  %v5191_v11 = vld [vmem:[%s9605_s6 + $0x78] sm:$0xff] }
 0x61e   :  { %4104 = vrot.lane.b32.xlu2 %v9214_v37, %s5240_s25  ;;  %4040 = vrot.lane.b32.xlu1 %v9214_v37, %s5239_s3 }
 0x61f   :  { %3976 = vrot.lane.b32.xlu0 %v9214_v37, %s5238_s21 }
 0x623   :  { %v3907_v48 = vpop.f32.mrf.mxu3 }
 0x624   :  { %v9225_v22 = vmul.f32 %v5185_v18, %v3907_v48  ;;  %v4505_v18 = vld [vmem:[%s9607_s8 + $0x28] sm:$0xff] }
 0x625   :  { %4568 = vmatpush.msrb.mxu1 %v4505_v18 }
 0x626   :  { %4106 = vrot.lane.b32.xlu2 %v9225_v22, %s5240_s25  ;;  %4042 = vrot.lane.b32.xlu1 %v9225_v22, %s5239_s3 }
 0x627   :  { %3978 = vrot.lane.b32.xlu0 %v9225_v22, %s5238_s21 }
 0x62b   :  { %v3910_v54 = vpop.f32.mrf.mxu3 }
 0x62c   :  { %v9236_v49 = vmul.f32 %v5186_v61, %v3910_v54 }
 0x62e   :  { %4108 = vrot.lane.b32.xlu2 %v9236_v49, %s5240_s25  ;;  %4044 = vrot.lane.b32.xlu1 %v9236_v49, %s5239_s3 }
 0x62f   :  { %3980 = vrot.lane.b32.xlu0 %v9236_v49, %s5238_s21 }
 0x633   :  { %v3913_v29 = vpop.f32.mrf.mxu3 }
 0x634   :  { %v9247_v53 = vmul.f32 %v5187_v9, %v3913_v29 }
 0x636   :  { %4110 = vrot.lane.b32.xlu2 %v9247_v53, %s5240_s25  ;;  %4046 = vrot.lane.b32.xlu1 %v9247_v53, %s5239_s3 }
 0x637   :  { %3982 = vrot.lane.b32.xlu0 %v9247_v53, %s5238_s21 }
 0x638   :  { %v4089_v56 = vpop.permute.xlu2 %4088 }
 0x63b   :  { %v3916_v36 = vpop.f32.mrf.mxu3 }
 0x63c   :  { %v9258_v2 = vmul.f32 %v5188_v20, %v3916_v36 }
 0x63e   :  { %4112 = vrot.lane.b32.xlu2 %v9258_v2, %s5240_s25  ;;  %4048 = vrot.lane.b32.xlu1 %v9258_v2, %s5239_s3 }
 0x63f   :  { %3984 = vrot.lane.b32.xlu0 %v9258_v2, %s5238_s21 }
 0x640   :  { %v4091_v12 = vpop.permute.xlu2 %4090 }
 0x643   :  { %v3919_v10 = vpop.f32.mrf.mxu3 }
 0x644   :  { %v9269_v32 = vmul.f32 %v5189_v34, %v3919_v10 }
 0x646   :  { %4114 = vrot.lane.b32.xlu2 %v9269_v32, %s5240_s25  ;;  %4050 = vrot.lane.b32.xlu1 %v9269_v32, %s5239_s3 }
 0x647   :  { %3986 = vrot.lane.b32.xlu0 %v9269_v32, %s5238_s21 }
 0x648   :  { %v4093_v58 = vpop.permute.xlu2 %4092 }
 0x64b   :  { %v3922_v45 = vpop.f32.mrf.mxu3 }
 0x64c   :  { %v9280_v38 = vmul.f32 %v5190_v60, %v3922_v45 }
 0x64e   :  { %4116 = vrot.lane.b32.xlu2 %v9280_v38, %s5240_s25  ;;  %4052 = vrot.lane.b32.xlu1 %v9280_v38, %s5239_s3 }
 0x64f   :  { %3988 = vrot.lane.b32.xlu0 %v9280_v38, %s5238_s21 }
 0x650   :  { %v4025_v55 = vpop.permute.xlu1 %4024  ;;  %v4095_v48 = vpop.permute.xlu2 %4094 }
 0x651   :  { %v3961_v40 = vpop.permute.xlu0 %3960 }
 0x652   :  { %v4008_v16 = vadd.f32 %v3961_v40, %v9126_v28 }
 0x653   :  { %v3925_v50 = vpop.f32.mrf.mxu3 }
 0x654   :  { %v4072_v23 = vadd.f32 %v4025_v55, %v4008_v16  ;;  %v9292_v15 = vmul.f32 %v5191_v11, %v3925_v50 }
 0x656   :  { %v4136_v54 = vadd.f32 %v4089_v56, %v4072_v23  ;;  %4118 = vrot.lane.b32.xlu2 %v9292_v15, %s5240_s25  ;;  %4054 = vrot.lane.b32.xlu1 %v9292_v15, %s5239_s3 }
 0x657   :  { %3990 = vrot.lane.b32.xlu0 %v9292_v15, %s5238_s21 }
 0x658   :  { %v4152_v28 = vadd.f32 %v8712_v41, %v4136_v54  ;;  %v4027_v61 = vpop.permute.xlu1 %4026  ;;  %v4097_v10 = vpop.permute.xlu2 %4096 }
 0x659   :  { %v3963_v29 = vpop.permute.xlu0 %3962 }
 0x65a   :  { %v4895_v9 = vmul.f32 -1.442695, %v4152_v28  ;;  %v4009_v36 = vadd.f32 %v3963_v29, %v9137_v52  ;;  %v4504_v52 = vld [vmem:[%s9607_s8 + $0x20] sm:$0xff] }
 0x65b   :  { %4569 = vmatpush.msrb.mxu1 %v4504_v52 }
 0x65c   :  { %5060 = vpow2.f32 %v4895_v9  ;;  %v4073_v20 = vadd.f32 %v4027_v61, %v4009_v36 }
 0x65e   :  { %v4137_v56 = vadd.f32 %v4091_v12, %v4073_v20 }
 0x660   :  { %v4153_v34 = vadd.f32 %v8699_v44, %v4137_v56  ;;  %v4029_v45 = vpop.permute.xlu1 %4028  ;;  %v9313_v11 = vpop.permute.xlu2 %4098 }
 0x661   :  { %v3965_v60 = vpop.permute.xlu0 %3964 }
 0x662   :  { %v5061_v55 = vpop.eup %5060  ;;  %v4896_v40 = vmul.f32 -1.442695, %v4153_v34  ;;  %v4010_v16 = vadd.f32 %v3965_v60, %v9148_v7  ;;  %v5192_v60 = vld [vmem:[%s9600_s1 + $0x18] sm:$0xff] }
 0x663   :  { %v4216_v50 = vadd.f32 1.0, %v5061_v55 }
 0x664   :  { %5062 = vpow2.f32 %v4896_v40  ;;  %v4074_v41 = vadd.f32 %v4029_v45, %v4010_v16 }
 0x665   :  { %5064 = vrcp.f32 %v4216_v50  ;;  %v4243_v45 = vand.u32 2147483648, %v4216_v50  ;;  %vm4237_vm14 = vweird.f32 %v4216_v50 }
 0x666   :  { %v4138_v23 = vadd.f32 %v4093_v58, %v4074_v41 }
 0x668   :  { %v9311_v12 = vadd.f32 %v8612_v47, %v4138_v23  ;;  %v4031_v44 = vpop.permute.xlu1 %4030  ;;  %v4241_v47 = vand.u32 2147483647, %v4216_v50 }
 0x669   :  { %v3967_v18 = vpop.permute.xlu0 %3966 }
 0x66a   :  { %v5063_v54 = vpop.eup %5062  ;;  %v4897_v7 = vmul.f32 -1.442695, %v9311_v12  ;;  %v4011_v61 = vadd.f32 %v3967_v18, %v9159_v63  ;;  %v9326_v18 = vpop.permute.xlu2 %4100  ;;  %vm4242_vm10 = vcmp.eq.f32.partialorder %v4241_v47, 8.507059e+37 }
 0x66b   :  { %v5065_v29 = vpop.eup %5064  ;;  %v4217_v9 = vadd.f32 1.0, %v5063_v54  ;;  %v4244_v54 = vor.u32 1.1754944e-38, %v4243_v45 }
 0x66c   :  { %5066 = vpow2.f32 %v4897_v7  ;;  %v4075_v36 = vadd.f32 %v4031_v44, %v4011_v61  ;;  %v4233_v20 = vmul.f32 %v5065_v29, %v4216_v50  ;;  %vm4238_vm11 = vweird.f32 %v5065_v29 }
 0x66d   :  { %5068 = vrcp.f32 %v4217_v9  ;;  %vm4239_vm0 = vmor %vm4237_vm14, %vm4238_vm11  ;;  %v4256_v50 = vand.u32 2147483647, %v4217_v9  ;;  %vm4252_vm7 = vweird.f32 %v4217_v9 }
 0x66e   :  { %v4139_v58 = vadd.f32 %v4095_v48, %v4075_v36  ;;  %v4234_v56 = vsub.f32 1.0, %v4233_v20  ;;  %5070 = vtanh.f32 %v4152_v28 }
 0x66f   :  { %vm4257_vm4 = vcmp.eq.f32.partialorder %v4256_v50, 8.507059e+37 }
 0x670   :  { %v9320_v55 = vadd.f32 %v5192_v60, %v4139_v58  ;;  %v4033_v40 = vpop.permute.xlu1 %4032  ;;  %v4235_v16 = vmul.f32 %v5065_v29, %v4234_v56 }
 0x671   :  { %v3969_v63 = vpop.permute.xlu0 %3968 }
 0x672   :  { %v5067_v41 = vpop.eup %5066  ;;  %v4898_v52 = vmul.f32 -1.442695, %v9320_v55  ;;  %v4012_v23 = vadd.f32 %v3969_v63, %v9170_v6  ;;  %v4236_v48 = vadd.f32 %v5065_v29, %v4235_v16  ;;  %v4258_v16 = vand.u32 2147483648, %v4217_v9  ;;  %v5193_v63 = vld [vmem:[%s9600_s1 + $0x20] sm:$0xff] }
 0x673   :  { %v5069_v28 = vpop.eup %5068  ;;  %v9324_v44 = vadd.f32 1.0, %v5067_v41 }
 0x674   :  { %5072 = vpow2.f32 %v4898_v52  ;;  %v4076_v7 = vadd.f32 %v4033_v40, %v4012_v23  ;;  %v4240_v61 = vsel %vm4239_vm0, %v5065_v29, %v4236_v48  ;;  %v4248_v36 = vmul.f32 %v5069_v28, %v4217_v9  ;;  %v5071_v20 = vpop.eup %5070 }
 0x675   :  { %5074 = vrcp.f32 %v9324_v44  ;;  %v4245_v58 = vsel %vm4242_vm10, %v4244_v54, %v4240_v61  ;;  %vm4253_vm15 = vweird.f32 %v5069_v28  ;;  %v4259_v54 = vor.u32 1.1754944e-38, %v4258_v16  ;;  %vm10264_vm10 = vmmov %vm10260_vm2 }
 0x676   :  { %v4140_v56 = vadd.f32 %v4097_v10, %v4076_v7  ;;  %v4488_v6 = vmul.f32 %v5071_v20, %v4245_v58  ;;  %v4249_v60 = vsub.f32 1.0, %v4248_v36  ;;  %5076 = vtanh.f32 %v4153_v34  ;;  %vm4254_vm6 = vmor %vm4252_vm7, %vm4253_vm15  ;;  %v9341_v58 = vpop.permute.xlu2 %4102 }
 0x677   :  { %v4273_v50 = vand.u32 2147483648, %v9324_v44  ;;  %vm4267_vm9 = vweird.f32 %v9324_v44 }
 0x678   :  { %v9332_v47 = vadd.f32 %v5193_v63, %v4140_v56  ;;  %4911 = vmatmul.msk.f32.vlgmr.msrb.gmra.mxu1 %vm10262_vm12, %v4488_v6  ;;  %v4035_v29 = vpop.permute.xlu1 %4034  ;;  %v4250_v45 = vmul.f32 %v5069_v28, %v4249_v60  ;;  %v4271_v60 = vand.u32 2147483647, %v9324_v44 }
 0x679   :  { %v3971_v40 = vpop.permute.xlu0 %3970 }
 0x67a   :  { %v5073_v41 = vpop.eup %5072  ;;  %v4899_v10 = vmul.f32 -1.442695, %v9332_v47  ;;  %v4013_v52 = vadd.f32 %v3971_v40, %v9181_v8  ;;  %v4251_v34 = vadd.f32 %v5069_v28, %v4250_v45  ;;  %vm4272_vm5 = vcmp.eq.f32.partialorder %v4271_v60, 8.507059e+37 }
 0x67b   :  { %v5075_v23 = vpop.eup %5074  ;;  %v9337_v48 = vadd.f32 1.0, %v5073_v41 }
 0x67c   :  { %5078 = vpow2.f32 %v4899_v10  ;;  %v4077_v7 = vadd.f32 %v4035_v29, %v4013_v52  ;;  %v4255_v61 = vsel %vm4254_vm6, %v5069_v28, %v4251_v34  ;;  %v4263_v36 = vmul.f32 %v5075_v23, %v9324_v44  ;;  %v5077_v20 = vpop.eup %5076  ;;  %v5194_v28 = vld [vmem:[%s9600_s1 + $0x28] sm:$0xff] }
 0x67d   :  { %5080 = vrcp.f32 %v9337_v48  ;;  %v4260_v56 = vsel %vm4257_vm4, %v4259_v54, %v4255_v61  ;;  %vm4268_vm3 = vweird.f32 %v5075_v23  ;;  %v4274_v34 = vor.u32 1.1754944e-38, %v4273_v50  ;;  %vm10265_vm4 = vmmov %vm10260_vm2 }
 0x67e   :  { %v4141_v8 = vadd.f32 %v9313_v11, %v4077_v7  ;;  %v4489_v9 = vmul.f32 %v5077_v20, %v4260_v56  ;;  %v4264_v6 = vsub.f32 1.0, %v4263_v36  ;;  %5082 = vtanh.f32 %v9311_v12  ;;  %vm4269_vm1 = vmor %vm4267_vm9, %vm4268_vm3  ;;  %v4105_v44 = vpop.permute.xlu2 %4104 }
 0x67f   :  { %vm4282_vm11 = vweird.f32 %v9337_v48 }
 0x680   :  { %v9350_v16 = vadd.f32 %v5194_v28, %v4141_v8  ;;  %4912 = vmatmul.msk.f32.gmra.mxu1 %vm10263_vm13, %v4489_v9  ;;  %v4037_v63 = vpop.permute.xlu1 %4036  ;;  %v4265_v29 = vmul.f32 %v5075_v23, %v4264_v6  ;;  %v4286_v9 = vand.u32 2147483647, %v9337_v48  ;;  %v4288_v6 = vand.u32 2147483648, %v9337_v48 }
 0x681   :  { %v3973_v11 = vpop.permute.xlu0 %3972 }
 0x682   :  { %v5079_v45 = vpop.eup %5078  ;;  %v4900_v40 = vmul.f32 -1.442695, %v9350_v16  ;;  %v4014_v12 = vadd.f32 %v3973_v11, %v9192_v19  ;;  %v4266_v41 = vadd.f32 %v5075_v23, %v4265_v29  ;;  %vm4287_vm0 = vcmp.eq.f32.partialorder %v4286_v9, 8.507059e+37 }
 0x683   :  { %v5081_v10 = vpop.eup %5080  ;;  %v9356_v52 = vadd.f32 1.0, %v5079_v45 }
 0x684   :  { %5084 = vpow2.f32 %v4900_v40  ;;  %v4078_v54 = vadd.f32 %v4037_v63, %v4014_v12  ;;  %v4270_v7 = vsel %vm4269_vm1, %v5075_v23, %v4266_v41  ;;  %v4278_v61 = vmul.f32 %v5081_v10, %v9337_v48  ;;  %v5083_v36 = vpop.eup %5082  ;;  %v5195_v23 = vld [vmem:[%s9600_s1 + $0x30] sm:$0xff] }
 0x685   :  { %5086 = vrcp.f32 %v9356_v52  ;;  %v4275_v20 = vsel %vm4272_vm5, %v4274_v34, %v4270_v7  ;;  %vm4283_vm8 = vweird.f32 %v5081_v10  ;;  %v4289_v12 = vor.u32 1.1754944e-38, %v4288_v6  ;;  %vm10266_vm5 = vmmov %vm10260_vm2 }
 0x686   :  { %v4142_v19 = vadd.f32 %v9326_v18, %v4078_v54  ;;  %v4490_v56 = vmul.f32 %v5083_v36, %v4275_v20  ;;  %v4279_v8 = vsub.f32 1.0, %v4278_v61  ;;  %5088 = vtanh.f32 %v9320_v55  ;;  %vm4284_vm14 = vmor %vm4282_vm11, %vm4283_vm8 }
 0x687   :  { %v4301_v48 = vand.u32 2147483647, %v9356_v52  ;;  %vm4297_vm15 = vweird.f32 %v9356_v52 }
 0x688   :  { %v9367_v60 = vadd.f32 %v5195_v23, %v4142_v19  ;;  %4913 = vmatmul.msk.f32.gmra.mxu1 %vm10260_vm2, %v4490_v56  ;;  %v4039_v50 = vpop.permute.xlu1 %4038  ;;  %v4280_v28 = vmul.f32 %v5081_v10, %v4279_v8  ;;  %v4303_v19 = vand.u32 2147483648, %v9356_v52 }
 0x689   :  { %v3975_v18 = vpop.permute.xlu0 %3974  ;;  %vm4302_vm6 = vcmp.eq.f32.partialorder %v4301_v48, 8.507059e+37 }
 0x68a   :  { %v5085_v63 = vpop.eup %5084  ;;  %v4901_v55 = vmul.f32 -1.442695, %v9367_v60  ;;  %v4015_v29 = vadd.f32 %v3975_v18, %v9203_v4  ;;  %v4281_v11 = vadd.f32 %v5081_v10, %v4280_v28 }
 0x68b   :  { %v5087_v45 = vpop.eup %5086  ;;  %v9373_v40 = vadd.f32 1.0, %v5085_v63 }
 0x68c   :  { %5090 = vpow2.f32 %v4901_v55  ;;  %v4079_v41 = vadd.f32 %v4039_v50, %v4015_v29  ;;  %v4285_v34 = vsel %vm4284_vm14, %v5081_v10, %v4281_v11  ;;  %v4293_v54 = vmul.f32 %v5087_v45, %v9356_v52  ;;  %v5089_v7 = vpop.eup %5088  ;;  %v5196_v10 = vld [vmem:[%s9600_s1 + $0x38] sm:$0xff] }
 0x68d   :  { %5092 = vrcp.f32 %v9373_v40  ;;  %v4290_v61 = vsel %vm4287_vm0, %v4289_v12, %v4285_v34  ;;  %vm4298_vm12 = vweird.f32 %v5087_v45  ;;  %v4304_v55 = vor.u32 1.1754944e-38, %v4303_v19  ;;  %vm10267_vm0 = vmmov %vm10265_vm4 }
 0x68e   :  { %v4143_v4 = vadd.f32 %v9341_v58, %v4079_v41  ;;  %v4491_v36 = vmul.f32 %v5089_v7, %v4290_v61  ;;  %v4294_v20 = vsub.f32 1.0, %v4293_v54  ;;  %5094 = vtanh.f32 %v9332_v47  ;;  %v4107_v58 = vpop.permute.xlu2 %4106  ;;  %vm4299_vm7 = vmor %vm4297_vm15, %vm4298_vm12 }
 0x68f   :  { %v4316_v52 = vand.u32 2147483647, %v9373_v40  ;;  %v4318_v61 = vand.u32 2147483648, %v9373_v40  ;;  %vm4312_vm3 = vweird.f32 %v9373_v40 }
 0x690   :  { %v9384_v56 = vadd.f32 %v5196_v10, %v4143_v4  ;;  %4914 = vmatmul.msk.f32.gmra.mxu1 %vm10264_vm10, %v4491_v36  ;;  %v4041_v8 = vpop.permute.xlu1 %4040  ;;  %v4295_v9 = vmul.f32 %v5087_v45, %v4294_v20  ;;  %v5197_v4 = vld [vmem:[%s9600_s1 + $0x40] sm:$0xff] }
 0x691   :  { %v3977_v6 = vpop.permute.xlu0 %3976  ;;  %vm4317_vm1 = vcmp.eq.f32.partialorder %v4316_v52, 8.507059e+37 }
 0x692   :  { %v5091_v23 = vpop.eup %5090  ;;  %v4902_v47 = vmul.f32 -1.442695, %v9384_v56  ;;  %v4016_v50 = vadd.f32 %v3977_v6, %v9214_v37  ;;  %v4296_v28 = vadd.f32 %v5087_v45, %v4295_v9 }
 0x693   :  { %v5093_v18 = vpop.eup %5092  ;;  %v9390_v63 = vadd.f32 1.0, %v5091_v23  ;;  %v4319_v23 = vor.u32 1.1754944e-38, %v4318_v61 }
 0x694   :  { %5096 = vpow2.f32 %v4902_v47  ;;  %v4080_v29 = vadd.f32 %v4041_v8, %v4016_v50  ;;  %v4300_v11 = vsel %vm4299_vm7, %v5087_v45, %v4296_v28  ;;  %v4308_v12 = vmul.f32 %v5093_v18, %v9373_v40  ;;  %v5095_v41 = vpop.eup %5094 }
 0x695   :  { %5098 = vrcp.f32 %v9390_v63  ;;  %v4305_v34 = vsel %vm4302_vm6, %v4304_v55, %v4300_v11  ;;  %vm4313_vm13 = vweird.f32 %v5093_v18  ;;  %v4331_v40 = vand.u32 2147483647, %v9390_v63  ;;  %vm10268_vm6 = vmmov %vm10267_vm0 }
 0x696   :  { %v4144_v54 = vadd.f32 %v4105_v44, %v4080_v29  ;;  %v4492_v37 = vmul.f32 %v5095_v41, %v4305_v34  ;;  %v4309_v7 = vsub.f32 1.0, %v4308_v12  ;;  %5100 = vtanh.f32 %v9350_v16  ;;  %v4109_v6 = vpop.permute.xlu2 %4108  ;;  %vm4314_vm9 = vmor %vm4312_vm3, %vm4313_vm13  ;;  %v5198_v34 = vld [vmem:[%s9600_s1 + $0x48] sm:$0xff] }
 0x697   :  { %v4333_v41 = vand.u32 2147483648, %v9390_v63  ;;  %vm4327_vm8 = vweird.f32 %v9390_v63  ;;  %vm4332_vm14 = vcmp.eq.f32.partialorder %v4331_v40, 8.507059e+37 }
 0x698   :  { %v9400_v45 = vadd.f32 %v5197_v4, %v4144_v54  ;;  %4915 = vmatmul.msk.f32.gmra.mxu1 %vm10265_vm4, %v4492_v37  ;;  %v4043_v36 = vpop.permute.xlu1 %4042  ;;  %v4310_v20 = vmul.f32 %v5093_v18, %v4309_v7 }
 0x699   :  { %v3979_v44 = vpop.permute.xlu0 %3978 }
 0x69a   :  { %v5097_v48 = vpop.eup %5096  ;;  %v4903_v19 = vmul.f32 -1.442695, %v9400_v45  ;;  %v4017_v16 = vadd.f32 %v3979_v44, %v9225_v22  ;;  %v4311_v10 = vadd.f32 %v5093_v18, %v4310_v20  ;;  %v4334_v20 = vor.u32 1.1754944e-38, %v4333_v41 }
 0x69b   :  { %v5099_v8 = vpop.eup %5098  ;;  %v9406_v9 = vadd.f32 1.0, %v5097_v48 }
 0x69c   :  { %5102 = vpow2.f32 %v4903_v19  ;;  %v4081_v47 = vadd.f32 %v4043_v36, %v4017_v16  ;;  %v4315_v50 = vsel %vm4314_vm9, %v5093_v18, %v4311_v10  ;;  %v4323_v28 = vmul.f32 %v5099_v8, %v9390_v63  ;;  %v5101_v55 = vpop.eup %5100 }
 0x69d   :  { %5104 = vrcp.f32 %v9406_v9  ;;  %v4320_v29 = vsel %vm4317_vm1, %v4319_v23, %v4315_v50  ;;  %vm4328_vm2 = vweird.f32 %v5099_v8  ;;  %v4346_v63 = vand.u32 2147483647, %v9406_v9  ;;  %vm10269_vm1 = vmmov %vm10267_vm0 }
 0x69e   :  { %v4145_v22 = vadd.f32 %v4107_v58, %v4081_v47  ;;  %v4493_v11 = vmul.f32 %v5101_v55, %v4320_v29  ;;  %v4324_v12 = vsub.f32 1.0, %v4323_v28  ;;  %5106 = vtanh.f32 %v9367_v60  ;;  %vm4329_vm11 = vmor %vm4327_vm8, %vm4328_vm2  ;;  %v4111_v10 = vpop.permute.xlu2 %4110 }
 0x69f   :  { %v4348_v28 = vand.u32 2147483648, %v9406_v9  ;;  %vm4342_vm12 = vweird.f32 %v9406_v9  ;;  %vm4347_vm7 = vcmp.eq.f32.partialorder %v4346_v63, 8.507059e+37 }
 0x6a0   :  { %v9416_v18 = vadd.f32 %v5198_v34, %v4145_v22  ;;  %4916 = vmatmul.msk.f32.gmra.mxu1 %vm10266_vm5, %v4493_v11  ;;  %v4045_v54 = vpop.permute.xlu1 %4044  ;;  %v4325_v37 = vmul.f32 %v5099_v8, %v4324_v12 }
 0x6a1   :  { %v3981_v58 = vpop.permute.xlu0 %3980 }
 0x6a2   :  { %v5103_v7 = vpop.eup %5102  ;;  %v4904_v52 = vmul.f32 -1.442695, %v9416_v18  ;;  %v4018_v60 = vadd.f32 %v3981_v58, %v9236_v49  ;;  %v4326_v61 = vadd.f32 %v5099_v8, %v4325_v37 }
 0x6a3   :  { %v5105_v4 = vpop.eup %5104  ;;  %v9422_v36 = vadd.f32 1.0, %v5103_v7 }
 0x6a4   :  { %5108 = vpow2.f32 %v4904_v52  ;;  %v4082_v44 = vadd.f32 %v4045_v54, %v4018_v60  ;;  %v4330_v48 = vsel %vm4329_vm11, %v5099_v8, %v4326_v61  ;;  %v4338_v19 = vmul.f32 %v5105_v4, %v9406_v9  ;;  %v5107_v16 = vpop.eup %5106  ;;  %v5199_v8 = vld [vmem:[%s9600_s1 + $0x50] sm:$0xff] }
 0x6a5   :  { %5110 = vrcp.f32 %v9422_v36  ;;  %v4335_v23 = vsel %vm4332_vm14, %v4334_v20, %v4330_v48  ;;  %vm4343_vm10 = vweird.f32 %v5105_v4  ;;  %v4349_v54 = vor.u32 1.1754944e-38, %v4348_v28  ;;  %vm10270_vm14 = vmmov %vm10267_vm0 }
 0x6a6   :  { %v4146_v49 = vadd.f32 %v4109_v6, %v4082_v44  ;;  %v4494_v47 = vmul.f32 %v5107_v16, %v4335_v23  ;;  %v4339_v50 = vsub.f32 1.0, %v4338_v19  ;;  %5112 = vtanh.f32 %v9384_v56  ;;  %vm4344_vm15 = vmor %vm4342_vm12, %vm4343_vm10  ;;  %v4113_v9 = vpop.permute.xlu2 %4112 }
 0x6a7   :  { %v4361_v44 = vand.u32 2147483647, %v9422_v36  ;;  %v4363_v48 = vand.u32 2147483648, %v9422_v36  ;;  %vm4357_vm13 = vweird.f32 %v9422_v36 }
 0x6a8   :  { %v9432_v55 = vadd.f32 %v5199_v8, %v4146_v49  ;;  %4917 = vmatmul.msk.f32.gmra.mxu1 %vm10267_vm0, %v4494_v47  ;;  %v4047_v29 = vpop.permute.xlu1 %4046  ;;  %v4340_v22 = vmul.f32 %v5105_v4, %v4339_v50 }
 0x6a9   :  { %v3983_v6 = vpop.permute.xlu0 %3982  ;;  %vm4362_vm9 = vcmp.eq.f32.partialorder %v4361_v44, 8.507059e+37  ;;  %v4364_v8 = vor.u32 1.1754944e-38, %v4363_v48 }
 0x6aa   :  { %v5109_v11 = vpop.eup %5108  ;;  %v4905_v12 = vmul.f32 -1.442695, %v9432_v55  ;;  %v4019_v56 = vadd.f32 %v3983_v6, %v9247_v53  ;;  %v4341_v40 = vadd.f32 %v5105_v4, %v4340_v22 }
 0x6ab   :  { %v5111_v41 = vpop.eup %5110  ;;  %v9438_v34 = vadd.f32 1.0, %v5109_v11 }
 0x6ac   :  { %5114 = vpow2.f32 %v4905_v12  ;;  %v4083_v37 = vadd.f32 %v4047_v29, %v4019_v56  ;;  %v4345_v58 = vsel %vm4344_vm15, %v5105_v4, %v4341_v40  ;;  %v4353_v7 = vmul.f32 %v5111_v41, %v9422_v36  ;;  %v5113_v52 = vpop.eup %5112  ;;  %v5200_v4 = vld [vmem:[%s9600_s1 + $0x58] sm:$0xff] }
 0x6ad   :  { %5116 = vrcp.f32 %v9438_v34  ;;  %v4350_v60 = vsel %vm4347_vm7, %v4349_v54, %v4345_v58  ;;  %vm4358_vm4 = vweird.f32 %v5111_v41  ;;  %v4376_v36 = vand.u32 2147483647, %v9438_v34  ;;  %vm10271_vm7 = vmmov %vm10269_vm1 }
 0x6ae   :  { %v4147_v61 = vadd.f32 %v4111_v10, %v4083_v37  ;;  %v4495_v53 = vmul.f32 %v5113_v52, %v4350_v60  ;;  %v4354_v20 = vsub.f32 1.0, %v4353_v7  ;;  %5118 = vtanh.f32 %v9400_v45  ;;  %vm4359_vm3 = vmor %vm4357_vm13, %vm4358_vm4  ;;  %v5201_v37 = vld [vmem:[%s9600_s1 + $0x60] sm:$0xff]  ;;  %v4115_v52 = vpop.permute.xlu2 %4114 }
 0x6af   :  { %v4378_v54 = vand.u32 2147483648, %v9438_v34  ;;  %vm4372_vm2 = vweird.f32 %v9438_v34  ;;  %vm4377_vm11 = vcmp.eq.f32.partialorder %v4376_v36, 8.507059e+37 }
 0x6b0   :  { %v9448_v19 = vadd.f32 %v5200_v4, %v4147_v61  ;;  %4918 = vmatmul.msk.f32.gmra.mxu1 %vm10268_vm6, %v4495_v53  ;;  %v4049_v16 = vpop.permute.xlu1 %4048  ;;  %v4355_v23 = vmul.f32 %v5111_v41, %v4354_v20 }
 0x6b1   :  { %v3985_v10 = vpop.permute.xlu0 %3984  ;;  %v4379_v48 = vor.u32 1.1754944e-38, %v4378_v54 }
 0x6b2   :  { %v5115_v49 = vpop.eup %5114  ;;  %v4906_v45 = vmul.f32 -1.442695, %v9448_v19  ;;  %v4020_v47 = vadd.f32 %v3985_v10, %v9258_v2  ;;  %v4356_v50 = vadd.f32 %v5111_v41, %v4355_v23 }
 0x6b3   :  { %v5117_v63 = vpop.eup %5116  ;;  %v9454_v28 = vadd.f32 1.0, %v5115_v49 }
 0x6b4   :  { %5120 = vpow2.f32 %v4906_v45  ;;  %v4084_v29 = vadd.f32 %v4049_v16, %v4020_v47  ;;  %v4360_v22 = vsel %vm4359_vm3, %v5111_v41, %v4356_v50  ;;  %v4368_v6 = vmul.f32 %v5117_v63, %v9438_v34  ;;  %v5119_v11 = vpop.eup %5118 }
 0x6b5   :  { %5122 = vrcp.f32 %v9454_v28  ;;  %v4365_v12 = vsel %vm4362_vm9, %v4364_v8, %v4360_v22  ;;  %vm4373_vm5 = vweird.f32 %v5117_v63  ;;  %v4391_v34 = vand.u32 2147483647, %v9454_v28  ;;  %v5202_v8 = vld [vmem:[%s9600_s1 + $0x68] sm:$0xff]  ;;  %vm10272_vm9 = vmmov %vm10269_vm1 }
 0x6b6   :  { %v4148_v56 = vadd.f32 %v4113_v9, %v4084_v29  ;;  %v4496_v2 = vmul.f32 %v5119_v11, %v4365_v12  ;;  %v4369_v40 = vsub.f32 1.0, %v4368_v6  ;;  %5124 = vtanh.f32 %v9416_v18  ;;  %vm4374_vm8 = vmor %vm4372_vm2, %vm4373_vm5 }
 0x6b7   :  { %v4393_v50 = vand.u32 2147483648, %v9454_v28  ;;  %vm4387_vm10 = vweird.f32 %v9454_v28  ;;  %vm4392_vm15 = vcmp.eq.f32.partialorder %v4391_v34, 8.507059e+37 }
 0x6b8   :  { %v9464_v41 = vadd.f32 %v5201_v37, %v4148_v56  ;;  %4919 = vmatmul.msk.f32.gmra.mxu1 %vm10269_vm1, %v4496_v2  ;;  %v4051_v58 = vpop.permute.xlu1 %4050  ;;  %v4370_v7 = vmul.f32 %v5117_v63, %v4369_v40  ;;  %v4117_v40 = vpop.permute.xlu2 %4116 }
 0x6b9   :  { %v3987_v60 = vpop.permute.xlu0 %3986  ;;  %v4394_v54 = vor.u32 1.1754944e-38, %v4393_v50 }
 0x6ba   :  { %v5121_v61 = vpop.eup %5120  ;;  %v4907_v18 = vmul.f32 -1.442695, %v9464_v41  ;;  %v4021_v53 = vadd.f32 %v3987_v60, %v9269_v32  ;;  %v4371_v20 = vadd.f32 %v5117_v63, %v4370_v7 }
 0x6bb   :  { %v5123_v9 = vpop.eup %5122  ;;  %v9470_v44 = vadd.f32 1.0, %v5121_v61 }
 0x6bc   :  { %5126 = vpow2.f32 %v4907_v18  ;;  %v4085_v4 = vadd.f32 %v4051_v58, %v4021_v53  ;;  %v4375_v16 = vsel %vm4374_vm8, %v5117_v63, %v4371_v20  ;;  %v4383_v23 = vmul.f32 %v5123_v9, %v9454_v28  ;;  %v5125_v10 = vpop.eup %5124  ;;  %v5203_v20 = vld [vmem:[%s9600_s1 + $0x70] sm:$0xff] }
 0x6bd   :  { %5128 = vrcp.f32 %v9470_v44  ;;  %v4380_v49 = vsel %vm4377_vm11, %v4379_v48, %v4375_v16  ;;  %vm4388_vm0 = vweird.f32 %v5123_v9  ;;  %v4406_v28 = vand.u32 2147483647, %v9470_v44  ;;  %vm10273_vm11 = vmmov %vm10271_vm7 }
 0x6be   :  { %v4149_v45 = vadd.f32 %v4115_v52, %v4085_v4  ;;  %v4497_v32 = vmul.f32 %v5125_v10, %v4380_v49  ;;  %v4384_v47 = vsub.f32 1.0, %v4383_v23  ;;  %5130 = vtanh.f32 %v9432_v55  ;;  %vm4389_vm12 = vmor %vm4387_vm10, %vm4388_vm0 }
 0x6bf   :  { %v4408_v53 = vand.u32 2147483648, %v9470_v44  ;;  %vm4402_vm4 = vweird.f32 %v9470_v44  ;;  %vm4407_vm3 = vcmp.eq.f32.partialorder %v4406_v28, 8.507059e+37 }
 0x6c0   :  { %v9480_v63 = vadd.f32 %v5202_v8, %v4149_v45  ;;  %4920 = vmatmul.msk.f32.gmra.mxu1 %vm10270_vm14, %v4497_v32  ;;  %v4385_v29 = vmul.f32 %v5123_v9, %v4384_v47  ;;  %v4053_v22 = vpop.permute.xlu1 %4052 }
 0x6c1   :  { %v3989_v6 = vpop.permute.xlu0 %3988  ;;  %v4409_v47 = vor.u32 1.1754944e-38, %v4408_v53 }
 0x6c2   :  { %v5127_v11 = vpop.eup %5126  ;;  %v4908_v12 = vmul.f32 -1.442695, %v9480_v63  ;;  %v4022_v55 = vadd.f32 %v3989_v6, %v9280_v38  ;;  %v4386_v56 = vadd.f32 %v5123_v9, %v4385_v29 }
 0x6c3   :  { %v5129_v2 = vpop.eup %5128  ;;  %v9486_v36 = vadd.f32 1.0, %v5127_v11 }
 0x6c4   :  { %5132 = vpow2.f32 %v4908_v12  ;;  %v4086_v37 = vadd.f32 %v4053_v22, %v4022_v55  ;;  %v4390_v58 = vsel %vm4389_vm12, %v5123_v9, %v4386_v56  ;;  %v4398_v7 = vmul.f32 %v5129_v2, %v9470_v44  ;;  %v5131_v52 = vpop.eup %5130  ;;  %v4119_v22 = vpop.permute.xlu2 %4118  ;;  %v5204_v55 = vld [vmem:[%s9600_s1 + $0x78] sm:$0xff] }
 0x6c5   :  { %5134 = vrcp.f32 %v9486_v36  ;;  %v4395_v60 = vsel %vm4392_vm15, %v4394_v54, %v4390_v58  ;;  %vm4403_vm6 = vweird.f32 %v5129_v2  ;;  %v4423_v44 = vand.u32 2147483648, %v9486_v36  ;;  %vm10274_vm15 = vmmov %vm10271_vm7 }
 0x6c6   :  { %v4150_v38 = vadd.f32 %v4117_v40, %v4086_v37  ;;  %v4498_v61 = vmul.f32 %v5131_v52, %v4395_v60  ;;  %v4399_v18 = vsub.f32 1.0, %v4398_v7  ;;  %5136 = vtanh.f32 %v9448_v19  ;;  %vm4404_vm13 = vmor %vm4402_vm4, %vm4403_vm6 }
 0x6c7   :  { %v4421_v40 = vand.u32 2147483647, %v9486_v36  ;;  %vm4417_vm5 = vweird.f32 %v9486_v36  ;;  %v4424_v52 = vor.u32 1.1754944e-38, %v4423_v44 }
 0x6c8   :  { %v9496_v9 = vadd.f32 %v5203_v20, %v4150_v38  ;;  %4921 = vmatmul.msk.f32.gmra.mxu1 %vm10271_vm7, %v4498_v61  ;;  %v4400_v48 = vmul.f32 %v5129_v2, %v4399_v18  ;;  %v4055_v32 = vpop.permute.xlu1 %4054 }
 0x6c9   :  { %v3991_v4 = vpop.permute.xlu0 %3990  ;;  %vm4422_vm8 = vcmp.eq.f32.partialorder %v4421_v40, 8.507059e+37 }
 0x6ca   :  { %v5133_v16 = vpop.eup %5132  ;;  %v4909_v23 = vmul.f32 -1.442695, %v9496_v9  ;;  %v4023_v19 = vadd.f32 %v3991_v4, %v9292_v15  ;;  %v4401_v10 = vadd.f32 %v5129_v2, %v4400_v48 }
 0x6cb   :  { %v5135_v49 = vpop.eup %5134  ;;  %v4229_v45 = vadd.f32 1.0, %v5133_v16 }
 0x6cc   :  { %5138 = vpow2.f32 %v4909_v23  ;;  %v4087_v34 = vadd.f32 %v4055_v32, %v4023_v19  ;;  %v4405_v50 = vsel %vm4404_vm13, %v5129_v2, %v4401_v10  ;;  %v4413_v8 = vmul.f32 %v5135_v49, %v9486_v36  ;;  %v5137_v29 = vpop.eup %5136 }
 0x6cd   :  { %5140 = vrcp.f32 %v4229_v45  ;;  %v4410_v6 = vsel %vm4407_vm3, %v4409_v47, %v4405_v50  ;;  %vm4418_vm1 = vweird.f32 %v5135_v49  ;;  %v4438_v20 = vand.u32 2147483648, %v4229_v45  ;;  %vm10275_vm3 = vmmov %vm10272_vm9 }
 0x6ce   :  { %v4151_v11 = vadd.f32 %v4119_v22, %v4087_v34  ;;  %v4499_v15 = vmul.f32 %v5137_v29, %v4410_v6  ;;  %v4414_v12 = vsub.f32 1.0, %v4413_v8  ;;  %5142 = vtanh.f32 %v9464_v41  ;;  %vm4419_vm2 = vmor %vm4417_vm5, %vm4418_vm1 }
 0x6cf   :  { %v4436_v36 = vand.u32 2147483647, %v4229_v45  ;;  %vm4432_vm0 = vweird.f32 %v4229_v45  ;;  %v4439_v10 = vor.u32 1.1754944e-38, %v4438_v20  ;;  %v9526_v20 = vld [vmem:[%s9608_s9] ss:$0 sm:$0xff]  ;;  %s5243_s9 = smov 48  }
 0x6d0   :  { %v4167_v56 = vadd.f32 %v5204_v55, %v4151_v11  ;;  %4922 = vmatmul.msk.f32.gmra.mxu1 %vm10272_vm9, %v4499_v15  ;;  %v4415_v2 = vmul.f32 %v5135_v49, %v4414_v12 }
 0x6d1   :  { %vm4437_vm12 = vcmp.eq.f32.partialorder %v4436_v36, 8.507059e+37 }
 0x6d2   :  { %v5139_v54 = vpop.eup %5138  ;;  %v4910_v37 = vmul.f32 -1.442695, %v4167_v56  ;;  %v4416_v58 = vadd.f32 %v5135_v49, %v4415_v2 }
 0x6d3   :  { %v5141_v7 = vpop.eup %5140  ;;  %v4230_v41 = vadd.f32 1.0, %v5139_v54 }
 0x6d4   :  { %5144 = vpow2.f32 %v4910_v37  ;;  %v4420_v60 = vsel %vm4419_vm2, %v5135_v49, %v4416_v58  ;;  %v4428_v38 = vmul.f32 %v5141_v7, %v4229_v45  ;;  %v5143_v61 = vpop.eup %5142  ;;  %vm4433_vm14 = vweird.f32 %v5141_v7 }
 0x6d5   :  { %5146 = vrcp.f32 %v4230_v41  ;;  %v4425_v18 = vsel %vm4422_vm8, %v4424_v52, %v4420_v60  ;;  %vm4434_vm10 = vmor %vm4432_vm0, %vm4433_vm14  ;;  %v4453_v8 = vand.u32 2147483648, %v4230_v41  ;;  %v4451_v45 = vand.u32 2147483647, %v4230_v41 }
 0x6d6   :  { %v4500_v28 = vmul.f32 %v5143_v61, %v4425_v18  ;;  %v4429_v53 = vsub.f32 1.0, %v4428_v38  ;;  %5148 = vtanh.f32 %v9480_v63  ;;  %vm4447_vm6 = vweird.f32 %v4230_v41  ;;  %vm10276_vm8 = vmmov %vm10275_vm3 }
 0x6d7   :  { %v4454_v11 = vor.u32 1.1754944e-38, %v4453_v8  ;;  %vm4452_vm13 = vcmp.eq.f32.partialorder %v4451_v45, 8.507059e+37  ;;  %vm4684_vm14 = vcmask 261120   ;;  %vm4686_vm0 = vcmask 392192  }
 0x6d8   :  { %4923 = vmatmul.msk.f32.gmra.mxu1 %vm10273_vm11, %v4500_v28  ;;  %v4430_v48 = vmul.f32 %v5141_v7, %v4429_v53  ;;  %v3706_v28 = vadd.f32 %v9061_v30, %v9068_v27  ;;  %v3712_v30 = vadd.f32 %v9071_v0, %v9078_v1  ;;  %v3718_v0 = vadd.f32 %v9083_v26, %v9086_v17  ;;  %vm10277_vm11 = vmmov %vm10275_vm3 }
 0x6da   :  { %v5145_v4 = vpop.eup %5144  ;;  %v4431_v16 = vadd.f32 %v5141_v7, %v4430_v48 }
 0x6db   :  { %v5147_v23 = vpop.eup %5146  ;;  %v4231_v19 = vadd.f32 1.0, %v5145_v4 }
 0x6dc   :  { %v4435_v49 = vsel %vm4434_vm10, %v5141_v7, %v4431_v16  ;;  %v4443_v32 = vmul.f32 %v5147_v23, %v4230_v41  ;;  %v5149_v47 = vpop.eup %5148  ;;  %vm4448_vm7 = vweird.f32 %v5147_v23  ;;  %vm4688_vm10 = vcmask 523264  }
 0x6dd   :  { %5150 = vrcp.f32 %v4231_v19  ;;  %v4440_v34 = vsel %vm4437_vm12, %v4439_v10, %v4435_v49  ;;  %vm4449_vm4 = vmor %vm4447_vm6, %vm4448_vm7  ;;  %v4466_v37 = vand.u32 2147483647, %v4231_v19  ;;  %vm4462_vm1 = vweird.f32 %v4231_v19 }
 0x6de   :  { %v4501_v63 = vmul.f32 %v5149_v47, %v4440_v34  ;;  %v4444_v50 = vsub.f32 1.0, %v4443_v32  ;;  %5152 = vtanh.f32 %v9496_v9  ;;  %v4468_v9 = vand.u32 2147483648, %v4231_v19  ;;  %vm10278_vm6 = vmmov %vm10275_vm3 }
 0x6df   :  { %5154 = vtanh.f32 %v4167_v56  ;;  %vm4467_vm2 = vcmp.eq.f32.partialorder %v4466_v37, 8.507059e+37  ;;  %v3703_v56 = vadd.f32 %v9055_v5, %v9063_v51  ;;  %v3709_v5 = vadd.f32 %v9066_v35, %v9073_v62 }
 0x6e0   :  { %4924 = vmatmul.msk.f32.gmra.mxu1 %vm10274_vm15, %v4501_v63  ;;  %v4445_v29 = vmul.f32 %v5147_v23, %v4444_v50  ;;  %v4469_v7 = vor.u32 1.1754944e-38, %v4468_v9  ;;  %v3715_v35 = vadd.f32 %v9076_v25, %v9081_v46  ;;  %v3721_v34 = vadd.f32 %v9089_v14, %v9091_v57  ;;  %v3729_v50 = vpop.f32.mrf.mxu0 }
 0x6e1   :  { %v3730_v45 = vadd.f32 %v3729_v50, %v9102_v42  ;;  %vm4690_vm12 = vcmask 654336   ;;  %vm4692_vm15 = vcmask 785408   ;;  %vm4694_vm7 = vcmask 916480  }
 0x6e2   :  { %v4446_v22 = vadd.f32 %v5147_v23, %v4445_v29 }
 0x6e3   :  { %v5151_v6 = vpop.eup %5150 }
 0x6e4   :  { %v4450_v15 = vsel %vm4449_vm4, %v5147_v23, %v4446_v22  ;;  %v4458_v12 = vmul.f32 %v5151_v6, %v4231_v19  ;;  %v5153_v44 = vpop.eup %5152  ;;  %vm4463_vm9 = vweird.f32 %v5151_v6 }
 0x6e5   :  { %v4455_v55 = vsel %vm4452_vm13, %v4454_v11, %v4450_v15  ;;  %vm4464_vm5 = vmor %vm4462_vm1, %vm4463_vm9  ;;  %v5155_v52 = vpop.eup %5154 }
 0x6e6   :  { %v4502_v2 = vmul.f32 %v5153_v44, %v4455_v55  ;;  %v4459_v40 = vsub.f32 1.0, %v4458_v12 }
 0x6e8   :  { %4925 = vmatmul.msk.f32.gmra.mxu1 %vm10275_vm3, %v4502_v2  ;;  %v4460_v54 = vmul.f32 %v5151_v6, %v4459_v40  ;;  %v3732_v17 = vpop.f32.mrf.mxu0 }
 0x6e9   :  { %v3733_v57 = vadd.f32 %v3732_v17, %v9105_v3 }
 0x6ea   :  { %v4461_v58 = vadd.f32 %v5151_v6, %v4460_v54 }
 0x6ec   :  { %v4465_v41 = vsel %vm4464_vm5, %v5151_v6, %v4461_v58 }
 0x6ed   :  { %v4470_v60 = vsel %vm4467_vm2, %v4469_v7, %v4465_v41 }
 0x6ee   :  { %v4503_v38 = vmul.f32 %v5155_v52, %v4470_v60 }
 0x6f0   :  { %4926 = vmatmul.msk.f32.gmra.mxu1 %vm10276_vm8, %v4503_v38  ;;  %v3735_v14 = vpop.f32.mrf.mxu0  ;;  %v3724_v38 = vadd.f32 %v9094_v59, %v9096_v31 }
 0x6f1   :  { %v3736_v55 = vadd.f32 %v3735_v14, %v9108_v33 }
 0x6f5   :  { %v4571_v61 = vpop.f32.mrf.mxu1 }
 0x6f6   :  { %v9519_v18 = vadd.f32 %v4571_v61, %v3703_v56 }
 0x6fd   :  { %v4574_v53 = vpop.f32.mrf.mxu1 }
 0x6fe   :  { %v4620_v48 = vadd.f32 %v4574_v53, %v3706_v28 }
 0x700   :  { %v4640_v36 = vadd.f32 %v9526_v20, %v4620_v48 }
 0x702   :  { %4656 = vrot.lane.b32.xlu0 %v4640_v36, %s5241_s4 }
 0x705   :  { %v4577_v51 = vpop.f32.mrf.mxu1 }
 0x706   :  { %v4621_v4 = vadd.f32 %v4577_v51, %v3709_v5 }
 0x708   :  { %v4641_v16 = vadd.f32 %v9526_v20, %v4621_v4 }
 0x70a   :  { %4660 = vrot.lane.b32.xlu2 %v4641_v16, %s5242_s5 }
 0x70d   :  { %v4580_v27 = vpop.f32.mrf.mxu1 }
 0x70e   :  { %v4622_v23 = vadd.f32 %v4580_v27, %v3712_v30 }
 0x710   :  { %v4642_v19 = vadd.f32 %v9526_v20, %v4622_v23  ;;  %v4639_v23 = vadd.f32 %v9526_v20, %v9519_v18 }
 0x712   :  { %4664 = vrot.lane.b32.xlu1 %v4642_v19, %s5243_s9 }
 0x715   :  { %v4583_v62 = vpop.f32.mrf.mxu1 }
 0x716   :  { %v4623_v10 = vadd.f32 %v4583_v62, %v3715_v35 }
 0x718   :  { %v4643_v49 = vadd.f32 %v9526_v20, %v4623_v10 }
 0x71a   :  { %4668 = vrot.lane.b32.xlu0 %v4643_v49, %s5244_s2 }
 0x71d   :  { %v4586_v1 = vpop.f32.mrf.mxu1 }
 0x71e   :  { %v4624_v32 = vadd.f32 %v4586_v1, %v3718_v0 }
 0x720   :  { %v4644_v47 = vadd.f32 %v9526_v20, %v4624_v32 }
 0x722   :  { %4672 = vrot.lane.b32.xlu2 %v4644_v47, %s5240_s25 }
 0x725   :  { %v4589_v25 = vpop.f32.mrf.mxu1 }
 0x726   :  { %v4625_v46 = vadd.f32 %v4589_v25, %v3721_v34 }
 0x728   :  { %v4645_v63 = vadd.f32 %v9526_v20, %v4625_v46 }
 0x72a   :  { %4676 = vrot.lane.b32.xlu1 %v4645_v63, %s5239_s3 }
 0x72d   :  { %v4592_v8 = vpop.f32.mrf.mxu1 }
 0x72e   :  { %v4626_v56 = vadd.f32 %v4592_v8, %v3724_v38 }
 0x730   :  { %v4646_v53 = vadd.f32 %v9526_v20, %v4626_v56 }
 0x735   :  { %v4595_v29 = vpop.f32.mrf.mxu1 }
 0x736   :  { %v9551_v26 = vadd.f32 %v4595_v29, %v9099_v21  ;;  %v3738_v21 = vpop.f32.mrf.mxu0 }
 0x737   :  { %v3739_v9 = vadd.f32 %v3738_v21, %v9111_v39 }
 0x738   :  { %v4647_v1 = vadd.f32 %v9526_v20, %v9551_v26 }
 0x73d   :  { %v4598_v22 = vpop.f32.mrf.mxu1 }
 0x73e   :  { %v4628_v6 = vadd.f32 %v4598_v22, %v3730_v45  ;;  %v3741_v54 = vpop.f32.mrf.mxu0 }
 0x73f   :  { %v3742_v7 = vadd.f32 %v3741_v54, %v9114_v13 }
 0x740   :  { %v4648_v11 = vadd.f32 %v9526_v20, %v4628_v6 }
 0x742   :  { %4697 = vrot.lane.b32.xlu1 %v4648_v11, %s5241_s4 }
 0x745   :  { %v4601_v15 = vpop.f32.mrf.mxu1 }
 0x746   :  { %v4629_v12 = vadd.f32 %v4601_v15, %v3733_v57  ;;  %v3744_v33 = vpop.f32.mrf.mxu0 }
 0x747   :  { %v3745_v39 = vadd.f32 %v3744_v33, %v9118_v24 }
 0x748   :  { %v4649_v44 = vadd.f32 %v9526_v20, %v4629_v12 }
 0x74a   :  { %4701 = vrot.lane.b32.xlu0 %v4649_v44, %s5242_s5 }
 0x74d   :  { %v4604_v2 = vpop.f32.mrf.mxu1 }
 0x74e   :  { %v4630_v42 = vadd.f32 %v4604_v2, %v3736_v55  ;;  %v3747_v13 = vpop.f32.mrf.mxu0 }
 0x74f   :  { %v3748_v36 = vadd.f32 %v3747_v13, %v9121_v43 }
 0x750   :  { %v4650_v40 = vadd.f32 %v9526_v20, %v4630_v42 }
 0x752   :  { %4705 = vrot.lane.b32.xlu2 %v4650_v40, %s5243_s9 }
 0x755   :  { %v4607_v37 = vpop.f32.mrf.mxu1 }
 0x756   :  { %v4631_v3 = vadd.f32 %v4607_v37, %v3739_v9 }
 0x758   :  { %v4651_v58 = vadd.f32 %v9526_v20, %v4631_v3 }
 0x75a   :  { %4709 = vrot.lane.b32.xlu1 %v4651_v58, %s5244_s2 }
 0x75d   :  { %v4610_v41 = vpop.f32.mrf.mxu1 }
 0x75e   :  { %v4632_v52 = vadd.f32 %v4610_v41, %v3742_v7 }
 0x760   :  { %v4652_v60 = vadd.f32 %v9526_v20, %v4632_v52 }
 0x762   :  { %4713 = vrot.lane.b32.xlu0 %v4652_v60, %s5240_s25 }
 0x764   :  { %v4661_v16 = vpop.permute.xlu2 %4660 }
 0x765   :  { %v4613_v61 = vpop.f32.mrf.mxu1 }
 0x766   :  { %v4633_v28 = vadd.f32 %v4613_v61, %v3745_v39 }
 0x768   :  { %v4653_v48 = vadd.f32 %v9526_v20, %v4633_v28 }
 0x76a   :  { %4717 = vrot.lane.b32.xlu2 %v4653_v48, %s5239_s3  ;;  %4680 = vrot.lane.b32.xlu0 %v4646_v53, %s5238_s21 }
 0x76d   :  { %v4616_v5 = vpop.f32.mrf.mxu1 }
 0x76e   :  { %v4634_v59 = vadd.f32 %v4616_v5, %v3748_v36 }
 0x770   :  { %v4654_v31 = vadd.f32 %v9526_v20, %v4634_v59 }
 0x772   :  { %4721 = vrot.lane.b32.xlu1 %v4654_v31, %s5238_s21  ;;  %s5245_s21 = smov [#allocation2]  }
 0x773   :  { %s4737_s3 = sshll.u32 %s5245_s21, 4  ;;  %s4738_s3 = int_to_ptr.vmem [resolvable:$true] %s4737_s3 }
 0x774   :  { %v4657_v24 = vpop.permute.xlu0 %4656 }
 0x775   :  { %v4683_v19 = vsel %vm10277_vm11, %v4639_v23, %v4657_v24 }
 0x776   :  { %v4685_v10 = vsel %vm4684_vm14, %v4683_v19, %v4661_v16 }
 0x77c   :  { %v4673_v35 = vpop.permute.xlu2 %4672 }
 0x784   :  { %v4665_v51 = vpop.permute.xlu1 %4664 }
 0x785   :  { %v4687_v49 = vsel %vm4686_vm0, %v4685_v10, %v4665_v51 }
 0x78c   :  { %v4669_v4 = vpop.permute.xlu0 %4668 }
 0x78d   :  { %v4689_v0 = vsel %vm4688_vm10, %v4687_v49, %v4669_v4 }
 0x78e   :  { %v4691_v18 = vsel %vm4690_vm12, %v4689_v0, %v4673_v35 }
 0x79c   :  { %v4677_v30 = vpop.permute.xlu1 %4676 }
 0x79d   :  { %v4693_v34 = vsel %vm4692_vm15, %v4691_v18, %v4677_v30 }
 0x7ac   :  { %v4706_v32 = vpop.permute.xlu2 %4705 }
 0x7b4   :  { %v4698_v43 = vpop.permute.xlu1 %4697 }
 0x7b5   :  { %v4724_v47 = vsel %vm10278_vm6, %v4647_v1, %v4698_v43 }
 0x7bc   :  { %v4702_v27 = vpop.permute.xlu0 %4701 }
 0x7bd   :  { %v4725_v25 = vsel %vm4684_vm14, %v4724_v47, %v4702_v27 }
 0x7be   :  { %v4726_v8 = vsel %vm4686_vm0, %v4725_v25, %v4706_v32 }
 0x7c4   :  { %v4718_v26 = vpop.permute.xlu2 %4717 }
 0x7cc   :  { %v4710_v46 = vpop.permute.xlu1 %4709 }
 0x7cd   :  { %v4727_v20 = vsel %vm4688_vm10, %v4726_v8, %v4710_v46 }
 0x7d4   :  { %v4714_v62 = vpop.permute.xlu0 %4713 }
 0x7d5   :  { %v4728_v29 = vsel %vm4690_vm12, %v4727_v20, %v4714_v62 }
 0x7d6   :  { %v4729_v17 = vsel %vm4692_vm15, %v4728_v29, %v4718_v26 }
 0x7dc   :  { %v4681_v63 = vpop.permute.xlu0 %4680 }
 0x7dd   :  { %v4695_v50 = vsel %vm4694_vm7, %v4693_v34, %v4681_v63 }
 0x7de   :  { %4731 = vst [vmem:[#allocation2] sm:$0xff] %v4695_v50 }
 0x7e4   :  { %v4722_v45 = vpop.permute.xlu1 %4721 }
 0x7e5   :  { %v4730_v22 = vsel %vm4694_vm7, %v4729_v17, %v4722_v45 }
 0x7e6   :  { %4732 = vst [vmem:[#allocation2 + $0x8] sm:$0xff] %v4730_v22 }
 0x7e7   :  { %4745 = dma.vmem_to_hbm [thread:$0]  %s4738_s3, 256, %s4740_s23, [#allocation3], %s5246_s24, %s5246_s24, %s5247_s26  }
 0x7e8   :  { %5229 = dma.done.wait [#allocation3], 256  }
 0x7e9   :  { %5230 = vsyncadd [#allocation3], 4294967040 }
 0x7ea   :  { %4750 = vsyncpa [#allocation3], 1 }

</bundles_post_ra>
